<compile_context>
chip_gen: v5e
topology: v5e:2x2
jax: 0.10.0
libtpu: 0.0.40
codegen_flags: <defaults>
</compile_context>

<pallas_src>
import functools

import jax
import jax.numpy as jnp
from jax import lax
from jax.experimental import pallas as pl
from jax.experimental.pallas import tpu as pltpu


# ---------------------------------------------------------------------------
# Kernel 1/2: (optional bn+relu on the input) -> 3x3 conv (im2col, one matmul)
#             -> raw conv output + per-image partial BN stats (sum, sumsq)
# ---------------------------------------------------------------------------
def _conv_bn_stats_kernel(x_ref, scale_ref, shift_ref, w_ref,
                          y_ref, stats_ref, pad_ref,
                          *, H, W, C, fuse_bn_relu):
    # ---- input tile -> (optional scale/shift + relu) -> bf16, cast ONCE -----
    xb = x_ref[0]                                            # (H, W, C) f32
    if fuse_bn_relu:
        xb = jnp.maximum(xb * scale_ref[0] + shift_ref[0], 0.0)
    hb = xb.astype(jnp.bfloat16)

    # ---- zero ONLY the 1-pixel halo strips of the padded bf16 scratch -------
    pad_ref[0:1, :, :] = jnp.zeros((1, W + 2, C), jnp.bfloat16)
    pad_ref[H + 1:H + 2, :, :] = jnp.zeros((1, W + 2, C), jnp.bfloat16)
    pad_ref[1:H + 1, 0:1, :] = jnp.zeros((H, 1, C), jnp.bfloat16)
    pad_ref[1:H + 1, W + 1:W + 2, :] = jnp.zeros((H, 1, C), jnp.bfloat16)
    pad_ref[1:H + 1, 1:W + 1, :] = hb

    # ---- im2col: 9 shifted windows packed once -> a single MXU matmul -------
    M = H * W
    cols = []
    for dh in range(3):
        for dw in range(3):
            cols.append(pad_ref[dh:dh + H, dw:dw + W, :].reshape(M, C))
    col = jnp.concatenate(cols, axis=1)                      # (M, 9C) bf16
    y = jnp.dot(col, w_ref[...],
                preferred_element_type=jnp.float32)          # (M, C) f32

    # ---- single-pass per-image partial BN statistics -------------------------
    s = jnp.sum(y, axis=0, keepdims=True)                    # (1, C)
    ss = jnp.sum(y * y, axis=0, keepdims=True)               # (1, C)
    stats_ref[0] = jnp.concatenate([s, ss], axis=0)          # (2, C)

    # ---- raw (pre-BN) conv output for the next stage -------------------------
    y_ref[0] = y.reshape(H, W, C)


# ---------------------------------------------------------------------------
# Kernel 3: bn2 (precomputed scale/shift) + residual add + relu, lane-dense.
# All operands are (.., H, W*C) views so the last dim fills the 128 lanes.
# ---------------------------------------------------------------------------
def _bn_add_relu_kernel(y_ref, x_ref, scale_ref, shift_ref, o_ref):
    o_ref[0] = jnp.maximum(
        y_ref[0] * scale_ref[...] + shift_ref[...] + x_ref[0], 0.0)


# ---------------------------------------------------------------------------
# Helpers
# ---------------------------------------------------------------------------
def _vmem_limit_bytes(B, H, W, C):
    per_img_f32 = H * W * C * 4
    est = (2 * per_img_f32                        # input block, double-buffered
           + 2 * per_img_f32                      # output block, double-buffered
           + (H + 2) * (W + 2) * C * 2            # bf16 padded staging scratch
           + H * W * 9 * C * 2                    # live im2col value
           + 2 * 9 * C * C * 2                    # bf16 weights, double-buffered
           + 4 * per_img_f32)                     # headroom (temps / spills)
    return int(min(64 * 2**20, max(4 * 2**20, 2 * est)))


def _conv_stage(x_nhwc, scale, shift, w_tap, *, fuse_bn_relu, vmem_limit):
    B, H, W, C = x_nhwc.shape
    kernel = functools.partial(_conv_bn_stats_kernel, H=H, W=W, C=C,
                               fuse_bn_relu=fuse_bn_relu)
    return pl.pallas_call(
        kernel,
        out_shape=(jax.ShapeDtypeStruct((B, H, W, C), jnp.float32),
                   jax.ShapeDtypeStruct((B, 2, C), jnp.float32)),
        grid=(B,),
        in_specs=[
            pl.BlockSpec((1, H, W, C), lambda b: (b, 0, 0, 0)),
            pl.BlockSpec((1, 1, C), lambda b: (0, 0, 0)),
            pl.BlockSpec((1, 1, C), lambda b: (0, 0, 0)),
            pl.BlockSpec((9 * C, C), lambda b: (0, 0)),
        ],
        out_specs=[
            pl.BlockSpec((1, H, W, C), lambda b: (b, 0, 0, 0)),
            pl.BlockSpec((1, 2, C), lambda b: (b, 0, 0)),
        ],
        scratch_shapes=[pltpu.VMEM((H + 2, W + 2, C), jnp.bfloat16)],
        compiler_params=pltpu.CompilerParams(
            dimension_semantics=("parallel",),
            vmem_limit_bytes=vmem_limit),
    )(x_nhwc, scale, shift, w_tap)


def _finalize_bn(stats, gamma, beta, count, eps):
    # stats: (B, 2, C) per-image partial (sum, sum-of-squares)
    s = jnp.sum(stats[:, 0, :], axis=0)
    ss = jnp.sum(stats[:, 1, :], axis=0)
    mean = s / count
    var = jnp.maximum(ss / count - mean * mean, 0.0)   # biased var (PyTorch norm)
    scale = gamma * lax.rsqrt(var + eps)
    shift = beta - mean * scale
    return scale, shift


# ---------------------------------------------------------------------------
# Wrapper: one NCHW->NHWC layout change in, one out, three pipelined stages.
# ---------------------------------------------------------------------------
@jax.jit
def basic_block_forward(x_nchw, params):
    eps = 1e-5
    B, C, H, W = x_nchw.shape
    WC = W * C
    count = B * H * W
    vmem_limit = _vmem_limit_bytes(B, H, W, C)

    x_nhwc = jnp.transpose(x_nchw, (0, 2, 3, 1)).astype(jnp.float32)

    # PyTorch conv weight [Cout, Cin, 3, 3] -> tap-major [9*Cin, Cout], bf16.
    def prep_w(w):
        return jnp.transpose(w, (2, 3, 1, 0)).reshape(9 * C, C).astype(jnp.bfloat16)

    w1 = prep_w(params["conv1_w"])
    w2 = prep_w(params["conv2_w"])
    ones_c = jnp.ones((1, 1, C), jnp.float32)
    zeros_c = jnp.zeros((1, 1, C), jnp.float32)

    # ---- stage 1: conv1 + BN1 partial statistics -----------------------------
    y1, st1 = _conv_stage(x_nhwc, ones_c, zeros_c, w1,
                          fuse_bn_relu=False, vmem_limit=vmem_limit)
    scale1, shift1 = _finalize_bn(st1, params["bn1_gamma"].astype(jnp.float32),
                                  params["bn1_beta"].astype(jnp.float32),
                                  count, eps)

    # ---- stage 2: bn1+relu fused into conv2's input, conv2 + BN2 stats -------
    y2, st2 = _conv_stage(y1, scale1.reshape(1, 1, C), shift1.reshape(1, 1, C),
                          w2, fuse_bn_relu=True, vmem_limit=vmem_limit)
    scale2, shift2 = _finalize_bn(st2, params["bn2_gamma"].astype(jnp.float32),
                                  params["bn2_beta"].astype(jnp.float32),
                                  count, eps)

    # ---- stage 3: bn2 + residual + relu, lane-dense (B, H, W*C) views --------
    out_wc = pl.pallas_call(
        _bn_add_relu_kernel,
        out_shape=jax.ShapeDtypeStruct((B, H, WC), jnp.float32),
        grid=(B,),
        in_specs=[
            pl.BlockSpec((1, H, WC), lambda b: (b, 0, 0)),
            pl.BlockSpec((1, H, WC), lambda b: (b, 0, 0)),
            pl.BlockSpec((1, WC), lambda b: (0, 0)),
            pl.BlockSpec((1, WC), lambda b: (0, 0)),
        ],
        out_specs=pl.BlockSpec((1, H, WC), lambda b: (b, 0, 0)),
        compiler_params=pltpu.CompilerParams(
            dimension_semantics=("parallel",),
            vmem_limit_bytes=vmem_limit),
    )(y2.reshape(B, H, WC), x_nhwc.reshape(B, H, WC),
      jnp.tile(scale2, W).reshape(1, WC), jnp.tile(shift2, W).reshape(1, WC))

    return jnp.transpose(out_wc.reshape(B, H, W, C), (0, 3, 1, 2))


# ---------------------------------------------------------------------------
# Pure-JAX reference for a correctness check
# ---------------------------------------------------------------------------
def _reference_forward(x, p, eps=1e-5):
    def conv3x3(x, w):
        return lax.conv_general_dilated(
            x, w, window_strides=(1, 1), padding=((1, 1), (1, 1)),
            dimension_numbers=("NCHW", "OIHW", "NCHW"))

    def bn(x, g, b):
        m = jnp.mean(x, axis=(0, 2, 3), keepdims=True)
        v = jnp.mean(jnp.square(x - m), axis=(0, 2, 3), keepdims=True)
        return (x - m) * lax.rsqrt(v + eps) * g.reshape(1, -1, 1, 1) \
            + b.reshape(1, -1, 1, 1)

    h = jnp.maximum(bn(conv3x3(x, p["conv1_w"]), p["bn1_gamma"], p["bn1_beta"]), 0.0)
    h = bn(conv3x3(h, p["conv2_w"]), p["bn2_gamma"], p["bn2_beta"])
    return jnp.maximum(h + x, 0.0)


if __name__ == "__main__":
    # downsample=None => nb_input_channel == nb_output_channel, stride == 1
    B, C, H, W = 2, 8, 16, 16          # W*C = 128 -> lane-dense elementwise path
    key = jax.random.PRNGKey(0)
    kx, k1, k2, k3, k4 = jax.random.split(key, 5)

    x = jax.random.normal(kx, (B, C, H, W), jnp.float32)
    params = {
        "conv1_w": 0.1 * jax.random.normal(k1, (C, C, 3, 3), jnp.float32),
        "conv2_w": 0.1 * jax.random.normal(k2, (C, C, 3, 3), jnp.float32),
        "bn1_gamma": 1.0 + 0.1 * jax.random.normal(k3, (C,), jnp.float32),
        "bn1_beta": 0.1 * jax.random.normal(k4, (C,), jnp.float32),
        "bn2_gamma": jnp.ones((C,), jnp.float32),
        "bn2_beta": jnp.zeros((C,), jnp.float32),
    }

    out = basic_block_forward(x, params)
    jax.block_until_ready(out)
    assert out.shape == (B, C, H, W)

    ref = _reference_forward(x, params)
    max_err = float(jnp.max(jnp.abs(out - ref)))
    assert max_err < 5e-2, f"max abs err {max_err}"

    print("KERNEL_OK")
</pallas_src>

<mosaic_0001>
module attributes {stable_mosaic.version = 11 : i64} {
  func.func @_conv_bn_stats_kernel(%arg0: i32, %arg1: memref<1x16x16x8xf32, #tpu.memory_space<vmem>>, %arg2: memref<1x1x8xf32, #tpu.memory_space<vmem>>, %arg3: memref<1x1x8xf32, #tpu.memory_space<vmem>>, %arg4: memref<72x8xbf16, #tpu.memory_space<vmem>>, %arg5: memref<1x16x16x8xf32, #tpu.memory_space<vmem>>, %arg6: memref<1x2x8xf32, #tpu.memory_space<vmem>>, %arg7: memref<18x18x8xbf16, #tpu.memory_space<vmem>>) attributes {dimension_semantics = [#tpu.dimension_semantics<parallel>], iteration_bounds = array<i64: 2>, scalar_prefetch = 0 : i64, scratch_operands = 1 : i64, tpu.core_type = #tpu.core_type<tc>, window_params = [{transform_indices = @transform_0, window_bounds = array<i64: 1, 16, 16, 8>}, {pipeline_mode = #tpu.pipeline_mode<synchronous>, transform_indices = @transform_1, window_bounds = array<i64: 1, 1, 8>}, {pipeline_mode = #tpu.pipeline_mode<synchronous>, transform_indices = @transform_2, window_bounds = array<i64: 1, 1, 8>}, {pipeline_mode = #tpu.pipeline_mode<synchronous>, transform_indices = @transform_3, window_bounds = array<i64: 72, 8>}, {transform_indices = @transform_4, window_bounds = array<i64: 1, 16, 16, 8>}, {transform_indices = @transform_5, window_bounds = array<i64: 1, 2, 8>}]} {
    %c0 = arith.constant 0 : index
    %c0_0 = arith.constant 0 : index
    %c0_1 = arith.constant 0 : index
    %c0_2 = arith.constant 0 : index
    %0 = vector.load %arg1[%c0, %c0_0, %c0_1, %c0_2] : memref<1x16x16x8xf32, #tpu.memory_space<vmem>>, vector<1x16x16x8xf32>
    %1 = vector.shape_cast %0 : vector<1x16x16x8xf32> to vector<16x16x8xf32>
    %2 = arith.truncf %1 : vector<16x16x8xf32> to vector<16x16x8xbf16>
    %cst = arith.constant 0.000000e+00 : bf16
    %3 = vector.broadcast %cst : bf16 to vector<1x18x8xbf16>
    %c0_3 = arith.constant 0 : index
    %c0_4 = arith.constant 0 : index
    %c0_5 = arith.constant 0 : index
    %4 = vector.load %arg7[%c0_3, %c0_4, %c0_5] : memref<18x18x8xbf16, #tpu.memory_space<vmem>>, vector<1x18x8xbf16>
    tpu.vector_store %arg7[%c0_3, %c0_4, %c0_5], %3 {strides = array<i32>} : memref<18x18x8xbf16, #tpu.memory_space<vmem>>, vector<1x18x8xbf16>,
    %cst_6 = arith.constant 0.000000e+00 : bf16
    %5 = vector.broadcast %cst_6 : bf16 to vector<1x18x8xbf16>
    %c17 = arith.constant 17 : index
    %c0_7 = arith.constant 0 : index
    %c0_8 = arith.constant 0 : index
    %6 = vector.load %arg7[%c17, %c0_7, %c0_8] : memref<18x18x8xbf16, #tpu.memory_space<vmem>>, vector<1x18x8xbf16>
    tpu.vector_store %arg7[%c17, %c0_7, %c0_8], %5 {strides = array<i32>} : memref<18x18x8xbf16, #tpu.memory_space<vmem>>, vector<1x18x8xbf16>,
    %cst_9 = arith.constant 0.000000e+00 : bf16
    %7 = vector.broadcast %cst_9 : bf16 to vector<16x1x8xbf16>
    %c1 = arith.constant 1 : index
    %c0_10 = arith.constant 0 : index
    %c0_11 = arith.constant 0 : index
    %8 = vector.load %arg7[%c1, %c0_10, %c0_11] : memref<18x18x8xbf16, #tpu.memory_space<vmem>>, vector<16x1x8xbf16>
    tpu.vector_store %arg7[%c1, %c0_10, %c0_11], %7 {strides = array<i32>} : memref<18x18x8xbf16, #tpu.memory_space<vmem>>, vector<16x1x8xbf16>,
    %cst_12 = arith.constant 0.000000e+00 : bf16
    %9 = vector.broadcast %cst_12 : bf16 to vector<16x1x8xbf16>
    %c1_13 = arith.constant 1 : index
    %c17_14 = arith.constant 17 : index
    %c0_15 = arith.constant 0 : index
    %10 = vector.load %arg7[%c1_13, %c17_14, %c0_15] : memref<18x18x8xbf16, #tpu.memory_space<vmem>>, vector<16x1x8xbf16>
    tpu.vector_store %arg7[%c1_13, %c17_14, %c0_15], %9 {strides = array<i32>} : memref<18x18x8xbf16, #tpu.memory_space<vmem>>, vector<16x1x8xbf16>,
    %c1_16 = arith.constant 1 : index
    %c1_17 = arith.constant 1 : index
    %c0_18 = arith.constant 0 : index
    %11 = vector.load %arg7[%c1_16, %c1_17, %c0_18] : memref<18x18x8xbf16, #tpu.memory_space<vmem>>, vector<16x16x8xbf16>
    tpu.vector_store %arg7[%c1_16, %c1_17, %c0_18], %2 {strides = array<i32>} : memref<18x18x8xbf16, #tpu.memory_space<vmem>>, vector<16x16x8xbf16>,
    %c0_19 = arith.constant 0 : index
    %c0_20 = arith.constant 0 : index
    %c0_21 = arith.constant 0 : index
    %12 = vector.load %arg7[%c0_19, %c0_20, %c0_21] : memref<18x18x8xbf16, #tpu.memory_space<vmem>>, vector<16x16x8xbf16>
    %13 = vector.shape_cast %12 : vector<16x16x8xbf16> to vector<256x8xbf16>
    %c0_22 = arith.constant 0 : index
    %c1_23 = arith.constant 1 : index
    %c0_24 = arith.constant 0 : index
    %14 = vector.load %arg7[%c0_22, %c1_23, %c0_24] : memref<18x18x8xbf16, #tpu.memory_space<vmem>>, vector<16x16x8xbf16>
    %15 = vector.shape_cast %14 : vector<16x16x8xbf16> to vector<256x8xbf16>
    %c0_25 = arith.constant 0 : index
    %c2 = arith.constant 2 : index
    %c0_26 = arith.constant 0 : index
    %16 = vector.load %arg7[%c0_25, %c2, %c0_26] : memref<18x18x8xbf16, #tpu.memory_space<vmem>>, vector<16x16x8xbf16>
    %17 = vector.shape_cast %16 : vector<16x16x8xbf16> to vector<256x8xbf16>
    %c1_27 = arith.constant 1 : index
    %c0_28 = arith.constant 0 : index
    %c0_29 = arith.constant 0 : index
    %18 = vector.load %arg7[%c1_27, %c0_28, %c0_29] : memref<18x18x8xbf16, #tpu.memory_space<vmem>>, vector<16x16x8xbf16>
    %19 = vector.shape_cast %18 : vector<16x16x8xbf16> to vector<256x8xbf16>
    %c1_30 = arith.constant 1 : index
    %c1_31 = arith.constant 1 : index
    %c0_32 = arith.constant 0 : index
    %20 = vector.load %arg7[%c1_30, %c1_31, %c0_32] : memref<18x18x8xbf16, #tpu.memory_space<vmem>>, vector<16x16x8xbf16>
    %21 = vector.shape_cast %20 : vector<16x16x8xbf16> to vector<256x8xbf16>
    %c1_33 = arith.constant 1 : index
    %c2_34 = arith.constant 2 : index
    %c0_35 = arith.constant 0 : index
    %22 = vector.load %arg7[%c1_33, %c2_34, %c0_35] : memref<18x18x8xbf16, #tpu.memory_space<vmem>>, vector<16x16x8xbf16>
    %23 = vector.shape_cast %22 : vector<16x16x8xbf16> to vector<256x8xbf16>
    %c2_36 = arith.constant 2 : index
    %c0_37 = arith.constant 0 : index
    %c0_38 = arith.constant 0 : index
    %24 = vector.load %arg7[%c2_36, %c0_37, %c0_38] : memref<18x18x8xbf16, #tpu.memory_space<vmem>>, vector<16x16x8xbf16>
    %25 = vector.shape_cast %24 : vector<16x16x8xbf16> to vector<256x8xbf16>
    %c2_39 = arith.constant 2 : index
    %c1_40 = arith.constant 1 : index
    %c0_41 = arith.constant 0 : index
    %26 = vector.load %arg7[%c2_39, %c1_40, %c0_41] : memref<18x18x8xbf16, #tpu.memory_space<vmem>>, vector<16x16x8xbf16>
    %27 = vector.shape_cast %26 : vector<16x16x8xbf16> to vector<256x8xbf16>
    %c2_42 = arith.constant 2 : index
    %c2_43 = arith.constant 2 : index
    %c0_44 = arith.constant 0 : index
    %28 = vector.load %arg7[%c2_42, %c2_43, %c0_44] : memref<18x18x8xbf16, #tpu.memory_space<vmem>>, vector<16x16x8xbf16>
    %29 = vector.shape_cast %28 : vector<16x16x8xbf16> to vector<256x8xbf16>
    %30 = tpu.concatenate %13, %15, %17, %19, %21, %23, %25, %27, %29 in 1 : vector<256x8xbf16>, vector<256x8xbf16>, vector<256x8xbf16>, vector<256x8xbf16>, vector<256x8xbf16>, vector<256x8xbf16>, vector<256x8xbf16>, vector<256x8xbf16>, vector<256x8xbf16> -> vector<256x72xbf16>
    %c0_45 = arith.constant 0 : index
    %c0_46 = arith.constant 0 : index
    %31 = vector.load %arg4[%c0_45, %c0_46] : memref<72x8xbf16, #tpu.memory_space<vmem>>, vector<72x8xbf16>
    %cst_47 = arith.constant dense<0.000000e+00> : vector<256x8xf32>
    %32 = tpu.matmul %30, %31, %cst_47 {dimension_numbers = #tpu.dot_dimension_numbers<[1], [0], [0], [1], [0, 0, 1, 1], [], []>} : vector<256x72xbf16>, vector<72x8xbf16>, vector<256x8xf32> -> vector<256x8xf32>
    %cst_48 = arith.constant dense<0.000000e+00> : vector<8xf32>
    %33 = vector.multi_reduction <add>, %32, %cst_48 [0] : vector<256x8xf32> to vector<8xf32>
    %34 = vector.shape_cast %33 : vector<8xf32> to vector<1x8xf32>
    %35 = arith.mulf %32, %32 : vector<256x8xf32>
    %cst_49 = arith.constant dense<0.000000e+00> : vector<8xf32>
    %36 = vector.multi_reduction <add>, %35, %cst_49 [0] : vector<256x8xf32> to vector<8xf32>
    %37 = vector.shape_cast %36 : vector<8xf32> to vector<1x8xf32>
    %38 = tpu.concatenate %34, %37 in 0 : vector<1x8xf32>, vector<1x8xf32> -> vector<2x8xf32>
    %c0_50 = arith.constant 0 : index
    %c0_51 = arith.constant 0 : index
    %c0_52 = arith.constant 0 : index
    %39 = vector.load %arg6[%c0_50, %c0_51, %c0_52] : memref<1x2x8xf32, #tpu.memory_space<vmem>>, vector<1x2x8xf32>
    %40 = vector.shape_cast %39 : vector<1x2x8xf32> to vector<2x8xf32>
    %41 = vector.shape_cast %38 : vector<2x8xf32> to vector<1x2x8xf32>
    tpu.vector_store %arg6[%c0_50, %c0_51, %c0_52], %41 {strides = array<i32>} : memref<1x2x8xf32, #tpu.memory_space<vmem>>, vector<1x2x8xf32>,
    %42 = vector.shape_cast %32 : vector<256x8xf32> to vector<16x16x8xf32>
    %c0_53 = arith.constant 0 : index
    %c0_54 = arith.constant 0 : index
    %c0_55 = arith.constant 0 : index
    %c0_56 = arith.constant 0 : index
    %43 = vector.load %arg5[%c0_53, %c0_54, %c0_55, %c0_56] : memref<1x16x16x8xf32, #tpu.memory_space<vmem>>, vector<1x16x16x8xf32>
    %44 = vector.shape_cast %43 : vector<1x16x16x8xf32> to vector<16x16x8xf32>
    %45 = vector.shape_cast %42 : vector<16x16x8xf32> to vector<1x16x16x8xf32>
    tpu.vector_store %arg5[%c0_53, %c0_54, %c0_55, %c0_56], %45 {strides = array<i32>} : memref<1x16x16x8xf32, #tpu.memory_space<vmem>>, vector<1x16x16x8xf32>,
    return
  }
  func.func @transform_0(%arg0: i32) -> (i32, i32, i32, i32) {
    %c0_i32 = arith.constant 0 : i32
    %c0_i32_0 = arith.constant 0 : i32
    %c0_i32_1 = arith.constant 0 : i32
    %c0_i32_2 = arith.constant 0 : i32
    return %arg0, %c0_i32, %c0_i32_0, %c0_i32_1 : i32, i32, i32, i32
  }
  func.func @transform_1(%arg0: i32) -> (i32, i32, i32) {
    %c0_i32 = arith.constant 0 : i32
    %c0_i32_0 = arith.constant 0 : i32
    %c0_i32_1 = arith.constant 0 : i32
    %c0_i32_2 = arith.constant 0 : i32
    return %c0_i32, %c0_i32_0, %c0_i32_1 : i32, i32, i32
  }
  func.func @transform_2(%arg0: i32) -> (i32, i32, i32) {
    %c0_i32 = arith.constant 0 : i32
    %c0_i32_0 = arith.constant 0 : i32
    %c0_i32_1 = arith.constant 0 : i32
    %c0_i32_2 = arith.constant 0 : i32
    return %c0_i32, %c0_i32_0, %c0_i32_1 : i32, i32, i32
  }
  func.func @transform_3(%arg0: i32) -> (i32, i32) {
    %c0_i32 = arith.constant 0 : i32
    %c0_i32_0 = arith.constant 0 : i32
    %c0_i32_1 = arith.constant 0 : i32
    return %c0_i32, %c0_i32_0 : i32, i32
  }
  func.func @transform_4(%arg0: i32) -> (i32, i32, i32, i32) {
    %c0_i32 = arith.constant 0 : i32
    %c0_i32_0 = arith.constant 0 : i32
    %c0_i32_1 = arith.constant 0 : i32
    %c0_i32_2 = arith.constant 0 : i32
    return %arg0, %c0_i32, %c0_i32_0, %c0_i32_1 : i32, i32, i32, i32
  }
  func.func @transform_5(%arg0: i32) -> (i32, i32, i32) {
    %c0_i32 = arith.constant 0 : i32
    %c0_i32_0 = arith.constant 0 : i32
    %c0_i32_1 = arith.constant 0 : i32
    return %arg0, %c0_i32, %c0_i32_0 : i32, i32, i32
  }
}

module attributes {stable_mosaic.version = 11 : i64} {
  func.func @_conv_bn_stats_kernel(%arg0: i32, %arg1: memref<1x16x16x8xf32, #tpu.memory_space<vmem>>, %arg2: memref<1x1x8xf32, #tpu.memory_space<vmem>>, %arg3: memref<1x1x8xf32, #tpu.memory_space<vmem>>, %arg4: memref<72x8xbf16, #tpu.memory_space<vmem>>, %arg5: memref<1x16x16x8xf32, #tpu.memory_space<vmem>>, %arg6: memref<1x2x8xf32, #tpu.memory_space<vmem>>, %arg7: memref<18x18x8xbf16, #tpu.memory_space<vmem>>) attributes {dimension_semantics = [#tpu.dimension_semantics<parallel>], iteration_bounds = array<i64: 2>, scalar_prefetch = 0 : i64, scratch_operands = 1 : i64, tpu.core_type = #tpu.core_type<tc>, window_params = [{transform_indices = @transform_0, window_bounds = array<i64: 1, 16, 16, 8>}, {pipeline_mode = #tpu.pipeline_mode<synchronous>, transform_indices = @transform_1, window_bounds = array<i64: 1, 1, 8>}, {pipeline_mode = #tpu.pipeline_mode<synchronous>, transform_indices = @transform_2, window_bounds = array<i64: 1, 1, 8>}, {pipeline_mode = #tpu.pipeline_mode<synchronous>, transform_indices = @transform_3, window_bounds = array<i64: 72, 8>}, {transform_indices = @transform_4, window_bounds = array<i64: 1, 16, 16, 8>}, {transform_indices = @transform_5, window_bounds = array<i64: 1, 2, 8>}]} {
    %c0 = arith.constant 0 : index
    %c0_0 = arith.constant 0 : index
    %c0_1 = arith.constant 0 : index
    %c0_2 = arith.constant 0 : index
    %0 = vector.load %arg1[%c0, %c0_0, %c0_1, %c0_2] : memref<1x16x16x8xf32, #tpu.memory_space<vmem>>, vector<1x16x16x8xf32>
    %1 = vector.shape_cast %0 : vector<1x16x16x8xf32> to vector<16x16x8xf32>
    %c0_3 = arith.constant 0 : index
    %c0_4 = arith.constant 0 : index
    %c0_5 = arith.constant 0 : index
    %2 = vector.load %arg2[%c0_3, %c0_4, %c0_5] : memref<1x1x8xf32, #tpu.memory_space<vmem>>, vector<1x1x8xf32>
    %3 = vector.shape_cast %2 : vector<1x1x8xf32> to vector<1x8xf32>
    %4 = vector.shape_cast %3 : vector<1x8xf32> to vector<1x1x8xf32>
    %5 = vector.broadcast %4 : vector<1x1x8xf32> to vector<16x16x8xf32>
    %6 = arith.mulf %1, %5 : vector<16x16x8xf32>
    %c0_6 = arith.constant 0 : index
    %c0_7 = arith.constant 0 : index
    %c0_8 = arith.constant 0 : index
    %7 = vector.load %arg3[%c0_6, %c0_7, %c0_8] : memref<1x1x8xf32, #tpu.memory_space<vmem>>, vector<1x1x8xf32>
    %8 = vector.shape_cast %7 : vector<1x1x8xf32> to vector<1x8xf32>
    %9 = vector.shape_cast %8 : vector<1x8xf32> to vector<1x1x8xf32>
    %10 = vector.broadcast %9 : vector<1x1x8xf32> to vector<16x16x8xf32>
    %11 = arith.addf %6, %10 : vector<16x16x8xf32>
    %cst = arith.constant 0.000000e+00 : f32
    %12 = vector.broadcast %cst : f32 to vector<16x16x8xf32>
    %13 = arith.maximumf %11, %12 : vector<16x16x8xf32>
    %14 = arith.truncf %13 : vector<16x16x8xf32> to vector<16x16x8xbf16>
    %cst_9 = arith.constant 0.000000e+00 : bf16
    %15 = vector.broadcast %cst_9 : bf16 to vector<1x18x8xbf16>
    %c0_10 = arith.constant 0 : index
    %c0_11 = arith.constant 0 : index
    %c0_12 = arith.constant 0 : index
    %16 = vector.load %arg7[%c0_10, %c0_11, %c0_12] : memref<18x18x8xbf16, #tpu.memory_space<vmem>>, vector<1x18x8xbf16>
    tpu.vector_store %arg7[%c0_10, %c0_11, %c0_12], %15 {strides = array<i32>} : memref<18x18x8xbf16, #tpu.memory_space<vmem>>, vector<1x18x8xbf16>,
    %cst_13 = arith.constant 0.000000e+00 : bf16
    %17 = vector.broadcast %cst_13 : bf16 to vector<1x18x8xbf16>
    %c17 = arith.constant 17 : index
    %c0_14 = arith.constant 0 : index
    %c0_15 = arith.constant 0 : index
    %18 = vector.load %arg7[%c17, %c0_14, %c0_15] : memref<18x18x8xbf16, #tpu.memory_space<vmem>>, vector<1x18x8xbf16>
    tpu.vector_store %arg7[%c17, %c0_14, %c0_15], %17 {strides = array<i32>} : memref<18x18x8xbf16, #tpu.memory_space<vmem>>, vector<1x18x8xbf16>,
    %cst_16 = arith.constant 0.000000e+00 : bf16
    %19 = vector.broadcast %cst_16 : bf16 to vector<16x1x8xbf16>
    %c1 = arith.constant 1 : index
    %c0_17 = arith.constant 0 : index
    %c0_18 = arith.constant 0 : index
    %20 = vector.load %arg7[%c1, %c0_17, %c0_18] : memref<18x18x8xbf16, #tpu.memory_space<vmem>>, vector<16x1x8xbf16>
    tpu.vector_store %arg7[%c1, %c0_17, %c0_18], %19 {strides = array<i32>} : memref<18x18x8xbf16, #tpu.memory_space<vmem>>, vector<16x1x8xbf16>,
    %cst_19 = arith.constant 0.000000e+00 : bf16
    %21 = vector.broadcast %cst_19 : bf16 to vector<16x1x8xbf16>
    %c1_20 = arith.constant 1 : index
    %c17_21 = arith.constant 17 : index
    %c0_22 = arith.constant 0 : index
    %22 = vector.load %arg7[%c1_20, %c17_21, %c0_22] : memref<18x18x8xbf16, #tpu.memory_space<vmem>>, vector<16x1x8xbf16>
    tpu.vector_store %arg7[%c1_20, %c17_21, %c0_22], %21 {strides = array<i32>} : memref<18x18x8xbf16, #tpu.memory_space<vmem>>, vector<16x1x8xbf16>,
    %c1_23 = arith.constant 1 : index
    %c1_24 = arith.constant 1 : index
    %c0_25 = arith.constant 0 : index
    %23 = vector.load %arg7[%c1_23, %c1_24, %c0_25] : memref<18x18x8xbf16, #tpu.memory_space<vmem>>, vector<16x16x8xbf16>
    tpu.vector_store %arg7[%c1_23, %c1_24, %c0_25], %14 {strides = array<i32>} : memref<18x18x8xbf16, #tpu.memory_space<vmem>>, vector<16x16x8xbf16>,
    %c0_26 = arith.constant 0 : index
    %c0_27 = arith.constant 0 : index
    %c0_28 = arith.constant 0 : index
    %24 = vector.load %arg7[%c0_26, %c0_27, %c0_28] : memref<18x18x8xbf16, #tpu.memory_space<vmem>>, vector<16x16x8xbf16>
    %25 = vector.shape_cast %24 : vector<16x16x8xbf16> to vector<256x8xbf16>
    %c0_29 = arith.constant 0 : index
    %c1_30 = arith.constant 1 : index
    %c0_31 = arith.constant 0 : index
    %26 = vector.load %arg7[%c0_29, %c1_30, %c0_31] : memref<18x18x8xbf16, #tpu.memory_space<vmem>>, vector<16x16x8xbf16>
    %27 = vector.shape_cast %26 : vector<16x16x8xbf16> to vector<256x8xbf16>
    %c0_32 = arith.constant 0 : index
    %c2 = arith.constant 2 : index
    %c0_33 = arith.constant 0 : index
    %28 = vector.load %arg7[%c0_32, %c2, %c0_33] : memref<18x18x8xbf16, #tpu.memory_space<vmem>>, vector<16x16x8xbf16>
    %29 = vector.shape_cast %28 : vector<16x16x8xbf16> to vector<256x8xbf16>
    %c1_34 = arith.constant 1 : index
    %c0_35 = arith.constant 0 : index
    %c0_36 = arith.constant 0 : index
    %30 = vector.load %arg7[%c1_34, %c0_35, %c0_36] : memref<18x18x8xbf16, #tpu.memory_space<vmem>>, vector<16x16x8xbf16>
    %31 = vector.shape_cast %30 : vector<16x16x8xbf16> to vector<256x8xbf16>
    %c1_37 = arith.constant 1 : index
    %c1_38 = arith.constant 1 : index
    %c0_39 = arith.constant 0 : index
    %32 = vector.load %arg7[%c1_37, %c1_38, %c0_39] : memref<18x18x8xbf16, #tpu.memory_space<vmem>>, vector<16x16x8xbf16>
    %33 = vector.shape_cast %32 : vector<16x16x8xbf16> to vector<256x8xbf16>
    %c1_40 = arith.constant 1 : index
    %c2_41 = arith.constant 2 : index
    %c0_42 = arith.constant 0 : index
    %34 = vector.load %arg7[%c1_40, %c2_41, %c0_42] : memref<18x18x8xbf16, #tpu.memory_space<vmem>>, vector<16x16x8xbf16>
    %35 = vector.shape_cast %34 : vector<16x16x8xbf16> to vector<256x8xbf16>
    %c2_43 = arith.constant 2 : index
    %c0_44 = arith.constant 0 : index
    %c0_45 = arith.constant 0 : index
    %36 = vector.load %arg7[%c2_43, %c0_44, %c0_45] : memref<18x18x8xbf16, #tpu.memory_space<vmem>>, vector<16x16x8xbf16>
    %37 = vector.shape_cast %36 : vector<16x16x8xbf16> to vector<256x8xbf16>
    %c2_46 = arith.constant 2 : index
    %c1_47 = arith.constant 1 : index
    %c0_48 = arith.constant 0 : index
    %38 = vector.load %arg7[%c2_46, %c1_47, %c0_48] : memref<18x18x8xbf16, #tpu.memory_space<vmem>>, vector<16x16x8xbf16>
    %39 = vector.shape_cast %38 : vector<16x16x8xbf16> to vector<256x8xbf16>
    %c2_49 = arith.constant 2 : index
    %c2_50 = arith.constant 2 : index
    %c0_51 = arith.constant 0 : index
    %40 = vector.load %arg7[%c2_49, %c2_50, %c0_51] : memref<18x18x8xbf16, #tpu.memory_space<vmem>>, vector<16x16x8xbf16>
    %41 = vector.shape_cast %40 : vector<16x16x8xbf16> to vector<256x8xbf16>
    %42 = tpu.concatenate %25, %27, %29, %31, %33, %35, %37, %39, %41 in 1 : vector<256x8xbf16>, vector<256x8xbf16>, vector<256x8xbf16>, vector<256x8xbf16>, vector<256x8xbf16>, vector<256x8xbf16>, vector<256x8xbf16>, vector<256x8xbf16>, vector<256x8xbf16> -> vector<256x72xbf16>
    %c0_52 = arith.constant 0 : index
    %c0_53 = arith.constant 0 : index
    %43 = vector.load %arg4[%c0_52, %c0_53] : memref<72x8xbf16, #tpu.memory_space<vmem>>, vector<72x8xbf16>
    %cst_54 = arith.constant dense<0.000000e+00> : vector<256x8xf32>
    %44 = tpu.matmul %42, %43, %cst_54 {dimension_numbers = #tpu.dot_dimension_numbers<[1], [0], [0], [1], [0, 0, 1, 1], [], []>} : vector<256x72xbf16>, vector<72x8xbf16>, vector<256x8xf32> -> vector<256x8xf32>
    %cst_55 = arith.constant dense<0.000000e+00> : vector<8xf32>
    %45 = vector.multi_reduction <add>, %44, %cst_55 [0] : vector<256x8xf32> to vector<8xf32>
    %46 = vector.shape_cast %45 : vector<8xf32> to vector<1x8xf32>
    %47 = arith.mulf %44, %44 : vector<256x8xf32>
    %cst_56 = arith.constant dense<0.000000e+00> : vector<8xf32>
    %48 = vector.multi_reduction <add>, %47, %cst_56 [0] : vector<256x8xf32> to vector<8xf32>
    %49 = vector.shape_cast %48 : vector<8xf32> to vector<1x8xf32>
    %50 = tpu.concatenate %46, %49 in 0 : vector<1x8xf32>, vector<1x8xf32> -> vector<2x8xf32>
    %c0_57 = arith.constant 0 : index
    %c0_58 = arith.constant 0 : index
    %c0_59 = arith.constant 0 : index
    %51 = vector.load %arg6[%c0_57, %c0_58, %c0_59] : memref<1x2x8xf32, #tpu.memory_space<vmem>>, vector<1x2x8xf32>
    %52 = vector.shape_cast %51 : vector<1x2x8xf32> to vector<2x8xf32>
    %53 = vector.shape_cast %50 : vector<2x8xf32> to vector<1x2x8xf32>
    tpu.vector_store %arg6[%c0_57, %c0_58, %c0_59], %53 {strides = array<i32>} : memref<1x2x8xf32, #tpu.memory_space<vmem>>, vector<1x2x8xf32>,
    %54 = vector.shape_cast %44 : vector<256x8xf32> to vector<16x16x8xf32>
    %c0_60 = arith.constant 0 : index
    %c0_61 = arith.constant 0 : index
    %c0_62 = arith.constant 0 : index
    %c0_63 = arith.constant 0 : index
    %55 = vector.load %arg5[%c0_60, %c0_61, %c0_62, %c0_63] : memref<1x16x16x8xf32, #tpu.memory_space<vmem>>, vector<1x16x16x8xf32>
    %56 = vector.shape_cast %55 : vector<1x16x16x8xf32> to vector<16x16x8xf32>
    %57 = vector.shape_cast %54 : vector<16x16x8xf32> to vector<1x16x16x8xf32>
    tpu.vector_store %arg5[%c0_60, %c0_61, %c0_62, %c0_63], %57 {strides = array<i32>} : memref<1x16x16x8xf32, #tpu.memory_space<vmem>>, vector<1x16x16x8xf32>,
    return
  }
  func.func @transform_0(%arg0: i32) -> (i32, i32, i32, i32) {
    %c0_i32 = arith.constant 0 : i32
    %c0_i32_0 = arith.constant 0 : i32
    %c0_i32_1 = arith.constant 0 : i32
    %c0_i32_2 = arith.constant 0 : i32
    return %arg0, %c0_i32, %c0_i32_0, %c0_i32_1 : i32, i32, i32, i32
  }
  func.func @transform_1(%arg0: i32) -> (i32, i32, i32) {
    %c0_i32 = arith.constant 0 : i32
    %c0_i32_0 = arith.constant 0 : i32
    %c0_i32_1 = arith.constant 0 : i32
    %c0_i32_2 = arith.constant 0 : i32
    return %c0_i32, %c0_i32_0, %c0_i32_1 : i32, i32, i32
  }
  func.func @transform_2(%arg0: i32) -> (i32, i32, i32) {
    %c0_i32 = arith.constant 0 : i32
    %c0_i32_0 = arith.constant 0 : i32
    %c0_i32_1 = arith.constant 0 : i32
    %c0_i32_2 = arith.constant 0 : i32
    return %c0_i32, %c0_i32_0, %c0_i32_1 : i32, i32, i32
  }
  func.func @transform_3(%arg0: i32) -> (i32, i32) {
    %c0_i32 = arith.constant 0 : i32
    %c0_i32_0 = arith.constant 0 : i32
    %c0_i32_1 = arith.constant 0 : i32
    return %c0_i32, %c0_i32_0 : i32, i32
  }
  func.func @transform_4(%arg0: i32) -> (i32, i32, i32, i32) {
    %c0_i32 = arith.constant 0 : i32
    %c0_i32_0 = arith.constant 0 : i32
    %c0_i32_1 = arith.constant 0 : i32
    %c0_i32_2 = arith.constant 0 : i32
    return %arg0, %c0_i32, %c0_i32_0, %c0_i32_1 : i32, i32, i32, i32
  }
  func.func @transform_5(%arg0: i32) -> (i32, i32, i32) {
    %c0_i32 = arith.constant 0 : i32
    %c0_i32_0 = arith.constant 0 : i32
    %c0_i32_1 = arith.constant 0 : i32
    return %arg0, %c0_i32, %c0_i32_0 : i32, i32, i32
  }
}

module attributes {stable_mosaic.version = 11 : i64} {
  func.func @_bn_add_relu_kernel(%arg0: i32, %arg1: memref<1x16x128xf32, #tpu.memory_space<vmem>>, %arg2: memref<1x16x128xf32, #tpu.memory_space<vmem>>, %arg3: memref<1x128xf32, #tpu.memory_space<vmem>>, %arg4: memref<1x128xf32, #tpu.memory_space<vmem>>, %arg5: memref<1x16x128xf32, #tpu.memory_space<vmem>>) attributes {dimension_semantics = [#tpu.dimension_semantics<parallel>], iteration_bounds = array<i64: 2>, scalar_prefetch = 0 : i64, scratch_operands = 0 : i64, tpu.core_type = #tpu.core_type<tc>, window_params = [{transform_indices = @transform_0, window_bounds = array<i64: 1, 16, 128>}, {transform_indices = @transform_1, window_bounds = array<i64: 1, 16, 128>}, {pipeline_mode = #tpu.pipeline_mode<synchronous>, transform_indices = @transform_2, window_bounds = array<i64: 1, 128>}, {pipeline_mode = #tpu.pipeline_mode<synchronous>, transform_indices = @transform_3, window_bounds = array<i64: 1, 128>}, {transform_indices = @transform_4, window_bounds = array<i64: 1, 16, 128>}]} {
    %c0 = arith.constant 0 : index
    %c0_0 = arith.constant 0 : index
    %c0_1 = arith.constant 0 : index
    %0 = vector.load %arg1[%c0, %c0_0, %c0_1] : memref<1x16x128xf32, #tpu.memory_space<vmem>>, vector<1x16x128xf32>
    %1 = vector.shape_cast %0 : vector<1x16x128xf32> to vector<16x128xf32>
    %c0_2 = arith.constant 0 : index
    %c0_3 = arith.constant 0 : index
    %2 = vector.load %arg3[%c0_2, %c0_3] : memref<1x128xf32, #tpu.memory_space<vmem>>, vector<1x128xf32>
    %3 = vector.broadcast %2 : vector<1x128xf32> to vector<16x128xf32>
    %4 = arith.mulf %1, %3 : vector<16x128xf32>
    %c0_4 = arith.constant 0 : index
    %c0_5 = arith.constant 0 : index
    %5 = vector.load %arg4[%c0_4, %c0_5] : memref<1x128xf32, #tpu.memory_space<vmem>>, vector<1x128xf32>
    %6 = vector.broadcast %5 : vector<1x128xf32> to vector<16x128xf32>
    %7 = arith.addf %4, %6 : vector<16x128xf32>
    %c0_6 = arith.constant 0 : index
    %c0_7 = arith.constant 0 : index
    %c0_8 = arith.constant 0 : index
    %8 = vector.load %arg2[%c0_6, %c0_7, %c0_8] : memref<1x16x128xf32, #tpu.memory_space<vmem>>, vector<1x16x128xf32>
    %9 = vector.shape_cast %8 : vector<1x16x128xf32> to vector<16x128xf32>
    %10 = arith.addf %7, %9 : vector<16x128xf32>
    %cst = arith.constant 0.000000e+00 : f32
    %11 = vector.broadcast %cst : f32 to vector<16x128xf32>
    %12 = arith.maximumf %10, %11 : vector<16x128xf32>
    %c0_9 = arith.constant 0 : index
    %c0_10 = arith.constant 0 : index
    %c0_11 = arith.constant 0 : index
    %13 = vector.load %arg5[%c0_9, %c0_10, %c0_11] : memref<1x16x128xf32, #tpu.memory_space<vmem>>, vector<1x16x128xf32>
    %14 = vector.shape_cast %13 : vector<1x16x128xf32> to vector<16x128xf32>
    %15 = vector.shape_cast %12 : vector<16x128xf32> to vector<1x16x128xf32>
    tpu.vector_store %arg5[%c0_9, %c0_10, %c0_11], %15 {strides = array<i32>} : memref<1x16x128xf32, #tpu.memory_space<vmem>>, vector<1x16x128xf32>,
    return
  }
  func.func @transform_0(%arg0: i32) -> (i32, i32, i32) {
    %c0_i32 = arith.constant 0 : i32
    %c0_i32_0 = arith.constant 0 : i32
    %c0_i32_1 = arith.constant 0 : i32
    return %arg0, %c0_i32, %c0_i32_0 : i32, i32, i32
  }
  func.func @transform_1(%arg0: i32) -> (i32, i32, i32) {
    %c0_i32 = arith.constant 0 : i32
    %c0_i32_0 = arith.constant 0 : i32
    %c0_i32_1 = arith.constant 0 : i32
    return %arg0, %c0_i32, %c0_i32_0 : i32, i32, i32
  }
  func.func @transform_2(%arg0: i32) -> (i32, i32) {
    %c0_i32 = arith.constant 0 : i32
    %c0_i32_0 = arith.constant 0 : i32
    %c0_i32_1 = arith.constant 0 : i32
    return %c0_i32, %c0_i32_0 : i32, i32
  }
  func.func @transform_3(%arg0: i32) -> (i32, i32) {
    %c0_i32 = arith.constant 0 : i32
    %c0_i32_0 = arith.constant 0 : i32
    %c0_i32_1 = arith.constant 0 : i32
    return %c0_i32, %c0_i32_0 : i32, i32
  }
  func.func @transform_4(%arg0: i32) -> (i32, i32, i32) {
    %c0_i32 = arith.constant 0 : i32
    %c0_i32_0 = arith.constant 0 : i32
    %c0_i32_1 = arith.constant 0 : i32
    return %arg0, %c0_i32, %c0_i32_0 : i32, i32, i32
  }
}

</mosaic_0001>

<bundles_post_ra>
// kernel: tile.13
= control target key start
LH: loop header
LB: loop body
LE: loop exit
PB: predicated region body
PF: predicated region fallthrough
CT: control target
= control target key end

     0   :  { %s28_s0 = inlined_call_operand.vmem [shape: f32[8], index: 0, kind: input, shape index: {}]   ;;  %s29_s1 = inlined_call_operand.vmem [shape: f32[16,8], index: 1, kind: output, shape index: {}]  }
   0x1   :  { %v4_v0 = vld [vmem:[%s28_s0] ss:$0 sm:$0xff] }
   0x2   :  { %5 = vst [vmem:[%s29_s1] sm:$0xff] %v4_v0 }
   0x3   :  { %8 = vst [vmem:[%s29_s1 + $0x8] sm:$0xff] %v4_v0 }

// kernel: tile.14
= control target key start
LH: loop header
LB: loop body
LE: loop exit
PB: predicated region body
PF: predicated region fallthrough
CT: control target
= control target key end

     0   :  { %s131_s10 = smov 120   ;;  %s132_s11 = smov 104   ;;  %vm3_vm0 = vcmask 64512   ;;  %vm9_vm1 = vcmask 1048512   ;;  %vm15_vm2 = vcmask 982912   ;;  %vm21_vm3 = vcmask 917312   ;;  %s207_s0 = inlined_call_operand.vmem [shape: f32[16,8], index: 0, kind: input, shape index: {}]   ;;  %s208_s1 = inlined_call_operand.vmem [shape: f32[1,128], index: 1, kind: output, shape index: {}]  }
   0x1   :  { %v101_v0 = vld [vmem:[%s207_s0 + $0xf] sm:$0x1]   ;;  %v103_v1 = vld [vmem:[%s207_s0 + $0xd] sm:$0x1]   ;;  %v105_v2 = vld [vmem:[%s207_s0 + $0xb] sm:$0x1]  }
   0x2   :  { %7 = vrot.lane.b32.xlu0 %v101_v0, %s131_s10  ;;  %19 = vrot.lane.b32.xlu1 %v103_v1, %s132_s11  ;;  %s133_s14 = smov 88   ;;  %v102_v3 = vld [vmem:[%s207_s0 + $0xe] sm:$0x1]   ;;  %v104_v4 = vld [vmem:[%s207_s0 + $0xc] sm:$0x1]   ;;  %s134_s19 = smov 112  }
   0x3   :  { %31 = vrot.lane.b32.xlu2 %v105_v2, %s133_s14  ;;  %s135_s20 = smov 96   ;;  %v106_v5 = vld [vmem:[%s207_s0 + $0xa] sm:$0x1]   ;;  %s136_s23 = smov 80   ;;  %v107_v6 = vld [vmem:[%s207_s0 + $0x9] sm:$0x1]  }
   0x4   :  { %v108_v7 = vld [vmem:[%s207_s0 + $0x8] sm:$0x1]   ;;  %s137_s28 = smov 72   ;;  %s138_s29 = smov 64   ;;  %v109_v8 = vld [vmem:[%s207_s0 + $0x7] sm:$0x1]  }
   0x5   :  { %s139_s3 = smov 56   ;;  %v110_v9 = vld [vmem:[%s207_s0 + $0x6] sm:$0x1]   ;;  %v111_v10 = vld [vmem:[%s207_s0 + $0x5] sm:$0x1]   ;;  %s140_s8 = smov 48  }
   0x6   :  { %s141_s9 = smov 40   ;;  %v112_v11 = vld [vmem:[%s207_s0 + $0x4] sm:$0x1]   ;;  %s142_s12 = smov 32   ;;  %v113_v12 = vld [vmem:[%s207_s0 + $0x3] sm:$0x1]  }
   0x7   :  { %v114_v13 = vld [vmem:[%s207_s0 + $0x2] sm:$0x1]   ;;  %s143_s17 = smov 24   ;;  %s144_s18 = smov 16   ;;  %v115_v14 = vld [vmem:[%s207_s0 + $0x1] sm:$0x1]  }
   0x8   :  { %s145_s21 = smov 8   ;;  %v2_v15 = vld [vmem:[%s207_s0] sm:$0x1]   ;;  %vm27_vm4 = vcmask 851712   ;;  %vm33_vm5 = vcmask 786112   ;;  %vm39_vm6 = vcmask 720512  }
   0x9   :  { %4 = vst.msk [vmem:[#allocation0] sm:$0x1] %vm3_vm0, %v2_v15   ;;  %vm45_vm7 = vcmask 654912   ;;  %vm51_vm8 = vcmask 589312   ;;  %vm57_vm9 = vcmask 523712   ;;  %vm63_vm10 = vcmask 458112  }
   0xa   :  { %13 = vrot.lane.b32.xlu0 %v102_v3, %s134_s19  ;;  %25 = vrot.lane.b32.xlu1 %v104_v4, %s135_s20  ;;  %vm69_vm11 = vcmask 392512   ;;  %vm75_vm12 = vcmask 326912   ;;  %vm81_vm13 = vcmask 261312   ;;  %vm87_vm14 = vcmask 195712  }
   0xb   :  { %37 = vrot.lane.b32.xlu2 %v106_v5, %s136_s23  ;;  %vm93_vm15 = vcmask 130112  }
  0x12   :  { %43 = vrot.lane.b32.xlu0 %v107_v6, %s137_s28  ;;  %49 = vrot.lane.b32.xlu1 %v108_v7, %s138_s29 }
  0x13   :  { %55 = vrot.lane.b32.xlu2 %v109_v8, %s139_s3 }
  0x1a   :  { %61 = vrot.lane.b32.xlu0 %v110_v9, %s140_s8  ;;  %67 = vrot.lane.b32.xlu1 %v111_v10, %s141_s9 }
  0x1b   :  { %73 = vrot.lane.b32.xlu2 %v112_v11, %s142_s12 }
  0x22   :  { %79 = vrot.lane.b32.xlu0 %v113_v12, %s143_s17  ;;  %85 = vrot.lane.b32.xlu1 %v114_v13, %s144_s18 }
  0x23   :  { %91 = vrot.lane.b32.xlu2 %v115_v14, %s145_s21 }
  0x5d   :  { %v32_v16 = vpop.permute.xlu2 %31  }
  0x65   :  { %v38_v17 = vpop.permute.xlu2 %37  }
  0x6d   :  { %v56_v18 = vpop.permute.xlu2 %55  }
  0x74   :  { %v8_v19 = vpop.permute.xlu0 %7   ;;  %v20_v20 = vpop.permute.xlu1 %19  }
  0x75   :  { %10 = vst.msk [vmem:[#allocation0] sm:$0x1] %vm9_vm1, %v8_v19   ;;  %v74_v21 = vpop.permute.xlu2 %73  }
  0x7c   :  { %v14_v22 = vpop.permute.xlu0 %13   ;;  %v26_v23 = vpop.permute.xlu1 %25  }
  0x7d   :  { %16 = vst.msk [vmem:[#allocation0] sm:$0x1] %vm15_vm2, %v14_v22   ;;  %v92_v24 = vpop.permute.xlu2 %91  }
  0x7e   :  { %22 = vst.msk [vmem:[#allocation0] sm:$0x1] %vm21_vm3, %v20_v20  }
  0x7f   :  { %28 = vst.msk [vmem:[#allocation0] sm:$0x1] %vm27_vm4, %v26_v23  }
  0x80   :  { %34 = vst.msk [vmem:[#allocation0] sm:$0x1] %vm33_vm5, %v32_v16  }
  0x81   :  { %40 = vst.msk [vmem:[#allocation0] sm:$0x1] %vm39_vm6, %v38_v17  }
  0x84   :  { %v44_v25 = vpop.permute.xlu0 %43   ;;  %v50_v26 = vpop.permute.xlu1 %49  }
  0x85   :  { %46 = vst.msk [vmem:[#allocation0] sm:$0x1] %vm45_vm7, %v44_v25  }
  0x86   :  { %52 = vst.msk [vmem:[#allocation0] sm:$0x1] %vm51_vm8, %v50_v26  }
  0x87   :  { %58 = vst.msk [vmem:[#allocation0] sm:$0x1] %vm57_vm9, %v56_v18  }
  0x8c   :  { %v62_v27 = vpop.permute.xlu0 %61   ;;  %v68_v28 = vpop.permute.xlu1 %67  }
  0x8d   :  { %64 = vst.msk [vmem:[#allocation0] sm:$0x1] %vm63_vm10, %v62_v27  }
  0x8e   :  { %70 = vst.msk [vmem:[#allocation0] sm:$0x1] %vm69_vm11, %v68_v28  }
  0x8f   :  { %76 = vst.msk [vmem:[#allocation0] sm:$0x1] %vm75_vm12, %v74_v21  }
  0x94   :  { %v80_v29 = vpop.permute.xlu0 %79   ;;  %v86_v30 = vpop.permute.xlu1 %85  }
  0x95   :  { %82 = vst.msk [vmem:[#allocation0] sm:$0x1] %vm81_vm13, %v80_v29  }
  0x96   :  { %88 = vst.msk [vmem:[#allocation0] sm:$0x1] %vm87_vm14, %v86_v30  }
  0x97   :  { %94 = vst.msk [vmem:[#allocation0] sm:$0x1] %vm93_vm15, %v92_v24  }
  0x9e   :  { %v97_v31 = vld [vmem:[#allocation0] sm:$0x1] }
  0x9f   :  { %100 = vst [vmem:[%s208_s1] sm:$0x1] %v97_v31 }

// kernel: basic_block_forward.5
= control target key start
LH: loop header
LB: loop body
LE: loop exit
PB: predicated region body
PF: predicated region fallthrough
CT: control target
= control target key end

     0   :  { %s366_s15 = smov 0   ;;  %s392_s0 = inlined_call_operand.vmem [shape: f32[2,16,128], index: 0, kind: input, shape index: {}]   ;;  %s393_s1 = inlined_call_operand.vmem [shape: f32[2,16,128], index: 1, kind: input, shape index: {}]   ;;  %s394_s2 = inlined_call_operand.vmem [shape: f32[1,128], index: 2, kind: input, shape index: {}]   ;;  %s395_s3 = inlined_call_operand.vmem [shape: f32[1,128], index: 3, kind: input, shape index: {}]   ;;  %s396_s4 = inlined_call_operand.vmem [shape: f32[2,16,128], index: 4, kind: output, shape index: {}]  }
   0x1 LB: > { %s307_s16 = sadd.s32 4294967295, %s339_s15   ;;  %p311_p0 = scmp.ge.s32.totalorder %s339_s15, 1  ;;  %s339_s15 = sphi %s366_s15, %s14_s15  }
   0x2   : > { %p172_p1 = scmp.lt.s32.totalorder %s339_s15, 3 }
   0x4   : > { %p173_p2 = pnand %p311_p0, %p172_p1 }
   0x5   : > { %p203_p3 = scmp.lt.s32.totalorder (!%p173_p2), %s307_s16, 1 }
   0x6   : > { %176 = sbr.rel (%p173_p2) target bundleno = 25 (0x19), region = 36 }
   0xb   : > { %s398_s16 = smov (!%p203_p3, %s307_s16), 1  ;;  %v331_v0 = vld [vmem:[%s394_s2] ss:$0 sm:$0xff] }
   0xc   : > { %s320_s19 = sshll.u32 %s398_s16, 4  ;;  %v332_v1 = vld [vmem:[%s395_s3] ss:$0 sm:$0xff] }
   0xd   : > { %s207_s22 = scalar_lea.vmem %s392_s0, %s320_s19  ;;  %s212_s25 = scalar_lea.vmem %s393_s1, %s320_s19 }
   0xe   : > { %v218_v2 = vld [vmem:[%s207_s22] sm:$0xff]  ;;  %v219_v3 = vld [vmem:[%s207_s22 + $0x8] sm:$0xff]  ;;  %s217_s30 = scalar_lea.vmem %s396_s4, %s320_s19 }
   0xf   : > { %v224_v4 = vmul.f32 %v331_v0, %v218_v2  ;;  %v225_v5 = vmul.f32 %v331_v0, %v219_v3  ;;  %v232_v6 = vld [vmem:[%s212_s25] sm:$0xff]  ;;  %v233_v7 = vld [vmem:[%s212_s25 + $0x8] sm:$0xff] }
  0x11   : > { %v230_v8 = vadd.f32 %v332_v1, %v224_v4  ;;  %v231_v9 = vadd.f32 %v332_v1, %v225_v5 }
  0x13   : > { %v234_v10 = vadd.f32 %v232_v6, %v230_v8  ;;  %v235_v11 = vadd.f32 %v233_v7, %v231_v9 }
  0x15   : > { %v236_v12 = vmax.f32 %v234_v10, 0.0  ;;  %v237_v13 = vmax.f32 %v235_v11, 0.0 }
  0x17   : > { %238 = vst [vmem:[%s217_s30] sm:$0xff] %v236_v12 }
  0x18   : > { %239 = vst [vmem:[%s217_s30 + $0x8] sm:$0xff] %v237_v13 }
  0x19 PF: > { %s14_s15 = sadd.s32 1, %s339_s15  }
  0x1a   : > { %p11_p4 = scmp.ge.s32.totalorder %s14_s15, 4  }
  0x1c   :  { %13 = sbr.rel (!%p11_p4) target bundleno = 1 (0x1), region = 69 }

// kernel: basic_block_forward.3
= control target key start
LH: loop header
LB: loop body
LE: loop exit
PB: predicated region body
PF: predicated region fallthrough
CT: control target
= control target key end

     0   :  { %s4580_s18 = smov 0   ;;  %s6594_s0 = inlined_call_operand.vmem [shape: f32[2,16,16,8], index: 0, kind: input, shape index: {}]   ;;  %s6595_s1 = inlined_call_operand.vmem [shape: f32[1,1,8], index: 1, kind: input, shape index: {}]   ;;  %s6596_s2 = inlined_call_operand.vmem [shape: f32[1,1,8], index: 2, kind: input, shape index: {}]   ;;  %s6597_s3 = inlined_call_operand.vmem [shape: bf16[72,8], index: 3, kind: input, shape index: {}]   ;;  %s6598_s4 = inlined_call_operand.vmem [shape: f32[2,16,16,8], index: 4, kind: output, shape index: {0}]   ;;  %s6599_s5 = inlined_call_operand.vmem [shape: f32[2,2,8], index: 5, kind: output, shape index: {1}]  }
   0x1 LB: > { %s4149_s1 = sadd.s32 4294967295, %s4539_s18   ;;  %p4153_p0 = scmp.ge.s32.totalorder %s4539_s18, 1  ;;  %s4539_s18 = sphi %s4580_s18, %s16_s18  }
   0x2   : > { %p190_p1 = scmp.lt.s32.totalorder %s4539_s18, 3 }
   0x4   : > { %p191_p2 = pnand %p4153_p0, %p190_p1 }
   0x6   : > { %194 = sbr.rel (%p191_p2) target bundleno = 745 (0x2e9), region = 36 }
   0xb   : > { %vm301_vm0 = vcmask 60416   ;;  %vm304_vm1 = vcmask 57344   ;;  %vm312_vm2 = vsmask.f32 256  ;;  %v4541_v0 = vmov 0   ;;  %p222_p3 = scmp.lt.s32.totalorder %s4149_s1, 1 }
   0xc   : > { %302 = vst.msk [vmem:[#allocation2] sm:$0xf] %vm301_vm0, %v4541_v0  ;;  %vm4591_vm3 = vmand %vm304_vm1, %vm312_vm2  ;;  %vm362_vm4 = vsmask.f32 7938  ;;  %vm896_vm6 = vsmask.f32 3328 }
   0xd   : > { %303 = vst.msk [vmem:[#allocation2 + $0x4] sm:$0xf] %vm301_vm0, %v4541_v0  ;;  %vm4598_vm5 = vmand %vm304_vm1, %vm362_vm4  ;;  %v323_v3 = vld [vmem:[#allocation2 + $0x30] sm:$0x1]  ;;  %v373_v4 = vld [vmem:[#allocation2 + $0x38] sm:$0x1] }
   0xe   : > { %305 = vst.msk [vmem:[#allocation2 + $0x8] sm:$0x1] %vm304_vm1, %v4541_v0  ;;  %vm897_vm7 = vsmask.f32 7440  ;;  %s6617_s1 = smov (!%p222_p3, %s4149_s1), 1  ;;  %v324_v5 = vsel %vm4591_vm3, 0, %v323_v3  ;;  %vm4630_vm9 = vmand %vm301_vm0, %vm362_vm4 }
   0xf   : > { %307 = vst.msk [vmem:[#allocation2 + $0xcc] sm:$0xf] %vm301_vm0, %v4541_v0  ;;  %v374_v6 = vsel %vm4598_vm5, 0, %v373_v4  ;;  %v317_v7 = vld [vmem:[#allocation2 + $0x18] sm:$0x1]  ;;  %s4433_s2 = sshll.u32 %s6617_s1, 8  ;;  %vm4636_vm10 = vmor %vm896_vm6, %vm897_vm7 }
  0x10   : > { %308 = vst.msk [vmem:[#allocation2 + $0xd0] sm:$0xf] %vm301_vm0, %v4541_v0  ;;  %v367_v8 = vld [vmem:[#allocation2 + $0x20] sm:$0x1]  ;;  %s4618_s21 = scalar_lea.vmem %s6594_s0, %s4433_s2  ;;  %vm412_vm8 = vsmask.f32 4368  ;;  %s6314_s17 = scalar_lea.vmem %s6598_s4, %s4433_s2 }
  0x11   : > { %309 = vst.msk [vmem:[#allocation2 + $0xd4] sm:$0x1] %vm304_vm1, %v4541_v0  ;;  %v318_v9 = vsel %vm4591_vm3, 0, %v317_v7  ;;  %v368_v10 = vsel %vm4598_vm5, 0, %v367_v8  ;;  %v243_v12 = vld [vmem:[%s4618_s21 + $0x30] sm:$0xff]  ;;  %v244_v13 = vld [vmem:[%s4618_s21 + $0x38] sm:$0xff]  ;;  %vm4642_vm11 = vmor %vm312_vm2, %vm412_vm8 }
  0x12   : > { %325 = vst [vmem:[#allocation2 + $0x30] sm:$0x1] %v324_v5  ;;  %v275_v17 = vpack.c.bf16 %v243_v12, %v243_v12  ;;  %v276_v18 = vpack.c.bf16 %v244_v13, %v244_v13  ;;  %v239_v19 = vld [vmem:[%s4618_s21 + $0x10] sm:$0xff]  ;;  %v240_v20 = vld [vmem:[%s4618_s21 + $0x18] sm:$0xff]  ;;  %v314_v55 = vld [vmem:[#allocation2 + $0xc] sm:$0x1] }
  0x13   : > { %v848_v11 = vld [vmem:[#allocation2] sm:$0xf]  ;;  %375 = vst [vmem:[#allocation2 + $0x38] sm:$0x1] %v374_v6  ;;  %v271_v24 = vpack.c.bf16 %v239_v19, %v239_v19  ;;  %v272_v25 = vpack.c.bf16 %v240_v20, %v240_v20  ;;  %v238_v61 = vld [vmem:[%s4618_s21 + $0x8] sm:$0xff]  ;;  %s4542_s22 = smov 8  }
  0x14   : > { %v849_v14 = vld [vmem:[#allocation2 + $0x4] sm:$0xf]  ;;  %v900_v15 = vshrl.u32 %v848_v11, 16  ;;  %v903_v16 = vshll.u32 %v848_v11, 16  ;;  %319 = vst [vmem:[#allocation2 + $0x18] sm:$0x1] %v318_v9 }
  0x15   : > { %v880_v21 = vld [vmem:[#allocation2 + $0x8] sm:$0x1]  ;;  %v909_v22 = vshll.u32 %v849_v14, 16  ;;  %v913_v23 = vshrl.u32 %v849_v14, 16  ;;  %v466_v29 = vshrl.u32 %v275_v17, 16  ;;  %v469_v32 = vshll.u32 %v275_v17, 16 }
  0x16   : > { %v902_v26 = vrot.slane %v900_v15, 4  ;;  %v905_v27 = vrot.slane %v903_v16, 5  ;;  %v919_v28 = vshll.u32 %v880_v21, 16  ;;  %369 = vst [vmem:[#allocation2 + $0x20] sm:$0x1] %v368_v10  ;;  %v474_v33 = vshrl.u32 %v276_v18, 16 }
  0x17   : > { %v911_v30 = vrot.slane %v909_v22, 5  ;;  %v915_v31 = vrot.slane %v913_v23, 4  ;;  %v468_v37 = vrot.slane %v466_v29, 7  ;;  %v477_v38 = vshll.u32 %v276_v18, 16  ;;  %v237_v60 = vld [vmem:[%s4618_s21] sm:$0xff]  ;;  %v246_v7 = vld [vmem:[%s4618_s21 + $0x48] sm:$0xff] }
  0x18   : > { %v906_v35 = vor.u32 %v905_v27, %v902_v26  ;;  %v921_v36 = vrot.slane %v919_v28, 5  ;;  %v476_v41 = vrot.slane %v474_v33, 7  ;;  %v432_v43 = vshrl.u32 %v271_v24, 16  ;;  %v364_v62 = vld [vmem:[#allocation2 + $0x14] sm:$0x1]  ;;  %v245_v6 = vld [vmem:[%s4618_s21 + $0x40] sm:$0xff] }
  0x19   : > { %v916_v40 = vor.u32 %v915_v31, %v911_v30  ;;  %v757_v42 = vld [vmem:[#allocation2 + $0x30] sm:$0xf]  ;;  %v435_v44 = vshll.u32 %v271_v24, 16  ;;  %v471_v47 = vor.u32 %v469_v32, %v468_v37  ;;  %v472_v48 = vrot.slane %v468_v37, 4  ;;  %v241_v13 = vld [vmem:[%s4618_s21 + $0x20] sm:$0xff]  ;;  %v242_v24 = vld [vmem:[%s4618_s21 + $0x28] sm:$0xff] }
  0x1a   : > { %v907_v45 = vrot.slane %v906_v35, 4  ;;  %v761_v49 = vld [vmem:[#allocation2 + $0x38] sm:$0x1]  ;;  %v440_v50 = vshrl.u32 %v272_v25, 16  ;;  %v479_v52 = vor.u32 %v477_v38, %v476_v41  ;;  %v481_v53 = vrot.slane %v476_v41, 4  ;;  %v247_v29 = vld [vmem:[%s4618_s21 + $0x50] sm:$0xff] }
  0x1b   : > { %v917_v51 = vrot.slane %v916_v40, 4  ;;  %v434_v54 = vrot.slane %v432_v43, 7  ;;  %v758_v57 = vsel %vm4630_vm9, %v471_v47, %v757_v42  ;;  %v443_v59 = vshll.u32 %v272_v25, 16  ;;  %v743_v5 = vld [vmem:[#allocation2 + $0x18] sm:$0xf]  ;;  %s4543_s23 = smov 16  }
  0x1c   : > { %v912_v56 = vsel %vm4636_vm10, %v907_v45, %v911_v30  ;;  %v442_v58 = vrot.slane %v440_v50, 7  ;;  %v480_v3 = vsel %vm4642_vm11, %v472_v48, %v479_v52  ;;  %759 = vst [vmem:[#allocation2 + $0x30] sm:$0xf] %v758_v57  ;;  %v762_v4 = vsel %vm4591_vm3, %v481_v53, %v761_v49  ;;  %v326_v18 = vld [vmem:[#allocation2 + $0x3c] sm:$0x1]  ;;  %s4544_s24 = smov 32  }
  0x1d   : > { %v922_v63 = vsel %vm4636_vm10, %v917_v51, %v921_v36  ;;  %v2743_v0 = vunpack.c.l.b16 %v912_v56  ;;  %760 = vst.msk [vmem:[#allocation2 + $0x34] sm:$0xf] %vm301_vm0, %v480_v3  ;;  %v437_v9 = vor.u32 %v435_v44, %v434_v54  ;;  %v438_v10 = vrot.slane %v434_v54, 4  ;;  %v747_v12 = vld [vmem:[#allocation2 + $0x20] sm:$0x1]  ;;  %s4545_s25 = smov 24  }
  0x1e   : > { %v2744_v8 = vunpack.c.l.b16 %v922_v63  ;;  %v445_v11 = vor.u32 %v443_v59, %v442_v58  ;;  %763 = vst [vmem:[#allocation2 + $0x38] sm:$0x1] %v762_v4  ;;  %v447_v14 = vrot.slane %v442_v58, 4  ;;  %v269_v15 = vpack.c.bf16 %v237_v60, %v237_v60  ;;  %v4670_v23 = vld [vmem:[#allocation2 + $0x44] sm:$0x1]  ;;  %s4546_s26 = smov 56  }
  0x1f   : > { %v270_v16 = vpack.c.bf16 %v238_v61, %v238_v61  ;;  %v315_v17 = vsel %vm4591_vm3, 0, %v314_v55  ;;  %v744_v21 = vsel %vm4630_vm9, %v437_v9, %v743_v5  ;;  %v365_v22 = vsel %vm4598_vm5, 0, %v364_v62  ;;  %s4547_s27 = smov 48   ;;  %s4548_s28 = smov 40  }
  0x20   : > { %v2775_v19 = vpack.c.b16 %v2744_v8, %v2743_v0  ;;  %v446_v20 = vsel %vm4642_vm11, %v438_v10, %v445_v11  ;;  %316 = vst [vmem:[#allocation2 + $0xc] sm:$0x1] %v315_v17  ;;  %v748_v25 = vsel %vm4591_vm3, %v447_v14, %v747_v12  ;;  %v415_v26 = vshrl.u32 %v269_v15, 16  ;;  %v320_v14 = vld [vmem:[#allocation2 + $0x24] sm:$0x1]  ;;  %s4549_s29 = smov 64  }
  0x21   : > { %745 = vst [vmem:[#allocation2 + $0x18] sm:$0xf] %v744_v21  ;;  %v418_v27 = vshll.u32 %v269_v15, 16  ;;  %v423_v28 = vshrl.u32 %v270_v16, 16  ;;  %v426_v30 = vshll.u32 %v270_v16, 16  ;;  %v277_v31 = vpack.c.bf16 %v245_v6, %v245_v6  ;;  %s4158_s2 = sshll.u32 %s6617_s1, 1 }
  0x22   : > { %2791 = vrot.lane.b32.xlu0 %v2775_v19, %s4542_s22  ;;  %746 = vst.msk [vmem:[#allocation2 + $0x1c] sm:$0xf] %vm301_vm0, %v446_v20  ;;  %v4678_v32 = vpack.c.bf16 %v246_v7, %v246_v7  ;;  %v327_v33 = vsel %vm4591_vm3, 0, %v326_v18  ;;  %v417_v35 = vrot.slane %v415_v26, 7  ;;  %v377_v37 = vsel %vm4598_vm5, 0, %v4670_v23 }
  0x23   : > { %749 = vst [vmem:[#allocation2 + $0x20] sm:$0x1] %v748_v25  ;;  %v425_v36 = vrot.slane %v423_v28, 7  ;;  %v4685_v38 = vpack.c.bf16 %v241_v13, %v241_v13  ;;  %v856_v40 = vld [vmem:[#allocation2 + $0x30] sm:$0xf]  ;;  %v483_v41 = vshrl.u32 %v277_v31, 16  ;;  %v4687_v43 = vpack.c.bf16 %v242_v24, %v242_v24 }
  0x24   : > { %366 = vst [vmem:[#allocation2 + $0x14] sm:$0x1] %v365_v22  ;;  %v486_v42 = vshll.u32 %v277_v31, 16  ;;  %v4689_v44 = vpack.c.bf16 %v247_v29, %v247_v29  ;;  %v857_v45 = vld [vmem:[#allocation2 + $0x34] sm:$0xf]  ;;  %v996_v47 = vshrl.u32 %v856_v40, 16  ;;  %v420_v49 = vor.u32 %v418_v27, %v417_v35 }
  0x25   : > { %v999_v48 = vshll.u32 %v856_v40, 16  ;;  %v421_v50 = vrot.slane %v417_v35, 4  ;;  %v884_v51 = vld [vmem:[#allocation2 + $0x38] sm:$0x1]  ;;  %v1005_v52 = vshll.u32 %v857_v45, 16  ;;  %v1009_v53 = vshrl.u32 %v857_v45, 16 }
  0x26   : > { %v428_v54 = vor.u32 %v426_v30, %v425_v36  ;;  %v430_v55 = vrot.slane %v425_v36, 4  ;;  %v998_v56 = vrot.slane %v996_v47, 4  ;;  %v1015_v58 = vshll.u32 %v884_v51, 16  ;;  %328 = vst [vmem:[#allocation2 + $0x3c] sm:$0x1] %v327_v33 }
  0x27   : > { %v1001_v57 = vrot.slane %v999_v48, 5  ;;  %v736_v59 = vld [vmem:[#allocation2 + $0xc] sm:$0xf]  ;;  %v4691_v60 = vrot.slane %v483_v41, 7  ;;  %v1007_v61 = vrot.slane %v1005_v52, 5  ;;  %v1011_v62 = vrot.slane %v1009_v53, 4 }
  0x28   : > { %v852_v63 = vld [vmem:[#allocation2 + $0x18] sm:$0xf]  ;;  %v429_v0 = vsel %vm4642_vm11, %v421_v50, %v428_v54  ;;  %v737_v3 = vsel %vm4630_vm9, %v420_v49, %v736_v59  ;;  %v1017_v5 = vrot.slane %v1015_v58, 5  ;;  %378 = vst [vmem:[#allocation2 + $0x44] sm:$0x1] %v377_v37  ;;  %v491_v33 = vshrl.u32 %v4678_v32, 16 }
  0x29   : > { %v1002_v4 = vor.u32 %v1001_v57, %v998_v56  ;;  %v853_v6 = vld [vmem:[#allocation2 + $0x1c] sm:$0xf]  ;;  %v948_v7 = vshrl.u32 %v852_v63, 16  ;;  %v951_v8 = vshll.u32 %v852_v63, 16  ;;  %v1012_v9 = vor.u32 %v1011_v62, %v1007_v61  ;;  %738 = vst [vmem:[#allocation2 + $0xc] sm:$0xf] %v737_v3 }
  0x2a   : > { %v882_v10 = vld [vmem:[#allocation2 + $0x20] sm:$0x1]  ;;  %v957_v11 = vshll.u32 %v853_v6, 16  ;;  %v961_v12 = vshrl.u32 %v853_v6, 16  ;;  %v488_v13 = vor.u32 %v486_v42, %v4691_v60  ;;  %739 = vst.msk [vmem:[#allocation2 + $0x10] sm:$0xf] %vm301_vm0, %v429_v0 }
  0x2b   : > { %v1003_v15 = vrot.slane %v1002_v4, 4  ;;  %v950_v16 = vrot.slane %v948_v7, 4  ;;  %v953_v17 = vrot.slane %v951_v8, 5  ;;  %v967_v18 = vshll.u32 %v882_v10, 16  ;;  %v740_v22 = vld [vmem:[#allocation2 + $0x14] sm:$0x1] }
  0x2c   : > { %v1013_v19 = vrot.slane %v1012_v9, 4  ;;  %v959_v20 = vrot.slane %v957_v11, 5  ;;  %v963_v21 = vrot.slane %v961_v12, 4  ;;  %v489_v23 = vrot.slane %v4691_v60, 4  ;;  %v370_v28 = vld [vmem:[#allocation2 + $0x2c] sm:$0x1] }
  0x2d   : > { %v1008_v24 = vsel %vm4636_vm10, %v1003_v15, %v1007_v61  ;;  %v954_v25 = vor.u32 %v953_v17, %v950_v16  ;;  %v969_v26 = vrot.slane %v967_v18, 5  ;;  %v741_v27 = vsel %vm4591_vm3, %v430_v55, %v740_v22  ;;  %v764_v41 = vld [vmem:[#allocation2 + $0x3c] sm:$0xf]  ;;  %v329_v10 = vld [vmem:[#allocation2 + $0x48] sm:$0x1]  ;;  %v251_v11 = vld [vmem:[%s4618_s21 + $0x70] sm:$0xff] }
  0x2e   : > { %v1018_v29 = vsel %vm4636_vm10, %v1013_v19, %v1017_v5  ;;  %v2751_v30 = vunpack.c.l.b16 %v1008_v24  ;;  %v964_v31 = vor.u32 %v963_v21, %v959_v20  ;;  %742 = vst [vmem:[#allocation2 + $0x14] sm:$0x1] %v741_v27  ;;  %v494_v40 = vshll.u32 %v4678_v32, 16  ;;  %v248_v9 = vld [vmem:[%s4618_s21 + $0x58] sm:$0xff]  ;;  %v379_v16 = vld [vmem:[#allocation2 + $0x50] sm:$0x1] }
  0x2f   : > { %v2752_v35 = vunpack.c.l.b16 %v1018_v29  ;;  %v955_v36 = vrot.slane %v954_v25, 4  ;;  %v321_v42 = vsel %vm4591_vm3, 0, %v320_v14  ;;  %v493_v47 = vrot.slane %v491_v33, 7 }
  0x30   : > { %v965_v45 = vrot.slane %v964_v31, 4  ;;  %v765_v37 = vsel %vm4630_vm9, %v488_v13, %v764_v41  ;;  %322 = vst [vmem:[#allocation2 + $0x24] sm:$0x1] %v321_v42  ;;  %v371_v48 = vsel %vm4598_vm5, 0, %v370_v28  ;;  %v850_v51 = vld [vmem:[#allocation2 + $0xc] sm:$0xf]  ;;  %v280_v25 = vpack.c.bf16 %v248_v9, %v248_v9 }
  0x31   : > { %v2779_v49 = vpack.c.b16 %v2752_v35, %v2751_v30  ;;  %v960_v50 = vsel %vm4636_vm10, %v955_v36, %v959_v20  ;;  %766 = vst [vmem:[#allocation2 + $0x3c] sm:$0xf] %v765_v37  ;;  %v449_v32 = vshrl.u32 %v4685_v38, 16  ;;  %v452_v52 = vshll.u32 %v4685_v38, 16  ;;  %v851_v55 = vld [vmem:[#allocation2 + $0x10] sm:$0xf] }
  0x32   : > { %v970_v53 = vsel %vm4636_vm10, %v965_v45, %v969_v26  ;;  %v2747_v54 = vunpack.c.l.b16 %v960_v50  ;;  %v924_v56 = vshrl.u32 %v850_v51, 16  ;;  %v927_v57 = vshll.u32 %v850_v51, 16  ;;  %372 = vst [vmem:[#allocation2 + $0x2c] sm:$0x1] %v371_v48  ;;  %v768_v38 = vld [vmem:[#allocation2 + $0x44] sm:$0x1] }
  0x33   : > { %2799 = vrot.lane.b32.xlu2 %v2779_v49, %s4542_s22  ;;  %v2748_v58 = vunpack.c.l.b16 %v970_v53  ;;  %v933_v59 = vshll.u32 %v851_v55, 16  ;;  %v937_v60 = vshrl.u32 %v851_v55, 16  ;;  %v496_v61 = vor.u32 %v494_v40, %v493_v47  ;;  %v252_v36 = vld [vmem:[%s4618_s21 + $0x78] sm:$0xff]  ;;  %v335_v51 = vld [vmem:[#allocation2 + $0x60] sm:$0x1] }
  0x34   : > { %v926_v62 = vrot.slane %v924_v56, 4  ;;  %v929_v63 = vrot.slane %v927_v57, 5  ;;  %v498_v0 = vrot.slane %v493_v47, 4  ;;  %v451_v3 = vrot.slane %v449_v32, 7 }
  0x35   : > { %v2777_v4 = vpack.c.b16 %v2748_v58, %v2747_v54  ;;  %v881_v5 = vld [vmem:[#allocation2 + $0x14] sm:$0x1]  ;;  %v935_v6 = vrot.slane %v933_v59, 5  ;;  %v939_v7 = vrot.slane %v937_v60, 4  ;;  %v497_v8 = vsel %vm4642_vm11, %v489_v23, %v496_v61  ;;  %v385_v61 = vld [vmem:[#allocation2 + $0x68] sm:$0x1] }
  0x36   : > { %v930_v12 = vor.u32 %v929_v63, %v926_v62  ;;  %v943_v13 = vshll.u32 %v881_v5, 16  ;;  %767 = vst.msk [vmem:[#allocation2 + $0x40] sm:$0xf] %vm301_vm0, %v497_v8  ;;  %v769_v14 = vsel %vm4591_vm3, %v498_v0, %v768_v38  ;;  %v454_v15 = vor.u32 %v452_v52, %v451_v3 }
  0x37   : > { %2795 = vrot.lane.b32.xlu1 %v2777_v4, %s4542_s22  ;;  %v940_v17 = vor.u32 %v939_v7, %v935_v6  ;;  %770 = vst [vmem:[#allocation2 + $0x44] sm:$0x1] %v769_v14  ;;  %v455_v18 = vrot.slane %v451_v3, 4  ;;  %v457_v19 = vshrl.u32 %v4687_v43, 16  ;;  %v460_v20 = vshll.u32 %v4687_v43, 16 }
  0x38   : > { %v931_v21 = vrot.slane %v930_v12, 4  ;;  %v945_v22 = vrot.slane %v943_v13, 5  ;;  %v858_v23 = vld [vmem:[#allocation2 + $0x3c] sm:$0xf]  ;;  %v750_v24 = vld [vmem:[#allocation2 + $0x24] sm:$0xf]  ;;  %v4731_v26 = vpack.c.bf16 %v251_v11, %v251_v11  ;;  %v4746_v55 = vpack.c.bf16 %v252_v36, %v252_v36 }
  0x39   : > { %v941_v27 = vrot.slane %v940_v17, 4  ;;  %v1020_v28 = vshrl.u32 %v858_v23, 16  ;;  %v1023_v29 = vshll.u32 %v858_v23, 16  ;;  %v459_v30 = vrot.slane %v457_v19, 7  ;;  %v754_v49 = vld [vmem:[#allocation2 + $0x2c] sm:$0x1] }
  0x3a   : > { %v936_v31 = vsel %vm4636_vm10, %v931_v21, %v935_v6  ;;  %v751_v33 = vsel %vm4630_vm9, %v454_v15, %v750_v24  ;;  %v330_v43 = vsel %vm4591_vm3, 0, %v329_v10  ;;  %v380_v35 = vsel %vm4598_vm5, 0, %v379_v16 }
  0x3b   : > { %v946_v40 = vsel %vm4636_vm10, %v941_v27, %v945_v22  ;;  %v2745_v41 = vunpack.c.l.b16 %v936_v31  ;;  %v1022_v42 = vrot.slane %v1020_v28, 4  ;;  %v1025_v45 = vrot.slane %v1023_v29, 5  ;;  %752 = vst [vmem:[#allocation2 + $0x24] sm:$0xf] %v751_v33 }
  0x3c   : > { %v2746_v47 = vunpack.c.l.b16 %v946_v40  ;;  %v462_v37 = vor.u32 %v460_v20, %v459_v30  ;;  %v464_v48 = vrot.slane %v459_v30, 4  ;;  %331 = vst [vmem:[#allocation2 + $0x48] sm:$0x1] %v330_v43  ;;  %v500_v50 = vshrl.u32 %v4689_v44, 16  ;;  %v249_v20 = vld [vmem:[%s4618_s21 + $0x60] sm:$0xff] }
  0x3d   : > { %v859_v32 = vld [vmem:[#allocation2 + $0x40] sm:$0xf]  ;;  %v1026_v52 = vor.u32 %v1025_v45, %v1022_v42  ;;  %381 = vst [vmem:[#allocation2 + $0x50] sm:$0x1] %v380_v35  ;;  %v503_v53 = vshll.u32 %v4689_v44, 16  ;;  %v508_v54 = vshrl.u32 %v280_v25, 16  ;;  %v4773_v36 = vpack.c.bf16 %v249_v20, %v249_v20 }
  0x3e   : > { %v2776_v56 = vpack.c.b16 %v2746_v47, %v2745_v41  ;;  %v885_v57 = vld [vmem:[#allocation2 + $0x44] sm:$0x1]  ;;  %v1029_v58 = vshll.u32 %v859_v32, 16  ;;  %v1033_v59 = vshrl.u32 %v859_v32, 16  ;;  %v463_v60 = vsel %vm4642_vm11, %v455_v18, %v462_v37  ;;  %v332_v40 = vld [vmem:[#allocation2 + $0x54] sm:$0x1] }
  0x3f   : > { %v1027_v62 = vrot.slane %v1026_v52, 4  ;;  %v1039_v63 = vshll.u32 %v885_v57, 16  ;;  %753 = vst.msk [vmem:[#allocation2 + $0x28] sm:$0xf] %vm301_vm0, %v463_v60  ;;  %v755_v0 = vsel %vm4591_vm3, %v464_v48, %v754_v49  ;;  %v502_v38 = vrot.slane %v500_v50, 7 }
  0x40   : > { %2793 = vrot.lane.b32.xlu0 %v2776_v56, %s4542_s22  ;;  %v1031_v44 = vrot.slane %v1029_v58, 5  ;;  %v1035_v3 = vrot.slane %v1033_v59, 4  ;;  %756 = vst [vmem:[#allocation2 + $0x2c] sm:$0x1] %v755_v0  ;;  %v510_v4 = vrot.slane %v508_v54, 7  ;;  %v511_v5 = vshll.u32 %v280_v25, 16 }
  0x41   : > { %v1041_v6 = vrot.slane %v1039_v63, 5  ;;  %v505_v7 = vor.u32 %v503_v53, %v502_v38  ;;  %v506_v8 = vrot.slane %v502_v38, 4  ;;  %v336_v9 = vsel %vm4591_vm3, 0, %v335_v51  ;;  %v250_v51 = vld [vmem:[%s4618_s21 + $0x68] sm:$0xff]  ;;  %v382_v32 = vld [vmem:[#allocation2 + $0x5c] sm:$0x1] }
  0x42   : > { %v1032_v10 = vsel %vm4636_vm10, %v1027_v62, %v1031_v44  ;;  %v1036_v11 = vor.u32 %v1035_v3, %v1031_v44  ;;  %v854_v12 = vld [vmem:[#allocation2 + $0x24] sm:$0xf]  ;;  %v513_v13 = vor.u32 %v511_v5, %v510_v4  ;;  %v515_v14 = vrot.slane %v510_v4, 4  ;;  %337 = vst [vmem:[#allocation2 + $0x60] sm:$0x1] %v336_v9 }
  0x43   : > { %v2753_v15 = vunpack.c.l.b16 %v1032_v10  ;;  %v972_v16 = vshrl.u32 %v854_v12, 16  ;;  %v975_v17 = vshll.u32 %v854_v12, 16  ;;  %v771_v18 = vld [vmem:[#allocation2 + $0x48] sm:$0xf]  ;;  %v386_v19 = vsel %vm4598_vm5, 0, %v385_v61  ;;  %v253_v3 = vld [vmem:[%s4618_s21 + $0x80] sm:$0xff] }
  0x44   : > { %v1037_v21 = vrot.slane %v1036_v11, 4  ;;  %v514_v22 = vsel %vm4642_vm11, %v506_v8, %v513_v13  ;;  %v772_v23 = vsel %vm4630_vm9, %v505_v7, %v771_v18  ;;  %v775_v24 = vld [vmem:[#allocation2 + $0x50] sm:$0x1]  ;;  %387 = vst [vmem:[#allocation2 + $0x68] sm:$0x1] %v386_v19  ;;  %v534_v25 = vshrl.u32 %v4731_v26, 16 }
  0x45   : > { %v974_v27 = vrot.slane %v972_v16, 4  ;;  %v977_v28 = vrot.slane %v975_v17, 5  ;;  %773 = vst [vmem:[#allocation2 + $0x48] sm:$0xf] %v772_v23  ;;  %v776_v29 = vsel %vm4591_vm3, %v515_v14, %v775_v24  ;;  %v537_v30 = vshll.u32 %v4731_v26, 16 }
  0x46   : > { %v1042_v31 = vsel %vm4636_vm10, %v1037_v21, %v1041_v6  ;;  %v855_v33 = vld [vmem:[#allocation2 + $0x28] sm:$0xf]  ;;  %774 = vst.msk [vmem:[#allocation2 + $0x4c] sm:$0xf] %vm301_vm0, %v514_v22  ;;  %v536_v43 = vrot.slane %v534_v25, 7  ;;  %v542_v35 = vshrl.u32 %v4746_v55, 16  ;;  %v4782_v38 = vpack.c.bf16 %v250_v51, %v250_v51 }
  0x47   : > { %v2754_v41 = vunpack.c.l.b16 %v1042_v31  ;;  %v883_v42 = vld [vmem:[#allocation2 + $0x2c] sm:$0x1]  ;;  %v978_v45 = vor.u32 %v977_v28, %v974_v27  ;;  %v981_v47 = vshll.u32 %v855_v33, 16  ;;  %v985_v37 = vshrl.u32 %v855_v33, 16  ;;  %777 = vst [vmem:[#allocation2 + $0x50] sm:$0x1] %v776_v29 }
  0x48   : > { %v991_v26 = vshll.u32 %v883_v42, 16  ;;  %v539_v48 = vor.u32 %v537_v30, %v536_v43  ;;  %v540_v49 = vrot.slane %v536_v43, 4  ;;  %v544_v50 = vrot.slane %v542_v35, 7  ;;  %v254_v31 = vld [vmem:[%s4618_s21 + $0x88] sm:$0xff] }
  0x49   : > { %v2780_v52 = vpack.c.b16 %v2754_v41, %v2753_v15  ;;  %v979_v53 = vrot.slane %v978_v45, 4  ;;  %v983_v54 = vrot.slane %v981_v47, 5  ;;  %v987_v56 = vrot.slane %v985_v37, 4  ;;  %v785_v57 = vld [vmem:[#allocation2 + $0x60] sm:$0xf] }
  0x4a   : > { %v993_v58 = vrot.slane %v991_v26, 5  ;;  %v545_v59 = vshll.u32 %v4746_v55, 16  ;;  %v549_v60 = vrot.slane %v544_v50, 4  ;;  %v786_v61 = vsel %vm4630_vm9, %v539_v48, %v785_v57  ;;  %v338_v33 = vld [vmem:[#allocation2 + $0x6c] sm:$0x1] }
  0x4b   : > { %2801 = vrot.lane.b32.xlu2 %v2780_v52, %s4542_s22  ;;  %v984_v62 = vsel %vm4636_vm10, %v979_v53, %v983_v54  ;;  %v988_v63 = vor.u32 %v987_v56, %v983_v54  ;;  %787 = vst [vmem:[#allocation2 + $0x60] sm:$0xf] %v786_v61  ;;  %v789_v0 = vld [vmem:[#allocation2 + $0x68] sm:$0x1]  ;;  %v333_v44 = vsel %vm4591_vm3, 0, %v332_v40  ;;  %v383_v7 = vsel %vm4598_vm5, 0, %v382_v32 }
  0x4c   : > { %v2749_v4 = vunpack.c.l.b16 %v984_v62  ;;  %v860_v55 = vld [vmem:[#allocation2 + $0x48] sm:$0xf]  ;;  %v547_v5 = vor.u32 %v545_v59, %v544_v50  ;;  %v790_v6 = vsel %vm4591_vm3, %v549_v60, %v789_v0  ;;  %334 = vst [vmem:[#allocation2 + $0x54] sm:$0x1] %v333_v44  ;;  %v517_v12 = vshrl.u32 %v4773_v36, 16 }
  0x4d   : > { %v989_v8 = vrot.slane %v988_v63, 4  ;;  %v4791_v9 = vld [vmem:[#allocation2 + $0x4c] sm:$0xf]  ;;  %v1044_v10 = vshrl.u32 %v860_v55, 16  ;;  %v1047_v11 = vshll.u32 %v860_v55, 16  ;;  %v4800_v17 = vpack.c.bf16 %v253_v3, %v253_v3 }
  0x4e   : > { %v4794_v13 = vld [vmem:[#allocation2 + $0x50] sm:$0x1]  ;;  %v1053_v14 = vshll.u32 %v4791_v9, 16  ;;  %v1057_v15 = vshrl.u32 %v4791_v9, 16  ;;  %v548_v16 = vsel %vm4642_vm11, %v540_v49, %v547_v5  ;;  %791 = vst [vmem:[#allocation2 + $0x68] sm:$0x1] %v790_v6 }
  0x4f   : > { %v994_v18 = vsel %vm4636_vm10, %v989_v8, %v993_v58  ;;  %v1046_v19 = vrot.slane %v1044_v10, 4  ;;  %v1049_v20 = vrot.slane %v1047_v11, 5  ;;  %v1063_v21 = vshll.u32 %v4794_v13, 16  ;;  %788 = vst.msk [vmem:[#allocation2 + $0x64] sm:$0xf] %vm301_vm0, %v548_v16  ;;  %v258_v16 = vld [vmem:[%s4618_s21 + $0xa8] sm:$0xff] }
  0x50   : > { %v2750_v22 = vunpack.c.l.b16 %v994_v18  ;;  %v1055_v23 = vrot.slane %v1053_v14, 5  ;;  %v1059_v24 = vrot.slane %v1057_v15, 4  ;;  %384 = vst [vmem:[#allocation2 + $0x5c] sm:$0x1] %v383_v7  ;;  %v519_v25 = vrot.slane %v517_v12, 7  ;;  %v257_v7 = vld [vmem:[%s4618_s21 + $0xa0] sm:$0xff] }
  0x51   : > { %v1050_v27 = vor.u32 %v1049_v20, %v1046_v19  ;;  %v1065_v28 = vrot.slane %v1063_v21, 5  ;;  %v520_v29 = vshll.u32 %v4773_v36, 16  ;;  %v525_v30 = vshrl.u32 %v4782_v38, 16  ;;  %v388_v32 = vld [vmem:[#allocation2 + $0x74] sm:$0x1] }
  0x52   : > { %v2778_v43 = vpack.c.b16 %v2750_v22, %v2749_v4  ;;  %v1060_v35 = vor.u32 %v1059_v24, %v1055_v23  ;;  %v864_v40 = vld [vmem:[#allocation2 + $0x60] sm:$0xf]  ;;  %v523_v41 = vrot.slane %v519_v25, 4  ;;  %v528_v42 = vshll.u32 %v4782_v38, 16  ;;  %v344_v8 = vld [vmem:[#allocation2 + $0x84] sm:$0x1] }
  0x53   : > { %v1051_v45 = vrot.slane %v1050_v27, 4  ;;  %v1092_v47 = vshrl.u32 %v864_v40, 16  ;;  %v1095_v37 = vshll.u32 %v864_v40, 16  ;;  %v522_v26 = vor.u32 %v520_v29, %v519_v25  ;;  %v778_v48 = vld [vmem:[#allocation2 + $0x54] sm:$0xf] }
  0x54   : > { %2797 = vrot.lane.b32.xlu1 %v2778_v43, %s4542_s22  ;;  %v1061_v49 = vrot.slane %v1060_v35, 4  ;;  %v527_v50 = vrot.slane %v525_v30, 7  ;;  %v286_v36 = vpack.c.bf16 %v254_v31, %v254_v31  ;;  %v339_v51 = vsel %vm4591_vm3, 0, %v338_v33  ;;  %v394_v10 = vld [vmem:[#allocation2 + $0x8c] sm:$0x1] }
  0x55   : > { %v1056_v52 = vsel %vm4636_vm10, %v1051_v45, %v1055_v23  ;;  %v4815_v53 = vld [vmem:[#allocation2 + $0x68] sm:$0x1]  ;;  %v1094_v54 = vrot.slane %v1092_v47, 4  ;;  %v1097_v56 = vrot.slane %v1095_v37, 5  ;;  %v779_v57 = vsel %vm4630_vm9, %v522_v26, %v778_v48  ;;  %340 = vst [vmem:[#allocation2 + $0x6c] sm:$0x1] %v339_v51 }
  0x56   : > { %v1066_v58 = vsel %vm4636_vm10, %v1061_v49, %v1065_v28  ;;  %v2755_v59 = vunpack.c.l.b16 %v1056_v52  ;;  %v4821_v60 = vld [vmem:[#allocation2 + $0x64] sm:$0xf]  ;;  %v1111_v61 = vshll.u32 %v4815_v53, 16  ;;  %v530_v62 = vor.u32 %v528_v42, %v527_v50  ;;  %780 = vst [vmem:[#allocation2 + $0x54] sm:$0xf] %v779_v57  ;;  %v255_v37 = vld [vmem:[%s4618_s21 + $0x90] sm:$0xff] }
  0x57   : > { %v2756_v63 = vunpack.c.l.b16 %v1066_v58  ;;  %v1098_v0 = vor.u32 %v1097_v56, %v1094_v54  ;;  %v1101_v38 = vshll.u32 %v4821_v60, 16  ;;  %v1105_v44 = vshrl.u32 %v4821_v60, 16  ;;  %v782_v3 = vld [vmem:[#allocation2 + $0x5c] sm:$0x1]  ;;  %v341_v56 = vld [vmem:[#allocation2 + $0x78] sm:$0x1] }
  0x58   : > { %v1113_v4 = vrot.slane %v1111_v61, 5  ;;  %v531_v55 = vsel %vm4642_vm11, %v523_v41, %v530_v62  ;;  %v532_v5 = vrot.slane %v527_v50, 4  ;;  %v389_v6 = vsel %vm4598_vm5, 0, %v388_v32 }
  0x59   : > { %v2781_v11 = vpack.c.b16 %v2756_v63, %v2755_v59  ;;  %v1099_v12 = vrot.slane %v1098_v0, 4  ;;  %v1103_v14 = vrot.slane %v1101_v38, 5  ;;  %v1107_v15 = vrot.slane %v1105_v44, 4  ;;  %781 = vst.msk [vmem:[#allocation2 + $0x58] sm:$0xf] %vm301_vm0, %v531_v55  ;;  %v256_v55 = vld [vmem:[%s4618_s21 + $0x98] sm:$0xff] }
  0x5a   : > { %v783_v18 = vsel %vm4591_vm3, %v532_v5, %v782_v3  ;;  %390 = vst [vmem:[#allocation2 + $0x74] sm:$0x1] %v389_v6  ;;  %v551_v19 = vshrl.u32 %v4800_v17, 16  ;;  %v554_v20 = vshll.u32 %v4800_v17, 16  ;;  %v559_v21 = vshrl.u32 %v286_v36, 16 }
  0x5b   : > { %2803 = vrot.lane.b32.xlu0 %v2781_v11, %s4542_s22  ;;  %v1104_v22 = vsel %vm4636_vm10, %v1099_v12, %v1103_v14  ;;  %v1108_v23 = vor.u32 %v1107_v15, %v1103_v14  ;;  %784 = vst [vmem:[#allocation2 + $0x5c] sm:$0x1] %v783_v18  ;;  %v562_v24 = vshll.u32 %v286_v36, 16  ;;  %v289_v25 = vpack.c.bf16 %v257_v7, %v257_v7  ;;  %v391_v63 = vld [vmem:[#allocation2 + $0x80] sm:$0x1] }
  0x5c   : > { %v2759_v27 = vunpack.c.l.b16 %v1104_v22  ;;  %v553_v28 = vrot.slane %v551_v19, 7  ;;  %v561_v29 = vrot.slane %v559_v21, 7  ;;  %v792_v30 = vld [vmem:[#allocation2 + $0x6c] sm:$0xf]  ;;  %v4840_v31 = vpack.c.bf16 %v258_v16, %v258_v16  ;;  %v259_v21 = vld [vmem:[%s4618_s21 + $0xb0] sm:$0xff] }
  0x5d   : > { %v1109_v33 = vrot.slane %v1108_v23, 4  ;;  %v862_v43 = vld [vmem:[#allocation2 + $0x54] sm:$0xf]  ;;  %v345_v17 = vsel %vm4591_vm3, 0, %v344_v8  ;;  %v395_v35 = vsel %vm4598_vm5, 0, %v394_v10  ;;  %v585_v40 = vshrl.u32 %v289_v25, 16 }
  0x5e   : > { %v1068_v41 = vshrl.u32 %v862_v43, 16  ;;  %v1071_v42 = vshll.u32 %v862_v43, 16  ;;  %v556_v45 = vor.u32 %v554_v20, %v553_v28  ;;  %v557_v47 = vrot.slane %v553_v28, 4  ;;  %346 = vst [vmem:[#allocation2 + $0x84] sm:$0x1] %v345_v17 }
  0x5f   : > { %v1114_v26 = vsel %vm4636_vm10, %v1109_v33, %v1113_v4  ;;  %v564_v48 = vor.u32 %v562_v24, %v561_v29  ;;  %v566_v49 = vrot.slane %v561_v29, 4  ;;  %396 = vst [vmem:[#allocation2 + $0x8c] sm:$0x1] %v395_v35  ;;  %v4849_v50 = vrot.slane %v585_v40, 7 }
  0x60   : > { %v2760_v36 = vunpack.c.l.b16 %v1114_v26  ;;  %v4851_v51 = vld [vmem:[#allocation2 + $0x58] sm:$0xf]  ;;  %v1070_v32 = vrot.slane %v1068_v41, 4  ;;  %v1073_v52 = vrot.slane %v1071_v42, 5  ;;  %v793_v54 = vsel %vm4630_vm9, %v556_v45, %v792_v30 }
  0x61   : > { %v1077_v57 = vshll.u32 %v4851_v51, 16  ;;  %v1081_v58 = vshrl.u32 %v4851_v51, 16  ;;  %v565_v59 = vsel %vm4642_vm11, %v557_v47, %v564_v48  ;;  %794 = vst [vmem:[#allocation2 + $0x6c] sm:$0xf] %v793_v54  ;;  %v796_v61 = vld [vmem:[#allocation2 + $0x74] sm:$0x1]  ;;  %v4859_v62 = vpack.c.bf16 %v255_v37, %v255_v37 }
  0x62   : > { %v2783_v0 = vpack.c.b16 %v2760_v36, %v2759_v27  ;;  %v4861_v38 = vld [vmem:[#allocation2 + $0x5c] sm:$0x1]  ;;  %v1074_v44 = vor.u32 %v1073_v52, %v1070_v32  ;;  %795 = vst.msk [vmem:[#allocation2 + $0x70] sm:$0xf] %vm301_vm0, %v565_v59  ;;  %v797_v3 = vsel %vm4591_vm3, %v566_v49, %v796_v61  ;;  %v588_v4 = vshll.u32 %v289_v25, 16 }
  0x63   : > { %v1079_v5 = vrot.slane %v1077_v57, 5  ;;  %v1083_v6 = vrot.slane %v1081_v58, 4  ;;  %v1087_v7 = vshll.u32 %v4861_v38, 16  ;;  %798 = vst [vmem:[#allocation2 + $0x74] sm:$0x1] %v797_v3  ;;  %v591_v8 = vrot.slane %v4849_v50, 4 }
  0x64   : > { %2807 = vrot.lane.b32.xlu2 %v2783_v0, %s4542_s22  ;;  %v1075_v10 = vrot.slane %v1074_v44, 4  ;;  %v590_v11 = vor.u32 %v588_v4, %v4849_v50  ;;  %v593_v12 = vshrl.u32 %v4840_v31, 16  ;;  %v596_v14 = vshll.u32 %v4840_v31, 16  ;;  %v260_v57 = vld [vmem:[%s4618_s21 + $0xb8] sm:$0xff]  ;;  %v347_v58 = vld [vmem:[#allocation2 + $0x90] sm:$0x1] }
  0x65   : > { %v1084_v15 = vor.u32 %v1083_v6, %v1079_v5  ;;  %v1089_v16 = vrot.slane %v1087_v7, 5  ;;  %v806_v18 = vld [vmem:[#allocation2 + $0x84] sm:$0xf]  ;;  %v288_v19 = vpack.c.bf16 %v256_v55, %v256_v55  ;;  %v342_v20 = vsel %vm4591_vm3, 0, %v341_v56  ;;  %v397_v0 = vld [vmem:[#allocation2 + $0x98] sm:$0x1] }
  0x66   : > { %v1080_v22 = vsel %vm4636_vm10, %v1075_v10, %v1079_v5  ;;  %v595_v23 = vrot.slane %v593_v12, 7  ;;  %v807_v24 = vsel %vm4630_vm9, %v590_v11, %v806_v18  ;;  %v810_v25 = vld [vmem:[#allocation2 + $0x8c] sm:$0x1]  ;;  %343 = vst [vmem:[#allocation2 + $0x78] sm:$0x1] %v342_v20  ;;  %v392_v27 = vsel %vm4598_vm5, 0, %v391_v63 }
  0x67   : > { %v1085_v28 = vrot.slane %v1084_v15, 4  ;;  %v2757_v29 = vunpack.c.l.b16 %v1080_v22  ;;  %808 = vst [vmem:[#allocation2 + $0x84] sm:$0xf] %v807_v24  ;;  %v568_v30 = vshrl.u32 %v4859_v62, 16  ;;  %v571_v31 = vshll.u32 %v4859_v62, 16 }
  0x68   : > { %v866_v33 = vld [vmem:[#allocation2 + $0x6c] sm:$0xf]  ;;  %v598_v43 = vor.u32 %v596_v14, %v595_v23  ;;  %v600_v17 = vrot.slane %v595_v23, 4  ;;  %393 = vst [vmem:[#allocation2 + $0x80] sm:$0x1] %v392_v27  ;;  %v576_v35 = vshrl.u32 %v288_v19, 16  ;;  %v4884_v40 = vpack.c.bf16 %v259_v21, %v259_v21 }
  0x69   : > { %v1090_v41 = vsel %vm4636_vm10, %v1085_v28, %v1089_v16  ;;  %v4888_v42 = vld [vmem:[#allocation2 + $0x70] sm:$0xf]  ;;  %v1116_v45 = vshrl.u32 %v866_v33, 16  ;;  %v1119_v47 = vshll.u32 %v866_v33, 16  ;;  %v570_v37 = vrot.slane %v568_v30, 7 }
  0x6a   : > { %v2758_v26 = vunpack.c.l.b16 %v1090_v41  ;;  %v4890_v48 = vld [vmem:[#allocation2 + $0x74] sm:$0x1]  ;;  %v1125_v49 = vshll.u32 %v4888_v42, 16  ;;  %v1129_v50 = vshrl.u32 %v4888_v42, 16  ;;  %v599_v36 = vsel %vm4642_vm11, %v591_v8, %v598_v43 }
  0x6b   : > { %v1118_v32 = vrot.slane %v1116_v45, 4  ;;  %v1121_v52 = vrot.slane %v1119_v47, 5  ;;  %v1135_v54 = vshll.u32 %v4890_v48, 16  ;;  %809 = vst.msk [vmem:[#allocation2 + $0x88] sm:$0xf] %vm301_vm0, %v599_v36  ;;  %v811_v56 = vsel %vm4591_vm3, %v600_v17, %v810_v25 }
  0x6c   : > { %v2782_v59 = vpack.c.b16 %v2758_v26, %v2757_v29  ;;  %v1127_v61 = vrot.slane %v1125_v49, 5  ;;  %v1131_v62 = vrot.slane %v1129_v50, 4  ;;  %812 = vst [vmem:[#allocation2 + $0x8c] sm:$0x1] %v811_v56  ;;  %v573_v63 = vor.u32 %v571_v31, %v570_v37 }
  0x6d   : > { %v1122_v44 = vor.u32 %v1121_v52, %v1118_v32  ;;  %v1137_v3 = vrot.slane %v1135_v54, 5  ;;  %v574_v4 = vrot.slane %v570_v37, 4  ;;  %v578_v55 = vrot.slane %v576_v35, 7  ;;  %v799_v5 = vld [vmem:[#allocation2 + $0x78] sm:$0xf]  ;;  %v263_v54 = vld [vmem:[%s4618_s21 + $0xd0] sm:$0xff] }
  0x6e   : > { %2805 = vrot.lane.b32.xlu1 %v2782_v59, %s4542_s22  ;;  %v1132_v6 = vor.u32 %v1131_v62, %v1127_v61  ;;  %v870_v7 = vld [vmem:[#allocation2 + $0x84] sm:$0xf]  ;;  %v579_v8 = vshll.u32 %v288_v19, 16  ;;  %v800_v10 = vsel %vm4630_vm9, %v573_v63, %v799_v5  ;;  %v4904_v11 = vpack.c.bf16 %v260_v57, %v260_v57 }
  0x6f   : > { %v1123_v12 = vrot.slane %v1122_v44, 4  ;;  %v1164_v14 = vshrl.u32 %v870_v7, 16  ;;  %v1167_v15 = vshll.u32 %v870_v7, 16  ;;  %v583_v16 = vrot.slane %v578_v55, 4  ;;  %801 = vst [vmem:[#allocation2 + $0x78] sm:$0xf] %v800_v10 }
  0x70   : > { %v1133_v18 = vrot.slane %v1132_v6, 4  ;;  %v581_v20 = vor.u32 %v579_v8, %v578_v55  ;;  %v803_v21 = vld [vmem:[#allocation2 + $0x80] sm:$0x1]  ;;  %v348_v22 = vsel %vm4591_vm3, 0, %v347_v58  ;;  %v398_v23 = vsel %vm4598_vm5, 0, %v397_v0  ;;  %v264_v44 = vld [vmem:[%s4618_s21 + $0xd8] sm:$0xff] }
  0x71   : > { %v1128_v19 = vsel %vm4636_vm10, %v1123_v12, %v1127_v61  ;;  %v1166_v24 = vrot.slane %v1164_v14, 4  ;;  %v1169_v25 = vrot.slane %v1167_v15, 5  ;;  %v804_v27 = vsel %vm4591_vm3, %v583_v16, %v803_v21  ;;  %349 = vst [vmem:[#allocation2 + $0x90] sm:$0x1] %v348_v22  ;;  %v403_v8 = vld [vmem:[#allocation2 + $0xb0] sm:$0x1] }
  0x72   : > { %v1138_v28 = vsel %vm4636_vm10, %v1133_v18, %v1137_v3  ;;  %v2761_v29 = vunpack.c.l.b16 %v1128_v19  ;;  %v4916_v30 = vld [vmem:[#allocation2 + $0x88] sm:$0xf]  ;;  %v582_v31 = vsel %vm4642_vm11, %v574_v4, %v581_v20  ;;  %805 = vst [vmem:[#allocation2 + $0x80] sm:$0x1] %v804_v27  ;;  %v602_v33 = vshrl.u32 %v4884_v40, 16 }
  0x73   : > { %v2762_v43 = vunpack.c.l.b16 %v1138_v28  ;;  %v4921_v17 = vld [vmem:[#allocation2 + $0x8c] sm:$0x1]  ;;  %v1170_v35 = vor.u32 %v1169_v25, %v1166_v24  ;;  %v1173_v41 = vshll.u32 %v4916_v30, 16  ;;  %v1177_v45 = vshrl.u32 %v4916_v30, 16  ;;  %802 = vst.msk [vmem:[#allocation2 + $0x7c] sm:$0xf] %vm301_vm0, %v582_v31 }
  0x74   : > { %v1183_v47 = vshll.u32 %v4921_v17, 16  ;;  %399 = vst [vmem:[#allocation2 + $0x98] sm:$0x1] %v398_v23  ;;  %v604_v37 = vrot.slane %v602_v33, 7  ;;  %v605_v26 = vshll.u32 %v4884_v40, 16  ;;  %v610_v49 = vshrl.u32 %v4904_v11, 16 }
  0x75   : > { %v2784_v50 = vpack.c.b16 %v2762_v43, %v2761_v29  ;;  %v1171_v36 = vrot.slane %v1170_v35, 4  ;;  %v1175_v32 = vrot.slane %v1173_v41, 5  ;;  %v1179_v52 = vrot.slane %v1177_v45, 4  ;;  %v353_v3 = vld [vmem:[#allocation2 + $0xa8] sm:$0x1]  ;;  %v261_v23 = vld [vmem:[%s4618_s21 + $0xc0] sm:$0xff] }
  0x76   : > { %v1185_v56 = vrot.slane %v1183_v47, 5  ;;  %v868_v57 = vld [vmem:[#allocation2 + $0x78] sm:$0xf]  ;;  %v607_v58 = vor.u32 %v605_v26, %v604_v37  ;;  %v608_v59 = vrot.slane %v604_v37, 4  ;;  %v612_v61 = vrot.slane %v610_v49, 7  ;;  %v262_v35 = vld [vmem:[%s4618_s21 + $0xc8] sm:$0xff] }
  0x77   : > { %2809 = vrot.lane.b32.xlu0 %v2784_v50, %s4542_s22  ;;  %v1176_v62 = vsel %vm4636_vm10, %v1171_v36, %v1175_v32  ;;  %v1180_v63 = vor.u32 %v1179_v52, %v1175_v32  ;;  %v1140_v40 = vshrl.u32 %v868_v57, 16  ;;  %v1143_v0 = vshll.u32 %v868_v57, 16  ;;  %v350_v41 = vld [vmem:[#allocation2 + $0x9c] sm:$0x1]  ;;  %v400_v45 = vld [vmem:[#allocation2 + $0xa4] sm:$0x1] }
  0x78   : > { %v2765_v4 = vunpack.c.l.b16 %v1176_v62  ;;  %v613_v55 = vshll.u32 %v4904_v11, 16  ;;  %v617_v5 = vrot.slane %v612_v61, 4  ;;  %v813_v6 = vld [vmem:[#allocation2 + $0x90] sm:$0xf]  ;;  %v295_v7 = vpack.c.bf16 %v263_v54, %v263_v54 }
  0x79   : > { %v1181_v10 = vrot.slane %v1180_v63, 4  ;;  %v4935_v12 = vld [vmem:[#allocation2 + $0x80] sm:$0x1]  ;;  %v1142_v14 = vrot.slane %v1140_v40, 4  ;;  %v1145_v15 = vrot.slane %v1143_v0, 5  ;;  %v814_v16 = vsel %vm4630_vm9, %v607_v58, %v813_v6 }
  0x7a   : > { %v4939_v18 = vld [vmem:[#allocation2 + $0x7c] sm:$0xf]  ;;  %v1159_v20 = vshll.u32 %v4935_v12, 16  ;;  %v615_v21 = vor.u32 %v613_v55, %v612_v61  ;;  %815 = vst [vmem:[#allocation2 + $0x90] sm:$0xf] %v814_v16  ;;  %v296_v11 = vpack.c.bf16 %v264_v44, %v264_v44  ;;  %v354_v22 = vsel %vm4591_vm3, 0, %v353_v3 }
  0x7b   : > { %v1186_v19 = vsel %vm4636_vm10, %v1181_v10, %v1185_v56  ;;  %v1146_v24 = vor.u32 %v1145_v15, %v1142_v14  ;;  %v1149_v25 = vshll.u32 %v4939_v18, 16  ;;  %v1153_v27 = vshrl.u32 %v4939_v18, 16  ;;  %v817_v28 = vld [vmem:[#allocation2 + $0x98] sm:$0x1]  ;;  %355 = vst [vmem:[#allocation2 + $0xa8] sm:$0x1] %v354_v22 }
  0x7c   : > { %v2766_v29 = vunpack.c.l.b16 %v1186_v19  ;;  %v1161_v31 = vrot.slane %v1159_v20, 5  ;;  %v616_v33 = vsel %vm4642_vm11, %v608_v59, %v615_v21  ;;  %v818_v43 = vsel %vm4591_vm3, %v617_v5, %v817_v28  ;;  %v265_v20 = vld [vmem:[%s4618_s21 + $0xe0] sm:$0xff] }
  0x7d   : > { %v1147_v47 = vrot.slane %v1146_v24, 4  ;;  %v1151_v37 = vrot.slane %v1149_v25, 5  ;;  %v1155_v26 = vrot.slane %v1153_v27, 4  ;;  %816 = vst.msk [vmem:[#allocation2 + $0x94] sm:$0xf] %vm301_vm0, %v616_v33  ;;  %v404_v49 = vsel %vm4598_vm5, 0, %v403_v8 }
  0x7e   : > { %v2786_v50 = vpack.c.b16 %v2766_v29, %v2765_v4  ;;  %819 = vst [vmem:[#allocation2 + $0x98] sm:$0x1] %v818_v43  ;;  %v636_v36 = vshrl.u32 %v295_v7, 16  ;;  %v639_v32 = vshll.u32 %v295_v7, 16  ;;  %v644_v52 = vshrl.u32 %v296_v11, 16 }
  0x7f   : > { %v1152_v54 = vsel %vm4636_vm10, %v1147_v47, %v1151_v37  ;;  %v1156_v56 = vor.u32 %v1155_v26, %v1151_v37  ;;  %405 = vst [vmem:[#allocation2 + $0xb0] sm:$0x1] %v404_v49  ;;  %v647_v57 = vshll.u32 %v296_v11, 16  ;;  %v293_v58 = vpack.c.bf16 %v261_v23, %v261_v23  ;;  %v356_v24 = vld [vmem:[#allocation2 + $0xb4] sm:$0x1] }
  0x80   : > { %2813 = vrot.lane.b32.xlu2 %v2786_v50, %s4542_s22  ;;  %v2763_v59 = vunpack.c.l.b16 %v1152_v54  ;;  %v638_v61 = vrot.slane %v636_v36, 7  ;;  %v646_v62 = vrot.slane %v644_v52, 7  ;;  %v4960_v63 = vpack.c.bf16 %v262_v35, %v262_v35  ;;  %v406_v49 = vld [vmem:[#allocation2 + $0xbc] sm:$0x1]  ;;  %v266_v54 = vld [vmem:[%s4618_s21 + $0xe8] sm:$0xff] }
  0x81   : > { %v1157_v40 = vrot.slane %v1156_v56, 4  ;;  %v872_v0 = vld [vmem:[#allocation2 + $0x90] sm:$0xf]  ;;  %v351_v44 = vsel %vm4591_vm3, 0, %v350_v41  ;;  %v401_v3 = vsel %vm4598_vm5, 0, %v400_v45  ;;  %v619_v4 = vshrl.u32 %v293_v58, 16 }
  0x82   : > { %v1188_v55 = vshrl.u32 %v872_v0, 16  ;;  %v1191_v5 = vshll.u32 %v872_v0, 16  ;;  %v641_v6 = vor.u32 %v639_v32, %v638_v61  ;;  %v642_v7 = vrot.slane %v638_v61, 4  ;;  %v827_v8 = vld [vmem:[#allocation2 + $0xa8] sm:$0xf] }
  0x83   : > { %v1162_v10 = vsel %vm4636_vm10, %v1157_v40, %v1161_v31  ;;  %v649_v14 = vor.u32 %v647_v57, %v646_v62  ;;  %v651_v15 = vrot.slane %v646_v62, 4  ;;  %352 = vst [vmem:[#allocation2 + $0x9c] sm:$0x1] %v351_v44  ;;  %v4968_v16 = vrot.slane %v619_v4, 7 }
  0x84   : > { %v2764_v21 = vunpack.c.l.b16 %v1162_v10  ;;  %v4971_v11 = vld [vmem:[#allocation2 + $0x94] sm:$0xf]  ;;  %v1190_v22 = vrot.slane %v1188_v55, 4  ;;  %v1193_v23 = vrot.slane %v1191_v5, 5  ;;  %v828_v19 = vsel %vm4630_vm9, %v641_v6, %v827_v8  ;;  %402 = vst [vmem:[#allocation2 + $0xa4] sm:$0x1] %v401_v3 }
  0x85   : > { %v4975_v25 = vld [vmem:[#allocation2 + $0x98] sm:$0x1]  ;;  %v1197_v27 = vshll.u32 %v4971_v11, 16  ;;  %v1201_v28 = vshrl.u32 %v4971_v11, 16  ;;  %v650_v29 = vsel %vm4642_vm11, %v642_v7, %v649_v14  ;;  %829 = vst [vmem:[#allocation2 + $0xa8] sm:$0xf] %v828_v19  ;;  %v297_v26 = vpack.c.bf16 %v265_v20, %v265_v20 }
  0x86   : > { %v2785_v31 = vpack.c.b16 %v2764_v21, %v2763_v59  ;;  %v1194_v33 = vor.u32 %v1193_v23, %v1190_v22  ;;  %v1207_v43 = vshll.u32 %v4975_v25, 16  ;;  %830 = vst.msk [vmem:[#allocation2 + $0xac] sm:$0xf] %vm301_vm0, %v650_v29  ;;  %v831_v35 = vld [vmem:[#allocation2 + $0xb0] sm:$0x1]  ;;  %v622_v41 = vshll.u32 %v293_v58, 16 }
  0x87   : > { %v1199_v45 = vrot.slane %v1197_v27, 5  ;;  %v1203_v47 = vrot.slane %v1201_v28, 4  ;;  %v832_v37 = vsel %vm4591_vm3, %v651_v15, %v831_v35  ;;  %v625_v32 = vrot.slane %v4968_v16, 4 }
  0x88   : > { %2811 = vrot.lane.b32.xlu1 %v2785_v31, %s4542_s22  ;;  %v1195_v50 = vrot.slane %v1194_v33, 4  ;;  %833 = vst [vmem:[#allocation2 + $0xb0] sm:$0x1] %v832_v37  ;;  %v624_v36 = vor.u32 %v622_v41, %v4968_v16  ;;  %v627_v52 = vshrl.u32 %v4960_v63, 16  ;;  %v1209_v57 = vrot.slane %v1207_v43, 5 }
  0x89   : > { %v1204_v56 = vor.u32 %v1203_v47, %v1199_v45  ;;  %v630_v58 = vshll.u32 %v4960_v63, 16  ;;  %v357_v59 = vsel %vm4591_vm3, 0, %v356_v24  ;;  %v407_v0 = vsel %vm4598_vm5, 0, %v406_v49 }
  0x8a   : > { %v1200_v61 = vsel %vm4636_vm10, %v1195_v50, %v1199_v45  ;;  %v629_v62 = vrot.slane %v627_v52, 7  ;;  %v820_v40 = vld [vmem:[#allocation2 + $0x9c] sm:$0xf]  ;;  %358 = vst [vmem:[#allocation2 + $0xb4] sm:$0x1] %v357_v59  ;;  %v298_v55 = vpack.c.bf16 %v266_v54, %v266_v54  ;;  %v653_v63 = vshrl.u32 %v297_v26, 16 }
  0x8b   : > { %v1205_v44 = vrot.slane %v1204_v56, 4  ;;  %v821_v3 = vsel %vm4630_vm9, %v624_v36, %v820_v40  ;;  %v824_v4 = vld [vmem:[#allocation2 + $0xa4] sm:$0x1]  ;;  %408 = vst [vmem:[#allocation2 + $0xbc] sm:$0x1] %v407_v0  ;;  %v2767_v5 = vunpack.c.l.b16 %v1200_v61  ;;  %v656_v10 = vshll.u32 %v297_v26, 16 }
  0x8c   : > { %v876_v6 = vld [vmem:[#allocation2 + $0xa8] sm:$0xf]  ;;  %v632_v7 = vor.u32 %v630_v58, %v629_v62  ;;  %v634_v8 = vrot.slane %v629_v62, 4  ;;  %822 = vst [vmem:[#allocation2 + $0x9c] sm:$0xf] %v821_v3  ;;  %v655_v21 = vrot.slane %v653_v63, 7 }
  0x8d   : > { %v1210_v14 = vsel %vm4636_vm10, %v1205_v44, %v1209_v57  ;;  %v5001_v15 = vld [vmem:[#allocation2 + $0xac] sm:$0xf]  ;;  %v1236_v16 = vshrl.u32 %v876_v6, 16  ;;  %v1239_v20 = vshll.u32 %v876_v6, 16  ;;  %v661_v26 = vshrl.u32 %v298_v55, 16 }
  0x8e   : > { %v2768_v22 = vunpack.c.l.b16 %v1210_v14  ;;  %v1245_v23 = vshll.u32 %v5001_v15, 16  ;;  %v1249_v19 = vshrl.u32 %v5001_v15, 16  ;;  %v633_v24 = vsel %vm4642_vm11, %v625_v32, %v632_v7  ;;  %v1283_v54 = vld [vmem:[#allocation2] sm:$0xe] }
  0x8f   : > { %v5007_v27 = vld [vmem:[#allocation2 + $0xb0] sm:$0x1]  ;;  %v1238_v28 = vrot.slane %v1236_v16, 4  ;;  %v1241_v29 = vrot.slane %v1239_v20, 5  ;;  %823 = vst.msk [vmem:[#allocation2 + $0xa0] sm:$0xf] %vm301_vm0, %v633_v24  ;;  %v825_v31 = vsel %vm4591_vm3, %v634_v8, %v824_v4  ;;  %v658_v33 = vor.u32 %v656_v10, %v655_v21 }
  0x90   : > { %v2787_v43 = vpack.c.b16 %v2768_v22, %v2767_v5  ;;  %v1247_v35 = vrot.slane %v1245_v23, 5  ;;  %v1251_v41 = vrot.slane %v1249_v19, 4  ;;  %v1255_v45 = vshll.u32 %v5007_v27, 16  ;;  %826 = vst [vmem:[#allocation2 + $0xa4] sm:$0x1] %v825_v31 }
  0x91   : > { %v1242_v47 = vor.u32 %v1241_v29, %v1238_v28  ;;  %v659_v37 = vrot.slane %v655_v21, 4  ;;  %v664_v49 = vshll.u32 %v298_v55, 16  ;;  %v834_v50 = vld [vmem:[#allocation2 + $0xb4] sm:$0xf]  ;;  %vm1347_vm12 = vcmask 1042432  }
  0x92   : > { %2815 = vrot.lane.b32.xlu0 %v2787_v43, %s4542_s22  ;;  %v1252_v36 = vor.u32 %v1251_v41, %v1247_v35  ;;  %v1257_v32 = vrot.slane %v1255_v45, 5  ;;  %v835_v52 = vsel %vm4630_vm9, %v658_v33, %v834_v50  ;;  %v663_v58 = vrot.slane %v661_v26, 7  ;;  %v838_v3 = vld [vmem:[#allocation2 + $0xbc] sm:$0x1]  ;;  %v4519_v24 = vld [vmem:[#allocation2 + $0x4] sm:$0xf] }
  0x93   : > { %v1243_v56 = vrot.slane %v1242_v47, 4  ;;  %v874_v57 = vld [vmem:[#allocation2 + $0x9c] sm:$0xf]  ;;  %836 = vst [vmem:[#allocation2 + $0xb4] sm:$0xf] %v835_v52  ;;  %vm1348_vm13 = vcmask 1046532  }
  0x94   : > { %v1253_v59 = vrot.slane %v1252_v36, 4  ;;  %v1212_v61 = vshrl.u32 %v874_v57, 16  ;;  %v1215_v62 = vshll.u32 %v874_v57, 16  ;;  %v666_v0 = vor.u32 %v664_v49, %v663_v58  ;;  %vm5030_vm14 = vmor %vm1347_vm12, %vm1348_vm13  ;;  %v1284_v29 = vld [vmem:[#allocation2 + $0xc] sm:$0xe] }
  0x95   : > { %v1248_v40 = vsel %vm4636_vm10, %v1243_v56, %v1247_v35  ;;  %v668_v44 = vrot.slane %v663_v58, 4  ;;  %v4159_v4 = vrot.slane %v1283_v54, 9  ;;  %v1352_v28 = vrot.slane %v4519_v24, 5  ;;  %v4520_v35 = vld [vmem:[#allocation2 + $0x8] sm:$0x1] }
  0x96   : > { %v1258_v55 = vsel %vm4636_vm10, %v1253_v59, %v1257_v32  ;;  %v2771_v63 = vunpack.c.l.b16 %v1248_v40  ;;  %v5020_v5 = vld [vmem:[#allocation2 + $0xa0] sm:$0xf]  ;;  %v1214_v6 = vrot.slane %v1212_v61, 4  ;;  %v1217_v7 = vrot.slane %v1215_v62, 5  ;;  %v4521_v57 = vld [vmem:[#allocation2 + $0x10] sm:$0xf] }
  0x97   : > { %v2772_v8 = vunpack.c.l.b16 %v1258_v55  ;;  %v5022_v10 = vld [vmem:[#allocation2 + $0xa4] sm:$0x1]  ;;  %v1221_v14 = vshll.u32 %v5020_v5, 16  ;;  %v1225_v16 = vshrl.u32 %v5020_v5, 16  ;;  %v667_v20 = vsel %vm4642_vm11, %v659_v37, %v666_v0  ;;  %v1285_v0 = vld [vmem:[#allocation2 + $0x18] sm:$0xe] }
  0x98   : > { %v1218_v22 = vor.u32 %v1217_v7, %v1214_v6  ;;  %v1231_v23 = vshll.u32 %v5022_v10, 16  ;;  %837 = vst.msk [vmem:[#allocation2 + $0xb8] sm:$0xf] %vm301_vm0, %v667_v20  ;;  %v839_v19 = vsel %vm4591_vm3, %v668_v44, %v838_v3  ;;  %v1355_v41 = vrot.slane %v4520_v35, 5  ;;  %v4522_v55 = vld [vmem:[#allocation2 + $0x14] sm:$0x1] }
  0x99   : > { %v2789_v31 = vpack.c.b16 %v2772_v8, %v2771_v63  ;;  %v1223_v33 = vrot.slane %v1221_v14, 5  ;;  %v1227_v43 = vrot.slane %v1225_v16, 4  ;;  %840 = vst [vmem:[#allocation2 + $0xbc] sm:$0x1] %v839_v19  ;;  %v1353_v37 = vsel %vm5030_vm14, %v4159_v4, %v1352_v28 }
  0x9a   : > { %v1219_v45 = vrot.slane %v1218_v22, 4  ;;  %v878_v47 = vld [vmem:[#allocation2 + $0xb4] sm:$0xf]  ;;  %v1354_v26 = vrot.slane %v1352_v28, 4  ;;  %v1233_v50 = vrot.slane %v1231_v23, 5  ;;  %v4160_v56 = vrot.slane %v1284_v29, 9 }
  0x9b   : > { %2819 = vrot.lane.b32.xlu2 %v2789_v31, %s4542_s22  ;;  %v1228_v49 = vor.u32 %v1227_v43, %v1223_v33  ;;  %v1260_v36 = vshrl.u32 %v878_v47, 16  ;;  %v1263_v32 = vshll.u32 %v878_v47, 16  ;;  %v1359_v58 = vrot.slane %v4521_v57, 5 }
  0x9c   : > { %v1224_v52 = vsel %vm4636_vm10, %v1219_v45, %v1223_v33  ;;  %v1356_v54 = vsel %vm5030_vm14, %v1354_v26, %v1355_v41  ;;  %v2823_v40 = vunpack.c.l.b16 %v1353_v37  ;;  %v1362_v63 = vrot.slane %v4522_v55, 5  ;;  %v4523_v33 = vld [vmem:[#allocation2 + $0x1c] sm:$0xf]  ;;  %v1286_v37 = vld [vmem:[#allocation2 + $0x24] sm:$0xe] }
  0x9d   : > { %v1229_v59 = vrot.slane %v1228_v49, 4  ;;  %v1262_v61 = vrot.slane %v1260_v36, 4  ;;  %v1265_v62 = vrot.slane %v1263_v32, 5  ;;  %v2769_v44 = vunpack.c.l.b16 %v1224_v52  ;;  %v4524_v49 = vld [vmem:[#allocation2 + $0x20] sm:$0x1] }
  0x9e   : > { %v1360_v3 = vsel %vm5030_vm14, %v4160_v56, %v1359_v58  ;;  %v1361_v4 = vrot.slane %v1359_v58, 4  ;;  %v2824_v14 = vunpack.c.l.b16 %v1356_v54  ;;  %v4161_v24 = vrot.slane %v1285_v0, 9  ;;  %v1287_v36 = vld [vmem:[#allocation2 + $0x30] sm:$0xe]  ;;  %v1288_v0 = vld [vmem:[#allocation2 + $0x3c] sm:$0xe] }
  0x9f   : > { %v1234_v6 = vsel %vm4636_vm10, %v1229_v59, %v1233_v50  ;;  %v879_v7 = vld [vmem:[#allocation2 + $0xb8] sm:$0xf]  ;;  %v1266_v8 = vor.u32 %v1265_v62, %v1262_v61  ;;  %v2825_v16 = vunpack.c.l.b16 %v1360_v3  ;;  %v1366_v43 = vrot.slane %v4523_v33, 5  ;;  %v4525_v61 = vld [vmem:[#allocation2 + $0x28] sm:$0xf] }
  0xa0   : > { %v2770_v20 = vunpack.c.l.b16 %v1234_v6  ;;  %v895_v22 = vld [vmem:[#allocation2 + $0xbc] sm:$0x1]  ;;  %v1269_v23 = vshll.u32 %v879_v7, 16  ;;  %v1273_v19 = vshrl.u32 %v879_v7, 16  ;;  %v1363_v31 = vsel %vm5030_vm14, %v1361_v4, %v1362_v63  ;;  %v4526_v4 = vld [vmem:[#allocation2 + $0x2c] sm:$0x1] }
  0xa1   : > { %v1267_v28 = vrot.slane %v1266_v8, 4  ;;  %v1279_v29 = vshll.u32 %v895_v22, 16  ;;  %v2826_v47 = vunpack.c.l.b16 %v1363_v31  ;;  %v1368_v26 = vrot.slane %v1366_v43, 4 }
  0xa2   : > { %v2788_v35 = vpack.c.b16 %v2770_v20, %v2769_v44  ;;  %v1271_v41 = vrot.slane %v1269_v23, 5  ;;  %v1275_v45 = vrot.slane %v1273_v19, 4  ;;  %v1369_v50 = vrot.slane %v4524_v49, 5 }
  0xa3   : > { %v1281_v54 = vrot.slane %v1279_v29, 5  ;;  %v2856_v56 = vpack.c.b16 %v2826_v47, %v2825_v16  ;;  %v2855_v57 = vpack.c.b16 %v2824_v14, %v2823_v40  ;;  %v1367_v58 = vsel %vm5030_vm14, %v4161_v24, %v1366_v43  ;;  %v4527_v40 = vld [vmem:[#allocation2 + $0x34] sm:$0xf]  ;;  %v4528_v14 = vld [vmem:[#allocation2 + $0x38] sm:$0x1] }
  0xa4   : > { %2817 = vrot.lane.b32.xlu1 %v2788_v35, %s4542_s22  ;;  %v1272_v32 = vsel %vm4636_vm10, %v1267_v28, %v1271_v41  ;;  %v1276_v52 = vor.u32 %v1275_v45, %v1271_v41  ;;  %v4162_v59 = vrot.slane %v1286_v37, 9  ;;  %v1373_v62 = vrot.slane %v4525_v61, 5  ;;  %v1289_v24 = vld [vmem:[#allocation2 + $0x48] sm:$0xe]  ;;  %v4529_v41 = vld [vmem:[#allocation2 + $0x40] sm:$0xf] }
  0xa5   : > { %v2773_v3 = vunpack.c.l.b16 %v1272_v32  ;;  %2873 = vrot.lane.b32.xlu2 %v2856_v56, %s4543_s23  ;;  %v1376_v55 = vrot.slane %v4526_v4, 5  ;;  %v4163_v63 = vrot.slane %v1287_v36, 9  ;;  %v1370_v6 = vsel %vm5030_vm14, %v1368_v26, %v1369_v50  ;;  %v4530_v47 = vld [vmem:[#allocation2 + $0x44] sm:$0x1]  ;;  %v1290_v32 = vld [vmem:[#allocation2 + $0x54] sm:$0xe] }
  0xa6   : > { %v1277_v44 = vrot.slane %v1276_v52, 4  ;;  %v1375_v7 = vrot.slane %v1373_v62, 4  ;;  %v1380_v8 = vrot.slane %v4527_v40, 5  ;;  %v1383_v16 = vrot.slane %v4528_v14, 5  ;;  %v1292_v14 = vld [vmem:[#allocation2 + $0x6c] sm:$0xe] }
  0xa7   : > { %v2827_v22 = vunpack.c.l.b16 %v1367_v58  ;;  %v1374_v23 = vsel %vm5030_vm14, %v4162_v59, %v1373_v62  ;;  %v4164_v19 = vrot.slane %v1288_v0, 9  ;;  %v2828_v43 = vunpack.c.l.b16 %v1370_v6 }
  0xa8   : > { %v1282_v20 = vsel %vm4636_vm10, %v1277_v44, %v1281_v54  ;;  %v1377_v29 = vsel %vm5030_vm14, %v1375_v7, %v1376_v55  ;;  %v1381_v31 = vsel %vm5030_vm14, %v4163_v63, %v1380_v8  ;;  %v1382_v33 = vrot.slane %v1380_v8, 4 }
  0xa9   : > { %v2774_v28 = vunpack.c.l.b16 %v1282_v20  ;;  %v2831_v35 = vunpack.c.l.b16 %v1381_v31  ;;  %v1387_v45 = vrot.slane %v4529_v41, 5  ;;  %v1390_v37 = vrot.slane %v4530_v47, 5 }
  0xaa   : > { %v1384_v49 = vsel %vm5030_vm14, %v1382_v33, %v1383_v16  ;;  %v4165_v50 = vrot.slane %v1289_v24, 9  ;;  %v1394_v36 = vrot.slane %v4791_v9, 5  ;;  %v2829_v52 = vunpack.c.l.b16 %v1374_v23 }
  0xab   : > { %v2790_v26 = vpack.c.b16 %v2774_v28, %v2773_v3  ;;  %v2830_v54 = vunpack.c.l.b16 %v1377_v29  ;;  %v2832_v56 = vunpack.c.l.b16 %v1384_v49  ;;  %v1389_v58 = vrot.slane %v1387_v45, 4  ;;  %v1291_v3 = vld [vmem:[#allocation2 + $0x60] sm:$0xe] }
  0xac   : > { %2871 = vrot.lane.b32.xlu1 %v2855_v57, %s4543_s23  ;;  %v1388_v59 = vsel %vm5030_vm14, %v4164_v19, %v1387_v45  ;;  %v1395_v61 = vsel %vm5030_vm14, %v4165_v50, %v1394_v36  ;;  %v1396_v62 = vrot.slane %v1394_v36, 4  ;;  %v1397_v0 = vrot.slane %v4794_v13, 5  ;;  %v1293_v19 = vld [vmem:[#allocation2 + $0x78] sm:$0xe] }
  0xad   : > { %2821 = vrot.lane.b32.xlu0 %v2790_v26, %s4542_s22  ;;  %v2859_v44 = vpack.c.b16 %v2832_v56, %v2831_v35  ;;  %v1391_v9 = vsel %vm5030_vm14, %v1389_v58, %v1390_v37  ;;  %v4166_v57 = vrot.slane %v1290_v32, 9  ;;  %v2857_v4 = vpack.c.b16 %v2828_v43, %v2827_v22  ;;  %v1294_v37 = vld [vmem:[#allocation2 + $0x84] sm:$0xe] }
  0xae   : > { %v1398_v55 = vsel %vm5030_vm14, %v1396_v62, %v1397_v0  ;;  %v1401_v63 = vrot.slane %v4851_v51, 5  ;;  %v1404_v6 = vrot.slane %v4861_v38, 5  ;;  %v2858_v7 = vpack.c.b16 %v2830_v54, %v2829_v52  ;;  %v1296_v52 = vld [vmem:[#allocation2 + $0x9c] sm:$0xe] }
  0xaf   : > { %2879 = vrot.lane.b32.xlu2 %v2859_v44, %s4543_s23  ;;  %v2833_v40 = vunpack.c.l.b16 %v1388_v59  ;;  %v2835_v8 = vunpack.c.l.b16 %v1395_v61  ;;  %v1408_v13 = vrot.slane %v4821_v60, 5  ;;  %v2834_v16 = vunpack.c.l.b16 %v1391_v9  ;;  %v1295_v59 = vld [vmem:[#allocation2 + $0x90] sm:$0xe] }
  0xb0   : > { %v1402_v20 = vsel %vm5030_vm14, %v4166_v57, %v1401_v63  ;;  %v1403_v22 = vrot.slane %v1401_v63, 4  ;;  %v4167_v23 = vrot.slane %v1291_v3, 9  ;;  %v2836_v24 = vunpack.c.l.b16 %v1398_v55 }
  0xb1   : > { %v2837_v28 = vunpack.c.l.b16 %v1402_v20  ;;  %v1410_v51 = vrot.slane %v1408_v13, 4  ;;  %v1411_v38 = vrot.slane %v4815_v53, 5  ;;  %v4168_v31 = vrot.slane %v1292_v14, 9  ;;  %v5123_v20 = vld [vmem:[#allocation2 + $0x10] sm:$0xf] }
  0xb2   : > { %v1405_v29 = vsel %vm5030_vm14, %v1403_v22, %v1404_v6  ;;  %v1415_v33 = vrot.slane %v4888_v42, 5  ;;  %v1418_v60 = vrot.slane %v4890_v48, 5  ;;  %v4169_v35 = vrot.slane %v1293_v19, 9  ;;  %v1297_v19 = vld [vmem:[#allocation2 + $0xa8] sm:$0xe] }
  0xb3   : > { %v2838_v43 = vunpack.c.l.b16 %v1405_v29  ;;  %v1422_v41 = vrot.slane %v4939_v18, 5  ;;  %v1409_v45 = vsel %vm5030_vm14, %v4167_v23, %v1408_v13  ;;  %v1425_v47 = vrot.slane %v4935_v12, 5  ;;  %v1462_v13 = vld [vmem:[#allocation2 + $0xc] sm:$0xf] }
  0xb4   : > { %2877 = vrot.lane.b32.xlu1 %v2858_v7, %s4543_s23  ;;  %v1417_v53 = vrot.slane %v1415_v33, 4  ;;  %v1412_v42 = vsel %vm5030_vm14, %v1410_v51, %v1411_v38  ;;  %v2860_v50 = vpack.c.b16 %v2834_v16, %v2833_v40  ;;  %v2861_v36 = vpack.c.b16 %v2836_v24, %v2835_v8  ;;  %v5129_v24 = vld [vmem:[#allocation2 + $0x14] sm:$0x1] }
  0xb5   : > { %2875 = vrot.lane.b32.xlu0 %v2857_v4, %s4543_s23  ;;  %v2862_v26 = vpack.c.b16 %v2838_v43, %v2837_v28  ;;  %v1423_v48 = vsel %vm5030_vm14, %v4169_v35, %v1422_v41  ;;  %v1424_v49 = vrot.slane %v1422_v41, 4  ;;  %v1416_v18 = vsel %vm5030_vm14, %v4168_v31, %v1415_v33 }
  0xb6   : > { %v1419_v32 = vsel %vm5030_vm14, %v1417_v53, %v1418_v60  ;;  %v2843_v54 = vunpack.c.l.b16 %v1423_v48  ;;  %v4170_v56 = vrot.slane %v1294_v37, 9  ;;  %v1429_v58 = vrot.slane %v4916_v30, 5 }
  0xb7   : > { %2885 = vrot.lane.b32.xlu2 %v2862_v26, %s4543_s23  ;;  %v1426_v12 = vsel %vm5030_vm14, %v1424_v49, %v1425_v47  ;;  %v2839_v61 = vunpack.c.l.b16 %v1409_v45  ;;  %v2840_v62 = vunpack.c.l.b16 %v1412_v42  ;;  %v1436_v44 = vrot.slane %v4971_v11, 5  ;;  %v2071_v47 = vld [vmem:[#allocation2 + $0x18] sm:$0xf]  ;;  %v5138_v49 = vld [vmem:[#allocation2 + $0x1c] sm:$0xf] }
  0xb8   : > { %v2844_v0 = vunpack.c.l.b16 %v1426_v12  ;;  %v2841_v9 = vunpack.c.l.b16 %v1416_v18  ;;  %v1431_v57 = vrot.slane %v1429_v58, 4  ;;  %v1432_v3 = vrot.slane %v4921_v17, 5 }
  0xb9   : > { %v4172_v4 = vrot.slane %v1296_v52, 9  ;;  %v2842_v55 = vunpack.c.l.b16 %v1419_v32  ;;  %v4171_v63 = vrot.slane %v1295_v59, 9  ;;  %v1438_v6 = vrot.slane %v1436_v44, 4 }
  0xba   : > { %v1439_v7 = vrot.slane %v4975_v25, 5  ;;  %v2865_v40 = vpack.c.b16 %v2844_v0, %v2843_v54  ;;  %v1430_v30 = vsel %vm5030_vm14, %v4170_v56, %v1429_v58  ;;  %v1443_v8 = vrot.slane %v5020_v5, 5 }
  0xbb   : > { %v1446_v11 = vrot.slane %v5022_v10, 5  ;;  %v2863_v17 = vpack.c.b16 %v2840_v62, %v2839_v61  ;;  %v1433_v14 = vsel %vm5030_vm14, %v1431_v57, %v1432_v3  ;;  %v2864_v22 = vpack.c.b16 %v2842_v55, %v2841_v9  ;;  %v5145_v61 = vld [vmem:[#allocation2 + $0x20] sm:$0x1] }
  0xbc   : > { %2883 = vrot.lane.b32.xlu1 %v2861_v36, %s4543_s23  ;;  %v1444_v25 = vsel %vm5030_vm14, %v4172_v4, %v1443_v8  ;;  %v1445_v16 = vrot.slane %v1443_v8, 4  ;;  %v2845_v23 = vunpack.c.l.b16 %v1430_v30  ;;  %v1437_v5 = vsel %vm5030_vm14, %v4171_v63, %v1436_v44  ;;  %v1894_v4 = vld [vmem:[#allocation2 + $0xc] sm:$0xe] }
  0xbd   : > { %2881 = vrot.lane.b32.xlu0 %v2860_v50, %s4543_s23  ;;  %v1440_v10 = vsel %vm5030_vm14, %v1438_v6, %v1439_v7  ;;  %v2849_v51 = vunpack.c.l.b16 %v1444_v25  ;;  %v1450_v38 = vrot.slane %v5001_v15, 5  ;;  %v1511_v29 = vshrl.u32 %v1462_v13, 16 }
  0xbe   : > { %v1447_v28 = vsel %vm5030_vm14, %v1445_v16, %v1446_v11  ;;  %v2846_v31 = vunpack.c.l.b16 %v1433_v14  ;;  %v1514_v60 = vshll.u32 %v1462_v13, 16  ;;  %v1520_v43 = vshll.u32 %v5123_v20, 16  ;;  %v1464_v14 = vld [vmem:[#allocation2 + $0x18] sm:$0xf] }
  0xbf   : > { %2891 = vrot.lane.b32.xlu2 %v2865_v40, %s4543_s23  ;;  %v2850_v33 = vunpack.c.l.b16 %v1447_v28  ;;  %v4173_v35 = vrot.slane %v1297_v19, 9  ;;  %v1513_v41 = vrot.slane %v1511_v29, 4  ;;  %v1524_v45 = vshrl.u32 %v5123_v20, 16 }
  0xc0   : > { %v1530_v53 = vshll.u32 %v5129_v24, 16  ;;  %v2847_v37 = vunpack.c.l.b16 %v1437_v5  ;;  %v2848_v26 = vunpack.c.l.b16 %v1440_v10  ;;  %v1516_v42 = vrot.slane %v1514_v60, 5  ;;  %v2503_v5 = vld [vmem:[#allocation2 + $0x18] sm:$0xe] }
  0xc1   : > { %v1522_v48 = vrot.slane %v1520_v43, 5  ;;  %v2868_v15 = vpack.c.b16 %v2850_v33, %v2849_v51  ;;  %v1452_v50 = vrot.slane %v1450_v38, 4  ;;  %v1453_v36 = vrot.slane %v5007_v27, 5  ;;  %v5161_v51 = vld [vmem:[#allocation2 + $0x1c] sm:$0xf] }
  0xc2   : > { %v1526_v18 = vrot.slane %v1524_v45, 4  ;;  %v2866_v32 = vpack.c.b16 %v2846_v31, %v2845_v23  ;;  %v1517_v52 = vor.u32 %v1516_v42, %v1513_v41  ;;  %v2120_v12 = vshrl.u32 %v2071_v47, 16 }
  0xc3   : > { %v2123_v54 = vshll.u32 %v2071_v47, 16  ;;  %v1451_v56 = vsel %vm5030_vm14, %v4173_v35, %v1450_v38  ;;  %v1532_v59 = vrot.slane %v1530_v53, 5  ;;  %v2129_v62 = vshll.u32 %v5138_v49, 16 }
  0xc4   : > { %2889 = vrot.lane.b32.xlu1 %v2864_v22, %s4543_s23  ;;  %v1527_v58 = vor.u32 %v1526_v18, %v1522_v48  ;;  %v2867_v0 = vpack.c.b16 %v2848_v26, %v2847_v37  ;;  %v1518_v44 = vrot.slane %v1517_v52, 4  ;;  %v2122_v9 = vrot.slane %v2120_v12, 4  ;;  %v1470_v26 = vld [vmem:[#allocation2 + $0x3c] sm:$0xf] }
  0xc5   : > { %2887 = vrot.lane.b32.xlu0 %v2863_v17, %s4543_s23  ;;  %v2125_v27 = vrot.slane %v2123_v54, 5  ;;  %v1454_v57 = vsel %vm5030_vm14, %v1452_v50, %v1453_v36  ;;  %v2131_v55 = vrot.slane %v2129_v62, 5  ;;  %v2133_v63 = vshrl.u32 %v5138_v49, 16  ;;  %v5175_v50 = vld [vmem:[#allocation2 + $0x20] sm:$0x1] }
  0xc6   : > { %v1528_v3 = vrot.slane %v1527_v58, 4  ;;  %v1523_v6 = vsel %vm4636_vm10, %v1518_v44, %v1522_v48  ;;  %v1960_v7 = vrot.slane %v5123_v20, 5  ;;  %v2139_v30 = vshll.u32 %v5145_v61, 16  ;;  %v4451_v48 = vld [vmem:[#allocation2 + $0xc] sm:$0xff]  ;;  %v5182_v54 = vld [vmem:[#allocation2 + $0x40] sm:$0xf] }
  0xc7   : > { %2897 = vrot.lane.b32.xlu2 %v2868_v15, %s4543_s23  ;;  %v2126_v40 = vor.u32 %v2125_v27, %v2122_v9  ;;  %v2851_v8 = vunpack.c.l.b16 %v1451_v56  ;;  %v2999_v13 = vunpack.c.l.b16 %v1523_v6  ;;  %v2135_v17 = vrot.slane %v2133_v63, 4  ;;  %v5194_v6 = vld [vmem:[#allocation2 + $0x44] sm:$0x1] }
  0xc8   : > { %v1533_v11 = vsel %vm4636_vm10, %v1528_v3, %v1532_v59  ;;  %v2852_v25 = vunpack.c.l.b16 %v1454_v57  ;;  %v4175_v22 = vrot.slane %v1894_v4, 9  ;;  %v1963_v10 = vrot.slane %v5129_v24, 5  ;;  %v5167_v24 = vpop.permute.xlu2 %2799 }
  0xc9   : > { %v3000_v16 = vunpack.c.l.b16 %v1533_v11  ;;  %v2127_v23 = vrot.slane %v2126_v40, 4  ;;  %v2136_v20 = vor.u32 %v2135_v17, %v2131_v55  ;;  %v2141_v19 = vrot.slane %v2139_v30, 5  ;;  %v1895_v40 = vld [vmem:[#allocation2 + $0x18] sm:$0xe] }
  0xca   : > { %v2569_v28 = vrot.slane %v5138_v49, 5  ;;  %v1962_v29 = vrot.slane %v1960_v7, 4  ;;  %v1535_v33 = vshrl.u32 %v1464_v14, 16  ;;  %v4191_v43 = vrot.slane %v2503_v5, 9 }
  0xcb   : > { %v3031_v38 = vpack.c.b16 %v3000_v16, %v2999_v13  ;;  %v2132_v31 = vsel %vm4636_vm10, %v2127_v23, %v2131_v55  ;;  %v2137_v60 = vrot.slane %v2136_v20, 4  ;;  %v2572_v41 = vrot.slane %v5145_v61, 5 }
  0xcc   : > { %2895 = vrot.lane.b32.xlu1 %v2867_v0, %s4543_s23  ;;  %v2571_v35 = vrot.slane %v2569_v28, 4  ;;  %v3255_v45 = vunpack.c.l.b16 %v2132_v31  ;;  %v1537_v53 = vrot.slane %v1535_v33, 4  ;;  %v1538_v47 = vshll.u32 %v1464_v14, 16  ;;  %v1898_v31 = vld [vmem:[#allocation2 + $0x3c] sm:$0xe] }
  0xcd   : > { %2893 = vrot.lane.b32.xlu0 %v2866_v32, %s4543_s23  ;;  %v1544_v37 = vshll.u32 %v5161_v51, 16  ;;  %v2869_v42 = vpack.c.b16 %v2852_v25, %v2851_v8  ;;  %v1961_v49 = vsel %vm5030_vm14, %v4175_v22, %v1960_v7  ;;  %v2142_v15 = vsel %vm4636_vm10, %v2137_v60, %v2141_v19  ;;  %v4467_v22 = vld [vmem:[#allocation2 + $0x18] sm:$0xff] }
  0xce   : > { %v1548_v36 = vshrl.u32 %v5161_v51, 16  ;;  %v1964_v18 = vsel %vm5030_vm14, %v1962_v29, %v1963_v10  ;;  %v3256_v32 = vunpack.c.l.b16 %v2142_v15  ;;  %v1540_v52 = vrot.slane %v1538_v47, 5 }
  0xcf   : > { %3047 = vrot.lane.b32.xlu2 %v3031_v38, %s4544_s24  ;;  %v5180_v12 = vrot.slane %v1544_v37, 5  ;;  %v2570_v56 = vsel %vm5030_vm14, %v4191_v43, %v2569_v28  ;;  %v2573_v58 = vsel %vm5030_vm14, %v2571_v35, %v2572_v41  ;;  %v1607_v61 = vshrl.u32 %v1470_v26, 16  ;;  %v2073_v35 = vld [vmem:[#allocation2 + $0x24] sm:$0xf]  ;;  %v5206_v41 = vld [vmem:[#allocation2 + $0x28] sm:$0xf] }
  0xd0   : > { %v1550_v59 = vrot.slane %v1548_v36, 4  ;;  %v3287_v62 = vpack.c.b16 %v3256_v32, %v3255_v45  ;;  %v1541_v0 = vor.u32 %v1540_v52, %v1537_v53  ;;  %v1554_v44 = vshll.u32 %v5175_v50, 16  ;;  %v5198_v5 = vpop.permute.xlu2 %2801  ;;  %v4455_v45 = vld [vmem:[#allocation2 + $0x3c] sm:$0xff] }
  0xd1   : > { %v1610_v9 = vshll.u32 %v1470_v26, 16  ;;  %v1609_v57 = vrot.slane %v1607_v61, 4  ;;  %v1616_v3 = vshll.u32 %v5182_v54, 16  ;;  %v1620_v4 = vshrl.u32 %v5182_v54, 16  ;;  %v4452_v61 = vld [vmem:[#allocation2 + $0x18] sm:$0xff] }
  0xd2   : > { %v1551_v27 = vor.u32 %v1550_v59, %v5180_v12  ;;  %v3079_v55 = vunpack.c.l.b16 %v1961_v49  ;;  %v3080_v63 = vunpack.c.l.b16 %v1964_v18  ;;  %v3335_v30 = vunpack.c.l.b16 %v2570_v56  ;;  %v5224_v56 = vld [vmem:[#allocation2 + $0x2c] sm:$0x1]  ;;  %v2079_v59 = vld [vmem:[#allocation2 + $0x48] sm:$0xf] }
  0xd3   : > { %v1612_v7 = vrot.slane %v1610_v9, 5  ;;  %v1618_v8 = vrot.slane %v1616_v3, 5  ;;  %v1622_v11 = vrot.slane %v1620_v4, 4  ;;  %v1967_v13 = vrot.slane %v5161_v51, 5 }
  0xd4   : > { %2967 = vrot.lane.b32.xlu1 %v4451_v48, %s4545_s25  ;;  %v3336_v17 = vunpack.c.l.b16 %v2573_v58  ;;  %v1542_v14 = vrot.slane %v1541_v0, 4  ;;  %v1556_v25 = vrot.slane %v1554_v44, 5  ;;  %v1552_v23 = vrot.slane %v1551_v27, 4  ;;  %v5228_v27 = vld [vmem:[#allocation2 + $0x4c] sm:$0xf] }
  0xd5   : > { %2899 = vrot.lane.b32.xlu0 %v2869_v42, %s4543_s23  ;;  %v1613_v16 = vor.u32 %v1612_v7, %v1609_v57  ;;  %v1623_v10 = vor.u32 %v1622_v11, %v1618_v8  ;;  %v1626_v20 = vshll.u32 %v5194_v6, 16  ;;  %v4176_v19 = vrot.slane %v1895_v40, 9 }
  0xd6   : > { %v3111_v28 = vpack.c.b16 %v3080_v63, %v3079_v55  ;;  %v1969_v29 = vrot.slane %v1967_v13, 4  ;;  %v1970_v51 = vrot.slane %v5175_v50, 5  ;;  %v1988_v33 = vrot.slane %v5182_v54, 5 }
  0xd7   : > { %3303 = vrot.lane.b32.xlu2 %v3287_v62, %s4546_s26  ;;  %v1614_v38 = vrot.slane %v1613_v16, 4  ;;  %v3367_v60 = vpack.c.b16 %v3336_v17, %v3335_v30  ;;  %v1547_v43 = vsel %vm4636_vm10, %v1542_v14, %v5180_v12  ;;  %v1557_v53 = vsel %vm4636_vm10, %v1552_v23, %v1556_v25 }
  0xd8   : > { %v1624_v47 = vrot.slane %v1623_v10, 4  ;;  %v1628_v37 = vrot.slane %v1626_v20, 5  ;;  %v1968_v26 = vsel %vm5030_vm14, %v4176_v19, %v1967_v13  ;;  %v1971_v48 = vsel %vm5030_vm14, %v1969_v29, %v1970_v51  ;;  %v5239_v13 = vld [vmem:[#allocation2 + $0x50] sm:$0x1] }
  0xd9   : > { %v1619_v42 = vsel %vm4636_vm10, %v1614_v38, %v1618_v8  ;;  %v4179_v49 = vrot.slane %v1898_v31, 9  ;;  %v1991_v15 = vrot.slane %v5194_v6, 5  ;;  %v1990_v50 = vrot.slane %v1988_v33, 4  ;;  %v5236_v6 = vpop.permute.xlu2 %2807  ;;  %v2504_v8 = vld [vmem:[#allocation2 + $0x24] sm:$0xe]  ;;  %v4439_v29 = vld [vmem:[#allocation2 + $0x30] sm:$0xff] }
  0xda   : > { %v2144_v36 = vshrl.u32 %v2073_v35, 16  ;;  %v2147_v18 = vshll.u32 %v2073_v35, 16  ;;  %v2153_v32 = vshll.u32 %v5206_v41, 16  ;;  %v5220_v52 = vunpack.c.l.b16 %v1547_v43  ;;  %v4440_v35 = vld [vmem:[#allocation2 + $0x3c] sm:$0xff] }
  0xdb   : > { %v5222_v12 = vunpack.c.l.b16 %v1557_v53  ;;  %v3081_v54 = vunpack.c.l.b16 %v1968_v26  ;;  %v2157_v58 = vshrl.u32 %v5206_v41, 16  ;;  %v3082_v62 = vunpack.c.l.b16 %v1971_v48 }
  0xdc   : > { %3223 = vrot.lane.b32.xlu1 %v4467_v22, %s4547_s27  ;;  %v2146_v0 = vrot.slane %v2144_v36, 4  ;;  %v2149_v44 = vrot.slane %v2147_v18, 5  ;;  %v2155_v9 = vrot.slane %v2153_v32, 5  ;;  %v1629_v57 = vsel %vm4636_vm10, %v1624_v47, %v1628_v37  ;;  %v2507_v36 = vld [vmem:[#allocation2 + $0x48] sm:$0xe]  ;;  %v2792_v32 = vpop.permute.xlu0 %2791 }
  0xdd   : > { %3127 = vrot.lane.b32.xlu0 %v3111_v28, %s4548_s28  ;;  %v3007_v3 = vunpack.c.l.b16 %v1619_v42  ;;  %v1989_v4 = vsel %vm5030_vm14, %v4179_v49, %v1988_v33  ;;  %v2159_v55 = vrot.slane %v2157_v58, 4  ;;  %v1992_v63 = vsel %vm5030_vm14, %v1990_v50, %v1991_v15 }
  0xde   : > { %v2150_v7 = vor.u32 %v2149_v44, %v2146_v0  ;;  %v2163_v40 = vshll.u32 %v5224_v56, 16  ;;  %v2216_v30 = vshrl.u32 %v2079_v59, 16  ;;  %v2219_v17 = vshll.u32 %v2079_v59, 16  ;;  %v1478_v59 = vld [vmem:[#allocation2 + $0x6c] sm:$0xf] }
  0xdf   : > { %2975 = vrot.lane.b32.xlu2 %v4455_v45, %s4545_s25  ;;  %v2160_v11 = vor.u32 %v2159_v55, %v2155_v9  ;;  %v2225_v14 = vshll.u32 %v5228_v27, 16  ;;  %v2229_v25 = vshrl.u32 %v5228_v27, 16  ;;  %v3008_v16 = vunpack.c.l.b16 %v1629_v57  ;;  %v4435_v45 = vld [vmem:[#allocation2] sm:$0xff]  ;;  %v1479_v0 = vld [vmem:[#allocation2 + $0x70] sm:$0xf] }
  0xe0   : > { %v3112_v22 = vpack.c.b16 %v3082_v62, %v3081_v54  ;;  %v2151_v23 = vrot.slane %v2150_v7, 4  ;;  %v2218_v10 = vrot.slane %v2216_v30, 4  ;;  %v2221_v20 = vrot.slane %v2219_v17, 5 }
  0xe1   : > { %v5245_v19 = vrot.slane %v2225_v14, 5  ;;  %v2231_v28 = vrot.slane %v2229_v25, 4  ;;  %v4192_v38 = vrot.slane %v2504_v8, 9  ;;  %v3087_v51 = vunpack.c.l.b16 %v1989_v4 }
  0xe2   : > { %v3088_v31 = vunpack.c.l.b16 %v1992_v63  ;;  %v2235_v33 = vshll.u32 %v5239_v13, 16  ;;  %v2576_v43 = vrot.slane %v5206_v41, 5  ;;  %v2161_v53 = vrot.slane %v2160_v11, 4 }
  0xe3   : > { %v2165_v47 = vrot.slane %v2163_v40, 5  ;;  %v2222_v37 = vor.u32 %v2221_v20, %v2218_v10  ;;  %v2232_v26 = vor.u32 %v2231_v28, %v5245_v19  ;;  %vm3415_vm15 = vcmask 64512   ;;  %v5286_v40 = vpop.permute.xlu1 %2795  ;;  %v4468_v10 = vld [vmem:[#allocation2 + $0x24] sm:$0xff] }
  0xe4   : > { %2969 = vrot.lane.b32.xlu1 %v4452_v61, %s4545_s25  ;;  %v2578_v42 = vrot.slane %v2576_v43, 4  ;;  %v2579_v48 = vrot.slane %v5224_v56, 5  ;;  %v3032_v49 = vpack.c.b16 %v5222_v12, %v5220_v52  ;;  %v2156_v41 = vsel %vm4636_vm10, %v2151_v23, %v2155_v9  ;;  %v5275_v9 = vpop.permute.xlu2 %2813  ;;  %v1902_v23 = vld [vmem:[#allocation2 + $0x6c] sm:$0xe] }
  0xe5   : > { %3383 = vrot.lane.b32.xlu0 %v3367_v60, %s4549_s29  ;;  %v3035_v60 = vpack.c.b16 %v3008_v16, %v3007_v3  ;;  %v2223_v15 = vrot.slane %v2222_v37, 4  ;;  %v2577_v50 = vsel %vm5030_vm14, %v4192_v38, %v2576_v43  ;;  %v5260_v18 = vsel %vm3415_vm15, %v4439_v29, %v5167_v24  ;;  %v4471_v24 = vld [vmem:[#allocation2 + $0x48] sm:$0xff]  ;;  %v5279_v3 = vld [vmem:[#allocation2 + $0x74] sm:$0x1]  ;;  %v5298_v37 = vld [vmem:[#allocation2 + $0x7c] sm:$0xf] }
  0xe6   : > { %v2233_v54 = vrot.slane %v2232_v26, 4  ;;  %v2237_v58 = vrot.slane %v2235_v33, 5  ;;  %v2597_v56 = vrot.slane %v5228_v27, 5  ;;  %v5265_v52 = vsel %vm3415_vm15, %v4440_v35, %v5198_v5  ;;  %v2087_v33 = vld [vmem:[#allocation2 + $0x78] sm:$0xf]  ;;  %v4436_v43 = vld [vmem:[#allocation2 + $0xc] sm:$0xff] }
  0xe7   : > { %3129 = vrot.lane.b32.xlu2 %v3112_v22, %s4548_s28  ;;  %v3115_v12 = vpack.c.b16 %v3088_v31, %v3087_v51  ;;  %v5268_v61 = vsel %vm3415_vm15, %v4435_v45, %v2792_v32  ;;  %v2166_v62 = vsel %vm4636_vm10, %v2161_v53, %v2165_v47  ;;  %v5273_v44 = vunpack.c.l.b16 %v2156_v41 }
  0xe8   : > { %v2580_v27 = vsel %vm5030_vm14, %v2578_v42, %v2579_v48  ;;  %v3337_v5 = vunpack.c.l.b16 %v2577_v50  ;;  %v4195_v57 = vrot.slane %v2507_v36, 9  ;;  %v2228_v4 = vsel %vm4636_vm10, %v2223_v15, %v5245_v19  ;;  %v2794_v36 = vpop.permute.xlu0 %2793 }
  0xe9   : > { %v2600_v55 = vrot.slane %v5239_v13, 5  ;;  %v1703_v63 = vshrl.u32 %v1478_v59, 16  ;;  %v1706_v7 = vshll.u32 %v1478_v59, 16  ;;  %v2238_v30 = vsel %vm4636_vm10, %v2233_v54, %v2237_v58  ;;  %v5305_v58 = vld [vmem:[#allocation2 + $0x80] sm:$0x1] }
  0xea   : > { %v2599_v8 = vrot.slane %v2597_v56, 4  ;;  %v1712_v11 = vshll.u32 %v1479_v0, 16  ;;  %v1716_v17 = vshrl.u32 %v1479_v0, 16  ;;  %v3338_v14 = vunpack.c.l.b16 %v2580_v27 }
  0xeb   : > { %v1705_v25 = vrot.slane %v1703_v63, 4  ;;  %v1708_v16 = vrot.slane %v1706_v7, 5  ;;  %v1722_v22 = vshll.u32 %v5279_v3, 16  ;;  %v2598_v13 = vsel %vm5030_vm14, %v4195_v57, %v2597_v56  ;;  %v5319_v7 = vpop.permute.xlu1 %2797 }
  0xec   : > { %3055 = vrot.lane.b32.xlu1 %v3035_v60, %s4544_s24  ;;  %v1714_v20 = vrot.slane %v1712_v11, 5  ;;  %v1718_v19 = vrot.slane %v1716_v17, 4  ;;  %v2016_v28 = vrot.slane %v1479_v0, 5  ;;  %v5294_v38 = vunpack.c.l.b16 %v2166_v62 }
  0xed   : > { %3049 = vrot.lane.b32.xlu0 %v3032_v49, %s4544_s24  ;;  %v3263_v29 = vunpack.c.l.b16 %v2228_v4  ;;  %v3264_v51 = vunpack.c.l.b16 %v2238_v30  ;;  %v1709_v31 = vor.u32 %v1708_v16, %v1705_v25  ;;  %v2601_v35 = vsel %vm5030_vm14, %v2599_v8, %v2600_v55  ;;  %v5330_v16 = vld [vmem:[#allocation2 + $0x28] sm:$0xf] }
  0xee   : > { %v1719_v45 = vor.u32 %v1718_v19, %v1714_v20  ;;  %v1724_v53 = vrot.slane %v1722_v22, 5  ;;  %v4183_v47 = vrot.slane %v1902_v23, 9  ;;  %v3368_v26 = vpack.c.b16 %v3338_v14, %v3337_v5  ;;  %v1466_v5 = vld [vmem:[#allocation2 + $0x24] sm:$0xf] }
  0xef   : > { %3231 = vrot.lane.b32.xlu2 %v4471_v24, %s4547_s27  ;;  %v3343_v60 = vunpack.c.l.b16 %v2598_v13  ;;  %v1710_v42 = vrot.slane %v1709_v31, 4  ;;  %v2019_v48 = vrot.slane %v5279_v3, 5  ;;  %v2018_v41 = vrot.slane %v2016_v28, 4  ;;  %v5335_v31 = vld [vmem:[#allocation2 + $0x2c] sm:$0x1] }
  0xf0   : > { %v1720_v49 = vrot.slane %v1719_v45, 4  ;;  %v2312_v15 = vshrl.u32 %v2087_v33, 16  ;;  %v2315_v50 = vshll.u32 %v2087_v33, 16  ;;  %v3344_v32 = vunpack.c.l.b16 %v2601_v35  ;;  %v1472_v35 = vld [vmem:[#allocation2 + $0x48] sm:$0xf] }
  0xf1   : > { %v1715_v54 = vsel %vm4636_vm10, %v1710_v42, %v1714_v20  ;;  %v2321_v56 = vshll.u32 %v5298_v37, 16  ;;  %v2325_v59 = vshrl.u32 %v5298_v37, 16  ;;  %v3421_v62 = vsel %vm3415_vm15, %v4436_v43, %v2794_v36  ;;  %v2511_v20 = vld [vmem:[#allocation2 + $0x78] sm:$0xe] }
  0xf2   : > { %v1725_v24 = vsel %vm4636_vm10, %v1720_v49, %v1724_v53  ;;  %v2314_v27 = vrot.slane %v2312_v15, 4  ;;  %v3015_v57 = vunpack.c.l.b16 %v1715_v54  ;;  %v2317_v4 = vrot.slane %v2315_v50, 5 }
  0xf3   : > { %v3016_v3 = vunpack.c.l.b16 %v1725_v24  ;;  %v2323_v55 = vrot.slane %v2321_v56, 5  ;;  %v3291_v63 = vpack.c.b16 %v3264_v51, %v3263_v29  ;;  %v5323_v30 = vsel %vm5030_vm14, %v2018_v41, %v2019_v48 }
  0xf4   : > { %3225 = vrot.lane.b32.xlu1 %v4468_v10, %s4547_s27  ;;  %v2327_v8 = vrot.slane %v2325_v59, 4  ;;  %v2331_v11 = vshll.u32 %v5305_v58, 16  ;;  %v3288_v17 = vpack.c.b16 %v5294_v38, %v5273_v44  ;;  %v5328_v14 = vpack.c.b16 %v3344_v32, %v3343_v60  ;;  %v4459_v32 = vld [vmem:[#allocation2 + $0x6c] sm:$0xff] }
  0xf5   : > { %3135 = vrot.lane.b32.xlu0 %v3115_v12, %s4548_s28  ;;  %v5310_v0 = vpop.permute.xlu2 %2819  ;;  %v5316_v12 = vsel %vm5030_vm14, %v4183_v47, %v2016_v28  ;;  %v2318_v25 = vor.u32 %v2317_v4, %v2314_v27  ;;  %v1559_v22 = vshrl.u32 %v1466_v5, 16  ;;  %v2625_v19 = vrot.slane %v5298_v37, 5  ;;  %v4443_v27 = vld [vmem:[#allocation2 + $0x60] sm:$0xff] }
  0xf6   : > { %v3095_v23 = vunpack.c.l.b16 %v5316_v12  ;;  %v2328_v10 = vor.u32 %v2327_v8, %v2323_v55  ;;  %v2333_v13 = vrot.slane %v2331_v11, 5  ;;  %v3039_v28 = vpack.c.b16 %v3016_v3, %v3015_v57  ;;  %v5353_v57 = vpop.permute.xlu0 %2803  ;;  %v4442_v11 = vld [vmem:[#allocation2 + $0x54] sm:$0xff] }
  0xf7   : > { %3385 = vrot.lane.b32.xlu2 %v3368_v26, %s4549_s29  ;;  %v3096_v29 = vunpack.c.l.b16 %v5323_v30  ;;  %vm3464_vm1 = vcmask 130048   ;;  %v2319_v51 = vrot.slane %v2318_v25, 4  ;;  %v1561_v38 = vrot.slane %v1559_v22, 4  ;;  %v5344_v26 = vld [vmem:[#allocation2 + $0x4c] sm:$0xf] }
  0xf8   : > { %v2329_v44 = vrot.slane %v2328_v10, 4  ;;  %v1562_v33 = vshll.u32 %v1466_v5, 16  ;;  %v1568_v43 = vshll.u32 %v5330_v16, 16  ;;  %v4199_v53 = vrot.slane %v2511_v20, 9  ;;  %v4446_v5 = vld [vmem:[#allocation2 + $0x84] sm:$0xff] }
  0xf9   : > { %v2324_v45 = vsel %vm4636_vm10, %v2319_v51, %v2323_v55  ;;  %v2628_v47 = vrot.slane %v5305_v58, 5  ;;  %v1572_v37 = vshrl.u32 %v5330_v16, 16  ;;  %v2627_v42 = vrot.slane %v2625_v19, 4 }
  0xfa   : > { %v2334_v60 = vsel %vm4636_vm10, %v2329_v44, %v2333_v13  ;;  %v1564_v48 = vrot.slane %v1562_v33, 5  ;;  %v5348_v49 = vrot.slane %v1568_v43, 5  ;;  %v3271_v41 = vunpack.c.l.b16 %v2324_v45 }
  0xfb   : > { %v3272_v15 = vunpack.c.l.b16 %v2334_v60  ;;  %v1574_v50 = vrot.slane %v1572_v37, 4  ;;  %v1578_v36 = vshll.u32 %v5335_v31, 16  ;;  %v1631_v56 = vshrl.u32 %v1472_v35, 16 }
  0xfc   : > { %3311 = vrot.lane.b32.xlu1 %v3291_v63, %s4546_s26  ;;  %v1565_v58 = vor.u32 %v1564_v48, %v1561_v38  ;;  %v1634_v59 = vshll.u32 %v1472_v35, 16  ;;  %v1640_v24 = vshll.u32 %v5344_v26, 16  ;;  %v2626_v4 = vsel %vm5030_vm14, %v4199_v53, %v2625_v19  ;;  %v5361_v63 = vld [vmem:[#allocation2 + $0x50] sm:$0x1]  ;;  %v1899_v48 = vld [vmem:[#allocation2 + $0x48] sm:$0xe] }
  0xfd   : > { %3305 = vrot.lane.b32.xlu0 %v3288_v17, %s4546_s26  ;;  %v1575_v55 = vor.u32 %v1574_v50, %v5348_v49  ;;  %v1644_v8 = vshrl.u32 %v5344_v26, 16  ;;  %v2806_v17 = vpop.permute.xlu1 %2805  ;;  %v2629_v25 = vsel %vm5030_vm14, %v2627_v42, %v2628_v47  ;;  %v1633_v22 = vrot.slane %v1631_v56, 4  ;;  %v4475_v50 = vld [vmem:[#allocation2 + $0x78] sm:$0xff] }
  0xfe   : > { %v1636_v10 = vrot.slane %v1634_v59, 5  ;;  %v5366_v13 = vrot.slane %v1640_v24, 5  ;;  %v1566_v20 = vrot.slane %v1565_v58, 4  ;;  %v1580_v51 = vrot.slane %v1578_v36, 5 }
  0xff   : > { %3063 = vrot.lane.b32.xlu2 %v3039_v28, %s4544_s24  ;;  %v2874_v54 = vpop.permute.xlu2 %2873  ;;  %v1576_v28 = vrot.slane %v1575_v55, 4  ;;  %v1646_v19 = vrot.slane %v1644_v8, 4  ;;  %v3295_v44 = vpack.c.b16 %v3272_v15, %v3271_v41  ;;  %v1650_v33 = vshll.u32 %v5361_v63, 16 }
 0x100   : > { %v5356_v3 = vsel %vm3464_vm1, %v3421_v62, %v2874_v54  ;;  %v1896_v62 = vld [vmem:[#allocation2 + $0x24] sm:$0xe]  ;;  %v1637_v38 = vor.u32 %v1636_v10, %v1633_v22  ;;  %v1974_v43 = vrot.slane %v5330_v16, 5  ;;  %v3351_v35 = vunpack.c.l.b16 %v2626_v4  ;;  %v4456_v22 = vld [vmem:[#allocation2 + $0x48] sm:$0xff] }
 0x101   : > { %v3352_v45 = vunpack.c.l.b16 %v2629_v25  ;;  %v1647_v53 = vor.u32 %v1646_v19, %v5366_v13  ;;  %v4177_v47 = vrot.slane %v1896_v62, 9  ;;  %v5376_v37 = vsel %vm3415_vm15, %v4443_v27, %v5236_v6 }
 0x102   : > { %v5380_v60 = vsel %vm3415_vm15, %v4446_v5, %v5275_v9  ;;  %v5383_v42 = vsel %vm3415_vm15, %v4442_v11, %v2806_v17  ;;  %v1977_v16 = vrot.slane %v5335_v31, 5  ;;  %v3119_v41 = vpack.c.b16 %v3096_v29, %v3095_v23  ;;  %v5401_v29 = vld [vmem:[#allocation2 + $0x34] sm:$0xf]  ;;  %v5410_v5 = vpop.permute.xlu0 %2809  ;;  %v5416_v17 = vld [vmem:[#allocation2 + $0x58] sm:$0xf] }
 0x103   : > { %v1571_v6 = vsel %vm4636_vm10, %v1566_v20, %v5348_v49  ;;  %v1581_v9 = vsel %vm4636_vm10, %v1576_v28, %v1580_v51  ;;  %v1976_v15 = vrot.slane %v1974_v43, 4  ;;  %v1638_v36 = vrot.slane %v1637_v38, 4  ;;  %v5424_v20 = vld [vmem:[#allocation2 + $0x38] sm:$0x1] }
 0x104   : > { %2983 = vrot.lane.b32.xlu1 %v4459_v32, %s4545_s25  ;;  %v1648_v31 = vrot.slane %v1647_v53, 4  ;;  %v1652_v32 = vrot.slane %v1650_v33, 5  ;;  %v1995_v54 = vrot.slane %v5344_v26, 5  ;;  %v5397_v12 = vpack.c.b16 %v3352_v45, %v3351_v35  ;;  %v2081_v26 = vld [vmem:[#allocation2 + $0x54] sm:$0xf]  ;;  %v4453_v45 = vld [vmem:[#allocation2 + $0x24] sm:$0xff] }
 0x105   : > { %3391 = vrot.lane.b32.xlu0 %v5328_v14, %s4549_s29  ;;  %v2075_v14 = vld [vmem:[#allocation2 + $0x30] sm:$0xf]  ;;  %v1975_v30 = vsel %vm5030_vm14, %v4177_v47, %v1974_v43  ;;  %v4180_v23 = vrot.slane %v1899_v48, 9  ;;  %v5403_v56 = vunpack.c.l.b16 %v1571_v6  ;;  %v5405_v59 = vunpack.c.l.b16 %v1581_v9  ;;  %v2812_v25 = vpop.permute.xlu1 %2811 }
 0x106   : > { %v2168_v49 = vshrl.u32 %v2075_v14, 16  ;;  %v1978_v24 = vsel %vm5030_vm14, %v1976_v15, %v1977_v16  ;;  %v1998_v27 = vrot.slane %v5361_v63, 5  ;;  %v1997_v55 = vrot.slane %v1995_v54, 4  ;;  %v2505_v35 = vld [vmem:[#allocation2 + $0x30] sm:$0xe] }
 0x107   : > { %3319 = vrot.lane.b32.xlu2 %v3295_v44, %s4546_s26  ;;  %v2171_v11 = vshll.u32 %v2075_v14, 16  ;;  %v1643_v63 = vsel %vm4636_vm10, %v1638_v36, %v5366_v13  ;;  %v1653_v10 = vsel %vm4636_vm10, %v1648_v31, %v1652_v32  ;;  %v3083_v62 = vunpack.c.l.b16 %v1975_v30  ;;  %v5436_v14 = vld [vmem:[#allocation2 + $0x5c] sm:$0x1] }
 0x108   : > { %v2170_v8 = vrot.slane %v2168_v49, 4  ;;  %v3084_v28 = vunpack.c.l.b16 %v1978_v24  ;;  %v1996_v51 = vsel %vm5030_vm14, %v4180_v23, %v1995_v54  ;;  %v2181_v44 = vshrl.u32 %v5401_v29, 16  ;;  %v4437_v54 = vld [vmem:[#allocation2 + $0x18] sm:$0xff] }
 0x109   : > { %v2880_v58 = vpop.permute.xlu2 %2879  ;;  %v2173_v19 = vrot.slane %v2171_v11, 5  ;;  %v2240_v33 = vshrl.u32 %v2081_v26, 16  ;;  %v2243_v13 = vshll.u32 %v2081_v26, 16  ;;  %v2249_v43 = vshll.u32 %v5416_v17, 16  ;;  %v4445_v30 = vld [vmem:[#allocation2 + $0x78] sm:$0xff] }
 0x10a   : > { %v5414_v4 = vsel %vm3464_vm1, %v5260_v18, %v2880_v58  ;;  %v2177_v18 = vshll.u32 %v5401_v29, 16  ;;  %v1999_v53 = vsel %vm5030_vm14, %v1997_v55, %v1998_v27  ;;  %v2183_v16 = vrot.slane %v2181_v44, 4 }
 0x10b   : > { %v2174_v47 = vor.u32 %v2173_v19, %v2170_v8  ;;  %v2187_v48 = vshll.u32 %v5424_v20, 16  ;;  %v2245_v6 = vrot.slane %v2243_v13, 5  ;;  %v5438_v9 = vrot.slane %v2249_v43, 5  ;;  %v2508_v13 = vld [vmem:[#allocation2 + $0x54] sm:$0xe] }
 0x10c   : > { %3239 = vrot.lane.b32.xlu1 %v4475_v50, %s4547_s27  ;;  %v2179_v38 = vrot.slane %v2177_v18, 5  ;;  %v2253_v15 = vshrl.u32 %v5416_v17, 16  ;;  %v3009_v50 = vunpack.c.l.b16 %v1643_v63  ;;  %v4193_v32 = vrot.slane %v2505_v35, 9  ;;  %v1480_v43 = vld [vmem:[#allocation2 + $0x78] sm:$0xf] }
 0x10d   : > { %3143 = vrot.lane.b32.xlu0 %v3119_v41, %s4548_s28  ;;  %v2242_v41 = vrot.slane %v2240_v33, 4  ;;  %v2175_v36 = vrot.slane %v2174_v47, 4  ;;  %v3010_v49 = vunpack.c.l.b16 %v1653_v10  ;;  %v3089_v58 = vunpack.c.l.b16 %v1996_v51  ;;  %v5451_v10 = vpop.permute.xlu0 %2815 }
 0x10e   : > { %v2184_v31 = vor.u32 %v2183_v16, %v2179_v38  ;;  %v2255_v24 = vrot.slane %v2253_v15, 4  ;;  %v2583_v27 = vrot.slane %v5401_v29, 5  ;;  %v3090_v55 = vunpack.c.l.b16 %v1999_v53 }
 0x10f   : > { %2977 = vrot.lane.b32.xlu2 %v4456_v22, %s4545_s25  ;;  %v2246_v8 = vor.u32 %v2245_v6, %v2242_v41  ;;  %v2259_v11 = vshll.u32 %v5436_v14, 16  ;;  %v3113_v22 = vpack.c.b16 %v3084_v28, %v3083_v62  ;;  %v2189_v18 = vrot.slane %v2187_v48, 5  ;;  %v1486_v6 = vld [vmem:[#allocation2 + $0x9c] sm:$0xf] }
 0x110   : > { %v2185_v63 = vrot.slane %v2184_v31, 4  ;;  %v2256_v19 = vor.u32 %v2255_v24, %v5438_v9  ;;  %v5457_v29 = vsel %vm5030_vm14, %v4193_v32, %v2583_v27  ;;  %v2585_v51 = vrot.slane %v2583_v27, 4  ;;  %v4472_v24 = vld [vmem:[#allocation2 + $0x54] sm:$0xff] }
 0x111   : > { %v2886_v23 = vpop.permute.xlu2 %2885  ;;  %v2586_v44 = vrot.slane %v5424_v20, 5  ;;  %v5462_v62 = vsel %vm3415_vm15, %v4437_v54, %v5286_v40  ;;  %v3448_v28 = vsel %vm3415_vm15, %v4445_v30, %v2812_v25  ;;  %v3036_v35 = vpack.c.b16 %v3010_v49, %v3009_v50  ;;  %v5470_v20 = vld [vmem:[#allocation2 + $0x7c] sm:$0xf]  ;;  %v5483_v54 = vld [vmem:[#allocation2 + $0xa0] sm:$0xf] }
 0x112   : > { %v5444_v26 = vsel %vm3464_vm1, %v5383_v42, %v2886_v23  ;;  %v2180_v42 = vsel %vm4636_vm10, %v2175_v36, %v2179_v38  ;;  %v2604_v38 = vrot.slane %v5416_v17, 5  ;;  %v2247_v53 = vrot.slane %v2246_v8, 4  ;;  %v4448_v30 = vld [vmem:[#allocation2 + $0x9c] sm:$0xff] }
 0x113   : > { %v2261_v47 = vrot.slane %v2259_v11, 5  ;;  %v2190_v40 = vsel %vm4636_vm10, %v2185_v63, %v2189_v18  ;;  %v5475_v25 = vunpack.c.l.b16 %v2180_v42  ;;  %v2587_v17 = vsel %vm5030_vm14, %v2585_v51, %v2586_v44 }
 0x114   : > { %2971 = vrot.lane.b32.xlu1 %v4453_v45, %s4545_s25  ;;  %v5468_v45 = vpack.c.b16 %v3090_v55, %v3089_v58  ;;  %v4196_v16 = vrot.slane %v2508_v13, 9  ;;  %v2607_v48 = vrot.slane %v5436_v14, 5  ;;  %v1727_v41 = vshrl.u32 %v1480_v43, 16  ;;  %v5496_v55 = vld [vmem:[#allocation2 + $0x80] sm:$0x1] }
 0x115   : > { %3399 = vrot.lane.b32.xlu0 %v5397_v12, %s4549_s29  ;;  %v3033_v12 = vpack.c.b16 %v5405_v59, %v5403_v56  ;;  %v2257_v56 = vrot.slane %v2256_v19, 4  ;;  %v3339_v59 = vunpack.c.l.b16 %v5457_v29  ;;  %v2606_v50 = vrot.slane %v2604_v38, 4 }
 0x116   : > { %v2818_v33 = vpop.permute.xlu1 %2817  ;;  %v1730_v36 = vshll.u32 %v1480_v43, 16  ;;  %v1736_v31 = vshll.u32 %v5470_v20, 16  ;;  %v1740_v32 = vshrl.u32 %v5470_v20, 16  ;;  %v5488_v49 = vunpack.c.l.b16 %v2190_v40 }
 0x117   : > { %3131 = vrot.lane.b32.xlu2 %v3113_v22, %s4548_s28  ;;  %v2252_v14 = vsel %vm4636_vm10, %v2247_v53, %v5438_v9  ;;  %v1729_v58 = vrot.slane %v1727_v41, 4  ;;  %v2262_v27 = vsel %vm4636_vm10, %v2257_v56, %v2261_v47  ;;  %v3340_v63 = vunpack.c.l.b16 %v2587_v17  ;;  %v1903_v47 = vld [vmem:[#allocation2 + $0x78] sm:$0xe]  ;;  %v4469_v56 = vld [vmem:[#allocation2 + $0x30] sm:$0xff]  ;;  %v4438_v41 = vld [vmem:[#allocation2 + $0x24] sm:$0xff] }
 0x118   : > { %v1732_v8 = vrot.slane %v1730_v36, 5  ;;  %v5498_v11 = vrot.slane %v1736_v31, 5  ;;  %v1742_v22 = vrot.slane %v1740_v32, 4  ;;  %v1799_v18 = vshrl.u32 %v1486_v6, 16 }
 0x119   : > { %v2892_v15 = vpop.permute.xlu2 %2891  ;;  %v1802_v19 = vshll.u32 %v1486_v6, 16  ;;  %v1808_v9 = vshll.u32 %v5483_v54, 16  ;;  %v2605_v29 = vsel %vm5030_vm14, %v4196_v16, %v2604_v38  ;;  %v2608_v51 = vsel %vm5030_vm14, %v2606_v50, %v2607_v48  ;;  %v5519_v48 = vld [vmem:[#allocation2 + $0xa4] sm:$0x1]  ;;  %v4441_v6 = vld [vmem:[#allocation2 + $0x48] sm:$0xff] }
 0x11a   : > { %v5486_v23 = vsel %vm3464_vm1, %v3448_v28, %v2892_v15  ;;  %v1733_v44 = vor.u32 %v1732_v8, %v1729_v58  ;;  %v1812_v28 = vshrl.u32 %v5483_v54, 16  ;;  %v1746_v43 = vshll.u32 %v5496_v55, 16  ;;  %v4444_v15 = vld [vmem:[#allocation2 + $0x6c] sm:$0xff] }
 0x11b   : > { %v1804_v53 = vrot.slane %v1802_v19, 5  ;;  %v3457_v40 = vsel %vm3415_vm15, %v4448_v30, %v2818_v33  ;;  %v5515_v38 = vunpack.c.l.b16 %v2252_v14  ;;  %v5517_v17 = vunpack.c.l.b16 %v2262_v27  ;;  %v4449_v58 = vld [vmem:[#allocation2 + $0xa8] sm:$0xff] }
 0x11c   : > { %3057 = vrot.lane.b32.xlu1 %v3036_v35, %s4544_s24  ;;  %v1801_v35 = vrot.slane %v1799_v18, 4  ;;  %v1734_v16 = vrot.slane %v1733_v44, 4  ;;  %v3345_v50 = vunpack.c.l.b16 %v2605_v29  ;;  %v1810_v31 = vrot.slane %v1808_v9, 5 }
 0x11d   : > { %3051 = vrot.lane.b32.xlu0 %v3033_v12, %s4544_s24  ;;  %v1743_v12 = vor.u32 %v1742_v22, %v5498_v11  ;;  %v1814_v32 = vrot.slane %v1812_v28, 4  ;;  %v3369_v33 = vpack.c.b16 %v3340_v63, %v3339_v59  ;;  %v3346_v30 = vunpack.c.l.b16 %v2608_v51 }
 0x11e   : > { %v5502_v42 = vpop.permute.xlu1 %2871  ;;  %v1805_v36 = vor.u32 %v1804_v53, %v1801_v35  ;;  %v4184_v22 = vrot.slane %v1903_v47, 9  ;;  %v2023_v14 = vrot.slane %v5470_v20, 5  ;;  %v5527_v18 = vrot.slane %v1746_v43, 5  ;;  %v2089_v53 = vld [vmem:[#allocation2 + $0x84] sm:$0xf] }
 0x11f   : > { %v5509_v13 = vpop.permute.xlu0 %2821  ;;  %3233 = vrot.lane.b32.xlu2 %v4472_v24, %s4547_s27  ;;  %v5525_v27 = vrot.slane %v1743_v12, 4  ;;  %v1818_v19 = vshll.u32 %v5519_v48, 16  ;;  %v1739_v9 = vsel %vm4636_vm10, %v1734_v16, %v5498_v11  ;;  %v2026_v29 = vrot.slane %v5496_v55, 5 }
 0x120   : > { %6612 = vst [vmem:[#allocation3_spill] sm:$0xff] %v5509_v13  ;;  %v1806_v59 = vrot.slane %v1805_v36, 4  ;;  %v2025_v63 = vrot.slane %v2023_v14, 4  ;;  %v3427_v20 = vsel %vm3415_vm15, %v4438_v41, %v5319_v7  ;;  %v3436_v51 = vsel %vm3415_vm15, %v4441_v6, %v5353_v57 }
 0x121   : > { %v2898_v8 = vpop.permute.xlu2 %2897  ;;  %v5541_v44 = vsel %vm3415_vm15, %v4444_v15, %v5410_v5  ;;  %v1815_v28 = vor.u32 %v1814_v32, %v1810_v31  ;;  %v5547_v11 = vsel %vm3415_vm15, %v4449_v58, %v5310_v0  ;;  %v3289_v55 = vpack.c.b16 %v5488_v49, %v5475_v25  ;;  %v1906_v5 = vld [vmem:[#allocation2 + $0x9c] sm:$0xe] }
 0x122   : > { %v5523_v24 = vsel %vm3464_vm1, %v3457_v40, %v2898_v8  ;;  %v3292_v7 = vpack.c.b16 %v5517_v17, %v5515_v38  ;;  %v5555_v57 = vsel %vm5030_vm14, %v4184_v22, %v2023_v14  ;;  %v5563_v35 = vpack.c.b16 %v3346_v30, %v3345_v50  ;;  %v5582_v17 = vld [vmem:[#allocation2 + $0x88] sm:$0xf]  ;;  %v5591_v30 = vld [vmem:[#allocation2 + $0x8c] sm:$0x1] }
 0x123   : > { %v1749_v25 = vsel %vm4636_vm10, %v5525_v27, %v5527_v18  ;;  %v5569_v49 = vunpack.c.l.b16 %v1739_v9  ;;  %v1811_v40 = vsel %vm4636_vm10, %v1806_v59, %v1810_v31  ;;  %v5580_v38 = vsel %vm5030_vm14, %v2025_v63, %v2026_v29  ;;  %v4463_v31 = vld [vmem:[#allocation2 + $0x9c] sm:$0xff]  ;;  %v2095_v14 = vld [vmem:[#allocation2 + $0xa8] sm:$0xf]  ;;  %v5597_v63 = vld [vmem:[#allocation2 + $0xac] sm:$0xf] }
 0x124   : > { %3227 = vrot.lane.b32.xlu1 %v4469_v56, %s4547_s27  ;;  %v1820_v56 = vrot.slane %v1818_v19, 5  ;;  %v1816_v16 = vrot.slane %v1815_v28, 4  ;;  %v3097_v41 = vunpack.c.l.b16 %v5555_v57  ;;  %v4187_v6 = vrot.slane %v1906_v5, 9  ;;  %v4486_v5 = vld [vmem:[%s6597_s3 + $0x18] sm:$0xff]  ;;  %v4484_v57 = vld [vmem:[%s6597_s3 + $0x8] sm:$0xff] }
 0x125   : > { %3137 = vrot.lane.b32.xlu0 %v5468_v45, %s4548_s28  ;;  %v3703_v45 = vld [vmem:[%s6597_s3 + $0x20] sm:$0xf]  ;;  %vm3764_vm2 = vcmask 1043456   ;;  %v2336_v36 = vshrl.u32 %v2089_v53, 16  ;;  %v2339_v32 = vshll.u32 %v2089_v53, 16  ;;  %v5588_v58 = vunpack.c.l.b16 %v1811_v40 }
 0x126   : > { %v2878_v12 = vpop.permute.xlu1 %2877  ;;  %v3721_v15 = vunpack.c.l.b16 %v3703_v45  ;;  %v3098_v8 = vunpack.c.l.b16 %v5580_v38  ;;  %v2345_v22 = vshll.u32 %v5582_v17, 16  ;;  %v2047_v19 = vrot.slane %v5519_v48, 5  ;;  %v5613_v53 = vld [vmem:[#allocation2 + $0xb0] sm:$0x1] }
 0x127   : > { %v2876_v43 = vpop.permute.xlu0 %2875  ;;  %v5561_v0 = vsel %vm3464_vm1, %v3427_v20, %v2878_v12  ;;  %3387 = vrot.lane.b32.xlu2 %v3369_v33, %s4549_s29  ;;  %v2338_v9 = vrot.slane %v2336_v36, 4  ;;  %v2349_v59 = vshrl.u32 %v5582_v17, 16  ;;  %v1821_v29 = vsel %vm4636_vm10, %v1816_v16, %v1820_v56 }
 0x128   : > { %v5573_v47 = vsel %vm3464_vm1, %v5462_v62, %v2876_v43  ;;  %v2044_v62 = vrot.slane %v5483_v54, 5  ;;  %v3726_v33 = vpack.c.b16 %v3721_v15, %v3721_v15  ;;  %v2341_v54 = vrot.slane %v2339_v32, 5 }
 0x129   : > { %v5585_v50 = vpop.permute.xlu2 %3047  ;;  %v5607_v12 = vrot.slane %v2345_v22, 5  ;;  %v2355_v43 = vshll.u32 %v5591_v30, 16  ;;  %v2408_v38 = vshrl.u32 %v2095_v14, 16  ;;  %v2411_v16 = vshll.u32 %v2095_v14, 16 }
 0x12a   : > { %v5604_v20 = vsel %vm5030_vm14, %v4187_v6, %v2044_v62  ;;  %v3766_v28 = vsel %vm3764_vm2, %v3726_v33, 0  ;;  %v2342_v45 = vor.u32 %v2341_v54, %v2338_v9  ;;  %v2417_v6 = vshll.u32 %v5597_v63, 16  ;;  %v2512_v33 = vld [vmem:[#allocation2 + $0x84] sm:$0xe] }
 0x12b   : > { %3771 = vmatpush.bf16.msra.mxu0 %v3766_v28  ;;  %4487 = vmatpush.bf16.msra.mxu1 %v3766_v28  ;;  %v5624_v36 = vunpack.c.l.b16 %v1821_v29  ;;  %v2410_v22 = vrot.slane %v2408_v38, 4  ;;  %v2413_v14 = vrot.slane %v2411_v16, 5  ;;  %v2427_v54 = vshll.u32 %v5613_v53, 16 }
 0x12c   : > { %3313 = vrot.lane.b32.xlu1 %v3292_v7, %s4546_s26  ;;  %v2046_v7 = vrot.slane %v2044_v62, 4  ;;  %4488 = vmatpush.bf16.msra.mxu2 %v3766_v28  ;;  %v4460_v62 = vld [vmem:[#allocation2 + $0x78] sm:$0xff]  ;;  %v5628_v9 = vrot.slane %v2417_v6, 5  ;;  %v2357_v29 = vrot.slane %v2355_v43, 5  ;;  %v4200_v38 = vrot.slane %v2512_v33, 9  ;;  %v4447_v6 = vld [vmem:[#allocation2 + $0x90] sm:$0xff] }
 0x12d   : > { %3307 = vrot.lane.b32.xlu0 %v3289_v55, %s4546_s26  ;;  %v2351_v55 = vrot.slane %v2349_v59, 4  ;;  %4489 = vmatpush.bf16.msra.mxu3 %v3766_v28  ;;  %v4485_v28 = vld [vmem:[%s6597_s3 + $0x10] sm:$0xff]  ;;  %v2632_v16 = vrot.slane %v5582_v17, 5  ;;  %v2635_v43 = vrot.slane %v5591_v30, 5  ;;  %v3103_v17 = vunpack.c.l.b16 %v5604_v20 }
 0x12e   : > { %v2884_v48 = vpop.permute.xlu1 %2883  ;;  %v3043_v27 = vpack.c.b16 %v5624_v36, %v5588_v58  ;;  %v3454_v33 = vsel %vm3415_vm15, %v4447_v6, %v5451_v10  ;;  %v4483_v10 = vld [vmem:[%s6597_s3] sm:$0xff]  ;;  %vm3497_vm4 = vcmask 195584   ;;  %vm3530_vm6 = vcmask 261120  }
 0x12f   : > { %v2882_v40 = vpop.permute.xlu0 %2881  ;;  %v5616_v56 = vsel %vm3464_vm1, %v3436_v51, %v2884_v48  ;;  %2991 = vrot.lane.b32.xlu2 %v4463_v31, %s4545_s25  ;;  %v2352_v32 = vor.u32 %v2351_v55, %v5607_v12  ;;  %v2421_v51 = vshrl.u32 %v5597_v63, 16  ;;  %3772 = vmatpush.bf16.msra.mxu0 %v4486_v5  ;;  %v2343_v31 = vrot.slane %v2342_v45, 4 }
 0x130   : > { %v5621_v15 = vsel %vm3464_vm1, %v5265_v52, %v2882_v40  ;;  %v2048_v52 = vsel %vm5030_vm14, %v2046_v7, %v2047_v19  ;;  %4490 = vmatpush.bf16.msra.mxu1 %v4486_v5  ;;  %v2414_v40 = vor.u32 %v2413_v14, %v2410_v22  ;;  %4491 = vmatpush.bf16.msra.mxu2 %v4486_v5  ;;  %v3018_v19 = vunpack.c.l.b16 %v1749_v25 }
 0x131   : > { %v5631_v59 = vpop.permute.xlu2 %3303  ;;  %v2423_v48 = vrot.slane %v2421_v51, 4  ;;  %v2353_v55 = vrot.slane %v2352_v32, 4  ;;  %4492 = vmatpush.bf16.msra.mxu3 %v4486_v5  ;;  %v3120_v7 = vpack.c.b16 %v3098_v8, %v3097_v41  ;;  %v2634_v32 = vrot.slane %v2632_v16, 4  ;;  %v2515_v41 = vld [vmem:[#allocation2 + $0xa8] sm:$0xe] }
 0x132   : > { %v2415_v5 = vrot.slane %v2414_v40, 4  ;;  %v3104_v18 = vunpack.c.l.b16 %v2048_v52  ;;  %v2653_v8 = vrot.slane %v5597_v63, 5  ;;  %v2348_v58 = vsel %vm4636_vm10, %v2343_v31, %v5607_v12  ;;  %v5686_v52 = vld [vmem:[#allocation2 + $0x34] sm:$0xf] }
 0x133   : > { %v2424_v45 = vor.u32 %v2423_v48, %v5628_v9  ;;  %3773 = vmatpush.bf16.msra.mxu0 %v4485_v28  ;;  %v2358_v20 = vsel %vm4636_vm10, %v2353_v55, %v2357_v29  ;;  %v5669_v36 = vsel %vm5030_vm14, %v4200_v38, %v2632_v16  ;;  %v2636_v12 = vsel %vm5030_vm14, %v2634_v32, %v2635_v43 }
 0x134   : > { %2985 = vrot.lane.b32.xlu1 %v4460_v62, %s4545_s25  ;;  %v2429_v62 = vrot.slane %v2427_v54, 5  ;;  %4493 = vmatpush.bf16.msra.mxu1 %v4485_v28  ;;  %v3040_v22 = vpack.c.b16 %v3018_v19, %v5569_v49  ;;  %v1468_v54 = vld [vmem:[#allocation2 + $0x30] sm:$0xf]  ;;  %v5688_v31 = vpack.c.b16 %v3104_v18, %v3103_v17  ;;  %v2656_v48 = vrot.slane %v5613_v53, 5  ;;  %v1474_v49 = vld [vmem:[#allocation2 + $0x54] sm:$0xf] }
 0x135   : > { %3393 = vrot.lane.b32.xlu0 %v5563_v35, %s4549_s29  ;;  %v2425_v25 = vrot.slane %v2424_v45, 4  ;;  %4494 = vmatpush.bf16.msra.mxu2 %v4485_v28  ;;  %v5698_v55 = vunpack.c.l.b16 %v2358_v20  ;;  %v3353_v38 = vunpack.c.l.b16 %v5669_v36  ;;  %v3354_v16 = vunpack.c.l.b16 %v2636_v12  ;;  %v4479_v19 = vld [vmem:[#allocation2 + $0xa8] sm:$0xff]  ;;  %v5706_v53 = vld [vmem:[#allocation2 + $0x38] sm:$0x1] }
 0x136   : > { %v2890_v51 = vpop.permute.xlu1 %2889  ;;  %4495 = vmatpush.bf16.msra.mxu3 %v4485_v28  ;;  %v2655_v28 = vrot.slane %v2653_v8, 4  ;;  %v1583_v45 = vshrl.u32 %v1468_v54, 16  ;;  %v1586_v43 = vshll.u32 %v1468_v54, 16  ;;  %v1592_v6 = vshll.u32 %v5686_v52, 16 }
 0x137   : > { %v2888_v35 = vpop.permute.xlu0 %2887  ;;  %v5660_v30 = vsel %vm3464_vm1, %v5541_v44, %v2890_v51  ;;  %3145 = vrot.lane.b32.xlu2 %v3120_v7, %s4548_s28  ;;  %v2420_v44 = vsel %vm4636_vm10, %v2415_v5, %v5628_v9  ;;  %v2430_v14 = vsel %vm4636_vm10, %v2425_v25, %v2429_v62  ;;  %v5692_v9 = vunpack.c.l.b16 %v2348_v58  ;;  %3774 = vmatpush.bf16.msra.mxu0 %v4484_v57  ;;  %v5713_v62 = vld [vmem:[#allocation2 + $0x58] sm:$0xf] }
 0x138   : > { %v5673_v63 = vsel %vm3464_vm1, %v5376_v37, %v2888_v35  ;;  %v4203_v37 = vrot.slane %v2515_v41, 9  ;;  %4496 = vmatpush.bf16.msra.mxu1 %v4484_v57  ;;  %v5700_v40 = vunpack.c.l.b16 %v2420_v44  ;;  %v5704_v7 = vunpack.c.l.b16 %v2430_v14 }
 0x139   : > { %v5690_v29 = vpop.permute.xlu2 %2975  ;;  %4497 = vmatpush.bf16.msra.mxu2 %v4484_v57  ;;  %v1596_v5 = vshrl.u32 %v5686_v52, 16  ;;  %v1655_v32 = vshrl.u32 %v1474_v49, 16  ;;  %v1658_v51 = vshll.u32 %v1474_v49, 16  ;;  %v2657_v18 = vsel %vm5030_vm14, %v2655_v28, %v2656_v48 }
 0x13a   : > { %4498 = vmatpush.bf16.msra.mxu3 %v4484_v57  ;;  %v2654_v17 = vsel %vm5030_vm14, %v4203_v37, %v2653_v8  ;;  %v1585_v25 = vrot.slane %v1583_v45, 4  ;;  %v1588_v41 = vrot.slane %v1586_v43, 5  ;;  %v1594_v35 = vrot.slane %v1592_v6, 5  ;;  %v1897_v57 = vld [vmem:[#allocation2 + $0x30] sm:$0xe] }
 0x13b   : > { %3775 = vmatpush.bf16.msra.mxu0 %v4483_v10  ;;  %v1598_v8 = vrot.slane %v1596_v5, 4  ;;  %v1602_v36 = vshll.u32 %v5706_v53, 16  ;;  %v1657_v44 = vrot.slane %v1655_v32, 4  ;;  %v5726_v37 = vld [vmem:[#allocation2 + $0x5c] sm:$0x1]  ;;  %v1660_v54 = vrot.slane %v1658_v51, 5 }
 0x13c   : > { %3071 = vrot.lane.b32.xlu1 %v3043_v27, %s4544_s24  ;;  %4499 = vmatpush.bf16.msra.mxu1 %v4483_v10  ;;  %v1589_v14 = vor.u32 %v1588_v41, %v1585_v25  ;;  %v1664_v28 = vshll.u32 %v5713_v62, 16  ;;  %v1668_v49 = vshrl.u32 %v5713_v62, 16  ;;  %v4178_v45 = vrot.slane %v1897_v57, 9 }
 0x13d   : > { %3065 = vrot.lane.b32.xlu0 %v3040_v22, %s4544_s24  ;;  %4500 = vmatpush.bf16.msra.mxu2 %v4483_v10  ;;  %v4476_v22 = vld [vmem:[#allocation2 + $0x84] sm:$0xff]  ;;  %v1599_v48 = vor.u32 %v1598_v8, %v1594_v35  ;;  %v3359_v32 = vunpack.c.l.b16 %v2654_v17  ;;  %v1674_v51 = vshll.u32 %v5726_v37, 16  ;;  %v1984_v41 = vrot.slane %v5706_v53, 5 }
 0x13e   : > { %v2896_v27 = vpop.permute.xlu1 %2895  ;;  %4501 = vmatpush.bf16.msra.mxu3 %v4483_v10  ;;  %v1590_v6 = vrot.slane %v1589_v14, 4  ;;  %v5732_v5 = vrot.slane %v1664_v28, 5  ;;  %v1670_v25 = vrot.slane %v1668_v49, 4  ;;  %v3466_v57 = vsel %vm3464_vm1, %v5268_v61, %v5502_v42  ;;  %v2077_v42 = vld [vmem:[#allocation2 + $0x3c] sm:$0xf] }
 0x13f   : > { %v2894_v58 = vpop.permute.xlu0 %2893  ;;  %v5718_v20 = vsel %vm3464_vm1, %v3454_v33, %v2896_v27  ;;  %3247 = vrot.lane.b32.xlu2 %v4479_v19, %s4547_s27  ;;  %v3376_v33 = vpack.c.b16 %v3354_v16, %v3353_v38  ;;  %v1981_v19 = vrot.slane %v5686_v52, 5  ;;  %v3360_v27 = vunpack.c.l.b16 %v2657_v18  ;;  %v5785_v28 = vld [vmem:[#allocation2 + $0x44] sm:$0x1] }
 0x140   : > { %v5723_v12 = vsel %vm3464_vm1, %v5380_v60, %v2894_v58  ;;  %v1661_v60 = vor.u32 %v1660_v54, %v1657_v44  ;;  %v5737_v10 = vrot.slane %v1599_v48, 4  ;;  %v5739_v38 = vrot.slane %v1602_v36, 5 }
 0x141   : > { %v5730_v43 = vpop.permute.xlu2 %3129  ;;  %v1983_v16 = vrot.slane %v1981_v19, 4  ;;  %v3296_v17 = vpack.c.b16 %v5698_v55, %v5692_v9  ;;  %vm3563_vm7 = vcmask 326656   ;;  %v1595_v58 = vsel %vm4636_vm10, %v1590_v6, %v1594_v35  ;;  %v1900_v55 = vld [vmem:[#allocation2 + $0x54] sm:$0xe] }
 0x142   : > { %v5747_v52 = vrot.slane %v1661_v60, 4  ;;  %v1671_v53 = vor.u32 %v1670_v25, %v5732_v5  ;;  %v5756_v61 = vsel %vm5030_vm14, %v4178_v45, %v1981_v19  ;;  %v3299_v8 = vpack.c.b16 %v5704_v7, %v5700_v40  ;;  %v5776_v7 = vld [vmem:[#allocation2 + $0x40] sm:$0xf]  ;;  %v5793_v25 = vld [vmem:[#allocation2 + $0x64] sm:$0xf] }
 0x143   : > { %v5760_v36 = vpack.c.b16 %v3360_v27, %v3359_v32  ;;  %vm3596_vm8 = vcmask 392192   ;;  %v1676_v9 = vrot.slane %v1674_v51, 5  ;;  %v1605_v35 = vsel %vm4636_vm10, %v5737_v10, %v5739_v38  ;;  %v2083_v60 = vld [vmem:[#allocation2 + $0x60] sm:$0xf]  ;;  %v4457_v51 = vld [vmem:[#allocation2 + $0x54] sm:$0xff] }
 0x144   : > { %3241 = vrot.lane.b32.xlu1 %v4476_v22, %s4547_s27  ;;  %v5773_v22 = vsel %vm5030_vm14, %v1983_v16, %v1984_v41  ;;  %v2002_v40 = vrot.slane %v5713_v62, 5  ;;  %v5778_v14 = vunpack.c.l.b16 %v1595_v58  ;;  %v3085_v54 = vunpack.c.l.b16 %v5756_v61 }
 0x145   : > { %3151 = vrot.lane.b32.xlu0 %v5688_v31, %s4548_s28  ;;  %vm3629_vm12 = vcmask 457728   ;;  %v1672_v62 = vrot.slane %v1671_v53, 4  ;;  %v4181_v45 = vrot.slane %v1900_v55, 9  ;;  %v2195_v6 = vshll.u32 %v2077_v42, 16 }
 0x146   : > { %v2968_v18 = vpop.permute.xlu1 %2967  ;;  %v3086_v19 = vunpack.c.l.b16 %v5773_v22  ;;  %v2201_v27 = vshll.u32 %v5776_v7, 16  ;;  %v2004_v10 = vrot.slane %v2002_v40, 4  ;;  %v2005_v38 = vrot.slane %v5726_v37, 5 }
 0x147   : > { %v2900_v31 = vpop.permute.xlu0 %2899  ;;  %3401 = vrot.lane.b32.xlu2 %v3376_v33, %s4549_s29  ;;  %v2192_v33 = vshrl.u32 %v2077_v42, 16  ;;  %v3499_v48 = vsel %vm3497_vm4, %v3466_v57, %v2968_v18  ;;  %v2197_v16 = vrot.slane %v2195_v6, 5  ;;  %v2211_v41 = vshll.u32 %v5785_v28, 16 }
 0x148   : > { %v5764_v44 = vsel %vm3464_vm1, %v5547_v11, %v2900_v31  ;;  %v1667_v11 = vsel %vm4636_vm10, %v5747_v52, %v5732_v5  ;;  %v2205_v5 = vshrl.u32 %v5776_v7, 16  ;;  %v3532_v57 = vsel %vm3530_vm6, %v3499_v48, %v5585_v50  ;;  %v4454_v50 = vld [vmem:[#allocation2 + $0x30] sm:$0xff] }
 0x149   : > { %6613 = vst [vmem:[#allocation4_spill] sm:$0xff] %v5764_v44  ;;  %v5788_v49 = vpop.permute.xlu2 %3231  ;;  %v2194_v32 = vrot.slane %v2192_v33, 4  ;;  %v2203_v52 = vrot.slane %v2201_v27, 5  ;;  %v2264_v58 = vshrl.u32 %v2083_v60, 16  ;;  %v1677_v61 = vsel %vm4636_vm10, %v1672_v62, %v1676_v9  ;;  %v5811_v27 = vld [vmem:[#allocation2 + $0x68] sm:$0x1] }
 0x14a   : > { %v2207_v18 = vrot.slane %v2205_v5, 4  ;;  %v2267_v31 = vshll.u32 %v2083_v60, 16  ;;  %v2003_v55 = vsel %vm5030_vm14, %v4181_v45, %v2002_v40  ;;  %v2277_v33 = vshrl.u32 %v5793_v25, 16 }
 0x14b   : > { %v2198_v42 = vor.u32 %v2197_v16, %v2194_v32  ;;  %v2006_v48 = vsel %vm5030_vm14, %v2004_v10, %v2005_v38  ;;  %v2213_v9 = vrot.slane %v2211_v41, 5  ;;  %v3006_v16 = vunpack.c.l.b16 %v1605_v35 }
 0x14c   : > { %3327 = vrot.lane.b32.xlu1 %v3299_v8, %s4546_s26  ;;  %v2273_v8 = vshll.u32 %v5793_v25, 16  ;;  %v2208_v22 = vor.u32 %v2207_v18, %v2203_v52  ;;  %v2269_v62 = vrot.slane %v2267_v31, 5  ;;  %v2279_v40 = vrot.slane %v2277_v33, 4  ;;  %v2506_v31 = vld [vmem:[#allocation2 + $0x3c] sm:$0xe] }
 0x14d   : > { %3321 = vrot.lane.b32.xlu0 %v3296_v17, %s4546_s26  ;;  %v2266_v17 = vrot.slane %v2264_v58, 4  ;;  %v2199_v6 = vrot.slane %v2198_v42, 4  ;;  %v3012_v58 = vunpack.c.l.b16 %v1677_v61  ;;  %v3091_v13 = vunpack.c.l.b16 %v2003_v55  ;;  %v5835_v33 = vld [vmem:[#allocation2 + $0x88] sm:$0xf] }
 0x14e   : > { %v3224_v53 = vpop.permute.xlu1 %3223  ;;  %v2209_v32 = vrot.slane %v2208_v22, 4  ;;  %v5813_v5 = vrot.slane %v2273_v8, 5  ;;  %v3092_v10 = vunpack.c.l.b16 %v2006_v48  ;;  %vm3662_vm13 = vcmask 523264   ;;  %v1482_v8 = vld [vmem:[#allocation2 + $0x84] sm:$0xf] }
 0x14f   : > { %v3128_v37 = vpop.permute.xlu0 %3127  ;;  %2979 = vrot.lane.b32.xlu2 %v4457_v51, %s4545_s25  ;;  %v3011_v51 = vunpack.c.l.b16 %v1667_v11  ;;  %v2270_v38 = vor.u32 %v2269_v62, %v2266_v17  ;;  %v3114_v41 = vpack.c.b16 %v3086_v19, %v3085_v54  ;;  %v2283_v42 = vshll.u32 %v5811_v27, 16  ;;  %v2509_v17 = vld [vmem:[#allocation2 + $0x60] sm:$0xe] }
 0x150   : > { %v3565_v60 = vsel %vm3563_vm7, %v3532_v57, %v3128_v37  ;;  %v2204_v57 = vsel %vm4636_vm10, %v2199_v6, %v2203_v52  ;;  %v2214_v11 = vsel %vm4636_vm10, %v2209_v32, %v2213_v9  ;;  %v2590_v61 = vrot.slane %v5776_v7, 5 }
 0x151   : > { %v3598_v45 = vsel %vm3596_vm8, %v3565_v60, %v3224_v53  ;;  %v5816_v18 = vpop.permute.xlu2 %3385  ;;  %v2280_v53 = vor.u32 %v2279_v40, %v5813_v5  ;;  %vm3731_vm2 = vcmask 588800   ;;  %v3034_v54 = vpack.c.b16 %v3006_v16, %v5778_v14  ;;  %v1488_v60 = vld [vmem:[#allocation2 + $0xa8] sm:$0xf] }
 0x152   : > { %v3631_v35 = vsel %vm3629_vm12, %v3598_v45, %v5631_v59  ;;  %v3037_v52 = vpack.c.b16 %v3012_v58, %v3011_v51  ;;  %v5831_v55 = vpack.c.b16 %v3092_v10, %v3091_v13  ;;  %v2271_v22 = vrot.slane %v2270_v38, 4  ;;  %v5848_v58 = vld [vmem:[#allocation2 + $0xac] sm:$0xf] }
 0x153   : > { %v4194_v59 = vrot.slane %v2506_v31, 9  ;;  %v5839_v7 = vunpack.c.l.b16 %v2214_v11  ;;  %v2285_v14 = vrot.slane %v2283_v42, 5  ;;  %v2611_v48 = vrot.slane %v5793_v25, 5  ;;  %v5856_v38 = vld [vmem:[#allocation2 + $0x8c] sm:$0x1] }
 0x154   : > { %2973 = vrot.lane.b32.xlu1 %v4454_v50, %s4545_s25  ;;  %v2281_v13 = vrot.slane %v2280_v53, 4  ;;  %v2592_v6 = vrot.slane %v2590_v61, 4  ;;  %v2593_v9 = vrot.slane %v5785_v28, 5  ;;  %v1751_v62 = vshrl.u32 %v1482_v8, 16 }
 0x155   : > { %3407 = vrot.lane.b32.xlu0 %v5760_v36, %s4549_s29  ;;  %v5833_v36 = vunpack.c.l.b16 %v2204_v57  ;;  %v4197_v40 = vrot.slane %v2509_v17, 9  ;;  %v1754_v45 = vshll.u32 %v1482_v8, 16  ;;  %v1760_v16 = vshll.u32 %v5835_v33, 16  ;;  %v4473_v57 = vld [vmem:[#allocation2 + $0x60] sm:$0xff] }
 0x156   : > { %v2970_v19 = vpop.permute.xlu1 %2969  ;;  %v1764_v51 = vshrl.u32 %v5835_v33, 16  ;;  %v2276_v25 = vsel %vm4636_vm10, %v2271_v22, %v5813_v5  ;;  %v2591_v10 = vsel %vm5030_vm14, %v4194_v59, %v2590_v61  ;;  %v2614_v28 = vrot.slane %v5811_v27, 5 }
 0x157   : > { %v3384_v37 = vpop.permute.xlu0 %3383  ;;  %3133 = vrot.lane.b32.xlu2 %v3114_v41, %s4548_s28  ;;  %v1753_v41 = vrot.slane %v1751_v62, 4  ;;  %v2613_v42 = vrot.slane %v2611_v48, 4  ;;  %v1756_v31 = vrot.slane %v1754_v45, 5  ;;  %v2594_v5 = vsel %vm5030_vm14, %v2592_v6, %v2593_v9  ;;  %v4470_v9 = vld [vmem:[#allocation2 + $0x3c] sm:$0xff] }
 0x158   : > { %v3664_v50 = vsel %vm3662_vm13, %v3631_v35, %v3384_v37  ;;  %v1762_v35 = vrot.slane %v1760_v16, 5  ;;  %v1766_v11 = vrot.slane %v1764_v51, 4  ;;  %v1823_v53 = vshrl.u32 %v1488_v60, 16 }
 0x159   : > { %4415 = vmatmul.msk.bf16.vlgmr.msra.gmra.mxu0 %vm3731_vm2, %v3664_v50  ;;  %v5844_v32 = vpop.permute.xlu2 %3063  ;;  %v1826_v8 = vshll.u32 %v1488_v60, 16  ;;  %v1832_v61 = vshll.u32 %v5848_v58, 16  ;;  %v1757_v37 = vor.u32 %v1756_v31, %v1753_v41  ;;  %v1770_v59 = vshll.u32 %v5856_v38, 16  ;;  %v1904_v41 = vld [vmem:[#allocation2 + $0x84] sm:$0xe] }
 0x15a   : > { %v1767_v22 = vor.u32 %v1766_v11, %v1762_v35  ;;  %v3501_v17 = vsel %vm3497_vm4, %v5356_v3, %v2970_v19  ;;  %v1825_v62 = vrot.slane %v1823_v53, 4  ;;  %v3341_v60 = vunpack.c.l.b16 %v2591_v10  ;;  %v5878_v10 = vld [vmem:[#allocation2 + $0xb0] sm:$0x1] }
 0x15b   : > { %v1828_v6 = vrot.slane %v1826_v8, 5  ;;  %v3342_v45 = vunpack.c.l.b16 %v2594_v5  ;;  %v2612_v16 = vsel %vm5030_vm14, %v4197_v40, %v2611_v48  ;;  %v2615_v51 = vsel %vm5030_vm14, %v2613_v42, %v2614_v28 }
 0x15c   : > { %3059 = vrot.lane.b32.xlu1 %v3037_v52, %s4544_s24  ;;  %v1836_v52 = vshrl.u32 %v5848_v58, 16  ;;  %v1758_v31 = vrot.slane %v1757_v37, 4  ;;  %v5874_v19 = vrot.slane %v1832_v61, 5  ;;  %v1768_v8 = vrot.slane %v1767_v22, 4 }
 0x15d   : > { %3053 = vrot.lane.b32.xlu0 %v3034_v54, %s4544_s24  ;;  %v2286_v54 = vsel %vm4636_vm10, %v2281_v13, %v2285_v14  ;;  %v1829_v3 = vor.u32 %v1828_v6, %v1825_v62  ;;  %v3267_v13 = vunpack.c.l.b16 %v2276_v25  ;;  %v3347_v5 = vunpack.c.l.b16 %v2612_v16 }
 0x15e   : > { %v3056_v27 = vpop.permute.xlu1 %3055  ;;  %v1838_v11 = vrot.slane %v1836_v52, 4  ;;  %v3268_v53 = vunpack.c.l.b16 %v2286_v54  ;;  %v3348_v44 = vunpack.c.l.b16 %v2615_v51  ;;  %v4185_v48 = vrot.slane %v1904_v41, 9  ;;  %v5919_v41 = vld [vmem:[#allocation2 + $0x98] sm:$0x1] }
 0x15f   : > { %v3050_v50 = vpop.permute.xlu0 %3049  ;;  %3235 = vrot.lane.b32.xlu2 %v4473_v57, %s4547_s27  ;;  %v1772_v57 = vrot.slane %v1770_v59, 5  ;;  %v2030_v40 = vrot.slane %v5835_v33, 5  ;;  %v3370_v42 = vpack.c.b16 %v3342_v45, %v3341_v60  ;;  %v1763_v25 = vsel %vm4636_vm10, %v1758_v31, %v1762_v35  ;;  %v2091_v59 = vld [vmem:[#allocation2 + $0x90] sm:$0xf]  ;;  %v5905_v60 = vld [vmem:[#allocation2 + $0x94] sm:$0xf] }
 0x160   : > { %v3534_v28 = vsel %vm3530_vm6, %v3501_v17, %v3050_v50  ;;  %v5887_v61 = vrot.slane %v1829_v3, 4  ;;  %v1839_v37 = vor.u32 %v1838_v11, %v5874_v19  ;;  %v1842_v22 = vshll.u32 %v5878_v10, 16 }
 0x161   : > { %v5876_v14 = vpop.permute.xlu2 %3319  ;;  %v3507_v33 = vsel %vm3497_vm4, %v5414_v4, %v5690_v29  ;;  %v3290_v52 = vpack.c.b16 %v5839_v7, %v5833_v36  ;;  %v3293_v50 = vpack.c.b16 %v3268_v53, %v3267_v13  ;;  %v5898_v54 = vpack.c.b16 %v3348_v44, %v3347_v5  ;;  %v1907_v44 = vld [vmem:[#allocation2 + $0xa8] sm:$0xe]  ;;  %v5925_v53 = vld [vmem:[#allocation2 + $0xb8] sm:$0xf] }
 0x162   : > { %v5902_v62 = vsel %vm5030_vm14, %v4185_v48, %v2030_v40  ;;  %v2032_v6 = vrot.slane %v2030_v40, 4  ;;  %v3540_v4 = vsel %vm3530_vm6, %v3507_v33, %v3056_v27  ;;  %v3567_v29 = vsel %vm3563_vm7, %v3534_v28, %v5730_v43  ;;  %v2097_v27 = vld [vmem:[#allocation2 + $0xb4] sm:$0xf]  ;;  %v4464_v48 = vld [vmem:[#allocation2 + $0xa8] sm:$0xff] }
 0x163   : > { %v5911_v36 = vunpack.c.l.b16 %v1763_v25  ;;  %v2360_v7 = vshrl.u32 %v2091_v59, 16  ;;  %v1840_v16 = vrot.slane %v1839_v37, 4  ;;  %v1844_v51 = vrot.slane %v1842_v22, 5 }
 0x164   : > { %3229 = vrot.lane.b32.xlu1 %v4470_v9, %s4547_s27  ;;  %v2033_v9 = vrot.slane %v5856_v38, 5  ;;  %v1835_v38 = vsel %vm4636_vm10, %v5887_v61, %v5874_v19  ;;  %v3099_v43 = vunpack.c.l.b16 %v5902_v62  ;;  %v2363_v11 = vshll.u32 %v2091_v59, 16 }
 0x165   : > { %3139 = vrot.lane.b32.xlu0 %v5831_v55, %s4548_s28  ;;  %v1773_v55 = vsel %vm4636_vm10, %v1768_v8, %v1772_v57  ;;  %v2362_v3 = vrot.slane %v2360_v7, 4  ;;  %v2369_v13 = vshll.u32 %v5905_v60, 16  ;;  %v4188_v57 = vrot.slane %v1907_v44, 9 }
 0x166   : > { %v3226_v17 = vpop.permute.xlu1 %3225  ;;  %v5913_v45 = vunpack.c.l.b16 %v1773_v55  ;;  %v2034_v8 = vsel %vm5030_vm14, %v2032_v6, %v2033_v9  ;;  %v2051_v19 = vrot.slane %v5848_v58, 5  ;;  %v2373_v5 = vshrl.u32 %v5905_v60, 16 }
 0x167   : > { %v3136_v35 = vpop.permute.xlu0 %3135  ;;  %3389 = vrot.lane.b32.xlu2 %v3370_v42, %s4549_s29  ;;  %v2365_v40 = vrot.slane %v2363_v11, 5  ;;  %v5932_v28 = vrot.slane %v2369_v13, 5  ;;  %v2432_v42 = vshrl.u32 %v2097_v27, 16  ;;  %v2435_v25 = vshll.u32 %v2097_v27, 16  ;;  %v5947_v11 = vld [vmem:[#allocation2 + $0xbc] sm:$0x1] }
 0x168   : > { %v3600_v61 = vsel %vm3596_vm8, %v3567_v29, %v3226_v17  ;;  %v2375_v37 = vrot.slane %v2373_v5, 4  ;;  %v2379_v22 = vshll.u32 %v5919_v41, 16  ;;  %v2441_v59 = vshll.u32 %v5925_v53, 16  ;;  %v4461_v29 = vld [vmem:[#allocation2 + $0x84] sm:$0xff] }
 0x169   : > { %v5921_v31 = vpop.permute.xlu2 %2977  ;;  %v2366_v33 = vor.u32 %v2365_v40, %v2362_v3  ;;  %v2434_v55 = vrot.slane %v2432_v42, 4  ;;  %v2437_v62 = vrot.slane %v2435_v25, 5  ;;  %v1845_v9 = vsel %vm4636_vm10, %v1840_v16, %v1844_v51 }
 0x16a   : > { %v3100_v44 = vunpack.c.l.b16 %v2034_v8  ;;  %v5942_v7 = vrot.slane %v2441_v59, 5  ;;  %v2053_v27 = vrot.slane %v2051_v19, 4  ;;  %v2054_v3 = vrot.slane %v5878_v10, 5 }
 0x16b   : > { %v3573_v5 = vsel %vm3563_vm7, %v3540_v4, %v3136_v35  ;;  %v2367_v51 = vrot.slane %v2366_v33, 4  ;;  %v2438_v8 = vor.u32 %v2437_v62, %v2434_v55  ;;  %v3025_v42 = vunpack.c.l.b16 %v1835_v38  ;;  %v2513_v4 = vld [vmem:[#allocation2 + $0x90] sm:$0xe] }
 0x16c   : > { %3315 = vrot.lane.b32.xlu1 %v3293_v50, %s4546_s26  ;;  %v2445_v50 = vshrl.u32 %v5925_v53, 16  ;;  %v3026_v25 = vunpack.c.l.b16 %v1845_v9  ;;  %v5957_v10 = vsel %vm5030_vm14, %v4188_v57, %v2051_v19  ;;  %v2451_v35 = vshll.u32 %v5947_v11, 16  ;;  %v2516_v9 = vld [vmem:[#allocation2 + $0xb4] sm:$0xe] }
 0x16d   : > { %3309 = vrot.lane.b32.xlu0 %v3290_v52, %s4546_s26  ;;  %v2376_v52 = vor.u32 %v2375_v37, %v5932_v28  ;;  %v3606_v59 = vsel %vm3596_vm8, %v3573_v5, %v5788_v49  ;;  %v3121_v33 = vpack.c.b16 %v3100_v44, %v3099_v43  ;;  %v5966_v38 = vsel %vm5030_vm14, %v2053_v27, %v2054_v3  ;;  %v5988_v3 = vld [vmem:[#allocation2 + $0x68] sm:$0x1] }
 0x16e   : > { %v3312_v58 = vpop.permute.xlu1 %3311  ;;  %v2447_v13 = vrot.slane %v2445_v50, 4  ;;  %v2639_v57 = vrot.slane %v5905_v60, 5  ;;  %v2372_v49 = vsel %vm4636_vm10, %v2367_v51, %v5932_v28  ;;  %v2439_v55 = vrot.slane %v2438_v8, 4 }
 0x16f   : > { %v3306_v6 = vpop.permute.xlu0 %3305  ;;  %2993 = vrot.lane.b32.xlu2 %v4464_v48, %s4545_s25  ;;  %v2381_v48 = vrot.slane %v2379_v22, 5  ;;  %v3639_v19 = vsel %vm3629_vm12, %v3606_v59, %v3312_v58  ;;  %v3041_v22 = vpack.c.b16 %v5913_v45, %v5911_v36  ;;  %v3044_v62 = vpack.c.b16 %v3026_v25, %v3025_v42  ;;  %v5981_v45 = vld [vmem:[#allocation2 + $0x64] sm:$0xf] }
 0x170   : > { %v3633_v17 = vsel %vm3629_vm12, %v3600_v61, %v3306_v6  ;;  %v2377_v61 = vrot.slane %v2376_v52, 4  ;;  %v2448_v37 = vor.u32 %v2447_v13, %v5942_v7  ;;  %v3105_v50 = vunpack.c.l.b16 %v5957_v10  ;;  %v2085_v10 = vld [vmem:[#allocation2 + $0x6c] sm:$0xf] }
 0x171   : > { %v3666_v16 = vsel %vm3662_vm13, %v3633_v17, %v5816_v18  ;;  %v5953_v40 = vpop.permute.xlu2 %3131  ;;  %v1476_v18 = vld [vmem:[#allocation2 + $0x60] sm:$0xf]  ;;  %v4201_v6 = vrot.slane %v2513_v4, 9  ;;  %v2453_v36 = vrot.slane %v2451_v35, 5  ;;  %v5985_v17 = vunpack.c.l.b16 %v2372_v49  ;;  %v4480_v4 = vld [vmem:[#allocation2 + $0xb4] sm:$0xff] }
 0x172   : > { %4416 = vmatmul.msk.bf16.gmra.mxu0 %vm3731_vm2, %v3666_v16  ;;  %v1679_v60 = vshrl.u32 %v1476_v18, 16  ;;  %v2382_v58 = vsel %vm4636_vm10, %v2377_v61, %v2381_v48  ;;  %v2449_v52 = vrot.slane %v2448_v37, 4  ;;  %v2642_v27 = vrot.slane %v5919_v41, 5 }
 0x173   : > { %v2444_v13 = vsel %vm4636_vm10, %v2439_v55, %v5942_v7  ;;  %v4204_v5 = vrot.slane %v2516_v9, 9  ;;  %v1682_v51 = vshll.u32 %v1476_v18, 16  ;;  %v5996_v42 = vunpack.c.l.b16 %v2382_v58 }
 0x174   : > { %2987 = vrot.lane.b32.xlu1 %v4461_v29, %s4545_s25  ;;  %v2641_v29 = vrot.slane %v2639_v57, 4  ;;  %v1681_v16 = vrot.slane %v1679_v60, 4  ;;  %v2640_v25 = vsel %vm5030_vm14, %v4201_v6, %v2639_v57  ;;  %v1688_v41 = vshll.u32 %v5981_v45, 16  ;;  %v6012_v57 = vld [vmem:[#allocation2 + $0x70] sm:$0xf] }
 0x175   : > { %3395 = vrot.lane.b32.xlu0 %v5898_v54, %s4549_s29  ;;  %v3106_v54 = vunpack.c.l.b16 %v5966_v38  ;;  %v1692_v48 = vshrl.u32 %v5981_v45, 16  ;;  %v2454_v7 = vsel %vm4636_vm10, %v2449_v52, %v2453_v36  ;;  %v1684_v37 = vrot.slane %v1682_v51, 5 }
 0x176   : > { %v2984_v43 = vpop.permute.xlu1 %2983  ;;  %v1698_v35 = vshll.u32 %v5988_v3, 16  ;;  %v6008_v18 = vunpack.c.l.b16 %v2444_v13  ;;  %v2643_v59 = vsel %vm5030_vm14, %v2641_v29, %v2642_v27  ;;  %v2288_v55 = vshrl.u32 %v2085_v10, 16 }
 0x177   : > { %v3392_v44 = vpop.permute.xlu0 %3391  ;;  %3147 = vrot.lane.b32.xlu2 %v3121_v33, %s4548_s28  ;;  %v3515_v61 = vsel %vm3497_vm4, %v5673_v63, %v2984_v43  ;;  %v1690_v33 = vrot.slane %v1688_v41, 5  ;;  %v1694_v38 = vrot.slane %v1692_v48, 4  ;;  %v3355_v63 = vunpack.c.l.b16 %v2640_v25 }
 0x178   : > { %v3672_v28 = vsel %vm3662_vm13, %v3639_v19, %v3392_v44  ;;  %v2660_v19 = vrot.slane %v5925_v53, 5  ;;  %v1685_v49 = vor.u32 %v1684_v37, %v1681_v16  ;;  %v3548_v43 = vsel %vm3530_vm6, %v3515_v61, %v5844_v32  ;;  %v4477_v53 = vld [vmem:[#allocation2 + $0x90] sm:$0xff] }
 0x179   : > { %4419 = vmatmul.msk.bf16.vlgmr.msra.gmra.mxu1 %vm3731_vm2, %v3672_v28  ;;  %v5994_v8 = vpop.permute.xlu2 %3233  ;;  %v6018_v6 = vunpack.c.l.b16 %v2454_v7  ;;  %v1695_v9 = vor.u32 %v1694_v38, %v1690_v33  ;;  %v2291_v60 = vshll.u32 %v2085_v10, 16  ;;  %v3356_v58 = vunpack.c.l.b16 %v2643_v59  ;;  %v6033_v10 = vld [vmem:[#allocation2 + $0x74] sm:$0x1]  ;;  %v1484_v61 = vld [vmem:[#allocation2 + $0x90] sm:$0xf] }
 0x17a   : > { %v6022_v52 = vsel %vm5030_vm14, %v4204_v5, %v2660_v19  ;;  %v2297_v36 = vshll.u32 %v6012_v57, 16  ;;  %v1686_v28 = vrot.slane %v1685_v49, 4  ;;  %v2290_v32 = vrot.slane %v2288_v55, 4 }
 0x17b   : > { %v1696_v29 = vrot.slane %v1695_v9, 4  ;;  %v2293_v27 = vrot.slane %v2291_v60, 5  ;;  %v3124_v16 = vpack.c.b16 %v3106_v54, %v3105_v50  ;;  %v3297_v25 = vpack.c.b16 %v5996_v42, %v5985_v17 }
 0x17c   : > { %3073 = vrot.lane.b32.xlu1 %v3044_v62, %s4544_s24  ;;  %v2662_v41 = vrot.slane %v2660_v19, 4  ;;  %v2663_v48 = vrot.slane %v5947_v11, 5  ;;  %v3300_v7 = vpack.c.b16 %v6018_v6, %v6008_v18  ;;  %v3361_v37 = vunpack.c.l.b16 %v6022_v52 }
 0x17d   : > { %3067 = vrot.lane.b32.xlu0 %v3041_v22, %s4544_s24  ;;  %v1700_v22 = vrot.slane %v1698_v35, 5  ;;  %v1901_v35 = vld [vmem:[#allocation2 + $0x60] sm:$0xe]  ;;  %v2299_v50 = vrot.slane %v2297_v36, 5  ;;  %v2301_v54 = vshrl.u32 %v6012_v57, 16  ;;  %v3377_v17 = vpack.c.b16 %v3356_v58, %v3355_v63 }
 0x17e   : > { %v3240_v62 = vpop.permute.xlu1 %3239  ;;  %v1691_v42 = vsel %vm4636_vm10, %v1686_v28, %v1690_v33  ;;  %v2307_v38 = vshll.u32 %v6033_v10, 16  ;;  %v1775_v19 = vshrl.u32 %v1484_v61, 16  ;;  %v2664_v63 = vsel %vm5030_vm14, %v2662_v41, %v2663_v48 }
 0x17f   : > { %v3144_v44 = vpop.permute.xlu0 %3143  ;;  %3249 = vrot.lane.b32.xlu2 %v4480_v4, %s4547_s27  ;;  %v1701_v11 = vsel %vm4636_vm10, %v1696_v29, %v1700_v22  ;;  %v2294_v4 = vor.u32 %v2293_v27, %v2290_v32  ;;  %v2303_v59 = vrot.slane %v2301_v54, 4  ;;  %v4182_v55 = vrot.slane %v1901_v35, 9  ;;  %v2510_v22 = vld [vmem:[#allocation2 + $0x6c] sm:$0xe]  ;;  %v1490_v27 = vld [vmem:[#allocation2 + $0xb4] sm:$0xf] }
 0x180   : > { %v3581_v13 = vsel %vm3563_vm7, %v3548_v43, %v3144_v44  ;;  %v2009_v33 = vrot.slane %v5981_v45, 5  ;;  %v6051_v43 = vld [vmem:[#allocation2 + $0x94] sm:$0xf]  ;;  %v3013_v9 = vunpack.c.l.b16 %v1691_v42  ;;  %v3014_v60 = vunpack.c.l.b16 %v1701_v11 }
 0x181   : > { %v3614_v51 = vsel %vm3596_vm8, %v3581_v13, %v3240_v62  ;;  %v6030_v5 = vpop.permute.xlu2 %3387  ;;  %v1778_v62 = vshll.u32 %v1484_v61, 16  ;;  %v2304_v44 = vor.u32 %v2303_v59, %v2299_v50  ;;  %v2295_v52 = vrot.slane %v2294_v4, 4 }
 0x182   : > { %v3647_v18 = vsel %vm3629_vm12, %v3614_v51, %v5876_v14  ;;  %v2618_v14 = vrot.slane %v6012_v57, 5  ;;  %v1777_v36 = vrot.slane %v1775_v19, 4  ;;  %v2309_v28 = vrot.slane %v2307_v38, 5 }
 0x183   : > { %v2305_v45 = vrot.slane %v2304_v44, 4  ;;  %v1784_v29 = vshll.u32 %v6051_v43, 16  ;;  %v1788_v32 = vshrl.u32 %v6051_v43, 16  ;;  %v3362_v13 = vunpack.c.l.b16 %v2664_v63 }
 0x184   : > { %3243 = vrot.lane.b32.xlu1 %v4477_v53, %s4547_s27  ;;  %v1780_v53 = vrot.slane %v1778_v62, 5  ;;  %v2010_v57 = vsel %vm5030_vm14, %v4182_v55, %v2009_v33  ;;  %v2011_v51 = vrot.slane %v2009_v33, 4  ;;  %v2012_v41 = vrot.slane %v5988_v3, 5  ;;  %v6075_v55 = vld [vmem:[#allocation2 + $0x98] sm:$0x1] }
 0x185   : > { %3153 = vrot.lane.b32.xlu0 %v3124_v16, %s4548_s28  ;;  %v3038_v48 = vpack.c.b16 %v3014_v60, %v3013_v9  ;;  %v4198_v61 = vrot.slane %v2510_v22, 9  ;;  %v2620_v35 = vrot.slane %v2618_v14, 4  ;;  %v2621_v54 = vrot.slane %v6033_v10, 5 }
 0x186   : > { %v2972_v49 = vpop.permute.xlu1 %2971  ;;  %v2300_v42 = vsel %vm4636_vm10, %v2295_v52, %v2299_v50  ;;  %v1781_v11 = vor.u32 %v1780_v53, %v1777_v36  ;;  %v1847_v4 = vshrl.u32 %v1490_v27, 16  ;;  %v2310_v3 = vsel %vm4636_vm10, %v2305_v45, %v2309_v28 }
 0x187   : > { %v3400_v6 = vpop.permute.xlu0 %3399  ;;  %3403 = vrot.lane.b32.xlu2 %v3377_v17, %s4549_s29  ;;  %v6065_v17 = vld [vmem:[#allocation2 + $0xb8] sm:$0xf]  ;;  %v1786_v59 = vrot.slane %v1784_v29, 5  ;;  %v1790_v38 = vrot.slane %v1788_v32, 4  ;;  %v3380_v19 = vpack.c.b16 %v3362_v13, %v3361_v37  ;;  %v2013_v10 = vsel %vm5030_vm14, %v2011_v51, %v2012_v41  ;;  %v4458_v37 = vld [vmem:[#allocation2 + $0x60] sm:$0xff] }
 0x188   : > { %v3680_v58 = vsel %vm3662_vm13, %v3647_v18, %v3400_v6  ;;  %v1850_v18 = vshll.u32 %v1490_v27, 16  ;;  %v1860_v50 = vshrl.u32 %v6065_v17, 16  ;;  %v3093_v62 = vunpack.c.l.b16 %v2010_v57  ;;  %v2093_v41 = vld [vmem:[#allocation2 + $0x9c] sm:$0xf] }
 0x189   : > { %4423 = vmatmul.msk.bf16.vlgmr.msra.gmra.mxu2 %vm3731_vm2, %v3680_v58  ;;  %v6059_v16 = vpop.permute.xlu2 %2991  ;;  %v3269_v6 = vunpack.c.l.b16 %v2300_v42  ;;  %v2622_v9 = vsel %vm5030_vm14, %v2620_v35, %v2621_v54  ;;  %v3270_v60 = vunpack.c.l.b16 %v2310_v3  ;;  %v1782_v44 = vrot.slane %v1781_v11, 4  ;;  %v6084_v58 = vld [vmem:[#allocation2 + $0xbc] sm:$0x1]  ;;  %v6106_v42 = vld [vmem:[#allocation2 + $0xb4] sm:$0xe] }
 0x18a   : > { %v1849_v52 = vrot.slane %v1847_v4, 4  ;;  %v1852_v22 = vrot.slane %v1850_v18, 5  ;;  %v3503_v36 = vsel %vm3497_vm4, %v5573_v47, %v2972_v49  ;;  %v3094_v53 = vunpack.c.l.b16 %v2013_v10 }
 0x18b   : > { %v1791_v45 = vor.u32 %v1790_v38, %v1786_v59  ;;  %v1794_v28 = vshll.u32 %v6075_v55, 16  ;;  %v3350_v32 = vunpack.c.l.b16 %v2622_v9  ;;  %v1862_v13 = vrot.slane %v1860_v50, 4  ;;  %v359_v38 = vld [vmem:[#allocation2 + $0xc0] sm:$0x1] }
 0x18c   : > { %3329 = vrot.lane.b32.xlu1 %v3300_v7, %s4546_s26  ;;  %v1856_v7 = vshll.u32 %v6065_v17, 16  ;;  %v1866_v57 = vshll.u32 %v6084_v58, 16  ;;  %v3294_v51 = vpack.c.b16 %v3270_v60, %v3269_v6  ;;  %v1787_v47 = vsel %vm4636_vm10, %v1782_v44, %v1786_v59  ;;  %v268_v6 = vld [vmem:[%s4618_s21 + $0xf8] sm:$0xff] }
 0x18d   : > { %3323 = vrot.lane.b32.xlu0 %v3297_v25, %s4546_s26  ;;  %v2619_v25 = vsel %vm5030_vm14, %v4198_v61, %v2618_v14  ;;  %v1853_v49 = vor.u32 %v1852_v22, %v1849_v52  ;;  %v6102_v35 = vrot.slane %v1791_v45, 4  ;;  %v6104_v54 = vrot.slane %v1794_v28, 5  ;;  %v6133_v45 = vld [vmem:[#allocation2 + $0xa4] sm:$0x1] }
 0x18e   : > { %v3058_v63 = vpop.permute.xlu1 %3057  ;;  %v3349_v29 = vunpack.c.l.b16 %v2619_v25  ;;  %v6091_v27 = vrot.slane %v1856_v7, 5  ;;  %v3118_v4 = vpack.c.b16 %v3094_v53, %v3093_v62  ;;  %v6115_v10 = vunpack.c.l.b16 %v1787_v47  ;;  %v409_v25 = vld [vmem:[#allocation2 + $0xc8] sm:$0x1]  ;;  %v4474_v62 = vld [vmem:[#allocation2 + $0x6c] sm:$0xff] }
 0x18f   : > { %v3052_v33 = vpop.permute.xlu0 %3051  ;;  %3061 = vrot.lane.b32.xlu2 %v3038_v48, %s4544_s24  ;;  %v3509_v48 = vsel %vm3497_vm4, %v5621_v15, %v5921_v31  ;;  %v6112_v15 = vld [vmem:[#allocation2 + $0xa0] sm:$0xf]  ;;  %v267_v31 = vld [vmem:[%s4618_s21 + $0xf0] sm:$0xff]  ;;  %v6117_v7 = vrot.slane %v1866_v57, 5  ;;  %v2384_v50 = vshrl.u32 %v2093_v41, 16  ;;  %v1854_v9 = vrot.slane %v1853_v49, 4  ;;  %s235_s21 = scalar_lea.vmem %s6599_s5, %s4158_s2 }
 0x190   : > { %v3536_v61 = vsel %vm3530_vm6, %v3503_v36, %v3052_v33  ;;  %v3542_v11 = vsel %vm3530_vm6, %v3509_v48, %v3058_v63  ;;  %v6109_v3 = vpack.c.b16 %v3350_v32, %v3349_v29  ;;  %v1863_v59 = vor.u32 %v1862_v13, %v6091_v27  ;;  %v4465_v49 = vld [vmem:[#allocation2 + $0xb4] sm:$0xff] }
 0x191   : > { %v6089_v14 = vpop.permute.xlu2 %3145  ;;  %v2387_v33 = vshll.u32 %v2093_v41, 16  ;;  %v3569_v63 = vsel %vm3563_vm7, %v3536_v61, %v5953_v40  ;;  %v2058_v60 = vrot.slane %v6065_v17, 5  ;;  %v1797_v44 = vsel %vm4636_vm10, %v6102_v35, %v6104_v54 }
 0x192   : > { %v2393_v52 = vshll.u32 %v6112_v15, 16  ;;  %v2397_v22 = vshrl.u32 %v6112_v15, 16  ;;  %v299_v36 = vpack.c.bf16 %v267_v31, %v267_v31  ;;  %v1864_v40 = vrot.slane %v1863_v59, 4 }
 0x193   : > { %v300_v28 = vpack.c.bf16 %v268_v6, %v268_v6  ;;  %v360_v29 = vsel %vm4591_vm3, 0, %v359_v38  ;;  %v410_v32 = vsel %vm4598_vm5, 0, %v409_v25  ;;  %v2386_v13 = vrot.slane %v2384_v50, 4 }
 0x194   : > { %2981 = vrot.lane.b32.xlu1 %v4458_v37, %s4545_s25  ;;  %v4189_v37 = vrot.slane %v6106_v42, 9  ;;  %v2389_v57 = vrot.slane %v2387_v33, 5  ;;  %361 = vst [vmem:[#allocation2 + $0xc0] sm:$0x1] %v360_v29  ;;  %v673_v47 = vshll.u32 %v299_v36, 16  ;;  %v1859_v41 = vsel %vm4636_vm10, %v1854_v9, %v6091_v27 }
 0x195   : > { %3409 = vrot.lane.b32.xlu0 %v3380_v19, %s4549_s29  ;;  %v2061_v48 = vrot.slane %v6084_v58, 5  ;;  %411 = vst [vmem:[#allocation2 + $0xc8] sm:$0x1] %v410_v32  ;;  %v678_v61 = vshrl.u32 %v300_v28, 16  ;;  %v681_v35 = vshll.u32 %v300_v28, 16  ;;  %v6146_v54 = vrot.slane %v2393_v52, 5 }
 0x196   : > { %v3228_v18 = vpop.permute.xlu1 %3227  ;;  %v2399_v59 = vrot.slane %v2397_v22, 4  ;;  %v1869_v50 = vsel %vm4636_vm10, %v1864_v40, %v6117_v7  ;;  %v2403_v27 = vshll.u32 %v6133_v45, 16  ;;  %v2037_v58 = vrot.slane %v6051_v43, 5  ;;  %v4462_v52 = vld [vmem:[#allocation2 + $0x90] sm:$0xff] }
 0x197   : > { %v3138_v19 = vpop.permute.xlu0 %3137  ;;  %3317 = vrot.lane.b32.xlu2 %v3294_v51, %s4546_s26  ;;  %v670_v51 = vshrl.u32 %v299_v36, 16  ;;  %v3602_v2 = vsel %vm3596_vm8, %v3569_v63, %v3228_v18  ;;  %v680_v33 = vrot.slane %v678_v61, 7  ;;  %v1905_v63 = vld [vmem:[#allocation2 + $0x90] sm:$0xe]  ;;  %v2060_v29 = vrot.slane %v2058_v60, 4 }
 0x198   : > { %v3575_v6 = vsel %vm3563_vm7, %v3542_v11, %v3138_v19  ;;  %v4186_v7 = vrot.slane %v1905_v63, 9  ;;  %v2400_v43 = vor.u32 %v2399_v59, %v6146_v54  ;;  %v2039_v28 = vrot.slane %v2037_v58, 4 }
 0x199   : > { %v6131_v53 = vpop.permute.xlu2 %3247  ;;  %v672_v31 = vrot.slane %v670_v51, 7  ;;  %v683_v22 = vor.u32 %v681_v35, %v680_v33  ;;  %v685_v36 = vrot.slane %v680_v33, 4  ;;  %v2040_v11 = vrot.slane %v6075_v55, 5 }
 0x19a   : > { %v3022_v19 = vunpack.c.l.b16 %v1797_v44  ;;  %v3608_v46 = vsel %vm3596_vm8, %v3575_v6, %v5994_v8  ;;  %v3028_v61 = vunpack.c.l.b16 %v1869_v50  ;;  %v2401_v59 = vrot.slane %v2400_v43, 4 }
 0x19b   : > { %v676_v18 = vrot.slane %v672_v31, 4  ;;  %v2041_v44 = vsel %vm5030_vm14, %v2039_v28, %v2040_v11  ;;  %v2059_v1 = vsel %vm5030_vm14, %v4189_v37, %v2058_v60  ;;  %v4531_v37 = vld [vmem:[#allocation2 + $0xb8] sm:$0xf] }
 0x19c   : > { %3237 = vrot.lane.b32.xlu1 %v4474_v62, %s4547_s27  ;;  %v675_v62 = vor.u32 %v673_v47, %v672_v31  ;;  %v845_v55 = vld [vmem:[#allocation2 + $0xc8] sm:$0x1]  ;;  %v3102_v35 = vunpack.c.l.b16 %v2041_v44  ;;  %v2405_v31 = vrot.slane %v2403_v27, 5  ;;  %v1457_v60 = vrot.slane %v4531_v37, 5 }
 0x19d   : > { %3141 = vrot.lane.b32.xlu0 %v3118_v4, %s4548_s28  ;;  %v2390_v4 = vor.u32 %v2389_v57, %v2386_v13  ;;  %v684_v32 = vsel %vm4642_vm11, %v676_v18, %v683_v22  ;;  %v841_v13 = vld [vmem:[#allocation2 + $0xc0] sm:$0xf]  ;;  %v2038_v57 = vsel %vm5030_vm14, %v4186_v7, %v2037_v58 }
 0x19e   : > { %v3314_v38 = vpop.permute.xlu1 %3313  ;;  %v842_v47 = vsel %vm4630_vm9, %v675_v62, %v841_v13  ;;  %844 = vst.msk [vmem:[#allocation2 + $0xc4] sm:$0xf] %vm301_vm0, %v684_v32  ;;  %v2406_v17 = vsel %vm4636_vm10, %v2401_v59, %v2405_v31  ;;  %v1459_v13 = vrot.slane %v1457_v60, 4  ;;  %vm4027_vm0 = vcmask 1040384  }
 0x19f   : > { %v3308_v25 = vpop.permute.xlu0 %3307  ;;  %2995 = vrot.lane.b32.xlu2 %v4465_v49, %s4545_s25  ;;  %v3101_v49 = vunpack.c.l.b16 %v2038_v57  ;;  %843 = vst [vmem:[#allocation2 + $0xc0] sm:$0xf] %v842_v47  ;;  %v3641_v34 = vsel %vm3629_vm12, %v3608_v46, %v3314_v38  ;;  %v3042_v38 = vpack.c.b16 %v3022_v19, %v6115_v10  ;;  %v4532_v57 = vld [vmem:[#allocation2 + $0xbc] sm:$0x1] }
 0x1a0   : > { %v3635_v9 = vsel %vm3629_vm12, %v3602_v2, %v3308_v25  ;;  %v2391_v2 = vrot.slane %v2390_v4, 4  ;;  %v1298_v25 = vld [vmem:[#allocation2 + $0xb4] sm:$0xe]  ;;  %v3107_v4 = vunpack.c.l.b16 %v2059_v1 }
 0x1a1   : > { %v3668_v40 = vsel %vm3662_vm13, %v3635_v9, %v6030_v5  ;;  %v6167_v51 = vpop.permute.xlu2 %3401  ;;  %v3027_v5 = vunpack.c.l.b16 %v1859_v41  ;;  %v846_v41 = vsel %vm4591_vm3, %v685_v36, %v845_v55  ;;  %v3122_v58 = vpack.c.b16 %v3102_v35, %v3101_v49 }
 0x1a2   : > { %4417 = vmatmul.msk.bf16.gmra.mxu0 %vm3731_vm2, %v3668_v40  ;;  %847 = vst [vmem:[#allocation2 + $0xc8] sm:$0x1] %v846_v41  ;;  %v2396_v27 = vsel %vm4636_vm10, %v2391_v2, %v6146_v54  ;;  %v6206_v54 = vunpack.c.l.b16 %v2406_v17  ;;  %v4174_v28 = vrot.slane %v1298_v25, 9  ;;  %v3523_v55 = vsel %vm3497_vm4, %v5718_v20, %v6059_v16  ;;  %v4478_v2 = vld [vmem:[#allocation2 + $0x9c] sm:$0xff] }
 0x1a3   : > { %v3045_v50 = vpack.c.b16 %v3028_v61, %v3027_v5  ;;  %v6204_v10 = vunpack.c.l.b16 %v2396_v27  ;;  %v1460_v5 = vrot.slane %v4532_v57, 5  ;;  %v2514_v25 = vld [vmem:[#allocation2 + $0x9c] sm:$0xe]  ;;  %vm4029_vm3 = vcmask 58368  }
 0x1a4   : > { %2989 = vrot.lane.b32.xlu1 %v4462_v52, %s4545_s25 }
 0x1a5   : > { %3397 = vrot.lane.b32.xlu0 %v6109_v3, %s4549_s29  ;;  %v2062_v3 = vsel %vm5030_vm14, %v2060_v29, %v2061_v48  ;;  %v6199_v42 = vld [vmem:[#allocation2 + $0xc4] sm:$0xf]  ;;  %v3298_v59 = vpack.c.b16 %v6206_v54, %v6204_v10 }
 0x1a6   : > { %v2986_v33 = vpop.permute.xlu1 %2985  ;;  %v3108_v48 = vunpack.c.l.b16 %v2062_v3  ;;  %v2099_v62 = vld [vmem:[#allocation2 + $0xc0] sm:$0xf]  ;;  %v2465_v18 = vshll.u32 %v6199_v42, 16  ;;  %v2469_v63 = vshrl.u32 %v6199_v42, 16  ;;  %v2667_v41 = vrot.slane %v6199_v42, 5 }
 0x1a7   : > { %v3394_v8 = vpop.permute.xlu0 %3393  ;;  %3149 = vrot.lane.b32.xlu2 %v3122_v58, %s4548_s28  ;;  %v2456_v52 = vshrl.u32 %v2099_v62, 16  ;;  %v2459_v22 = vshll.u32 %v2099_v62, 16  ;;  %v4481_v11 = vld [vmem:[#allocation2 + $0xc0] sm:$0xff]  ;;  %v3517_v20 = vsel %vm3497_vm4, %v5660_v30, %v2986_v33  ;;  %v1461_v30 = vsel %vm5030_vm14, %v1459_v13, %v1460_v5  ;;  %v2101_v62 = vld [vmem:[#allocation2 + $0xcc] sm:$0xf] }
 0x1a8   : > { %v3674_v6 = vsel %vm3662_vm13, %v3641_v34, %v3394_v8  ;;  %v2467_v7 = vrot.slane %v2465_v18, 5  ;;  %v2471_v40 = vrot.slane %v2469_v63, 4  ;;  %v1492_v47 = vld [vmem:[#allocation2 + $0xc0] sm:$0xf]  ;;  %v6218_v35 = vld [vmem:[#allocation2 + $0xc4] sm:$0xf]  ;;  %v3125_v34 = vpack.c.b16 %v3108_v48, %v3107_v4 }
 0x1a9   : > { %4420 = vmatmul.msk.bf16.gmra.mxu1 %vm3731_vm2, %v3674_v6  ;;  %v6208_v9 = vld [vmem:[#allocation2 + $0xc8] sm:$0x1]  ;;  %v6211_v36 = vpop.permute.xlu2 %2979  ;;  %v2458_v29 = vrot.slane %v2456_v52, 4  ;;  %v2461_v32 = vrot.slane %v2459_v22, 5  ;;  %v2517_v61 = vld [vmem:[#allocation2 + $0xc0] sm:$0xe]  ;;  %v6227_v8 = vsel %vm5030_vm14, %v4174_v28, %v1457_v60  ;;  %v2854_v22 = vunpack.c.l.b16 %v1461_v30 }
 0x1aa   : > { %v2475_v43 = vshll.u32 %v6208_v9, 16  ;;  %v2472_v49 = vor.u32 %v2471_v40, %v2467_v7  ;;  %v1871_v58 = vshrl.u32 %v1492_v47, 16  ;;  %v1874_v6 = vshll.u32 %v1492_v47, 16  ;;  %v6236_v33 = vld [vmem:[#allocation2 + $0xc8] sm:$0x1] }
 0x1ab   : > { %v2462_v31 = vor.u32 %v2461_v32, %v2458_v29  ;;  %v4205_v1 = vrot.slane %v2517_v61, 9  ;;  %v1880_v3 = vshll.u32 %v6218_v35, 16  ;;  %v2669_v17 = vrot.slane %v2667_v41, 4 }
 0x1ac   : > { %3075 = vrot.lane.b32.xlu1 %v3045_v50, %s4544_s24  ;;  %v2477_v46 = vrot.slane %v2475_v43, 5  ;;  %v2473_v16 = vrot.slane %v2472_v49, 4  ;;  %v2670_v42 = vrot.slane %v6208_v9, 5  ;;  %v1873_v4 = vrot.slane %v1871_v58, 4  ;;  %v1909_v49 = vld [vmem:[#allocation2 + $0xc0] sm:$0xe] }
 0x1ad   : > { %3069 = vrot.lane.b32.xlu0 %v3042_v38, %s4544_s24  ;;  %v2463_v50 = vrot.slane %v2462_v31, 4  ;;  %v1884_v38 = vshrl.u32 %v6218_v35, 16  ;;  %v1876_v48 = vrot.slane %v1874_v6, 5  ;;  %v2853_v63 = vunpack.c.l.b16 %v6227_v8 }
 0x1ae   : > { %v3072_v19 = vpop.permute.xlu1 %3071  ;;  %v2478_v27 = vsel %vm4636_vm10, %v2473_v16, %v2477_v46  ;;  %v6243_v10 = vrot.slane %v1880_v3, 5  ;;  %v2668_v52 = vsel %vm5030_vm14, %v4205_v1, %v2667_v41  ;;  %v1890_v40 = vshll.u32 %v6236_v33, 16 }
 0x1af   : > { %v3066_v44 = vpop.permute.xlu0 %3065  ;;  %3251 = vrot.lane.b32.xlu2 %v4481_v11, %s4547_s27  ;;  %v2468_v37 = vsel %vm4636_vm10, %v2463_v50, %v2467_v7  ;;  %v3284_v60 = vunpack.c.l.b16 %v2478_v27  ;;  %v1886_v54 = vrot.slane %v1884_v38, 4  ;;  %v4202_v7 = vrot.slane %v2514_v25, 9 }
 0x1b0   : > { %v3283_v18 = vunpack.c.l.b16 %v2468_v37  ;;  %v3550_v43 = vsel %vm3530_vm6, %v3517_v20, %v3066_v44  ;;  %v2671_v29 = vsel %vm5030_vm14, %v2669_v17, %v2670_v42  ;;  %v2646_v32 = vrot.slane %v6112_v15, 5 }
 0x1b1   : > { %v6249_v11 = vpop.permute.xlu2 %3133  ;;  %v2480_v13 = vshrl.u32 %v2101_v62, 16  ;;  %v3556_v57 = vsel %vm3530_vm6, %v3523_v55, %v3072_v19  ;;  %v1877_v47 = vor.u32 %v1876_v48, %v1873_v4  ;;  %v2483_v46 = vshll.u32 %v2101_v62, 16  ;;  %v2118_v48 = vld [vmem:[#allocation2 + $0xd4] sm:$0x1] }
 0x1b2   : > { %v3301_v5 = vpack.c.b16 %v3284_v60, %v3283_v18  ;;  %v3363_v61 = vunpack.c.l.b16 %v2668_v52  ;;  %v1887_v41 = vor.u32 %v1886_v54, %v6243_v10  ;;  %v2065_v44 = vrot.slane %v6218_v35, 5 }
 0x1b3   : > { %v3583_v15 = vsel %vm3563_vm7, %v3550_v43, %v6089_v14  ;;  %v3364_v31 = vunpack.c.l.b16 %v2671_v29  ;;  %v1892_v58 = vrot.slane %v1890_v40, 5  ;;  %v2648_v19 = vrot.slane %v2646_v32, 4 }
 0x1b4   : > { %3245 = vrot.lane.b32.xlu1 %v4478_v2, %s4547_s27  ;;  %v6259_v2 = vld [vmem:[#allocation2 + $0xd0] sm:$0xf]  ;;  %v4190_v20 = vrot.slane %v1909_v49, 9  ;;  %v2068_v16 = vrot.slane %v6236_v33, 5  ;;  %v2649_v8 = vrot.slane %v6133_v45, 5  ;;  %v1878_v35 = vrot.slane %v1877_v47, 4 }
 0x1b5   : > { %3155 = vrot.lane.b32.xlu0 %v3125_v34, %s4548_s28  ;;  %v2647_v34 = vsel %vm5030_vm14, %v4202_v7, %v2646_v32  ;;  %v2489_v50 = vshll.u32 %v6259_v2, 16  ;;  %v2493_v1 = vshrl.u32 %v6259_v2, 16  ;;  %v1888_v14 = vrot.slane %v1887_v41, 4 }
 0x1b6   : > { %v3242_v9 = vpop.permute.xlu1 %3241  ;;  %v3357_v6 = vunpack.c.l.b16 %v2647_v34  ;;  %v2067_v3 = vrot.slane %v2065_v44, 4  ;;  %v2650_v38 = vsel %vm5030_vm14, %v2648_v19, %v2649_v8  ;;  %v2482_v27 = vrot.slane %v2480_v13, 4 }
 0x1b7   : > { %v3152_v28 = vpop.permute.xlu0 %3151  ;;  %v3616_v55 = vsel %vm3596_vm8, %v3583_v15, %v3242_v9  ;;  %v3358_v42 = vunpack.c.l.b16 %v2650_v38  ;;  %v2485_v30 = vrot.slane %v2483_v46, 5  ;;  %v2491_v45 = vrot.slane %v2489_v50, 5 }
 0x1b8   : > { %v2495_v33 = vrot.slane %v2493_v1, 4  ;;  %v3589_v25 = vsel %vm3563_vm7, %v3556_v57, %v3152_v28  ;;  %v3381_v60 = vpack.c.b16 %v3364_v31, %v3363_v61  ;;  %v2870_v4 = vpack.c.b16 %v2854_v22, %v2853_v63  ;;  %v2518_v28 = vld [vmem:[#allocation2 + $0xcc] sm:$0xe] }
 0x1b9   : > { %v2066_v18 = vsel %vm5030_vm14, %v4190_v20, %v2065_v44  ;;  %v3378_v54 = vpack.c.b16 %v3358_v42, %v3357_v6  ;;  %v6281_v52 = vpop.permute.xlu2 %3235  ;;  %v1893_v40 = vsel %vm4636_vm10, %v1888_v14, %v1892_v58  ;;  %v2069_v63 = vsel %vm5030_vm14, %v2067_v3, %v2068_v16  ;;  %v4482_v14 = vld [vmem:[#allocation2 + $0xcc] sm:$0xff] }
 0x1ba   : > { %v2674_v22 = vrot.slane %v6259_v2, 5  ;;  %v2496_v7 = vor.u32 %v2495_v33, %v2491_v45  ;;  %v2499_v43 = vshll.u32 %v2118_v48, 16  ;;  %v3030_v32 = vunpack.c.l.b16 %v1893_v40  ;;  %v4466_v2 = vld [vmem:[#allocation2 + $0xc0] sm:$0xff] }
 0x1bb   : > { %3405 = vrot.lane.b32.xlu2 %v3378_v54, %s4549_s29  ;;  %v3109_v13 = vunpack.c.l.b16 %v2066_v18  ;;  %v3110_v57 = vunpack.c.l.b16 %v2069_v63  ;;  %v4206_v47 = vrot.slane %v2518_v28, 9  ;;  %v2677_v46 = vrot.slane %v2118_v48, 5 }
 0x1bc   : > { %3331 = vrot.lane.b32.xlu1 %v3301_v5, %s4546_s26  ;;  %v2676_v49 = vrot.slane %v2674_v22, 4  ;;  %v2497_v44 = vrot.slane %v2496_v7, 4  ;;  %v2501_v34 = vrot.slane %v2499_v43, 5 }
 0x1bd   : > { %3325 = vrot.lane.b32.xlu0 %v3298_v59, %s4546_s26  ;;  %v1883_v59 = vsel %vm4636_vm10, %v1878_v35, %v6243_v10  ;;  %v2486_v10 = vor.u32 %v2485_v30, %v2482_v27  ;;  %v3126_v31 = vpack.c.b16 %v3110_v57, %v3109_v13  ;;  %v2675_v19 = vsel %vm5030_vm14, %v4206_v47, %v2674_v22 }
 0x1be   : > { %v3328_v17 = vpop.permute.xlu1 %3327  ;;  %v3029_v29 = vunpack.c.l.b16 %v1883_v59  ;;  %v2502_v16 = vsel %vm4636_vm10, %v2497_v44, %v2501_v34  ;;  %v3365_v35 = vunpack.c.l.b16 %v2675_v19 }
 0x1bf   : > { %v3322_v37 = vpop.permute.xlu0 %3321  ;;  %v2487_v41 = vrot.slane %v2486_v10, 4  ;;  %v3286_v1 = vunpack.c.l.b16 %v2502_v16 }
 0x1c0   : > { %v3649_v62 = vsel %vm3629_vm12, %v3616_v55, %v3322_v37  ;;  %v3046_v58 = vpack.c.b16 %v3030_v32, %v3029_v29  ;;  %v2678_v55 = vsel %vm5030_vm14, %v2676_v49, %v2677_v46  ;;  %v3511_v37 = vsel %vm3497_vm4, %v5616_v56, %v6211_v36 }
 0x1c1   : > { %v3682_v9 = vsel %vm3662_vm13, %v3649_v62, %v6167_v51  ;;  %v3622_v51 = vsel %vm3596_vm8, %v3589_v25, %v6131_v53  ;;  %v2492_v20 = vsel %vm4636_vm10, %v2487_v41, %v2491_v45  ;;  %v3390_v8 = vpop.permute.xlu2 %3389  ;;  %v3366_v6 = vunpack.c.l.b16 %v2678_v55 }
 0x1c2   : > { %4424 = vmatmul.msk.bf16.gmra.mxu2 %vm3731_vm2, %v3682_v9  ;;  %v3655_v5 = vsel %vm3629_vm12, %v3622_v51, %v3328_v17  ;;  %v3285_v50 = vunpack.c.l.b16 %v2492_v20 }
 0x1c3   : > { %2997 = vrot.lane.b32.xlu2 %v4466_v2, %s4545_s25  ;;  %v3382_v38 = vpack.c.b16 %v3366_v6, %v3365_v35 }
 0x1c4   : > { %2901 = vrot.lane.b32.xlu1 %v2870_v4, %s4543_s23  ;;  %v3302_v27 = vpack.c.b16 %v3286_v1, %v3285_v50 }
 0x1c5   : > { %3411 = vrot.lane.b32.xlu0 %v3381_v60, %s4549_s29 }
 0x1c6   : > { %v2974_v61 = vpop.permute.xlu1 %2973 }
 0x1c7   : > { %v3408_v15 = vpop.permute.xlu0 %3407  ;;  %v3505_v17 = vsel %vm3497_vm4, %v5561_v0, %v2974_v61 }
 0x1c8   : > { %v3688_v53 = vsel %vm3662_vm13, %v3655_v5, %v3408_v15 }
 0x1c9   : > { %4427 = vmatmul.msk.bf16.vlgmr.msra.gmra.mxu3 %vm3731_vm2, %v3688_v53  ;;  %v2994_v39 = vpop.permute.xlu2 %2993 }
 0x1ca   : > { %v3525_v35 = vsel %vm3497_vm4, %v5523_v24, %v2994_v39 }
 0x1cb   : > { %3253 = vrot.lane.b32.xlu2 %v4482_v14, %s4547_s27 }
 0x1cc   : > { %3157 = vrot.lane.b32.xlu1 %v3126_v31, %s4548_s28 }
 0x1cd   : > { %3077 = vrot.lane.b32.xlu0 %v3046_v58, %s4544_s24 }
 0x1ce   : > { %v3060_v21 = vpop.permute.xlu1 %3059 }
 0x1cf   : > { %v3054_v3 = vpop.permute.xlu0 %3053  ;;  %v3544_v0 = vsel %vm3530_vm6, %v3511_v37, %v3060_v21 }
 0x1d0   : > { %v3538_v33 = vsel %vm3530_vm6, %v3505_v17, %v3054_v3 }
 0x1d1   : > { %v3571_v25 = vsel %vm3563_vm7, %v3538_v33, %v6249_v11  ;;  %v3148_v18 = vpop.permute.xlu2 %3147 }
 0x1d4   : > { %3413 = vrot.lane.b32.xlu1 %v3382_v38, %s4549_s29 }
 0x1d5   : > { %3333 = vrot.lane.b32.xlu0 %v3302_v27, %s4546_s26 }
 0x1d6   : > { %v3777_v42 = vpop.f32.mrf.mxu0  ;;  %v3230_v30 = vpop.permute.xlu1 %3229 }
 0x1d7   : > { %4031 = vst.msk [vmem:[%s6314_s17] sm:$0xff] %vm3415_vm15, %v3777_v42  ;;  %v3140_v45 = vpop.permute.xlu0 %3139  ;;  %v3926_v60 = vmul.f32 %v3777_v42, %v3777_v42  ;;  %v3604_v4 = vsel %vm3596_vm8, %v3571_v25, %v3230_v30  ;;  %v3857_v59 = vsel %vm3415_vm15, %v3777_v42, 0.0 }
 0x1d8   : > { %v3577_v36 = vsel %vm3563_vm7, %v3544_v0, %v3140_v45 }
 0x1d9   : > { %v3958_v56 = vsel %vm3415_vm15, %v3926_v60, 0.0  ;;  %v3610_v43 = vsel %vm3596_vm8, %v3577_v36, %v6281_v52  ;;  %v3250_v13 = vpop.permute.xlu2 %3249 }
 0x1de   : > { %v3779_v48 = vpop.f32.mrf.mxu0  ;;  %v3316_v62 = vpop.permute.xlu1 %3315 }
 0x1df   : > { %v3858_v54 = vsel %vm3415_vm15, %v3779_v48, 0.0  ;;  %v3927_v9 = vmul.f32 %v3779_v48, %v3779_v48  ;;  %4032 = vst.msk [vmem:[%s6314_s17 + $0x8] sm:$0xff] %vm3415_vm15, %v3779_v48  ;;  %v3310_v11 = vpop.permute.xlu0 %3309  ;;  %v3643_v28 = vsel %vm3629_vm12, %v3610_v43, %v3316_v62 }
 0x1e0   : > { %v3859_v40 = vadd.f32 %v3858_v54, %v3857_v59  ;;  %v3637_v63 = vsel %vm3629_vm12, %v3604_v4, %v3310_v11 }
 0x1e1   : > { %v3959_v22 = vsel %vm3415_vm15, %v3927_v9, 0.0  ;;  %v3670_v10 = vsel %vm3662_vm13, %v3637_v63, %v3390_v8  ;;  %v3404_v41 = vpop.permute.xlu2 %3403 }
 0x1e2   : > { %v3960_v7 = vadd.f32 %v3959_v22, %v3958_v56  ;;  %4418 = vmatmul.msk.bf16.gmra.mxu0 %vm3731_vm2, %v3670_v10 }
 0x1e6   : > { %v2988_v51 = vpop.permute.xlu1 %2987 }
 0x1e7   : > { %v3396_v29 = vpop.permute.xlu0 %3395  ;;  %v3519_v34 = vsel %vm3497_vm4, %v5486_v23, %v2988_v51 }
 0x1e8   : > { %v3676_v32 = vsel %vm3662_vm13, %v3643_v28, %v3396_v29 }
 0x1e9   : > { %4421 = vmatmul.msk.bf16.gmra.mxu1 %vm3731_vm2, %v3676_v32  ;;  %v3062_v6 = vpop.permute.xlu2 %3061 }
 0x1ee   : > { %v3074_v57 = vpop.permute.xlu1 %3073 }
 0x1ef   : > { %v3782_v5 = vpop.f32.mrf.mxu0  ;;  %v3068_v47 = vpop.permute.xlu0 %3067  ;;  %v3558_v1 = vsel %vm3530_vm6, %v3525_v35, %v3074_v57 }
 0x1f0   : > { %v3860_v49 = vsel %vm3415_vm15, %v3782_v5, 0.0  ;;  %v3928_v46 = vmul.f32 %v3782_v5, %v3782_v5  ;;  %4033 = vst.msk [vmem:[%s6314_s17 + $0x10] sm:$0xff] %vm3415_vm15, %v3782_v5  ;;  %v3552_v55 = vsel %vm3530_vm6, %v3519_v34, %v3068_v47 }
 0x1f1   : > { %v3861_v52 = vadd.f32 %v3860_v49, %v3859_v40  ;;  %v3585_v8 = vsel %vm3563_vm7, %v3552_v55, %v3148_v18  ;;  %v3318_v30 = vpop.permute.xlu2 %3317 }
 0x1f2   : > { %v3961_v61 = vsel %vm3415_vm15, %v3928_v46, 0.0 }
 0x1f3   : > { %v3962_v44 = vadd.f32 %v3961_v61, %v3960_v7 }
 0x1f6   : > { %v6351_v2 = vpop.f32.mrf.mxu1  ;;  %v3244_v15 = vpop.permute.xlu1 %3243 }
 0x1f7   : > { %4039 = vst.msk [vmem:[%s6314_s17 + $0x40] sm:$0xff] %vm3415_vm15, %v6351_v2  ;;  %v3784_v53 = vpop.f32.mrf.mxu0  ;;  %v3154_v31 = vpop.permute.xlu0 %3153  ;;  %v3618_v50 = vsel %vm3596_vm8, %v3585_v8, %v3244_v15 }
 0x1f8   : > { %v3862_v58 = vsel %vm3415_vm15, %v3784_v53, 0.0  ;;  %v3929_v19 = vmul.f32 %v3784_v53, %v3784_v53  ;;  %4034 = vst.msk [vmem:[%s6314_s17 + $0x18] sm:$0xff] %vm3415_vm15, %v3784_v53  ;;  %v3591_v27 = vsel %vm3563_vm7, %v3558_v1, %v3154_v31 }
 0x1f9   : > { %v3863_v20 = vadd.f32 %v3862_v58, %v3861_v52  ;;  %v3624_v24 = vsel %vm3596_vm8, %v3591_v27, %v3250_v13  ;;  %v2996_v48 = vpop.permute.xlu2 %2995 }
 0x1fa   : > { %v3963_v16 = vsel %vm3415_vm15, %v3929_v19, 0.0 }
 0x1fb   : > { %v3964_v23 = vadd.f32 %v3963_v16, %v3962_v44  ;;  %v6614_v44 = vld [vmem:[#allocation4_spill] sm:$0xff] }
 0x1fc   : > { %v3527_v34 = vsel %vm3497_vm4, %v6614_v44, %v2996_v48 }
 0x1fe   : > { %v6366_v21 = vpop.f32.mrf.mxu1  ;;  %v3330_v14 = vpop.permute.xlu1 %3329 }
 0x1ff   : > { %4040 = vst.msk [vmem:[%s6314_s17 + $0x48] sm:$0xff] %vm3415_vm15, %v6366_v21  ;;  %v3324_v3 = vpop.permute.xlu0 %3323  ;;  %v3657_v39 = vsel %vm3629_vm12, %v3624_v24, %v3330_v14 }
 0x200   : > { %v3651_v38 = vsel %vm3629_vm12, %v3618_v50, %v3324_v3 }
 0x201   : > { %v3684_v17 = vsel %vm3662_vm13, %v3651_v38, %v3404_v41  ;;  %v3150_v40 = vpop.permute.xlu2 %3149  ;;  %v6615_v38 = vld [vmem:[#allocation3_spill] sm:$0xff] }
 0x202   : > { %4425 = vmatmul.msk.bf16.gmra.mxu2 %vm3731_vm2, %v3684_v17 }
 0x206   : > { %v2982_v42 = vpop.permute.xlu1 %2981 }
 0x207   : > { %v3410_v45 = vpop.permute.xlu0 %3409  ;;  %v3513_v25 = vsel %vm3497_vm4, %v5444_v26, %v2982_v42 }
 0x208   : > { %v3690_v33 = vsel %vm3662_vm13, %v3657_v39, %v3410_v45  ;;  %v3546_v60 = vsel %vm3530_vm6, %v3513_v25, %v3062_v6  ;;  %v4450_v6 = vld [vmem:[#allocation2 + $0xb4] sm:$0xff] }
 0x209   : > { %4428 = vmatmul.msk.bf16.gmra.mxu3 %vm3731_vm2, %v3690_v33  ;;  %v3252_v51 = vpop.permute.xlu2 %3251  ;;  %v3463_v27 = vsel %vm3415_vm15, %v4450_v6, %v6615_v38 }
 0x20c   : > { %v6381_v37 = vpop.f32.mrf.mxu2 }
 0x20d   : > { %4047 = vst.msk [vmem:[%s6314_s17 + $0x80] sm:$0xff] %vm3415_vm15, %v6381_v37 }
 0x20e   : > { %v3238_v4 = vpop.permute.xlu1 %3237 }
 0x20f   : > { %v3142_v0 = vpop.permute.xlu0 %3141 }
 0x210   : > { %v3579_v62 = vsel %vm3563_vm7, %v3546_v60, %v3142_v0 }
 0x211   : > { %v3612_v59 = vsel %vm3596_vm8, %v3579_v62, %v3238_v4 }
 0x212   : > { %v3645_v26 = vsel %vm3629_vm12, %v3612_v59, %v3318_v30 }
 0x214   : > { %v6389_v18 = vpop.f32.mrf.mxu2 }
 0x215   : > { %4048 = vst.msk [vmem:[%s6314_s17 + $0x88] sm:$0xff] %vm3415_vm15, %v6389_v18  ;;  %v3406_v53 = vpop.permute.xlu2 %3405 }
 0x216   : > { %v2990_v54 = vpop.permute.xlu1 %2989 }
 0x217   : > { %v3398_v9 = vpop.permute.xlu0 %3397  ;;  %v3521_v29 = vsel %vm3497_vm4, %v5723_v12, %v2990_v54 }
 0x218   : > { %v3678_v11 = vsel %vm3662_vm13, %v3645_v26, %v3398_v9 }
 0x219   : > { %4422 = vmatmul.msk.bf16.gmra.mxu1 %vm3731_vm2, %v3678_v11 }
 0x21d   : > { %v2998_v3 = vpop.permute.xlu2 %2997 }
 0x21e   : > { %v3076_v63 = vpop.permute.xlu1 %3075 }
 0x21f   : > { %v3787_v56 = vpop.f32.mrf.mxu0  ;;  %v3070_v36 = vpop.permute.xlu0 %3069  ;;  %v3560_v31 = vsel %vm3530_vm6, %v3527_v34, %v3076_v63 }
 0x220   : > { %v3864_v22 = vsel %vm3415_vm15, %v3787_v56, 0.0  ;;  %v3930_v10 = vmul.f32 %v3787_v56, %v3787_v56  ;;  %4035 = vst.msk [vmem:[%s6314_s17 + $0x20] sm:$0xff] %vm3415_vm15, %v3787_v56  ;;  %v3554_v46 = vsel %vm3530_vm6, %v3521_v29, %v3070_v36  ;;  %v3872_v29 = vsel %vm3415_vm15, %v6351_v2, 0.0 }
 0x221   : > { %v3865_v7 = vadd.f32 %v3864_v22, %v3863_v20  ;;  %v3587_v41 = vsel %vm3563_vm7, %v3554_v46, %v3150_v40  ;;  %v3874_v46 = vsel %vm3415_vm15, %v6366_v21, 0.0 }
 0x222   : > { %v3965_v43 = vsel %vm3415_vm15, %v3930_v10, 0.0 }
 0x223   : > { %v3966_v28 = vadd.f32 %v3965_v43, %v3964_v23 }
 0x225   : > { %v3254_v33 = vpop.permute.xlu2 %3253 }
 0x226   : > { %v6403_v32 = vpop.f32.mrf.mxu1  ;;  %v3246_v13 = vpop.permute.xlu1 %3245 }
 0x227   : > { %4041 = vst.msk [vmem:[%s6314_s17 + $0x50] sm:$0xff] %vm3415_vm15, %v6403_v32  ;;  %v3789_v57 = vpop.f32.mrf.mxu0  ;;  %v3156_v5 = vpop.permute.xlu0 %3155  ;;  %v3620_v15 = vsel %vm3596_vm8, %v3587_v41, %v3246_v13  ;;  %v3935_v13 = vmul.f32 %v6366_v21, %v6366_v21  ;;  %v3876_v41 = vsel %vm3415_vm15, %v6403_v32, 0.0 }
 0x228   : > { %v3866_v47 = vsel %vm3415_vm15, %v3789_v57, 0.0  ;;  %v3931_v49 = vmul.f32 %v3789_v57, %v3789_v57  ;;  %4036 = vst.msk [vmem:[%s6314_s17 + $0x28] sm:$0xff] %vm3415_vm15, %v3789_v57  ;;  %v3593_v16 = vsel %vm3563_vm7, %v3560_v31, %v3156_v5 }
 0x229   : > { %v3867_v52 = vadd.f32 %v3866_v47, %v3865_v7  ;;  %v3626_v8 = vsel %vm3596_vm8, %v3593_v16, %v3252_v51  ;;  %v3934_v7 = vmul.f32 %v6351_v2, %v6351_v2  ;;  %v3975_v2 = vsel %vm3415_vm15, %v3935_v13, 0.0 }
 0x22a   : > { %v3967_v61 = vsel %vm3415_vm15, %v3931_v49, 0.0 }
 0x22b   : > { %v3968_v12 = vadd.f32 %v3967_v61, %v3966_v28  ;;  %v3973_v49 = vsel %vm3415_vm15, %v3934_v7, 0.0 }
 0x22e   : > { %v6418_v58 = vpop.f32.mrf.mxu1  ;;  %v3332_v19 = vpop.permute.xlu1 %3331 }
 0x22f   : > { %4042 = vst.msk [vmem:[%s6314_s17 + $0x58] sm:$0xff] %vm3415_vm15, %v6418_v58  ;;  %v3326_v55 = vpop.permute.xlu0 %3325  ;;  %v3659_v35 = vsel %vm3629_vm12, %v3626_v8, %v3332_v19  ;;  %v3937_v44 = vmul.f32 %v6418_v58, %v6418_v58  ;;  %v3878_v31 = vsel %vm3415_vm15, %v6418_v58, 0.0 }
 0x230   : > { %v3653_v20 = vsel %vm3629_vm12, %v3620_v15, %v3326_v55 }
 0x231   : > { %v3686_v23 = vsel %vm3662_vm13, %v3653_v20, %v3406_v53 }
 0x232   : > { %4426 = vmatmul.msk.bf16.gmra.mxu2 %vm3731_vm2, %v3686_v23 }
 0x236   : > { %v2902_v50 = vpop.permute.xlu1 %2901 }
 0x237   : > { %v3412_v1 = vpop.permute.xlu0 %3411  ;;  %v3496_v17 = vsel %vm3464_vm1, %v3463_v27, %v2902_v50 }
 0x238   : > { %v3692_v14 = vsel %vm3662_vm13, %v3659_v35, %v3412_v1  ;;  %v3529_v24 = vsel %vm3497_vm4, %v3496_v17, %v2998_v3 }
 0x239   : > { %4429 = vmatmul.msk.bf16.gmra.mxu3 %vm3731_vm2, %v3692_v14 }
 0x23e   : > { %v3158_v39 = vpop.permute.xlu1 %3157 }
 0x23f   : > { %v3078_v42 = vpop.permute.xlu0 %3077 }
 0x240   : > { %v3562_v30 = vsel %vm3530_vm6, %v3529_v24, %v3078_v42 }
 0x241   : > { %v3595_v45 = vsel %vm3563_vm7, %v3562_v30, %v3158_v39 }
 0x242   : > { %v3628_v60 = vsel %vm3596_vm8, %v3595_v45, %v3254_v33 }
 0x245   : > { %v6437_v25 = vpop.f32.mrf.mxu2 }
 0x246   : > { %4049 = vst.msk [vmem:[%s6314_s17 + $0x90] sm:$0xff] %vm3415_vm15, %v6437_v25  ;;  %v3414_v4 = vpop.permute.xlu1 %3413  ;;  %v3944_v7 = vmul.f32 %v6437_v25, %v6437_v25 }
 0x247   : > { %v3334_v0 = vpop.permute.xlu0 %3333 }
 0x248   : > { %v3661_v48 = vsel %vm3629_vm12, %v3628_v60, %v3334_v0 }
 0x249   : > { %v3694_v62 = vsel %vm3662_vm13, %v3661_v48, %v3414_v4  ;;  %v3942_v4 = vmul.f32 %v6381_v37, %v6381_v37 }
 0x24a   : > { %4430 = vmatmul.msk.bf16.gmra.mxu3 %vm3731_vm2, %v3694_v62 }
 0x24c   : > { %v6446_v59 = vpop.f32.mrf.mxu3 }
 0x24d   : > { %4055 = vst.msk [vmem:[%s6314_s17 + $0xc0] sm:$0xff] %vm3415_vm15, %v6446_v59  ;;  %v6451_v26 = vpop.f32.mrf.mxu2 }
 0x24e   : > { %4050 = vst.msk [vmem:[%s6314_s17 + $0x98] sm:$0xff] %vm3415_vm15, %v6451_v26 }
 0x254   : > { %v6456_v54 = vpop.f32.mrf.mxu3 }
 0x255   : > { %4056 = vst.msk [vmem:[%s6314_s17 + $0xc8] sm:$0xff] %vm3415_vm15, %v6456_v54 }
 0x25f   : > { %v3792_v9 = vpop.f32.mrf.mxu0 }
 0x260   : > { %v3868_v11 = vsel %vm3415_vm15, %v3792_v9, 0.0  ;;  %v3932_v40 = vmul.f32 %v3792_v9, %v3792_v9  ;;  %4037 = vst.msk [vmem:[%s6314_s17 + $0x30] sm:$0xff] %vm3415_vm15, %v3792_v9 }
 0x261   : > { %v3869_v63 = vadd.f32 %v3868_v11, %v3867_v52  ;;  %v3936_v52 = vmul.f32 %v6403_v32, %v6403_v32  ;;  %v3979_v32 = vsel %vm3415_vm15, %v3937_v44, 0.0  ;;  %v3888_v11 = vsel %vm3415_vm15, %v6381_v37, 0.0 }
 0x262   : > { %v3969_v56 = vsel %vm3415_vm15, %v3932_v40, 0.0  ;;  %v3943_v40 = vmul.f32 %v6389_v18, %v6389_v18 }
 0x263   : > { %v3970_v36 = vadd.f32 %v3969_v56, %v3968_v12  ;;  %v3977_v21 = vsel %vm3415_vm15, %v3936_v52, 0.0 }
 0x264   : > { %v3991_v37 = vsel %vm3415_vm15, %v3943_v40, 0.0 }
 0x266   : > { %v3807_v22 = vpop.f32.mrf.mxu1 }
 0x267   : > { %4043 = vst.msk [vmem:[%s6314_s17 + $0x60] sm:$0xff] %vm3415_vm15, %v3807_v22  ;;  %v3794_v10 = vpop.f32.mrf.mxu0  ;;  %v3938_v19 = vmul.f32 %v3807_v22, %v3807_v22  ;;  %v3880_v16 = vsel %vm3415_vm15, %v3807_v22, 0.0  ;;  %v3989_v22 = vsel %vm3415_vm15, %v3942_v4, 0.0 }
 0x268   : > { %v3870_v43 = vsel %vm3415_vm15, %v3794_v10, 0.0  ;;  %v3933_v28 = vmul.f32 %v3794_v10, %v3794_v10  ;;  %4038 = vst.msk [vmem:[%s6314_s17 + $0x38] sm:$0xff] %vm3415_vm15, %v3794_v10  ;;  %v3890_v10 = vsel %vm3415_vm15, %v6389_v18, 0.0  ;;  %v3894_v18 = vsel %vm3415_vm15, %v6451_v26, 0.0 }
 0x269   : > { %v3871_v51 = vadd.f32 %v3870_v43, %v3869_v63  ;;  %v3981_v6 = vsel %vm3415_vm15, %v3938_v19, 0.0 }
 0x26a   : > { %v3971_v57 = vsel %vm3415_vm15, %v3933_v28, 0.0 }
 0x26b   : > { %v3873_v5 = vadd.f32 %v3872_v29, %v3871_v51  ;;  %v3972_v47 = vadd.f32 %v3971_v57, %v3970_v36  ;;  %v3892_v51 = vsel %vm3415_vm15, %v6437_v25, 0.0  ;;  %v3945_v29 = vmul.f32 %v6451_v26, %v6451_v26 }
 0x26d   : > { %v3875_v61 = vadd.f32 %v3874_v46, %v3873_v5  ;;  %v3974_v12 = vadd.f32 %v3973_v49, %v3972_v47  ;;  %v3993_v5 = vsel %vm3415_vm15, %v3944_v7, 0.0  ;;  %v3995_v46 = vsel %vm3415_vm15, %v3945_v29, 0.0 }
 0x26e   : > { %v3809_v34 = vpop.f32.mrf.mxu1 }
 0x26f   : > { %v3877_v15 = vadd.f32 %v3876_v41, %v3875_v61  ;;  %v3976_v53 = vadd.f32 %v3975_v2, %v3974_v12  ;;  %4044 = vst.msk [vmem:[%s6314_s17 + $0x68] sm:$0xff] %vm3415_vm15, %v3809_v34  ;;  %v3939_v23 = vmul.f32 %v3809_v34, %v3809_v34  ;;  %v3882_v50 = vsel %vm3415_vm15, %v3809_v34, 0.0 }
 0x271   : > { %v3978_v55 = vadd.f32 %v3977_v21, %v3976_v53  ;;  %v3879_v20 = vadd.f32 %v3878_v31, %v3877_v15  ;;  %v3983_v14 = vsel %vm3415_vm15, %v3939_v23, 0.0  ;;  %v3950_v23 = vmul.f32 %v6446_v59, %v6446_v59 }
 0x273   : > { %v3881_v8 = vadd.f32 %v3880_v16, %v3879_v20  ;;  %v3980_v35 = vadd.f32 %v3979_v32, %v3978_v55 }
 0x275   : > { %v3883_v58 = vadd.f32 %v3882_v50, %v3881_v8  ;;  %v3982_v1 = vadd.f32 %v3981_v6, %v3980_v35 }
 0x277   : > { %v3984_v3 = vadd.f32 %v3983_v14, %v3982_v1  ;;  %v3951_v1 = vmul.f32 %v6456_v54, %v6456_v54 }
 0x285   : > { %v3827_v38 = vpop.f32.mrf.mxu2 }
 0x286   : > { %4051 = vst.msk [vmem:[%s6314_s17 + $0xa0] sm:$0xff] %vm3415_vm15, %v3827_v38  ;;  %v3946_v61 = vmul.f32 %v3827_v38, %v3827_v38  ;;  %v3896_v25 = vsel %vm3415_vm15, %v3827_v38, 0.0 }
 0x288   : > { %v3997_v41 = vsel %vm3415_vm15, %v3946_v61, 0.0 }
 0x28c   : > { %v6499_v27 = vpop.f32.mrf.mxu3 }
 0x28d   : > { %4057 = vst.msk [vmem:[%s6314_s17 + $0xd0] sm:$0xff] %vm3415_vm15, %v6499_v27  ;;  %v3829_v17 = vpop.f32.mrf.mxu2 }
 0x28e   : > { %4052 = vst.msk [vmem:[%s6314_s17 + $0xa8] sm:$0xff] %vm3415_vm15, %v3829_v17  ;;  %v3947_v44 = vmul.f32 %v3829_v17, %v3829_v17  ;;  %v3898_v26 = vsel %vm3415_vm15, %v3829_v17, 0.0  ;;  %v4005_v17 = vsel %vm3415_vm15, %v3950_v23, 0.0 }
 0x290   : > { %v3999_v31 = vsel %vm3415_vm15, %v3947_v44, 0.0 }
 0x294   : > { %v6506_v24 = vpop.f32.mrf.mxu3 }
 0x295   : > { %4058 = vst.msk [vmem:[%s6314_s17 + $0xd8] sm:$0xff] %vm3415_vm15, %v6506_v24 }
 0x296   : > { %v3812_v39 = vpop.f32.mrf.mxu1 }
 0x297   : > { %4045 = vst.msk [vmem:[%s6314_s17 + $0x70] sm:$0xff] %vm3415_vm15, %v3812_v39  ;;  %v3940_v42 = vmul.f32 %v3812_v39, %v3812_v39  ;;  %v3884_v30 = vsel %vm3415_vm15, %v3812_v39, 0.0  ;;  %v3906_v39 = vsel %vm3415_vm15, %v6456_v54, 0.0  ;;  %v3953_v54 = vmul.f32 %v6506_v24, %v6506_v24 }
 0x298   : > { %v3885_v33 = vadd.f32 %v3884_v30, %v3883_v58  ;;  %v3904_v58 = vsel %vm3415_vm15, %v6446_v59, 0.0  ;;  %v3952_v59 = vmul.f32 %v6499_v27, %v6499_v27 }
 0x299   : > { %v3985_v45 = vsel %vm3415_vm15, %v3940_v42, 0.0  ;;  %v4011_v40 = vsel %vm3415_vm15, %v3953_v54, 0.0 }
 0x29a   : > { %v3986_v62 = vadd.f32 %v3985_v45, %v3984_v3  ;;  %v4007_v45 = vsel %vm3415_vm15, %v3951_v1, 0.0 }
 0x29e   : > { %v3814_v60 = vpop.f32.mrf.mxu1 }
 0x29f   : > { %v3886_v0 = vsel %vm3415_vm15, %v3814_v60, 0.0  ;;  %v3941_v48 = vmul.f32 %v3814_v60, %v3814_v60  ;;  %4046 = vst.msk [vmem:[%s6314_s17 + $0x78] sm:$0xff] %vm3415_vm15, %v3814_v60 }
 0x2a0   : > { %v3887_v9 = vadd.f32 %v3886_v0, %v3885_v33  ;;  %v3908_v33 = vsel %vm3415_vm15, %v6499_v27, 0.0 }
 0x2a1   : > { %v3987_v63 = vsel %vm3415_vm15, %v3941_v48, 0.0  ;;  %v4009_v48 = vsel %vm3415_vm15, %v3952_v59, 0.0 }
 0x2a2   : > { %v3889_v56 = vadd.f32 %v3888_v11, %v3887_v9  ;;  %v3988_v36 = vadd.f32 %v3987_v63, %v3986_v62  ;;  %v3910_v9 = vsel %vm3415_vm15, %v6506_v24, 0.0 }
 0x2a4   : > { %v3891_v43 = vadd.f32 %v3890_v10, %v3889_v56  ;;  %v3990_v28 = vadd.f32 %v3989_v22, %v3988_v36 }
 0x2a6   : > { %v3893_v13 = vadd.f32 %v3892_v51, %v3891_v43  ;;  %v3992_v57 = vadd.f32 %v3991_v37, %v3990_v28 }
 0x2a8   : > { %v3994_v47 = vadd.f32 %v3993_v5, %v3992_v57  ;;  %v3895_v49 = vadd.f32 %v3894_v18, %v3893_v13 }
 0x2aa   : > { %v3996_v52 = vadd.f32 %v3995_v46, %v3994_v47  ;;  %v3897_v2 = vadd.f32 %v3896_v25, %v3895_v49 }
 0x2ac   : > { %v3998_v15 = vadd.f32 %v3997_v41, %v3996_v52  ;;  %v3899_v21 = vadd.f32 %v3898_v26, %v3897_v2 }
 0x2ae   : > { %v4000_v32 = vadd.f32 %v3999_v31, %v3998_v15 }
 0x2b5   : > { %v3832_v12 = vpop.f32.mrf.mxu2 }
 0x2b6   : > { %4053 = vst.msk [vmem:[%s6314_s17 + $0xb0] sm:$0xff] %vm3415_vm15, %v3832_v12  ;;  %v3948_v34 = vmul.f32 %v3832_v12, %v3832_v12  ;;  %v3900_v53 = vsel %vm3415_vm15, %v3832_v12, 0.0 }
 0x2b7   : > { %v3901_v20 = vadd.f32 %v3900_v53, %v3899_v21 }
 0x2b8   : > { %v4001_v19 = vsel %vm3415_vm15, %v3948_v34, 0.0 }
 0x2b9   : > { %v4002_v6 = vadd.f32 %v4001_v19, %v4000_v32 }
 0x2bc   : > { %v3847_v55 = vpop.f32.mrf.mxu3 }
 0x2bd   : > { %4059 = vst.msk [vmem:[%s6314_s17 + $0xe0] sm:$0xff] %vm3415_vm15, %v3847_v55  ;;  %v3834_v16 = vpop.f32.mrf.mxu2  ;;  %v3954_v63 = vmul.f32 %v3847_v55, %v3847_v55  ;;  %v3912_v36 = vsel %vm3415_vm15, %v3847_v55, 0.0 }
 0x2be   : > { %v3902_v8 = vsel %vm3415_vm15, %v3834_v16, 0.0  ;;  %v3949_v35 = vmul.f32 %v3834_v16, %v3834_v16  ;;  %4054 = vst.msk [vmem:[%s6314_s17 + $0xb8] sm:$0xff] %vm3415_vm15, %v3834_v16 }
 0x2bf   : > { %v3903_v50 = vadd.f32 %v3902_v8, %v3901_v20  ;;  %v4013_v10 = vsel %vm3415_vm15, %v3954_v63, 0.0 }
 0x2c0   : > { %v4003_v14 = vsel %vm3415_vm15, %v3949_v35, 0.0 }
 0x2c1   : > { %v3905_v3 = vadd.f32 %v3904_v58, %v3903_v50  ;;  %v4004_v38 = vadd.f32 %v4003_v14, %v4002_v6 }
 0x2c3   : > { %v3907_v42 = vadd.f32 %v3906_v39, %v3905_v3  ;;  %v4006_v30 = vadd.f32 %v4005_v17, %v4004_v38 }
 0x2c4   : > { %v3849_v60 = vpop.f32.mrf.mxu3 }
 0x2c5   : > { %v3909_v4 = vadd.f32 %v3908_v33, %v3907_v42  ;;  %v4008_v0 = vadd.f32 %v4007_v45, %v4006_v30  ;;  %4060 = vst.msk [vmem:[%s6314_s17 + $0xe8] sm:$0xff] %vm3415_vm15, %v3849_v60  ;;  %v3955_v7 = vmul.f32 %v3849_v60, %v3849_v60  ;;  %v3914_v37 = vsel %vm3415_vm15, %v3849_v60, 0.0 }
 0x2c7   : > { %v4010_v62 = vadd.f32 %v4009_v48, %v4008_v0  ;;  %v3911_v11 = vadd.f32 %v3910_v9, %v3909_v4  ;;  %v4015_v29 = vsel %vm3415_vm15, %v3955_v7, 0.0 }
 0x2c9   : > { %v4012_v56 = vadd.f32 %v4011_v40, %v4010_v62  ;;  %v3913_v22 = vadd.f32 %v3912_v36, %v3911_v11 }
 0x2cb   : > { %v4014_v28 = vadd.f32 %v4013_v10, %v4012_v56  ;;  %v3915_v51 = vadd.f32 %v3914_v37, %v3913_v22 }
 0x2cd   : > { %v3852_v27 = vpop.f32.mrf.mxu3  ;;  %v4016_v57 = vadd.f32 %v4015_v29, %v4014_v28 }
 0x2ce   : > { %4061 = vst.msk [vmem:[%s6314_s17 + $0xf0] sm:$0xff] %vm3415_vm15, %v3852_v27  ;;  %v3956_v43 = vmul.f32 %v3852_v27, %v3852_v27  ;;  %v3916_v24 = vsel %vm3415_vm15, %v3852_v27, 0.0 }
 0x2cf   : > { %v3917_v5 = vadd.f32 %v3916_v24, %v3915_v51 }
 0x2d0   : > { %v4017_v13 = vsel %vm3415_vm15, %v3956_v43, 0.0 }
 0x2d1   : > { %v4018_v46 = vadd.f32 %v4017_v13, %v4016_v57 }
 0x2d5   : > { %v3854_v18 = vpop.f32.mrf.mxu3 }
 0x2d6   : > { %v3918_v47 = vsel %vm3415_vm15, %v3854_v18, 0.0  ;;  %v3957_v49 = vmul.f32 %v3854_v18, %v3854_v18  ;;  %4062 = vst.msk [vmem:[%s6314_s17 + $0xf8] sm:$0xff] %vm3415_vm15, %v3854_v18 }
 0x2d7   : > { %v3919_v52 = vadd.f32 %v3918_v47, %v3917_v5 }
 0x2d8   : > { %v4019_v61 = vsel %vm3415_vm15, %v3957_v49, 0.0 }
 0x2d9   : > { %v3920_v12 = vrot.slane %v3919_v52, 4  ;;  %v4020_v25 = vadd.f32 %v4019_v61, %v4018_v46 }
 0x2db   : > { %v3921_v2 = vadd.f32 %v3920_v12, %v3919_v52  ;;  %v4021_v41 = vrot.slane %v4020_v25, 4 }
 0x2dd   : > { %v3922_v44 = vrot.slane %v3921_v2, 2  ;;  %v4022_v34 = vadd.f32 %v4021_v41, %v4020_v25 }
 0x2df   : > { %v3923_v15 = vadd.f32 %v3922_v44, %v3921_v2  ;;  %v4023_v26 = vrot.slane %v4022_v34, 2 }
 0x2e1   : > { %v3924_v53 = vrot.slane %v3923_v15, 1  ;;  %v4024_v21 = vadd.f32 %v4023_v26, %v4022_v34 }
 0x2e3   : > { %v4025_v31 = vrot.slane %v4024_v21, 1  ;;  %v3925_v19 = vadd.f32 %v3924_v53, %v3923_v15 }
 0x2e5   : > { %v4026_v55 = vadd.f32 %v4025_v31, %v4024_v21 }
 0x2e7   : > { %v4028_v20 = vsel %vm4027_vm0, %v3925_v19, %v4026_v55 }
 0x2e8   : > { %4030 = vst.msk [vmem:[%s235_s21] sm:$0x3] %vm4029_vm3, %v4028_v20 }
 0x2e9 PF: > { %s16_s18 = sadd.s32 1, %s4539_s18  }
 0x2ea   : > { %p13_p4 = scmp.ge.s32.totalorder %s16_s18, 4  }
 0x2ec   :  { %15 = sbr.rel (!%p13_p4) target bundleno = 1 (0x1), region = 81 }

// kernel: basic_block_forward.4
= control target key start
LH: loop header
LB: loop body
LE: loop exit
PB: predicated region body
PF: predicated region fallthrough
CT: control target
= control target key end

     0   :  { %s4687_s18 = smov 0   ;;  %s6617_s0 = inlined_call_operand.vmem [shape: f32[2,16,16,8], index: 0, kind: input, shape index: {}]   ;;  %s6618_s1 = inlined_call_operand.vmem [shape: f32[1,1,8], index: 1, kind: input, shape index: {}]   ;;  %s6619_s2 = inlined_call_operand.vmem [shape: f32[1,1,8], index: 2, kind: input, shape index: {}]   ;;  %s6620_s3 = inlined_call_operand.vmem [shape: bf16[72,8], index: 3, kind: input, shape index: {}]   ;;  %s6621_s4 = inlined_call_operand.vmem [shape: f32[2,16,16,8], index: 4, kind: output, shape index: {0}]   ;;  %s6622_s5 = inlined_call_operand.vmem [shape: f32[2,2,8], index: 5, kind: output, shape index: {1}]  }
   0x1 LB: > { %s4253_s19 = sadd.s32 4294967295, %s4646_s18   ;;  %p4257_p0 = scmp.ge.s32.totalorder %s4646_s18, 1  ;;  %s4646_s18 = sphi %s4687_s18, %s16_s18  }
   0x2   : > { %p190_p1 = scmp.lt.s32.totalorder %s4646_s18, 3 }
   0x4   : > { %p191_p2 = pnand %p4257_p0, %p190_p1 }
   0x5   : > { %p222_p3 = scmp.lt.s32.totalorder (!%p191_p2), %s4253_s19, 1  ;;  %s4649_s28 = smov (!%p191_p2), 16  }
   0x6   : > { %194 = sbr.rel (%p191_p2) target bundleno = 770 (0x302), region = 36  ;;  %s4650_s29 = smov (!%p191_p2), 8  }
   0x7   : > { %s4651_s9 = smov (!%p191_p2), 24   ;;  %s4652_s10 = smov (!%p191_p2), 48  }
   0x8   : > { %s4653_s11 = smov (!%p191_p2), 40   ;;  %s4654_s12 = smov (!%p191_p2), 32  }
   0x9   : > { %s4655_s13 = smov (!%p191_p2), 64   ;;  %s4656_s14 = smov (!%p191_p2), 56  }
   0xb   : > { %vm405_vm0 = vcmask 60416   ;;  %vm408_vm1 = vcmask 57344   ;;  %vm416_vm2 = vsmask.f32 256  ;;  %v4648_v0 = vmov 0   ;;  %s6636_s19 = smov (!%p222_p3, %s4253_s19), 1 }
   0xc   : > { %406 = vst.msk [vmem:[#allocation2] sm:$0xf] %vm405_vm0, %v4648_v0  ;;  %vm466_vm3 = vsmask.f32 7938  ;;  %vm4700_vm4 = vmand %vm408_vm1, %vm416_vm2  ;;  %vm1451_vm5 = vcmask 1042432   ;;  %vm1452_vm8 = vcmask 1046532  }
   0xd   : > { %407 = vst.msk [vmem:[#allocation2 + $0x4] sm:$0xf] %vm405_vm0, %v4648_v0  ;;  %vm4706_vm6 = vmand %vm408_vm1, %vm466_vm3  ;;  %vm1000_vm7 = vsmask.f32 3328  ;;  %v4717_v3 = vld [vmem:[%s6618_s1] ss:$0 sm:$0xff] }
   0xe   : > { %409 = vst.msk [vmem:[#allocation2 + $0x8] sm:$0x1] %vm408_vm1, %v4648_v0  ;;  %v418_v4 = vld [vmem:[#allocation2 + $0xc] sm:$0x1]  ;;  %v468_v5 = vld [vmem:[#allocation2 + $0x14] sm:$0x1]  ;;  %vm4739_vm10 = vmor %vm1451_vm5, %vm1452_vm8 }
   0xf   : > { %411 = vst.msk [vmem:[#allocation2 + $0xcc] sm:$0xf] %vm405_vm0, %v4648_v0  ;;  %vm1001_vm9 = vsmask.f32 7440  ;;  %s4537_s22 = sshll.u32 %s6636_s19, 8  ;;  %v419_v6 = vsel %vm4700_vm4, 0, %v418_v4  ;;  %vm4780_vm13 = vmand %vm405_vm0, %vm466_vm3 }
  0x10   : > { %412 = vst.msk [vmem:[#allocation2 + $0xd0] sm:$0xf] %vm405_vm0, %v4648_v0  ;;  %v469_v7 = vsel %vm4706_vm6, 0, %v468_v5  ;;  %s4730_s25 = scalar_lea.vmem %s6617_s0, %s4537_s22  ;;  %v4735_v10 = vld [vmem:[%s6619_s2] ss:$0 sm:$0xff]  ;;  %vm4755_vm12 = vmor %vm1000_vm7, %vm1001_vm9  ;;  %vm3519_vm15 = vcmask 64512   ;;  %s6320_s15 = scalar_lea.vmem %s6621_s4, %s4537_s22 }
  0x11   : > { %413 = vst.msk [vmem:[#allocation2 + $0xd4] sm:$0x1] %vm408_vm1, %v4648_v0  ;;  %v237_v16 = vld [vmem:[%s4730_s25] sm:$0xff]  ;;  %v238_v21 = vld [vmem:[%s4730_s25 + $0x8] sm:$0xff]  ;;  %v239_v31 = vld [vmem:[%s4730_s25 + $0x10] sm:$0xff]  ;;  %vm3568_vm1 = vcmask 130048  }
  0x12   : > { %420 = vst [vmem:[#allocation2 + $0xc] sm:$0x1] %v419_v6  ;;  %v273_v22 = vmul.f32 %v4717_v3, %v237_v16  ;;  %v240_v32 = vld [vmem:[%s4730_s25 + $0x18] sm:$0xff]  ;;  %v274_v36 = vmul.f32 %v4717_v3, %v238_v21  ;;  %vm516_vm11 = vsmask.f32 4368  ;;  %v275_v42 = vmul.f32 %v4717_v3, %v239_v31  ;;  %v243_v56 = vld [vmem:[%s4730_s25 + $0x30] sm:$0xff] }
  0x13   : > { %v1387_v8 = vld [vmem:[#allocation2] sm:$0xe]  ;;  %470 = vst [vmem:[#allocation2 + $0x14] sm:$0x1] %v469_v7  ;;  %v421_v37 = vld [vmem:[#allocation2 + $0x18] sm:$0x1]  ;;  %v276_v46 = vmul.f32 %v4717_v3, %v240_v32  ;;  %vm4788_vm14 = vmor %vm416_vm2, %vm516_vm11 }
  0x14   : > { %v952_v9 = vld [vmem:[#allocation2] sm:$0xf]  ;;  %v953_v11 = vld [vmem:[#allocation2 + $0x4] sm:$0xf]  ;;  %v4263_v13 = vrot.slane %v1387_v8, 9  ;;  %v309_v41 = vadd.f32 %v4735_v10, %v273_v22  ;;  %v310_v45 = vadd.f32 %v4735_v10, %v274_v36  ;;  %v311_v49 = vadd.f32 %v4735_v10, %v275_v42  ;;  %v244_v4 = vld [vmem:[%s4730_s25 + $0x38] sm:$0xff] }
  0x15   : > { %v1004_v14 = vshrl.u32 %v952_v9, 16  ;;  %v1007_v15 = vshll.u32 %v952_v9, 16  ;;  %v984_v17 = vld [vmem:[#allocation2 + $0x8] sm:$0x1]  ;;  %v1456_v18 = vrot.slane %v953_v11, 5  ;;  %v1013_v19 = vshll.u32 %v953_v11, 16 }
  0x16   : > { %v1017_v20 = vshrl.u32 %v953_v11, 16  ;;  %v1459_v23 = vrot.slane %v984_v17, 5  ;;  %v1023_v26 = vshll.u32 %v984_v17, 16  ;;  %v341_v48 = vmax.f32 %v309_v41, 0.0  ;;  %v471_v51 = vld [vmem:[#allocation2 + $0x20] sm:$0x1] }
  0x17   : > { %v1006_v24 = vrot.slane %v1004_v14, 4  ;;  %v1009_v25 = vrot.slane %v1007_v15, 5  ;;  %v1457_v27 = vsel %vm4739_vm10, %v4263_v13, %v1456_v18  ;;  %v1458_v28 = vrot.slane %v1456_v18, 4  ;;  %v477_v32 = vld [vmem:[#allocation2 + $0x38] sm:$0x1]  ;;  %s4262_s22 = sshll.u32 %s6636_s19, 1 }
  0x18   : > { %v1015_v29 = vrot.slane %v1013_v19, 5  ;;  %v1019_v30 = vrot.slane %v1017_v20, 4  ;;  %v2927_v33 = vunpack.c.l.b16 %v1457_v27  ;;  %v1025_v35 = vrot.slane %v1023_v26, 5 }
  0x19   : > { %v1010_v34 = vor.u32 %v1009_v25, %v1006_v24  ;;  %v1460_v38 = vsel %vm4739_vm10, %v1458_v28, %v1459_v23  ;;  %v422_v50 = vsel %vm4700_vm4, 0, %v421_v37  ;;  %v342_v54 = vmax.f32 %v310_v45, 0.0  ;;  %v840_v21 = vld [vmem:[#allocation2 + $0xc] sm:$0xf]  ;;  %v427_v25 = vld [vmem:[#allocation2 + $0x30] sm:$0x1] }
  0x1a   : > { %v1020_v40 = vor.u32 %v1019_v30, %v1015_v29  ;;  %v2928_v43 = vunpack.c.l.b16 %v1460_v38  ;;  %v312_v55 = vadd.f32 %v4735_v10, %v276_v46  ;;  %423 = vst [vmem:[#allocation2 + $0x18] sm:$0x1] %v422_v50  ;;  %v373_v59 = vpack.c.bf16 %v341_v48, %v341_v48  ;;  %v241_v38 = vld [vmem:[%s4730_s25 + $0x20] sm:$0xff]  ;;  %v4798_v45 = vld [vmem:[#allocation2 + $0x2c] sm:$0x1] }
  0x1b   : > { %v1011_v44 = vrot.slane %v1010_v34, 4  ;;  %v343_v60 = vmax.f32 %v311_v49, 0.0  ;;  %v374_v62 = vpack.c.bf16 %v342_v54, %v342_v54  ;;  %v472_v0 = vsel %vm4706_vm6, 0, %v471_v51  ;;  %v242_v51 = vld [vmem:[%s4730_s25 + $0x28] sm:$0xff] }
  0x1c   : > { %v1021_v47 = vrot.slane %v1020_v40, 4  ;;  %v2959_v52 = vpack.c.b16 %v2928_v43, %v2927_v33  ;;  %v344_v63 = vmax.f32 %v312_v55, 0.0  ;;  %v519_v5 = vshrl.u32 %v373_v59, 16  ;;  %473 = vst [vmem:[#allocation2 + $0x20] sm:$0x1] %v472_v0 }
  0x1d   : > { %v1016_v53 = vsel %vm4755_vm12, %v1011_v44, %v1015_v29  ;;  %v522_v6 = vshll.u32 %v373_v59, 16  ;;  %v375_v7 = vpack.c.bf16 %v343_v60, %v343_v60  ;;  %v279_v8 = vmul.f32 %v4717_v3, %v243_v56  ;;  %v844_v29 = vld [vmem:[#allocation2 + $0x14] sm:$0x1]  ;;  %v4796_v44 = vld [vmem:[#allocation2 + $0x24] sm:$0x1] }
  0x1e   : > { %v1026_v57 = vsel %vm4755_vm12, %v1021_v47, %v1025_v35  ;;  %v2847_v58 = vunpack.c.l.b16 %v1016_v53  ;;  %2975 = vrot.lane.b32.xlu1 %v2959_v52, %s4649_s28  ;;  %v527_v11 = vshrl.u32 %v374_v62, 16  ;;  %v530_v13 = vshll.u32 %v374_v62, 16  ;;  %v247_v56 = vld [vmem:[%s4730_s25 + $0x50] sm:$0xff]  ;;  %v248_v62 = vld [vmem:[%s4730_s25 + $0x58] sm:$0xff] }
  0x1f   : > { %v2848_v61 = vunpack.c.l.b16 %v1026_v57  ;;  %v376_v14 = vpack.c.bf16 %v344_v63, %v344_v63  ;;  %v521_v15 = vrot.slane %v519_v5, 7  ;;  %v536_v16 = vshrl.u32 %v375_v7, 16  ;;  %v4811_v57 = vld [vmem:[#allocation2 + $0x48] sm:$0x1]  ;;  %v4821_v63 = vld [vmem:[#allocation2 + $0x50] sm:$0x1] }
  0x20   : > { %v539_v17 = vshll.u32 %v375_v7, 16  ;;  %v280_v18 = vmul.f32 %v4717_v3, %v244_v4  ;;  %v529_v20 = vrot.slane %v527_v11, 7  ;;  %v315_v24 = vadd.f32 %v4735_v10, %v279_v8 }
  0x21   : > { %v2879_v9 = vpack.c.b16 %v2848_v61, %v2847_v58  ;;  %v544_v22 = vshrl.u32 %v376_v14, 16  ;;  %v547_v23 = vshll.u32 %v376_v14, 16  ;;  %v524_v27 = vor.u32 %v522_v6, %v521_v15  ;;  %v847_v36 = vld [vmem:[#allocation2 + $0x18] sm:$0xf] }
  0x22   : > { %v525_v28 = vrot.slane %v521_v15, 4  ;;  %v538_v30 = vrot.slane %v536_v16, 7  ;;  %v316_v31 = vadd.f32 %v4735_v10, %v280_v18  ;;  %v532_v33 = vor.u32 %v530_v13, %v529_v20 }
  0x23   : > { %2895 = vrot.lane.b32.xlu0 %v2879_v9, %s4650_s29  ;;  %v534_v34 = vrot.slane %v529_v20, 4  ;;  %v546_v35 = vrot.slane %v544_v22, 7  ;;  %v347_v37 = vmax.f32 %v315_v24, 0.0  ;;  %v841_v40 = vsel %vm4780_vm13, %v524_v27, %v840_v21  ;;  %v851_v50 = vld [vmem:[#allocation2 + $0x20] sm:$0x1] }
  0x24   : > { %v541_v41 = vor.u32 %v539_v17, %v538_v30  ;;  %v542_v42 = vrot.slane %v538_v30, 4  ;;  %v348_v43 = vmax.f32 %v316_v31, 0.0  ;;  %v533_v46 = vsel %vm4788_vm14, %v525_v28, %v532_v33  ;;  %842 = vst [vmem:[#allocation2 + $0xc] sm:$0xf] %v841_v40 }
  0x25   : > { %v845_v47 = vsel %vm4700_vm4, %v534_v34, %v844_v29  ;;  %v549_v48 = vor.u32 %v547_v23, %v546_v35  ;;  %v551_v49 = vrot.slane %v546_v35, 4  ;;  %843 = vst.msk [vmem:[#allocation2 + $0x10] sm:$0xf] %vm405_vm0, %v533_v46  ;;  %v379_v53 = vpack.c.bf16 %v347_v37, %v347_v37 }
  0x26   : > { %v848_v52 = vsel %vm4780_vm13, %v541_v41, %v847_v36  ;;  %v380_v54 = vpack.c.bf16 %v348_v43, %v348_v43  ;;  %v428_v55 = vsel %vm4700_vm4, 0, %v427_v25  ;;  %846 = vst [vmem:[#allocation2 + $0x14] sm:$0x1] %v845_v47  ;;  %v478_v60 = vsel %vm4706_vm6, 0, %v477_v32 }
  0x27   : > { %v550_v58 = vsel %vm4788_vm14, %v542_v42, %v549_v48  ;;  %v852_v59 = vsel %vm4700_vm4, %v551_v49, %v851_v50  ;;  %v277_v61 = vmul.f32 %v4717_v3, %v241_v38  ;;  %849 = vst [vmem:[#allocation2 + $0x18] sm:$0xf] %v848_v52  ;;  %v570_v0 = vshrl.u32 %v379_v53, 16 }
  0x28   : > { %v573_v4 = vshll.u32 %v379_v53, 16  ;;  %v578_v5 = vshrl.u32 %v380_v54, 16  ;;  %v581_v6 = vshll.u32 %v380_v54, 16  ;;  %850 = vst.msk [vmem:[#allocation2 + $0x1c] sm:$0xf] %vm405_vm0, %v550_v58  ;;  %v278_v7 = vmul.f32 %v4717_v3, %v242_v51 }
  0x29   : > { %v4826_v8 = vadd.f32 %v4735_v10, %v277_v61  ;;  %v425_v9 = vsel %vm4700_vm4, 0, %v4796_v44  ;;  %v475_v11 = vsel %vm4706_vm6, 0, %v4798_v45  ;;  %853 = vst [vmem:[#allocation2 + $0x20] sm:$0x1] %v852_v59  ;;  %v572_v13 = vrot.slane %v570_v0, 7 }
  0x2a   : > { %v4834_v14 = vrot.slane %v578_v5, 7  ;;  %v283_v15 = vmul.f32 %v4717_v3, %v247_v56  ;;  %v284_v16 = vmul.f32 %v4717_v3, %v248_v62  ;;  %429 = vst [vmem:[#allocation2 + $0x30] sm:$0x1] %v428_v55  ;;  %v4839_v17 = vadd.f32 %v4735_v10, %v278_v7 }
  0x2b   : > { %v345_v18 = vmax.f32 %v4826_v8, 0.0  ;;  %v434_v20 = vsel %vm4700_vm4, 0, %v4811_v57  ;;  %v484_v21 = vsel %vm4706_vm6, 0, %v4821_v63  ;;  %v1388_v22 = vld [vmem:[#allocation2 + $0xc] sm:$0xe]  ;;  %v575_v24 = vor.u32 %v573_v4, %v572_v13 }
  0x2c   : > { %v954_v23 = vld [vmem:[#allocation2 + $0xc] sm:$0xf]  ;;  %479 = vst [vmem:[#allocation2 + $0x38] sm:$0x1] %v478_v60  ;;  %v583_v25 = vor.u32 %v581_v6, %v4834_v14  ;;  %v4850_v27 = vadd.f32 %v4735_v10, %v283_v15  ;;  %v4853_v28 = vadd.f32 %v4735_v10, %v284_v16  ;;  %v955_v29 = vld [vmem:[#allocation2 + $0x10] sm:$0xf] }
  0x2d   : > { %v4264_v30 = vrot.slane %v1388_v22, 9  ;;  %v1028_v31 = vshrl.u32 %v954_v23, 16  ;;  %v1031_v32 = vshll.u32 %v954_v23, 16  ;;  %v576_v33 = vrot.slane %v572_v13, 4  ;;  %v985_v34 = vld [vmem:[#allocation2 + $0x14] sm:$0x1] }
  0x2e   : > { %v1041_v35 = vshrl.u32 %v955_v29, 16  ;;  %v1463_v36 = vrot.slane %v955_v29, 5  ;;  %v1037_v37 = vshll.u32 %v955_v29, 16  ;;  %v585_v38 = vrot.slane %v4834_v14, 4  ;;  %v956_v42 = vld [vmem:[#allocation2 + $0x18] sm:$0xf] }
  0x2f   : > { %v1047_v40 = vshll.u32 %v985_v34, 16  ;;  %v1466_v41 = vrot.slane %v985_v34, 5  ;;  %v1030_v43 = vrot.slane %v1028_v31, 4  ;;  %v1033_v44 = vrot.slane %v1031_v32, 5  ;;  %v957_v47 = vld [vmem:[#allocation2 + $0x1c] sm:$0xf] }
  0x30   : > { %v1464_v45 = vsel %vm4739_vm10, %v4264_v30, %v1463_v36  ;;  %v1465_v46 = vrot.slane %v1463_v36, 4  ;;  %v1052_v48 = vshrl.u32 %v956_v42, 16  ;;  %v1055_v49 = vshll.u32 %v956_v42, 16  ;;  %v986_v51 = vld [vmem:[#allocation2 + $0x20] sm:$0x1] }
  0x31   : > { %v2929_v50 = vunpack.c.l.b16 %v1464_v45  ;;  %v1061_v52 = vshll.u32 %v957_v47, 16  ;;  %v1065_v53 = vshrl.u32 %v957_v47, 16  ;;  %v1034_v54 = vor.u32 %v1033_v44, %v1030_v43  ;;  %426 = vst [vmem:[#allocation2 + $0x24] sm:$0x1] %v425_v9  ;;  %v861_v59 = vld [vmem:[#allocation2 + $0x30] sm:$0xf] }
  0x32   : > { %v1467_v55 = vsel %vm4739_vm10, %v1465_v46, %v1466_v41  ;;  %v1054_v56 = vrot.slane %v1052_v48, 4  ;;  %v1057_v57 = vrot.slane %v1055_v49, 5  ;;  %v1071_v58 = vshll.u32 %v986_v51, 16  ;;  %476 = vst [vmem:[#allocation2 + $0x2c] sm:$0x1] %v475_v11 }
  0x33   : > { %v2930_v60 = vunpack.c.l.b16 %v1467_v55  ;;  %v1063_v61 = vrot.slane %v1061_v52, 5  ;;  %v1067_v62 = vrot.slane %v1065_v53, 4  ;;  %v1035_v0 = vrot.slane %v1034_v54, 4  ;;  %v865_v4 = vld [vmem:[#allocation2 + $0x38] sm:$0x1] }
  0x34   : > { %v1058_v5 = vor.u32 %v1057_v57, %v1054_v56  ;;  %v1073_v6 = vrot.slane %v1071_v58, 5  ;;  %v1039_v7 = vrot.slane %v1037_v37, 5  ;;  %v1043_v13 = vrot.slane %v1041_v35, 4  ;;  %435 = vst [vmem:[#allocation2 + $0x48] sm:$0x1] %v434_v20 }
  0x35   : > { %v2960_v14 = vpack.c.b16 %v2930_v60, %v2929_v50  ;;  %v1068_v15 = vor.u32 %v1067_v62, %v1063_v61  ;;  %v1049_v9 = vrot.slane %v1047_v40, 5  ;;  %v584_v16 = vsel %vm4788_vm14, %v576_v33, %v583_v25  ;;  %485 = vst [vmem:[#allocation2 + $0x50] sm:$0x1] %v484_v21 }
  0x36   : > { %v1059_v22 = vrot.slane %v1058_v5, 4  ;;  %v1040_v23 = vsel %vm4755_vm12, %v1035_v0, %v1039_v7  ;;  %v1044_v29 = vor.u32 %v1043_v13, %v1039_v7  ;;  %v862_v30 = vsel %vm4780_vm13, %v575_v24, %v861_v59  ;;  %864 = vst.msk [vmem:[#allocation2 + $0x34] sm:$0xf] %vm405_vm0, %v584_v16  ;;  %v246_v7 = vld [vmem:[%s4730_s25 + $0x48] sm:$0xff]  ;;  %v430_v16 = vld [vmem:[#allocation2 + $0x3c] sm:$0x1] }
  0x37   : > { %2977 = vrot.lane.b32.xlu2 %v2960_v14, %s4649_s28  ;;  %v1069_v11 = vrot.slane %v1068_v15, 4  ;;  %v2849_v31 = vunpack.c.l.b16 %v1040_v23  ;;  %863 = vst [vmem:[#allocation2 + $0x30] sm:$0xf] %v862_v30  ;;  %v866_v25 = vsel %vm4700_vm4, %v585_v38, %v865_v4  ;;  %v346_v20 = vmax.f32 %v4839_v17, 0.0  ;;  %v245_v17 = vld [vmem:[%s4730_s25 + $0x40] sm:$0xff] }
  0x38   : > { %v1064_v32 = vsel %vm4755_vm12, %v1059_v22, %v1063_v61  ;;  %v1045_v33 = vrot.slane %v1044_v29, 4  ;;  %867 = vst [vmem:[#allocation2 + $0x38] sm:$0x1] %v866_v25  ;;  %v377_v24 = vpack.c.bf16 %v345_v18, %v345_v18  ;;  %v351_v34 = vmax.f32 %v4850_v27, 0.0  ;;  %v854_v47 = vld [vmem:[#allocation2 + $0x24] sm:$0xf] }
  0x39   : > { %v1074_v35 = vsel %vm4755_vm12, %v1069_v11, %v1073_v6  ;;  %v2851_v36 = vunpack.c.l.b16 %v1064_v32  ;;  %v378_v37 = vpack.c.bf16 %v346_v20, %v346_v20  ;;  %v352_v38 = vmax.f32 %v4853_v28, 0.0  ;;  %v858_v28 = vld [vmem:[#allocation2 + $0x2c] sm:$0x1] }
  0x3a   : > { %v2852_v40 = vunpack.c.l.b16 %v1074_v35  ;;  %v1050_v8 = vsel %vm4755_vm12, %v1045_v33, %v1049_v9  ;;  %v553_v18 = vshrl.u32 %v377_v24, 16  ;;  %v556_v41 = vshll.u32 %v377_v24, 16 }
  0x3b   : > { %v2850_v27 = vunpack.c.l.b16 %v1050_v8  ;;  %v561_v42 = vshrl.u32 %v378_v37, 16  ;;  %v564_v43 = vshll.u32 %v378_v37, 16  ;;  %v383_v44 = vpack.c.bf16 %v351_v34, %v351_v34  ;;  %v875_v25 = vld [vmem:[#allocation2 + $0x48] sm:$0xf] }
  0x3c   : > { %v2881_v45 = vpack.c.b16 %v2852_v40, %v2851_v36  ;;  %v555_v46 = vrot.slane %v553_v18, 7  ;;  %v384_v48 = vpack.c.bf16 %v352_v38, %v352_v38  ;;  %v281_v49 = vmul.f32 %v4717_v3, %v245_v17  ;;  %v480_v36 = vld [vmem:[#allocation2 + $0x44] sm:$0x1]  ;;  %v879_v38 = vld [vmem:[#allocation2 + $0x50] sm:$0x1] }
  0x3d   : > { %v2880_v63 = vpack.c.b16 %v2850_v27, %v2849_v31  ;;  %v961_v21 = vld [vmem:[#allocation2 + $0x34] sm:$0xf]  ;;  %v563_v50 = vrot.slane %v561_v42, 7  ;;  %v604_v51 = vshrl.u32 %v383_v44, 16  ;;  %v607_v52 = vshll.u32 %v383_v44, 16 }
  0x3e   : > { %2899 = vrot.lane.b32.xlu1 %v2881_v45, %s4650_s29  ;;  %v960_v53 = vld [vmem:[#allocation2 + $0x30] sm:$0xf]  ;;  %v1109_v54 = vshll.u32 %v961_v21, 16  ;;  %v1113_v55 = vshrl.u32 %v961_v21, 16  ;;  %v558_v56 = vor.u32 %v556_v41, %v555_v46  ;;  %v559_v57 = vrot.slane %v555_v46, 4 }
  0x3f   : > { %2897 = vrot.lane.b32.xlu0 %v2880_v63, %s4650_s29  ;;  %v988_v58 = vld [vmem:[#allocation2 + $0x38] sm:$0x1]  ;;  %v1100_v59 = vshrl.u32 %v960_v53, 16  ;;  %v1103_v60 = vshll.u32 %v960_v53, 16  ;;  %v566_v61 = vor.u32 %v564_v43, %v563_v50  ;;  %v568_v62 = vrot.slane %v563_v50, 4  ;;  %v249_v43 = vld [vmem:[%s4730_s25 + $0x60] sm:$0xff] }
  0x40   : > { %v1111_v0 = vrot.slane %v1109_v54, 5  ;;  %v1115_v4 = vrot.slane %v1113_v55, 4  ;;  %v1119_v5 = vshll.u32 %v988_v58, 16  ;;  %v855_v6 = vsel %vm4780_vm13, %v558_v56, %v854_v47 }
  0x41   : > { %v1102_v13 = vrot.slane %v1100_v59, 4  ;;  %v1105_v14 = vrot.slane %v1103_v60, 5  ;;  %v567_v15 = vsel %vm4788_vm14, %v559_v57, %v566_v61  ;;  %856 = vst [vmem:[#allocation2 + $0x24] sm:$0xf] %v855_v6  ;;  %v859_v9 = vsel %vm4700_vm4, %v568_v62, %v858_v28  ;;  %v250_v28 = vld [vmem:[%s4730_s25 + $0x68] sm:$0xff] }
  0x42   : > { %v1116_v22 = vor.u32 %v1115_v4, %v1111_v0  ;;  %v1121_v23 = vrot.slane %v1119_v5, 5  ;;  %857 = vst.msk [vmem:[#allocation2 + $0x28] sm:$0xf] %vm405_vm0, %v567_v15  ;;  %v606_v29 = vrot.slane %v604_v51, 7  ;;  %v612_v30 = vshrl.u32 %v384_v48, 16 }
  0x43   : > { %v1106_v11 = vor.u32 %v1105_v14, %v1102_v13  ;;  %860 = vst [vmem:[#allocation2 + $0x2c] sm:$0x1] %v859_v9  ;;  %v615_v31 = vshll.u32 %v384_v48, 16  ;;  %v282_v20 = vmul.f32 %v4717_v3, %v246_v7  ;;  %v317_v32 = vadd.f32 %v4735_v10, %v281_v49 }
  0x44   : > { %v1117_v33 = vrot.slane %v1116_v22, 4  ;;  %v609_v24 = vor.u32 %v607_v52, %v606_v29  ;;  %v610_v34 = vrot.slane %v606_v29, 4  ;;  %v614_v35 = vrot.slane %v612_v30, 7 }
  0x45   : > { %v1107_v37 = vrot.slane %v1106_v11, 4  ;;  %v318_v17 = vadd.f32 %v4735_v10, %v282_v20  ;;  %v349_v40 = vmax.f32 %v317_v32, 0.0  ;;  %v431_v8 = vsel %vm4700_vm4, 0, %v430_v16 }
  0x46   : > { %v1122_v18 = vsel %vm4755_vm12, %v1117_v33, %v1121_v23  ;;  %v617_v41 = vor.u32 %v615_v31, %v614_v35  ;;  %v619_v27 = vrot.slane %v614_v35, 4  ;;  %v876_v42 = vsel %vm4780_vm13, %v609_v24, %v875_v25  ;;  %432 = vst [vmem:[#allocation2 + $0x3c] sm:$0x1] %v431_v8 }
  0x47   : > { %v1112_v44 = vsel %vm4755_vm12, %v1107_v37, %v1111_v0  ;;  %v2856_v45 = vunpack.c.l.b16 %v1122_v18  ;;  %877 = vst [vmem:[#allocation2 + $0x48] sm:$0xf] %v876_v42  ;;  %v350_v46 = vmax.f32 %v318_v17, 0.0  ;;  %v381_v47 = vpack.c.bf16 %v349_v40, %v349_v40 }
  0x48   : > { %v2855_v48 = vunpack.c.l.b16 %v1112_v44  ;;  %v958_v49 = vld [vmem:[#allocation2 + $0x24] sm:$0xf]  ;;  %v618_v63 = vsel %vm4788_vm14, %v610_v34, %v617_v41  ;;  %v880_v21 = vsel %vm4700_vm4, %v619_v27, %v879_v38  ;;  %v481_v50 = vsel %vm4706_vm6, 0, %v480_v36 }
  0x49   : > { %v959_v51 = vld [vmem:[#allocation2 + $0x28] sm:$0xf]  ;;  %v1076_v52 = vshrl.u32 %v958_v49, 16  ;;  %v1079_v53 = vshll.u32 %v958_v49, 16  ;;  %878 = vst.msk [vmem:[#allocation2 + $0x4c] sm:$0xf] %vm405_vm0, %v618_v63  ;;  %v382_v54 = vpack.c.bf16 %v350_v46, %v350_v46  ;;  %v285_v55 = vmul.f32 %v4717_v3, %v249_v43 }
  0x4a   : > { %v2883_v56 = vpack.c.b16 %v2856_v45, %v2855_v48  ;;  %v4919_v57 = vld [vmem:[#allocation2 + $0x2c] sm:$0x1]  ;;  %v1085_v58 = vshll.u32 %v959_v51, 16  ;;  %v1089_v59 = vshrl.u32 %v959_v51, 16  ;;  %881 = vst [vmem:[#allocation2 + $0x50] sm:$0x1] %v880_v21  ;;  %v286_v60 = vmul.f32 %v4717_v3, %v250_v28 }
  0x4b   : > { %v1078_v61 = vrot.slane %v1076_v52, 4  ;;  %v1081_v62 = vrot.slane %v1079_v53, 5  ;;  %v1095_v0 = vshll.u32 %v4919_v57, 16  ;;  %482 = vst [vmem:[#allocation2 + $0x44] sm:$0x1] %v481_v50  ;;  %v587_v4 = vshrl.u32 %v381_v47, 16 }
  0x4c   : > { %2903 = vrot.lane.b32.xlu2 %v2883_v56, %s4650_s29  ;;  %v1087_v5 = vrot.slane %v1085_v58, 5  ;;  %v1091_v6 = vrot.slane %v1089_v59, 4  ;;  %v590_v7 = vshll.u32 %v381_v47, 16  ;;  %v595_v13 = vshrl.u32 %v382_v54, 16  ;;  %v436_v48 = vld [vmem:[#allocation2 + $0x54] sm:$0x1] }
  0x4d   : > { %v1082_v14 = vor.u32 %v1081_v62, %v1078_v61  ;;  %v1097_v15 = vrot.slane %v1095_v0, 5  ;;  %v589_v9 = vrot.slane %v587_v4, 7  ;;  %v598_v16 = vshll.u32 %v382_v54, 16  ;;  %v868_v33 = vld [vmem:[#allocation2 + $0x3c] sm:$0xf]  ;;  %v253_v63 = vld [vmem:[%s4730_s25 + $0x80] sm:$0xff] }
  0x4e   : > { %v1092_v22 = vor.u32 %v1091_v6, %v1087_v5  ;;  %v964_v23 = vld [vmem:[#allocation2 + $0x48] sm:$0xf]  ;;  %v597_v29 = vrot.slane %v595_v13, 7  ;;  %v321_v30 = vadd.f32 %v4735_v10, %v285_v55  ;;  %v322_v11 = vadd.f32 %v4735_v10, %v286_v60  ;;  %v486_v49 = vld [vmem:[#allocation2 + $0x5c] sm:$0x1] }
  0x4f   : > { %v1083_v31 = vrot.slane %v1082_v14, 4  ;;  %v1148_v25 = vshrl.u32 %v964_v23, 16  ;;  %v1151_v20 = vshll.u32 %v964_v23, 16  ;;  %v592_v32 = vor.u32 %v590_v7, %v589_v9  ;;  %v442_v53 = vld [vmem:[#allocation2 + $0x6c] sm:$0x1] }
  0x50   : > { %v1093_v24 = vrot.slane %v1092_v22, 4  ;;  %v965_v34 = vld [vmem:[#allocation2 + $0x4c] sm:$0xf]  ;;  %v593_v35 = vrot.slane %v589_v9, 4  ;;  %v600_v36 = vor.u32 %v598_v16, %v597_v29  ;;  %v602_v37 = vrot.slane %v597_v29, 4  ;;  %v251_v22 = vld [vmem:[%s4730_s25 + $0x70] sm:$0xff] }
  0x51   : > { %v1088_v38 = vsel %vm4755_vm12, %v1083_v31, %v1087_v5  ;;  %v990_v17 = vld [vmem:[#allocation2 + $0x50] sm:$0x1]  ;;  %v1150_v40 = vrot.slane %v1148_v25, 4  ;;  %v1153_v8 = vrot.slane %v1151_v20, 5  ;;  %v1157_v18 = vshll.u32 %v965_v34, 16  ;;  %v254_v59 = vld [vmem:[%s4730_s25 + $0x88] sm:$0xff] }
  0x52   : > { %v1098_v41 = vsel %vm4755_vm12, %v1093_v24, %v1097_v15  ;;  %v2853_v27 = vunpack.c.l.b16 %v1088_v38  ;;  %v1161_v42 = vshrl.u32 %v965_v34, 16  ;;  %v1167_v43 = vshll.u32 %v990_v17, 16  ;;  %v872_v44 = vld [vmem:[#allocation2 + $0x44] sm:$0x1]  ;;  %v492_v13 = vld [vmem:[#allocation2 + $0x74] sm:$0x1] }
  0x53   : > { %v2854_v45 = vunpack.c.l.b16 %v1098_v41  ;;  %v1154_v46 = vor.u32 %v1153_v8, %v1150_v40  ;;  %v1159_v47 = vrot.slane %v1157_v18, 5  ;;  %v601_v28 = vsel %vm4788_vm14, %v593_v35, %v600_v36 }
  0x54   : > { %v1163_v21 = vrot.slane %v1161_v42, 4  ;;  %v1169_v50 = vrot.slane %v1167_v43, 5  ;;  %v869_v51 = vsel %vm4780_vm13, %v592_v32, %v868_v33  ;;  %871 = vst.msk [vmem:[#allocation2 + $0x40] sm:$0xf] %vm405_vm0, %v601_v28  ;;  %v873_v52 = vsel %vm4700_vm4, %v602_v37, %v872_v44 }
  0x55   : > { %v2882_v54 = vpack.c.b16 %v2854_v45, %v2853_v27  ;;  %v1155_v55 = vrot.slane %v1154_v46, 4  ;;  %870 = vst [vmem:[#allocation2 + $0x3c] sm:$0xf] %v869_v51  ;;  %v353_v56 = vmax.f32 %v321_v30, 0.0  ;;  %v354_v58 = vmax.f32 %v322_v11, 0.0 }
  0x56   : > { %v1164_v60 = vor.u32 %v1163_v21, %v1159_v47  ;;  %874 = vst [vmem:[#allocation2 + $0x44] sm:$0x1] %v873_v52  ;;  %v437_v61 = vsel %vm4700_vm4, 0, %v436_v48  ;;  %v487_v62 = vsel %vm4706_vm6, 0, %v486_v49  ;;  %v289_v0 = vmul.f32 %v4717_v3, %v253_v63 }
  0x57   : > { %2901 = vrot.lane.b32.xlu1 %v2882_v54, %s4650_s29  ;;  %v1160_v4 = vsel %vm4755_vm12, %v1155_v55, %v1159_v47  ;;  %v385_v5 = vpack.c.bf16 %v353_v56, %v353_v56  ;;  %v386_v6 = vpack.c.bf16 %v354_v58, %v354_v58  ;;  %438 = vst [vmem:[#allocation2 + $0x54] sm:$0x1] %v437_v61  ;;  %v443_v7 = vsel %vm4700_vm4, 0, %v442_v53  ;;  %v252_v55 = vld [vmem:[%s4730_s25 + $0x78] sm:$0xff]  ;;  %v439_v56 = vld [vmem:[#allocation2 + $0x60] sm:$0x1] }
  0x58   : > { %v1165_v14 = vrot.slane %v1164_v60, 4  ;;  %v2859_v15 = vunpack.c.l.b16 %v1160_v4  ;;  %488 = vst [vmem:[#allocation2 + $0x5c] sm:$0x1] %v487_v62  ;;  %v290_v9 = vmul.f32 %v4717_v3, %v254_v59  ;;  %v325_v16 = vadd.f32 %v4735_v10, %v289_v0  ;;  %v489_v62 = vld [vmem:[#allocation2 + $0x68] sm:$0x1] }
  0x59   : > { %v621_v23 = vshrl.u32 %v385_v5, 16  ;;  %v624_v29 = vshll.u32 %v385_v5, 16  ;;  %v629_v30 = vshrl.u32 %v386_v6, 16  ;;  %v632_v11 = vshll.u32 %v386_v6, 16  ;;  %444 = vst [vmem:[#allocation2 + $0x6c] sm:$0x1] %v443_v7 }
  0x5a   : > { %v1170_v31 = vsel %vm4755_vm12, %v1165_v14, %v1169_v50  ;;  %v326_v25 = vadd.f32 %v4735_v10, %v290_v9  ;;  %v357_v20 = vmax.f32 %v325_v16, 0.0  ;;  %v493_v32 = vsel %vm4706_vm6, 0, %v492_v13  ;;  %v255_v9 = vld [vmem:[%s4730_s25 + $0x90] sm:$0xff] }
  0x5b   : > { %v2860_v33 = vunpack.c.l.b16 %v1170_v31  ;;  %v963_v24 = vld [vmem:[#allocation2 + $0x40] sm:$0xf]  ;;  %v623_v34 = vrot.slane %v621_v23, 7  ;;  %v631_v35 = vrot.slane %v629_v30, 7  ;;  %494 = vst [vmem:[#allocation2 + $0x74] sm:$0x1] %v493_v32  ;;  %v287_v36 = vmul.f32 %v4717_v3, %v251_v22 }
  0x5c   : > { %v962_v37 = vld [vmem:[#allocation2 + $0x3c] sm:$0xf]  ;;  %v1133_v38 = vshll.u32 %v963_v24, 16  ;;  %v1137_v17 = vshrl.u32 %v963_v24, 16  ;;  %v358_v40 = vmax.f32 %v326_v25, 0.0  ;;  %v389_v8 = vpack.c.bf16 %v357_v20, %v357_v20 }
  0x5d   : > { %v2885_v18 = vpack.c.b16 %v2860_v33, %v2859_v15  ;;  %v989_v41 = vld [vmem:[#allocation2 + $0x44] sm:$0x1]  ;;  %v1124_v27 = vshrl.u32 %v962_v37, 16  ;;  %v1127_v42 = vshll.u32 %v962_v37, 16  ;;  %v626_v43 = vor.u32 %v624_v29, %v623_v34 }
  0x5e   : > { %v1135_v44 = vrot.slane %v1133_v38, 5  ;;  %v1139_v45 = vrot.slane %v1137_v17, 4  ;;  %v1143_v46 = vshll.u32 %v989_v41, 16  ;;  %v627_v47 = vrot.slane %v623_v34, 4  ;;  %v882_v28 = vld [vmem:[#allocation2 + $0x54] sm:$0xf] }
  0x5f   : > { %2907 = vrot.lane.b32.xlu0 %v2885_v18, %s4650_s29  ;;  %v1126_v48 = vrot.slane %v1124_v27, 4  ;;  %v1129_v49 = vrot.slane %v1127_v42, 5  ;;  %v634_v63 = vor.u32 %v632_v11, %v631_v35  ;;  %v636_v21 = vrot.slane %v631_v35, 4  ;;  %v886_v50 = vld [vmem:[#allocation2 + $0x5c] sm:$0x1] }
  0x60   : > { %v1140_v51 = vor.u32 %v1139_v45, %v1135_v44  ;;  %v1145_v52 = vrot.slane %v1143_v46, 5  ;;  %v883_v53 = vsel %vm4780_vm13, %v626_v43, %v882_v28  ;;  %v390_v54 = vpack.c.bf16 %v358_v40, %v358_v40  ;;  %v896_v23 = vld [vmem:[#allocation2 + $0x6c] sm:$0xf]  ;;  %v256_v11 = vld [vmem:[%s4730_s25 + $0x98] sm:$0xff] }
  0x61   : > { %v1130_v58 = vor.u32 %v1129_v49, %v1126_v48  ;;  %v635_v59 = vsel %vm4788_vm14, %v627_v47, %v634_v63  ;;  %884 = vst [vmem:[#allocation2 + $0x54] sm:$0xf] %v883_v53  ;;  %v887_v60 = vsel %vm4700_vm4, %v636_v21, %v886_v50  ;;  %v655_v61 = vshrl.u32 %v389_v8, 16 }
  0x62   : > { %v1141_v0 = vrot.slane %v1140_v51, 4  ;;  %885 = vst.msk [vmem:[#allocation2 + $0x58] sm:$0xf] %vm405_vm0, %v635_v59  ;;  %v658_v4 = vshll.u32 %v389_v8, 16  ;;  %v663_v5 = vshrl.u32 %v390_v54, 16  ;;  %v666_v6 = vshll.u32 %v390_v54, 16 }
  0x63   : > { %v1131_v7 = vrot.slane %v1130_v58, 4  ;;  %888 = vst [vmem:[#allocation2 + $0x5c] sm:$0x1] %v887_v60  ;;  %v657_v13 = vrot.slane %v655_v61, 7  ;;  %v288_v14 = vmul.f32 %v4717_v3, %v252_v55  ;;  %v323_v15 = vadd.f32 %v4735_v10, %v287_v36  ;;  %v900_v33 = vld [vmem:[#allocation2 + $0x74] sm:$0x1] }
  0x64   : > { %v1146_v16 = vsel %vm4755_vm12, %v1141_v0, %v1145_v52  ;;  %v665_v22 = vrot.slane %v663_v5, 7  ;;  %v440_v29 = vsel %vm4700_vm4, 0, %v439_v56  ;;  %v490_v30 = vsel %vm4706_vm6, 0, %v489_v62  ;;  %v445_v58 = vld [vmem:[#allocation2 + $0x78] sm:$0x1] }
  0x65   : > { %v1136_v31 = vsel %vm4755_vm12, %v1131_v7, %v1135_v44  ;;  %v2858_v25 = vunpack.c.l.b16 %v1146_v16  ;;  %v660_v20 = vor.u32 %v658_v4, %v657_v13  ;;  %v661_v32 = vrot.slane %v657_v13, 4  ;;  %441 = vst [vmem:[#allocation2 + $0x60] sm:$0x1] %v440_v29 }
  0x66   : > { %v2857_v24 = vunpack.c.l.b16 %v1136_v31  ;;  %v668_v34 = vor.u32 %v666_v6, %v665_v22  ;;  %v670_v35 = vrot.slane %v665_v22, 4  ;;  %v324_v36 = vadd.f32 %v4735_v10, %v288_v14  ;;  %491 = vst [vmem:[#allocation2 + $0x68] sm:$0x1] %v490_v30 }
  0x67   : > { %v897_v37 = vsel %vm4780_vm13, %v660_v20, %v896_v23  ;;  %v355_v38 = vmax.f32 %v323_v15, 0.0  ;;  %v291_v17 = vmul.f32 %v4717_v3, %v255_v9  ;;  %v292_v40 = vmul.f32 %v4717_v3, %v256_v11 }
  0x68   : > { %v2884_v8 = vpack.c.b16 %v2858_v25, %v2857_v24  ;;  %v966_v18 = vld [vmem:[#allocation2 + $0x54] sm:$0xf]  ;;  %v669_v41 = vsel %vm4788_vm14, %v661_v32, %v668_v34  ;;  %898 = vst [vmem:[#allocation2 + $0x6c] sm:$0xf] %v897_v37  ;;  %v901_v27 = vsel %vm4700_vm4, %v670_v35, %v900_v33  ;;  %v356_v42 = vmax.f32 %v324_v36, 0.0 }
  0x69   : > { %v4988_v43 = vld [vmem:[#allocation2 + $0x58] sm:$0xf]  ;;  %v1172_v44 = vshrl.u32 %v966_v18, 16  ;;  %v1175_v45 = vshll.u32 %v966_v18, 16  ;;  %899 = vst.msk [vmem:[#allocation2 + $0x70] sm:$0xf] %vm405_vm0, %v669_v41  ;;  %v387_v46 = vpack.c.bf16 %v355_v38, %v355_v38  ;;  %v4992_v47 = vadd.f32 %v4735_v10, %v291_v17 }
  0x6a   : > { %2905 = vrot.lane.b32.xlu2 %v2884_v8, %s4650_s29  ;;  %v4995_v3 = vld [vmem:[#allocation2 + $0x5c] sm:$0x1]  ;;  %v1181_v28 = vshll.u32 %v4988_v43, 16  ;;  %v1185_v48 = vshrl.u32 %v4988_v43, 16  ;;  %902 = vst [vmem:[#allocation2 + $0x74] sm:$0x1] %v901_v27  ;;  %v388_v49 = vpack.c.bf16 %v356_v42, %v356_v42  ;;  %v328_v63 = vadd.f32 %v4735_v10, %v292_v40 }
  0x6b   : > { %v1174_v21 = vrot.slane %v1172_v44, 4  ;;  %v1177_v50 = vrot.slane %v1175_v45, 5  ;;  %v1191_v51 = vshll.u32 %v4995_v3, 16  ;;  %v638_v52 = vshrl.u32 %v387_v46, 16  ;;  %v495_v8 = vld [vmem:[#allocation2 + $0x80] sm:$0x1] }
  0x6c   : > { %v1183_v53 = vrot.slane %v1181_v28, 5  ;;  %v1187_v54 = vrot.slane %v1185_v48, 4  ;;  %v641_v55 = vshll.u32 %v387_v46, 16  ;;  %v646_v56 = vshrl.u32 %v388_v49, 16  ;;  %v889_v15 = vld [vmem:[#allocation2 + $0x60] sm:$0xf] }
  0x6d   : > { %v1178_v59 = vor.u32 %v1177_v50, %v1174_v21  ;;  %v1193_v60 = vrot.slane %v1191_v51, 5  ;;  %v640_v61 = vrot.slane %v638_v52, 7  ;;  %v649_v62 = vshll.u32 %v388_v49, 16  ;;  %v893_v9 = vld [vmem:[#allocation2 + $0x68] sm:$0x1]  ;;  %v259_v18 = vld [vmem:[%s4730_s25 + $0xb0] sm:$0xff] }
  0x6e   : > { %v1188_v0 = vor.u32 %v1187_v54, %v1183_v53  ;;  %v648_v4 = vrot.slane %v646_v56, 7  ;;  %v359_v5 = vmax.f32 %v4992_v47, 0.0  ;;  %v360_v6 = vmax.f32 %v328_v63, 0.0  ;;  %v260_v45 = vld [vmem:[%s4730_s25 + $0xb8] sm:$0xff]  ;;  %v5029_v50 = vld [vmem:[%s6618_s1] ss:$0 sm:$0xff] }
  0x6f   : > { %v1179_v10 = vrot.slane %v1178_v59, 4  ;;  %v970_v7 = vld [vmem:[#allocation2 + $0x6c] sm:$0xf]  ;;  %v643_v13 = vor.u32 %v641_v55, %v640_v61  ;;  %v644_v14 = vrot.slane %v640_v61, 4  ;;  %v446_v16 = vsel %vm4700_vm4, 0, %v445_v58 }
  0x70   : > { %v1189_v22 = vrot.slane %v1188_v0, 4  ;;  %v5004_v23 = vld [vmem:[#allocation2 + $0x70] sm:$0xf]  ;;  %v1220_v29 = vshrl.u32 %v970_v7, 16  ;;  %v1223_v30 = vshll.u32 %v970_v7, 16  ;;  %v651_v11 = vor.u32 %v649_v62, %v648_v4 }
  0x71   : > { %v1184_v31 = vsel %vm4755_vm12, %v1179_v10, %v1183_v53  ;;  %v5008_v25 = vld [vmem:[#allocation2 + $0x74] sm:$0x1]  ;;  %v1229_v20 = vshll.u32 %v5004_v23, 16  ;;  %v1233_v32 = vshrl.u32 %v5004_v23, 16  ;;  %v653_v33 = vrot.slane %v648_v4, 4 }
  0x72   : > { %v1194_v24 = vsel %vm4755_vm12, %v1189_v22, %v1193_v60  ;;  %v2861_v34 = vunpack.c.l.b16 %v1184_v31  ;;  %v1222_v35 = vrot.slane %v1220_v29, 4  ;;  %v1225_v36 = vrot.slane %v1223_v30, 5  ;;  %447 = vst [vmem:[#allocation2 + $0x78] sm:$0x1] %v446_v16  ;;  %v451_v52 = vld [vmem:[#allocation2 + $0x90] sm:$0x1] }
  0x73   : > { %v2862_v37 = vunpack.c.l.b16 %v1194_v24  ;;  %v1231_v38 = vrot.slane %v1229_v20, 5  ;;  %v1235_v17 = vrot.slane %v1233_v32, 4  ;;  %v1239_v40 = vshll.u32 %v5008_v25, 16  ;;  %v5039_v61 = vld [vmem:[%s6619_s2] ss:$0 sm:$0xff] }
  0x74   : > { %v1226_v41 = vor.u32 %v1225_v36, %v1222_v35  ;;  %v652_v27 = vsel %vm4788_vm14, %v644_v14, %v651_v11  ;;  %v890_v42 = vsel %vm4780_vm13, %v643_v13, %v889_v15  ;;  %v894_v44 = vsel %vm4700_vm4, %v653_v33, %v893_v9  ;;  %v501_v0 = vld [vmem:[#allocation2 + $0x98] sm:$0x1]  ;;  %v257_v11 = vld [vmem:[%s4730_s25 + $0xa0] sm:$0xff] }
  0x75   : > { %v2886_v46 = vpack.c.b16 %v2862_v37, %v2861_v34  ;;  %v1236_v47 = vor.u32 %v1235_v17, %v1231_v38  ;;  %v1241_v28 = vrot.slane %v1239_v40, 5  ;;  %891 = vst [vmem:[#allocation2 + $0x60] sm:$0xf] %v890_v42  ;;  %v391_v48 = vpack.c.bf16 %v359_v5, %v359_v5  ;;  %v258_v17 = vld [vmem:[%s4730_s25 + $0xa8] sm:$0xff] }
  0x76   : > { %v1227_v49 = vrot.slane %v1226_v41, 4  ;;  %892 = vst.msk [vmem:[#allocation2 + $0x64] sm:$0xf] %vm405_vm0, %v652_v27  ;;  %v392_v63 = vpack.c.bf16 %v360_v6, %v360_v6  ;;  %v496_v21 = vsel %vm4706_vm6, 0, %v495_v8  ;;  %v295_v51 = vmul.f32 %v5029_v50, %v259_v18 }
  0x77   : > { %2909 = vrot.lane.b32.xlu1 %v2886_v46, %s4650_s29  ;;  %v1237_v53 = vrot.slane %v1236_v47, 4  ;;  %895 = vst [vmem:[#allocation2 + $0x68] sm:$0x1] %v894_v44  ;;  %v672_v54 = vshrl.u32 %v391_v48, 16  ;;  %v675_v55 = vshll.u32 %v391_v48, 16  ;;  %v296_v56 = vmul.f32 %v5029_v50, %v260_v45 }
  0x78   : > { %v1232_v58 = vsel %vm4755_vm12, %v1227_v49, %v1231_v38  ;;  %497 = vst [vmem:[#allocation2 + $0x80] sm:$0x1] %v496_v21  ;;  %v680_v59 = vshrl.u32 %v392_v63, 16  ;;  %v683_v60 = vshll.u32 %v392_v63, 16  ;;  %v331_v62 = vadd.f32 %v5039_v61, %v295_v51 }
  0x79   : > { %v1242_v4 = vsel %vm4755_vm12, %v1237_v53, %v1241_v28  ;;  %v2865_v5 = vunpack.c.l.b16 %v1232_v58  ;;  %v674_v6 = vrot.slane %v672_v54, 7  ;;  %v332_v10 = vadd.f32 %v5039_v61, %v296_v56  ;;  %v903_v14 = vld [vmem:[#allocation2 + $0x78] sm:$0xf]  ;;  %v448_v54 = vld [vmem:[#allocation2 + $0x84] sm:$0x1] }
  0x7a   : > { %v2866_v7 = vunpack.c.l.b16 %v1242_v4  ;;  %v682_v13 = vrot.slane %v680_v59, 7  ;;  %v363_v15 = vmax.f32 %v331_v62, 0.0  ;;  %v452_v9 = vsel %vm4700_vm4, 0, %v451_v52 }
  0x7b   : > { %v677_v16 = vor.u32 %v675_v55, %v674_v6  ;;  %v678_v22 = vrot.slane %v674_v6, 4  ;;  %v364_v29 = vmax.f32 %v332_v10, 0.0  ;;  %453 = vst [vmem:[#allocation2 + $0x90] sm:$0x1] %v452_v9  ;;  %v502_v30 = vsel %vm4706_vm6, 0, %v501_v0 }
  0x7c   : > { %v2888_v31 = vpack.c.b16 %v2866_v7, %v2865_v5  ;;  %v968_v20 = vld [vmem:[#allocation2 + $0x60] sm:$0xf]  ;;  %v685_v32 = vor.u32 %v683_v60, %v682_v13  ;;  %v687_v33 = vrot.slane %v682_v13, 4  ;;  %v395_v24 = vpack.c.bf16 %v363_v15, %v363_v15  ;;  %503 = vst [vmem:[#allocation2 + $0x98] sm:$0x1] %v502_v30 }
  0x7d   : > { %v5050_v34 = vld [vmem:[#allocation2 + $0x64] sm:$0xf]  ;;  %v1196_v35 = vshrl.u32 %v968_v20, 16  ;;  %v1199_v36 = vshll.u32 %v968_v20, 16  ;;  %v904_v37 = vsel %vm4780_vm13, %v677_v16, %v903_v14  ;;  %v396_v38 = vpack.c.bf16 %v364_v29, %v364_v29 }
  0x7e   : > { %2913 = vrot.lane.b32.xlu0 %v2888_v31, %s4650_s29  ;;  %v5056_v40 = vld [vmem:[#allocation2 + $0x68] sm:$0x1]  ;;  %v1205_v8 = vshll.u32 %v5050_v34, 16  ;;  %v1209_v18 = vshrl.u32 %v5050_v34, 16  ;;  %v686_v41 = vsel %vm4788_vm14, %v678_v22, %v685_v32  ;;  %905 = vst [vmem:[#allocation2 + $0x78] sm:$0xf] %v904_v37  ;;  %v293_v27 = vmul.f32 %v5029_v50, %v257_v11 }
  0x7f   : > { %v1198_v42 = vrot.slane %v1196_v35, 4  ;;  %v1201_v44 = vrot.slane %v1199_v36, 5  ;;  %v1215_v45 = vshll.u32 %v5056_v40, 16  ;;  %906 = vst.msk [vmem:[#allocation2 + $0x7c] sm:$0xf] %vm405_vm0, %v686_v41  ;;  %v706_v46 = vshrl.u32 %v395_v24, 16 }
  0x80   : > { %v1207_v47 = vrot.slane %v1205_v8, 5  ;;  %v1211_v28 = vrot.slane %v1209_v18, 4  ;;  %v907_v48 = vld [vmem:[#allocation2 + $0x80] sm:$0x1]  ;;  %v709_v49 = vshll.u32 %v395_v24, 16  ;;  %v714_v63 = vshrl.u32 %v396_v38, 16 }
  0x81   : > { %v1202_v21 = vor.u32 %v1201_v44, %v1198_v42  ;;  %v1217_v51 = vrot.slane %v1215_v45, 5  ;;  %v908_v52 = vsel %vm4700_vm4, %v687_v33, %v907_v48  ;;  %v708_v53 = vrot.slane %v706_v46, 7  ;;  %v498_v37 = vld [vmem:[#allocation2 + $0x8c] sm:$0x1]  ;;  %v261_v41 = vld [vmem:[%s4730_s25 + $0xc0] sm:$0xff] }
  0x82   : > { %v1212_v55 = vor.u32 %v1211_v28, %v1207_v47  ;;  %909 = vst [vmem:[#allocation2 + $0x80] sm:$0x1] %v908_v52  ;;  %v716_v56 = vrot.slane %v714_v63, 7  ;;  %v717_v58 = vshll.u32 %v396_v38, 16  ;;  %v917_v59 = vld [vmem:[#allocation2 + $0x90] sm:$0xf]  ;;  %v294_v60 = vmul.f32 %v5029_v50, %v258_v17 }
  0x83   : > { %v1203_v62 = vrot.slane %v1202_v21, 4  ;;  %v711_v0 = vor.u32 %v709_v49, %v708_v53  ;;  %v712_v4 = vrot.slane %v708_v53, 4  ;;  %v329_v5 = vadd.f32 %v5039_v61, %v293_v27  ;;  %v921_v16 = vld [vmem:[#allocation2 + $0x98] sm:$0x1]  ;;  %v262_v63 = vld [vmem:[%s4730_s25 + $0xc8] sm:$0xff] }
  0x84   : > { %v1213_v6 = vrot.slane %v1212_v55, 4  ;;  %v719_v10 = vor.u32 %v717_v58, %v716_v56  ;;  %v721_v7 = vrot.slane %v716_v56, 4  ;;  %v330_v13 = vadd.f32 %v5039_v61, %v294_v60 }
  0x85   : > { %v1208_v14 = vsel %vm4755_vm12, %v1203_v62, %v1207_v47  ;;  %v972_v15 = vld [vmem:[#allocation2 + $0x78] sm:$0xf]  ;;  %v918_v9 = vsel %vm4780_vm13, %v711_v0, %v917_v59  ;;  %v361_v22 = vmax.f32 %v329_v5, 0.0  ;;  %v449_v29 = vsel %vm4700_vm4, 0, %v448_v54 }
  0x86   : > { %v1218_v30 = vsel %vm4755_vm12, %v1213_v6, %v1217_v51  ;;  %v2863_v11 = vunpack.c.l.b16 %v1208_v14  ;;  %v5078_v31 = vld [vmem:[#allocation2 + $0x7c] sm:$0xf]  ;;  %v1244_v20 = vshrl.u32 %v972_v15, 16  ;;  %v1247_v32 = vshll.u32 %v972_v15, 16  ;;  %919 = vst [vmem:[#allocation2 + $0x90] sm:$0xf] %v918_v9 }
  0x87   : > { %v2864_v33 = vunpack.c.l.b16 %v1218_v30  ;;  %v1253_v24 = vshll.u32 %v5078_v31, 16  ;;  %v1257_v35 = vshrl.u32 %v5078_v31, 16  ;;  %v720_v36 = vsel %vm4788_vm14, %v712_v4, %v719_v10  ;;  %450 = vst [vmem:[#allocation2 + $0x84] sm:$0x1] %v449_v29 }
  0x88   : > { %v1246_v38 = vrot.slane %v1244_v20, 4  ;;  %v1249_v17 = vrot.slane %v1247_v32, 5  ;;  %920 = vst.msk [vmem:[#allocation2 + $0x94] sm:$0xf] %vm405_vm0, %v720_v36  ;;  %v922_v8 = vsel %vm4700_vm4, %v721_v7, %v921_v16  ;;  %v362_v18 = vmax.f32 %v330_v13, 0.0 }
  0x89   : > { %v2887_v27 = vpack.c.b16 %v2864_v33, %v2863_v11  ;;  %v5088_v42 = vld [vmem:[#allocation2 + $0x80] sm:$0x1]  ;;  %v1255_v44 = vrot.slane %v1253_v24, 5  ;;  %v1259_v45 = vrot.slane %v1257_v35, 4  ;;  %923 = vst [vmem:[#allocation2 + $0x98] sm:$0x1] %v922_v8  ;;  %v393_v46 = vpack.c.bf16 %v361_v22, %v361_v22 }
  0x8a   : > { %v1250_v47 = vor.u32 %v1249_v17, %v1246_v38  ;;  %v1263_v28 = vshll.u32 %v5088_v42, 16  ;;  %v394_v48 = vpack.c.bf16 %v362_v18, %v362_v18  ;;  %v499_v49 = vsel %vm4706_vm6, 0, %v498_v37  ;;  %v454_v37 = vld [vmem:[#allocation2 + $0x9c] sm:$0x1]  ;;  %v265_v38 = vld [vmem:[%s4730_s25 + $0xe0] sm:$0xff] }
  0x8b   : > { %2911 = vrot.lane.b32.xlu2 %v2887_v27, %s4650_s29  ;;  %v1260_v21 = vor.u32 %v1259_v45, %v1255_v44  ;;  %500 = vst [vmem:[#allocation2 + $0x8c] sm:$0x1] %v499_v49  ;;  %v689_v51 = vshrl.u32 %v393_v46, 16  ;;  %v692_v52 = vshll.u32 %v393_v46, 16  ;;  %v297_v53 = vmul.f32 %v5029_v50, %v261_v41  ;;  %v266_v45 = vld [vmem:[%s4730_s25 + $0xe8] sm:$0xff] }
  0x8c   : > { %v1251_v54 = vrot.slane %v1250_v47, 4  ;;  %v1265_v55 = vrot.slane %v1263_v28, 5  ;;  %v697_v56 = vshrl.u32 %v394_v48, 16  ;;  %v700_v58 = vshll.u32 %v394_v48, 16  ;;  %v460_v49 = vld [vmem:[#allocation2 + $0xb4] sm:$0x1] }
  0x8d   : > { %v1261_v59 = vrot.slane %v1260_v21, 4  ;;  %v976_v60 = vld [vmem:[#allocation2 + $0x90] sm:$0xf]  ;;  %v691_v62 = vrot.slane %v689_v51, 7  ;;  %v298_v0 = vmul.f32 %v5029_v50, %v262_v63  ;;  %v333_v4 = vadd.f32 %v5039_v61, %v297_v53 }
  0x8e   : > { %v1256_v5 = vsel %vm4755_vm12, %v1251_v54, %v1255_v44  ;;  %v1292_v6 = vshrl.u32 %v976_v60, 16  ;;  %v1295_v10 = vshll.u32 %v976_v60, 16  ;;  %v699_v7 = vrot.slane %v697_v56, 7  ;;  %v910_v22 = vld [vmem:[#allocation2 + $0x84] sm:$0xf] }
  0x8f   : > { %v1266_v13 = vsel %vm4755_vm12, %v1261_v59, %v1265_v55  ;;  %v2867_v14 = vunpack.c.l.b16 %v1256_v5  ;;  %v5102_v15 = vld [vmem:[#allocation2 + $0x94] sm:$0xf]  ;;  %v694_v9 = vor.u32 %v692_v52, %v691_v62  ;;  %v695_v16 = vrot.slane %v691_v62, 4  ;;  %v504_v44 = vld [vmem:[#allocation2 + $0xa4] sm:$0x1] }
  0x90   : > { %v2868_v29 = vunpack.c.l.b16 %v1266_v13  ;;  %v5104_v30 = vld [vmem:[#allocation2 + $0x98] sm:$0x1]  ;;  %v1294_v11 = vrot.slane %v1292_v6, 4  ;;  %v1297_v20 = vrot.slane %v1295_v10, 5  ;;  %v1301_v32 = vshll.u32 %v5102_v15, 16 }
  0x91   : > { %v1305_v33 = vshrl.u32 %v5102_v15, 16  ;;  %v1311_v24 = vshll.u32 %v5104_v30, 16  ;;  %v702_v35 = vor.u32 %v700_v58, %v699_v7  ;;  %v704_v36 = vrot.slane %v699_v7, 4  ;;  %v510_v58 = vld [vmem:[#allocation2 + $0xbc] sm:$0x1] }
  0x92   : > { %v2889_v17 = vpack.c.b16 %v2868_v29, %v2867_v14  ;;  %v1298_v8 = vor.u32 %v1297_v20, %v1294_v11  ;;  %v1303_v18 = vrot.slane %v1301_v32, 5  ;;  %v911_v41 = vsel %vm4780_vm13, %v694_v9, %v910_v22  ;;  %v914_v27 = vld [vmem:[#allocation2 + $0x8c] sm:$0x1] }
  0x93   : > { %v1307_v46 = vrot.slane %v1305_v33, 4  ;;  %v1313_v47 = vrot.slane %v1311_v24, 5  ;;  %v703_v28 = vsel %vm4788_vm14, %v695_v16, %v702_v35  ;;  %912 = vst [vmem:[#allocation2 + $0x84] sm:$0xf] %v911_v41  ;;  %v915_v48 = vsel %vm4700_vm4, %v704_v36, %v914_v27 }
  0x94   : > { %2915 = vrot.lane.b32.xlu1 %v2889_v17, %s4650_s29  ;;  %v1299_v63 = vrot.slane %v1298_v8, 4  ;;  %913 = vst.msk [vmem:[#allocation2 + $0x88] sm:$0xf] %vm405_vm0, %v703_v28  ;;  %v334_v21 = vadd.f32 %v5039_v61, %v298_v0  ;;  %v365_v51 = vmax.f32 %v333_v4, 0.0  ;;  %v455_v52 = vsel %vm4700_vm4, 0, %v454_v37  ;;  %v263_v4 = vld [vmem:[%s4730_s25 + $0xd0] sm:$0xff] }
  0x95   : > { %v1308_v53 = vor.u32 %v1307_v46, %v1303_v18  ;;  %916 = vst [vmem:[#allocation2 + $0x8c] sm:$0x1] %v915_v48  ;;  %v505_v54 = vsel %vm4706_vm6, 0, %v504_v44  ;;  %v301_v55 = vmul.f32 %v5029_v50, %v265_v38  ;;  %v302_v56 = vmul.f32 %v5029_v50, %v266_v45 }
  0x96   : > { %v1304_v59 = vsel %vm4755_vm12, %v1299_v63, %v1303_v18  ;;  %v366_v60 = vmax.f32 %v334_v21, 0.0  ;;  %v397_v62 = vpack.c.bf16 %v365_v51, %v365_v51  ;;  %456 = vst [vmem:[#allocation2 + $0x9c] sm:$0x1] %v455_v52  ;;  %v461_v0 = vsel %vm4700_vm4, 0, %v460_v49 }
  0x97   : > { %v1309_v5 = vrot.slane %v1308_v53, 4  ;;  %v2871_v6 = vunpack.c.l.b16 %v1304_v59  ;;  %506 = vst [vmem:[#allocation2 + $0xa4] sm:$0x1] %v505_v54  ;;  %v337_v10 = vadd.f32 %v5039_v61, %v301_v55  ;;  %v338_v7 = vadd.f32 %v5039_v61, %v302_v56  ;;  %v264_v55 = vld [vmem:[%s4730_s25 + $0xd8] sm:$0xff] }
  0x98   : > { %v398_v13 = vpack.c.bf16 %v366_v60, %v366_v60  ;;  %v723_v14 = vshrl.u32 %v397_v62, 16  ;;  %v726_v9 = vshll.u32 %v397_v62, 16  ;;  %462 = vst [vmem:[#allocation2 + $0xb4] sm:$0x1] %v461_v0  ;;  %v511_v16 = vsel %vm4706_vm6, 0, %v510_v58 }
  0x99   : > { %v1314_v22 = vsel %vm4755_vm12, %v1309_v5, %v1313_v47  ;;  %v369_v29 = vmax.f32 %v337_v10, 0.0  ;;  %v370_v11 = vmax.f32 %v338_v7, 0.0  ;;  %512 = vst [vmem:[#allocation2 + $0xbc] sm:$0x1] %v511_v16  ;;  %v299_v20 = vmul.f32 %v5029_v50, %v263_v4 }
  0x9a   : > { %v2872_v32 = vunpack.c.l.b16 %v1314_v22  ;;  %v974_v33 = vld [vmem:[#allocation2 + $0x84] sm:$0xf]  ;;  %v725_v24 = vrot.slane %v723_v14, 7  ;;  %v731_v35 = vshrl.u32 %v398_v13, 16  ;;  %v734_v36 = vshll.u32 %v398_v13, 16 }
  0x9b   : > { %v5138_v37 = vld [vmem:[#allocation2 + $0x88] sm:$0xf]  ;;  %v1268_v38 = vshrl.u32 %v974_v33, 16  ;;  %v1271_v17 = vshll.u32 %v974_v33, 16  ;;  %v401_v8 = vpack.c.bf16 %v369_v29, %v369_v29  ;;  %v402_v18 = vpack.c.bf16 %v370_v11, %v370_v11 }
  0x9c   : > { %v2891_v41 = vpack.c.b16 %v2872_v32, %v2871_v6  ;;  %v5140_v27 = vld [vmem:[#allocation2 + $0x8c] sm:$0x1]  ;;  %v1277_v44 = vshll.u32 %v5138_v37, 16  ;;  %v1281_v45 = vshrl.u32 %v5138_v37, 16  ;;  %v728_v46 = vor.u32 %v726_v9, %v725_v24  ;;  %v457_v14 = vld [vmem:[#allocation2 + $0xa8] sm:$0x1] }
  0x9d   : > { %v1270_v47 = vrot.slane %v1268_v38, 4  ;;  %v1273_v28 = vrot.slane %v1271_v17, 5  ;;  %v1287_v48 = vshll.u32 %v5140_v27, 16  ;;  %v729_v49 = vrot.slane %v725_v24, 4  ;;  %v924_v63 = vld [vmem:[#allocation2 + $0x9c] sm:$0xf] }
  0x9e   : > { %2919 = vrot.lane.b32.xlu0 %v2891_v41, %s4650_s29  ;;  %v1279_v21 = vrot.slane %v1277_v44, 5  ;;  %v1283_v51 = vrot.slane %v1281_v45, 4  ;;  %v733_v52 = vrot.slane %v731_v35, 7  ;;  %v925_v53 = vsel %vm4780_vm13, %v728_v46, %v924_v63  ;;  %v928_v54 = vld [vmem:[#allocation2 + $0xa4] sm:$0x1] }
  0x9f   : > { %v1274_v56 = vor.u32 %v1273_v28, %v1270_v47  ;;  %v1289_v58 = vrot.slane %v1287_v48, 5  ;;  %926 = vst [vmem:[#allocation2 + $0x9c] sm:$0xf] %v925_v53  ;;  %v757_v59 = vshrl.u32 %v401_v8, 16  ;;  %v760_v60 = vshll.u32 %v401_v8, 16 }
  0xa0   : > { %v1284_v62 = vor.u32 %v1283_v51, %v1279_v21  ;;  %v736_v0 = vor.u32 %v734_v36, %v733_v52  ;;  %v738_v4 = vrot.slane %v733_v52, 4  ;;  %v765_v5 = vshrl.u32 %v402_v18, 16  ;;  %v938_v11 = vld [vmem:[#allocation2 + $0xb4] sm:$0xf]  ;;  %v507_v32 = vld [vmem:[#allocation2 + $0xb0] sm:$0x1] }
  0xa1   : > { %v1275_v6 = vrot.slane %v1274_v56, 4  ;;  %v759_v10 = vrot.slane %v757_v59, 7  ;;  %v768_v7 = vshll.u32 %v402_v18, 16  ;;  %v300_v13 = vmul.f32 %v5029_v50, %v264_v55  ;;  %v942_v36 = vld [vmem:[#allocation2 + $0xbc] sm:$0x1] }
  0xa2   : > { %v1285_v9 = vrot.slane %v1284_v62, 4  ;;  %v737_v16 = vsel %vm4788_vm14, %v729_v49, %v736_v0  ;;  %v929_v22 = vsel %vm4700_vm4, %v738_v4, %v928_v54  ;;  %v767_v29 = vrot.slane %v765_v5, 7  ;;  %v1390_v53 = vld [vmem:[#allocation2 + $0x24] sm:$0xe]  ;;  %v4627_v54 = vld [vmem:[#allocation2 + $0x28] sm:$0xf] }
  0xa3   : > { %v1280_v33 = vsel %vm4755_vm12, %v1275_v6, %v1279_v21  ;;  %927 = vst.msk [vmem:[#allocation2 + $0xa0] sm:$0xf] %vm405_vm0, %v737_v16  ;;  %v762_v24 = vor.u32 %v760_v60, %v759_v10  ;;  %v763_v35 = vrot.slane %v759_v10, 4  ;;  %v335_v50 = vadd.f32 %v5039_v61, %v299_v20 }
  0xa4   : > { %v1290_v38 = vsel %vm4755_vm12, %v1285_v9, %v1289_v58  ;;  %v2869_v17 = vunpack.c.l.b16 %v1280_v33  ;;  %930 = vst [vmem:[#allocation2 + $0xa4] sm:$0x1] %v929_v22  ;;  %v770_v8 = vor.u32 %v768_v7, %v767_v29  ;;  %v772_v18 = vrot.slane %v767_v29, 4 }
  0xa5   : > { %v2870_v41 = vunpack.c.l.b16 %v1290_v38  ;;  %v939_v44 = vsel %vm4780_vm13, %v762_v24, %v938_v11  ;;  %v336_v45 = vadd.f32 %v5039_v61, %v300_v13  ;;  %v367_v46 = vmax.f32 %v335_v50, 0.0 }
  0xa6   : > { %v978_v47 = vld [vmem:[#allocation2 + $0x9c] sm:$0xf]  ;;  %v771_v28 = vsel %vm4788_vm14, %v763_v35, %v770_v8  ;;  %940 = vst [vmem:[#allocation2 + $0xb4] sm:$0xf] %v939_v44  ;;  %v943_v20 = vsel %vm4700_vm4, %v772_v18, %v942_v36  ;;  %v458_v48 = vsel %vm4700_vm4, 0, %v457_v14  ;;  %v508_v49 = vsel %vm4706_vm6, 0, %v507_v32 }
  0xa7   : > { %v2890_v63 = vpack.c.b16 %v2870_v41, %v2869_v17  ;;  %v1316_v21 = vshrl.u32 %v978_v47, 16  ;;  %v1319_v51 = vshll.u32 %v978_v47, 16  ;;  %941 = vst.msk [vmem:[#allocation2 + $0xb8] sm:$0xf] %vm405_vm0, %v771_v28  ;;  %v368_v61 = vmax.f32 %v336_v45, 0.0 }
  0xa8   : > { %944 = vst [vmem:[#allocation2 + $0xbc] sm:$0x1] %v943_v20  ;;  %v399_v52 = vpack.c.bf16 %v367_v46, %v367_v46  ;;  %v1477_v55 = vrot.slane %v4627_v54, 5  ;;  %v1480_v56 = vrot.slane %v4919_v57, 5  ;;  %v4266_v62 = vrot.slane %v1390_v53, 9 }
  0xa9   : > { %2917 = vrot.lane.b32.xlu2 %v2890_v63, %s4650_s29  ;;  %v1318_v58 = vrot.slane %v1316_v21, 4  ;;  %v1321_v59 = vrot.slane %v1319_v51, 5  ;;  %v400_v60 = vpack.c.bf16 %v368_v61, %v368_v61  ;;  %459 = vst [vmem:[#allocation2 + $0xa8] sm:$0x1] %v458_v48  ;;  %v4629_v57 = vld [vmem:[#allocation2 + $0x20] sm:$0x1] }
  0xaa   : > { %v5174_v0 = vld [vmem:[#allocation2 + $0xa0] sm:$0xf]  ;;  %509 = vst [vmem:[#allocation2 + $0xb0] sm:$0x1] %v508_v49  ;;  %v740_v4 = vshrl.u32 %v399_v52, 16  ;;  %v743_v5 = vshll.u32 %v399_v52, 16  ;;  %v5183_v29 = vsel %vm4739_vm10, %v4266_v62, %v1477_v55 }
  0xab   : > { %v5176_v6 = vld [vmem:[#allocation2 + $0xa4] sm:$0x1]  ;;  %v1322_v10 = vor.u32 %v1321_v59, %v1318_v58  ;;  %v1325_v7 = vshll.u32 %v5174_v0, 16  ;;  %v1329_v13 = vshrl.u32 %v5174_v0, 16  ;;  %v748_v14 = vshrl.u32 %v400_v60, 16 }
  0xac   : > { %v1335_v9 = vshll.u32 %v5176_v6, 16  ;;  %v742_v16 = vrot.slane %v740_v4, 7  ;;  %v751_v22 = vshll.u32 %v400_v60, 16  ;;  %v1389_v60 = vld [vmem:[#allocation2 + $0x18] sm:$0xe]  ;;  %vm3868_vm2 = vcmask 1043456  }
  0xad   : > { %v1323_v11 = vrot.slane %v1322_v10, 4  ;;  %v1327_v32 = vrot.slane %v1325_v7, 5  ;;  %v1331_v33 = vrot.slane %v1329_v13, 4  ;;  %v982_v24 = vld [vmem:[#allocation2 + $0xb4] sm:$0xf]  ;;  %v750_v35 = vrot.slane %v748_v14, 7 }
  0xae   : > { %v1337_v36 = vrot.slane %v1335_v9, 5  ;;  %v983_v50 = vld [vmem:[#allocation2 + $0xb8] sm:$0xf]  ;;  %v1364_v38 = vshrl.u32 %v982_v24, 16  ;;  %v1367_v17 = vshll.u32 %v982_v24, 16  ;;  %v745_v8 = vor.u32 %v743_v5, %v742_v16 }
  0xaf   : > { %v1328_v18 = vsel %vm4755_vm12, %v1323_v11, %v1327_v32  ;;  %v1332_v41 = vor.u32 %v1331_v33, %v1327_v32  ;;  %v999_v44 = vld [vmem:[#allocation2 + $0xbc] sm:$0x1]  ;;  %v1373_v45 = vshll.u32 %v983_v50, 16  ;;  %v1377_v46 = vshrl.u32 %v983_v50, 16 }
  0xb0   : > { %v2873_v47 = vunpack.c.l.b16 %v1328_v18  ;;  %v1366_v28 = vrot.slane %v1364_v38, 4  ;;  %v1369_v20 = vrot.slane %v1367_v17, 5  ;;  %v1383_v48 = vshll.u32 %v999_v44, 16  ;;  %v931_v49 = vld [vmem:[#allocation2 + $0xa8] sm:$0xf] }
  0xb1   : > { %v1333_v63 = vrot.slane %v1332_v41, 4  ;;  %v1375_v21 = vrot.slane %v1373_v45, 5  ;;  %v1379_v51 = vrot.slane %v1377_v46, 4  ;;  %v746_v61 = vrot.slane %v742_v16, 4  ;;  %v935_v52 = vld [vmem:[#allocation2 + $0xb0] sm:$0x1] }
  0xb2   : > { %v1370_v53 = vor.u32 %v1369_v20, %v1366_v28  ;;  %v1385_v54 = vrot.slane %v1383_v48, 5  ;;  %v753_v58 = vor.u32 %v751_v22, %v750_v35  ;;  %v755_v59 = vrot.slane %v750_v35, 4  ;;  %v1391_v16 = vld [vmem:[#allocation2 + $0x30] sm:$0xe]  ;;  %v1393_v38 = vld [vmem:[#allocation2 + $0x48] sm:$0xe] }
  0xb3   : > { %v1338_v62 = vsel %vm4755_vm12, %v1333_v63, %v1337_v36  ;;  %v1380_v4 = vor.u32 %v1379_v51, %v1375_v21  ;;  %v932_v5 = vsel %vm4780_vm13, %v745_v8, %v931_v49  ;;  %v1479_v10 = vrot.slane %v1477_v55, 4  ;;  %v4628_v36 = vld [vmem:[#allocation2 + $0x1c] sm:$0xf]  ;;  %v4630_v46 = vld [vmem:[#allocation2 + $0x34] sm:$0xf] }
  0xb4   : > { %v2874_v7 = vunpack.c.l.b16 %v1338_v62  ;;  %v1371_v13 = vrot.slane %v1370_v53, 4  ;;  %v754_v14 = vsel %vm4788_vm14, %v746_v61, %v753_v58  ;;  %933 = vst [vmem:[#allocation2 + $0xa8] sm:$0xf] %v932_v5  ;;  %v936_v9 = vsel %vm4700_vm4, %v755_v59, %v935_v52  ;;  %v1392_v20 = vld [vmem:[#allocation2 + $0x3c] sm:$0xe] }
  0xb5   : > { %v1381_v22 = vrot.slane %v1380_v4, 4  ;;  %934 = vst.msk [vmem:[#allocation2 + $0xac] sm:$0xf] %vm405_vm0, %v754_v14  ;;  %v1481_v11 = vsel %vm4739_vm10, %v1479_v10, %v1480_v56  ;;  %v2933_v55 = vunpack.c.l.b16 %v5183_v29  ;;  %v4265_v32 = vrot.slane %v1389_v60, 9  ;;  %v4632_v58 = vld [vmem:[#allocation2 + $0x4c] sm:$0xf] }
  0xb6   : > { %v2892_v33 = vpack.c.b16 %v2874_v7, %v2873_v47  ;;  %v1376_v24 = vsel %vm4755_vm12, %v1371_v13, %v1375_v21  ;;  %937 = vst [vmem:[#allocation2 + $0xb0] sm:$0x1] %v936_v9  ;;  %v2934_v35 = vunpack.c.l.b16 %v1481_v11  ;;  %v1470_v50 = vrot.slane %v4628_v36, 5  ;;  %v4631_v21 = vld [vmem:[#allocation2 + $0x38] sm:$0x1] }
  0xb7   : > { %v1386_v17 = vsel %vm4755_vm12, %v1381_v22, %v1385_v54  ;;  %v2877_v8 = vunpack.c.l.b16 %v1376_v24  ;;  %v1473_v18 = vrot.slane %v4629_v57, 5  ;;  %v4267_v41 = vrot.slane %v1391_v16, 9  ;;  %v4633_v5 = vld [vmem:[#allocation2 + $0x50] sm:$0x1]  ;;  %v1394_v24 = vld [vmem:[#allocation2 + $0x54] sm:$0xe] }
  0xb8   : > { %2921 = vrot.lane.b32.xlu1 %v2892_v33, %s4650_s29  ;;  %v2878_v56 = vunpack.c.l.b16 %v1386_v17  ;;  %v1471_v29 = vsel %vm4739_vm10, %v4265_v32, %v1470_v50  ;;  %v1472_v44 = vrot.slane %v1470_v50, 4  ;;  %v2962_v45 = vpack.c.b16 %v2934_v35, %v2933_v55 }
  0xb9   : > { %v1484_v47 = vrot.slane %v4630_v46, 5  ;;  %v4269_v28 = vrot.slane %v1393_v38, 9  ;;  %v2931_v63 = vunpack.c.l.b16 %v1471_v29  ;;  %v1487_v51 = vrot.slane %v4631_v21, 5 }
  0xba   : > { %v2894_v48 = vpack.c.b16 %v2878_v56, %v2877_v8  ;;  %v1474_v49 = vsel %vm4739_vm10, %v1472_v44, %v1473_v18  ;;  %v1498_v59 = vrot.slane %v4632_v58, 5  ;;  %v1501_v10 = vrot.slane %v4633_v5, 5  ;;  %v4634_v18 = vld [vmem:[#allocation2 + $0x40] sm:$0xf]  ;;  %v4635_v44 = vld [vmem:[#allocation2 + $0x44] sm:$0x1] }
  0xbb   : > { %v980_v61 = vld [vmem:[#allocation2 + $0xa8] sm:$0xf]  ;;  %v2932_v52 = vunpack.c.l.b16 %v1474_v49  ;;  %v5212_v53 = vsel %vm4739_vm10, %v4267_v41, %v1484_v47  ;;  %v1486_v54 = vrot.slane %v1484_v47, 4  ;;  %v4268_v7 = vrot.slane %v1392_v20, 9 }
  0xbc   : > { %2925 = vrot.lane.b32.xlu0 %v2894_v48, %s4650_s29  ;;  %v5215_v60 = vld [vmem:[#allocation2 + $0xac] sm:$0xf]  ;;  %v1340_v62 = vshrl.u32 %v980_v61, 16  ;;  %v1343_v4 = vshll.u32 %v980_v61, 16  ;;  %v2935_v16 = vunpack.c.l.b16 %v5212_v53  ;;  %v1499_v22 = vsel %vm4739_vm10, %v4269_v28, %v1498_v59 }
  0xbd   : > { %v5217_v13 = vld [vmem:[#allocation2 + $0xb0] sm:$0x1]  ;;  %v1349_v14 = vshll.u32 %v5215_v60, 16  ;;  %v1353_v9 = vshrl.u32 %v5215_v60, 16  ;;  %v2961_v33 = vpack.c.b16 %v2932_v52, %v2931_v63  ;;  %v1488_v50 = vsel %vm4739_vm10, %v1486_v54, %v1487_v51  ;;  %v1396_v28 = vld [vmem:[#allocation2 + $0x6c] sm:$0xe] }
  0xbe   : > { %v1342_v11 = vrot.slane %v1340_v62, 4  ;;  %v1345_v55 = vrot.slane %v1343_v4, 5  ;;  %v1359_v32 = vshll.u32 %v5217_v13, 16  ;;  %v1500_v38 = vrot.slane %v1498_v59, 4  ;;  %v1395_v59 = vld [vmem:[#allocation2 + $0x60] sm:$0xe] }
  0xbf   : > { %v1351_v35 = vrot.slane %v1349_v14, 5  ;;  %v1355_v36 = vrot.slane %v1353_v9, 4  ;;  %v2939_v57 = vunpack.c.l.b16 %v1499_v22  ;;  %v1491_v41 = vrot.slane %v4634_v18, 5 }
  0xc0   : > { %v1346_v17 = vor.u32 %v1345_v55, %v1342_v11  ;;  %v1361_v8 = vrot.slane %v1359_v32, 5  ;;  %2981 = vrot.lane.b32.xlu1 %v2962_v45, %s4649_s28  ;;  %v1502_v29 = vsel %vm4739_vm10, %v1500_v38, %v1501_v10  ;;  %v1494_v46 = vrot.slane %v4635_v44, 5  ;;  %v1399_v38 = vld [vmem:[#allocation2 + $0x90] sm:$0xe]  ;;  %v1398_v44 = vld [vmem:[#allocation2 + $0x84] sm:$0xe] }
  0xc1   : > { %v1356_v56 = vor.u32 %v1355_v36, %v1351_v35  ;;  %v4270_v47 = vrot.slane %v1394_v24, 9  ;;  %v2940_v48 = vunpack.c.l.b16 %v1502_v29  ;;  %v1492_v49 = vsel %vm4739_vm10, %v4268_v7, %v1491_v41 }
  0xc2   : > { %v1347_v20 = vrot.slane %v1346_v17, 4  ;;  %v1493_v63 = vrot.slane %v1491_v41, 4  ;;  %v2937_v51 = vunpack.c.l.b16 %v1492_v49  ;;  %v1505_v45 = vrot.slane %v4988_v43, 5 }
  0xc3   : > { %v1357_v21 = vrot.slane %v1356_v56, 4  ;;  %v1508_v61 = vrot.slane %v4995_v3, 5  ;;  %v2965_v53 = vpack.c.b16 %v2940_v48, %v2939_v57  ;;  %v4272_v58 = vrot.slane %v1396_v28, 9  ;;  %v1397_v57 = vld [vmem:[#allocation2 + $0x78] sm:$0xe] }
  0xc4   : > { %v1352_v52 = vsel %vm4755_vm12, %v1347_v20, %v1351_v35  ;;  %2979 = vrot.lane.b32.xlu0 %v2961_v33, %s4649_s28  ;;  %v1495_v54 = vsel %vm4739_vm10, %v1493_v63, %v1494_v46  ;;  %v2936_v5 = vunpack.c.l.b16 %v1488_v50  ;;  %v1506_v3 = vsel %vm4739_vm10, %v4270_v47, %v1505_v45 }
  0xc5   : > { %v1362_v62 = vsel %vm4755_vm12, %v1357_v21, %v1361_v8  ;;  %v2875_v4 = vunpack.c.l.b16 %v1352_v52  ;;  %v2938_v10 = vunpack.c.l.b16 %v1495_v54  ;;  %v1507_v7 = vrot.slane %v1505_v45, 4  ;;  %v1400_v52 = vld [vmem:[#allocation2 + $0x9c] sm:$0xe] }
  0xc6   : > { %v2876_v43 = vunpack.c.l.b16 %v1362_v62  ;;  %v1519_v14 = vrot.slane %v5004_v23, 5  ;;  %v1522_v22 = vrot.slane %v5008_v25, 5  ;;  %v4271_v11 = vrot.slane %v1395_v59, 9 }
  0xc7   : > { %v2964_v9 = vpack.c.b16 %v2938_v10, %v2937_v51  ;;  %v1512_v55 = vrot.slane %v5050_v34, 5  ;;  %v1509_v33 = vsel %vm4739_vm10, %v1507_v7, %v1508_v61  ;;  %v2963_v25 = vpack.c.b16 %v2936_v5, %v2935_v16  ;;  %v1567_v7 = vld [vmem:[#allocation2 + $0x10] sm:$0xf] }
  0xc8   : > { %v2893_v32 = vpack.c.b16 %v2876_v43, %v2875_v4  ;;  %2987 = vrot.lane.b32.xlu1 %v2965_v53, %s4649_s28  ;;  %v1520_v24 = vsel %vm4739_vm10, %v4272_v58, %v1519_v14  ;;  %v1521_v35 = vrot.slane %v1519_v14, 4  ;;  %v2941_v34 = vunpack.c.l.b16 %v1506_v3  ;;  %v1401_v53 = vld [vmem:[#allocation2 + $0xa8] sm:$0xe]  ;;  %v1566_v3 = vld [vmem:[#allocation2 + $0xc] sm:$0xf] }
  0xc9   : > { %v2945_v36 = vunpack.c.l.b16 %v1520_v24  ;;  %v1513_v23 = vsel %vm4739_vm10, %v4271_v11, %v1512_v55  ;;  %v1514_v50 = vrot.slane %v1512_v55, 4  ;;  %v1515_v8 = vrot.slane %v5056_v40, 5 }
  0xca   : > { %2923 = vrot.lane.b32.xlu2 %v2893_v32, %s4650_s29  ;;  %v1523_v17 = vsel %vm4739_vm10, %v1521_v35, %v1522_v22  ;;  %v2942_v18 = vunpack.c.l.b16 %v1509_v33  ;;  %v2943_v56 = vunpack.c.l.b16 %v1513_v23  ;;  %v1526_v29 = vrot.slane %v5078_v31, 5 }
  0xcb   : > { %v2946_v41 = vunpack.c.l.b16 %v1523_v17  ;;  %v1516_v46 = vsel %vm4739_vm10, %v1514_v50, %v1515_v8  ;;  %v4275_v47 = vrot.slane %v1399_v38, 9  ;;  %v1540_v16 = vrot.slane %v5102_v15, 5 }
  0xcc   : > { %2985 = vrot.lane.b32.xlu0 %v2964_v9, %s4649_s28  ;;  %v1543_v28 = vrot.slane %v5104_v30, 5  ;;  %v2944_v48 = vunpack.c.l.b16 %v1516_v46  ;;  %v4273_v40 = vrot.slane %v1397_v57, 9  ;;  %v1529_v49 = vrot.slane %v5088_v42, 5  ;;  %v2175_v57 = vld [vmem:[#allocation2 + $0x18] sm:$0xf] }
  0xcd   : > { %v2968_v20 = vpack.c.b16 %v2946_v41, %v2945_v36  ;;  %v1528_v63 = vrot.slane %v1526_v29, 4  ;;  %v1541_v31 = vsel %vm4739_vm10, %v4275_v47, %v1540_v16  ;;  %v1542_v21 = vrot.slane %v1540_v16, 4 }
  0xce   : > { %v4274_v51 = vrot.slane %v1398_v44, 9  ;;  %v2966_v45 = vpack.c.b16 %v2942_v18, %v2941_v34  ;;  %v1533_v61 = vrot.slane %v5138_v37, 5  ;;  %v2967_v15 = vpack.c.b16 %v2944_v48, %v2943_v56  ;;  %v1998_v34 = vld [vmem:[#allocation2 + $0xc] sm:$0xe] }
  0xcf   : > { %v1544_v30 = vsel %vm4739_vm10, %v1542_v21, %v1543_v28  ;;  %v2951_v54 = vunpack.c.l.b16 %v1541_v31  ;;  %v1536_v42 = vrot.slane %v5140_v27, 5  ;;  %v1547_v4 = vrot.slane %v5174_v0, 5 }
  0xd0   : > { %2993 = vrot.lane.b32.xlu1 %v2968_v20, %s4649_s28  ;;  %v2952_v58 = vunpack.c.l.b16 %v1544_v30  ;;  %v1534_v59 = vsel %vm4739_vm10, %v4274_v51, %v1533_v61  ;;  %v1535_v62 = vrot.slane %v1533_v61, 4  ;;  %v1527_v37 = vsel %vm4739_vm10, %v4273_v40, %v1526_v29  ;;  %v2176_v40 = vld [vmem:[#allocation2 + $0x1c] sm:$0xf]  ;;  %v4555_v61 = vld [vmem:[#allocation2 + $0xc] sm:$0xff] }
  0xd1   : > { %v1530_v5 = vsel %vm4739_vm10, %v1528_v63, %v1529_v49  ;;  %v4276_v10 = vrot.slane %v1400_v52, 9  ;;  %v4277_v43 = vrot.slane %v1401_v53, 9  ;;  %v2949_v14 = vunpack.c.l.b16 %v1534_v59 }
  0xd2   : > { %2983 = vrot.lane.b32.xlu2 %v2963_v25, %s4649_s28  ;;  %v1537_v27 = vsel %vm4739_vm10, %v1535_v62, %v1536_v42  ;;  %v1549_v9 = vrot.slane %v1547_v4, 4  ;;  %v1550_v22 = vrot.slane %v5176_v6, 5  ;;  %v2971_v0 = vpack.c.b16 %v2952_v58, %v2951_v54  ;;  %v1598_v25 = vld [vmem:[#allocation2 + $0x14] sm:$0x1]  ;;  %v2607_v54 = vld [vmem:[#allocation2 + $0x18] sm:$0xe] }
  0xd3   : > { %v2950_v11 = vunpack.c.l.b16 %v1537_v27  ;;  %v1554_v55 = vrot.slane %v5215_v60, 5  ;;  %v1557_v32 = vrot.slane %v5217_v13, 5  ;;  %v2947_v33 = vunpack.c.l.b16 %v1527_v37 }
  0xd4   : > { %2991 = vrot.lane.b32.xlu0 %v2967_v15, %s4649_s28  ;;  %v1615_v24 = vshrl.u32 %v1566_v3, 16  ;;  %v1618_v35 = vshll.u32 %v1566_v3, 16  ;;  %v1624_v36 = vshll.u32 %v1567_v7, 16  ;;  %v2948_v23 = vunpack.c.l.b16 %v1530_v5  ;;  %v2207_v5 = vld [vmem:[#allocation2 + $0x20] sm:$0x1] }
  0xd5   : > { %v1548_v50 = vsel %vm4739_vm10, %v4276_v10, %v1547_v4  ;;  %v1555_v38 = vsel %vm4739_vm10, %v4277_v43, %v1554_v55  ;;  %v1556_v6 = vrot.slane %v1554_v55, 4  ;;  %v2970_v17 = vpack.c.b16 %v2950_v11, %v2949_v14  ;;  %v1574_v11 = vld [vmem:[#allocation2 + $0x3c] sm:$0xf] }
  0xd6   : > { %v1551_v60 = vsel %vm4739_vm10, %v1549_v9, %v1550_v22  ;;  %v1617_v8 = vrot.slane %v1615_v24, 4  ;;  %v1620_v13 = vrot.slane %v1618_v35, 5  ;;  %v2955_v41 = vunpack.c.l.b16 %v1555_v38 }
  0xd7   : > { %v1558_v18 = vsel %vm4739_vm10, %v1556_v6, %v1557_v32  ;;  %v1626_v56 = vrot.slane %v1624_v36, 5  ;;  %v1628_v29 = vshrl.u32 %v1567_v7, 16  ;;  %v1634_v46 = vshll.u32 %v1598_v25, 16  ;;  %v1568_v6 = vld [vmem:[#allocation2 + $0x18] sm:$0xf] }
  0xd8   : > { %2999 = vrot.lane.b32.xlu1 %v2971_v0, %s4649_s28  ;;  %v1621_v44 = vor.u32 %v1620_v13, %v1617_v8  ;;  %v4279_v47 = vrot.slane %v1998_v34, 9  ;;  %v2064_v16 = vrot.slane %v1567_v7, 5  ;;  %v2956_v28 = vunpack.c.l.b16 %v1558_v18  ;;  %v5316_v8 = vld [vmem:[#allocation2 + $0x44] sm:$0x1] }
  0xd9   : > { %v1630_v20 = vrot.slane %v1628_v29, 4  ;;  %v2067_v48 = vrot.slane %v1598_v25, 5  ;;  %v2224_v49 = vshrl.u32 %v2175_v57, 16  ;;  %v2969_v63 = vpack.c.b16 %v2948_v23, %v2947_v33  ;;  %v4571_v25 = vld [vmem:[#allocation2 + $0x18] sm:$0xff] }
  0xda   : > { %2989 = vrot.lane.b32.xlu2 %v2966_v45, %s4649_s28  ;;  %v2953_v31 = vunpack.c.l.b16 %v1548_v50  ;;  %v1622_v21 = vrot.slane %v1621_v44, 4  ;;  %v2066_v51 = vrot.slane %v2064_v16, 4  ;;  %v2065_v53 = vsel %vm4739_vm10, %v4279_v47, %v2064_v16  ;;  %v5313_v50 = vld [vmem:[#allocation2 + $0x40] sm:$0xf]  ;;  %v5320_v16 = vld [vmem:[#allocation2 + $0x1c] sm:$0xf] }
  0xdb   : > { %v1631_v52 = vor.u32 %v1630_v20, %v1626_v56  ;;  %v2226_v15 = vrot.slane %v2224_v49, 4  ;;  %v2227_v30 = vshll.u32 %v2175_v57, 16  ;;  %v2954_v45 = vunpack.c.l.b16 %v1551_v60 }
  0xdc   : > { %2997 = vrot.lane.b32.xlu0 %v2970_v17, %s4649_s28  ;;  %v2068_v42 = vsel %vm4739_vm10, %v2066_v51, %v2067_v48  ;;  %v2233_v58 = vshll.u32 %v2176_v40, 16  ;;  %v2237_v59 = vshrl.u32 %v2176_v40, 16  ;;  %v2973_v62 = vpack.c.b16 %v2956_v28, %v2955_v41  ;;  %v5326_v48 = vld [vmem:[#allocation2 + $0x20] sm:$0x1] }
  0xdd   : > { %v1632_v4 = vrot.slane %v1631_v52, 4  ;;  %v1636_v37 = vrot.slane %v1634_v46, 5  ;;  %v2229_v10 = vrot.slane %v2227_v30, 5  ;;  %v3183_v43 = vunpack.c.l.b16 %v2065_v53 }
  0xde   : > { %v5300_v3 = vrot.slane %v2233_v58, 5  ;;  %v2239_v7 = vrot.slane %v2237_v59, 4  ;;  %v4295_v27 = vrot.slane %v2607_v54, 9  ;;  %v1627_v14 = vsel %vm4755_vm12, %v1622_v21, %v1626_v56 }
  0xdf   : > { %v3184_v9 = vunpack.c.l.b16 %v2068_v42  ;;  %v2230_v22 = vor.u32 %v2229_v10, %v2226_v15  ;;  %v2673_v0 = vrot.slane %v2176_v40, 5  ;;  %v2243_v32 = vshll.u32 %v2207_v5, 16 }
  0xe0   : > { %3071 = vrot.lane.b32.xlu1 %v4555_v61, %s4651_s9  ;;  %v2240_v55 = vor.u32 %v2239_v7, %v5300_v3  ;;  %v2972_v33 = vpack.c.b16 %v2954_v45, %v2953_v31  ;;  %v1637_v24 = vsel %vm4755_vm12, %v1632_v4, %v1636_v37  ;;  %v5309_v35 = vunpack.c.l.b16 %v1627_v14  ;;  %v4556_v37 = vld [vmem:[#allocation2 + $0x18] sm:$0xff] }
  0xe1   : > { %v2231_v36 = vrot.slane %v2230_v22, 4  ;;  %v2674_v23 = vsel %vm4739_vm10, %v4295_v27, %v2673_v0  ;;  %v1711_v38 = vshrl.u32 %v1574_v11, 16  ;;  %v3215_v34 = vpack.c.b16 %v3184_v9, %v3183_v43 }
  0xe2   : > { %2995 = vrot.lane.b32.xlu2 %v2969_v63, %s4649_s28  ;;  %v2675_v17 = vrot.slane %v2673_v0, 4  ;;  %v2676_v60 = vrot.slane %v2207_v5, 5  ;;  %v1714_v13 = vshll.u32 %v1574_v11, 16  ;;  %v3104_v57 = vunpack.c.l.b16 %v1637_v24  ;;  %v2002_v11 = vld [vmem:[#allocation2 + $0x3c] sm:$0xe] }
  0xe3   : > { %v2241_v18 = vrot.slane %v2240_v55, 4  ;;  %v2245_v41 = vrot.slane %v2243_v32, 5  ;;  %v1713_v56 = vrot.slane %v1711_v38, 4  ;;  %v3439_v29 = vunpack.c.l.b16 %v2674_v23  ;;  %v1999_v23 = vld [vmem:[#allocation2 + $0x18] sm:$0xe] }
  0xe4   : > { %3003 = vrot.lane.b32.xlu0 %v2973_v62, %s4649_s28  ;;  %v1716_v44 = vrot.slane %v1714_v13, 5  ;;  %v1720_v46 = vshll.u32 %v5313_v50, 16  ;;  %v1724_v47 = vshrl.u32 %v5313_v50, 16  ;;  %v2236_v28 = vsel %vm4755_vm12, %v2231_v36, %v5300_v3 }
  0xe5   : > { %v1730_v20 = vshll.u32 %v5316_v8, 16  ;;  %v1639_v40 = vshrl.u32 %v1568_v6, 16  ;;  %v1642_v49 = vshll.u32 %v1568_v6, 16  ;;  %v2677_v63 = vsel %vm4739_vm10, %v2675_v17, %v2676_v60  ;;  %v5354_v60 = vpop.permute.xlu2 %2977 }
  0xe6   : > { %v1717_v31 = vor.u32 %v1716_v44, %v1713_v56  ;;  %v1722_v21 = vrot.slane %v1720_v46, 5  ;;  %v1726_v51 = vrot.slane %v1724_v47, 4  ;;  %v1648_v15 = vshll.u32 %v5320_v16, 16  ;;  %v2177_v44 = vld [vmem:[#allocation2 + $0x24] sm:$0xf] }
  0xe7   : > { %v1732_v61 = vrot.slane %v1730_v20, 5  ;;  %v1641_v52 = vrot.slane %v1639_v40, 4  ;;  %v1644_v53 = vrot.slane %v1642_v49, 5  ;;  %v1652_v45 = vshrl.u32 %v5320_v16, 16  ;;  %v5363_v40 = vld [vmem:[#allocation2 + $0x28] sm:$0xf] }
  0xe8   : > { %3327 = vrot.lane.b32.xlu1 %v4571_v25, %s4652_s10  ;;  %v1718_v30 = vrot.slane %v1717_v31, 4  ;;  %v1727_v54 = vor.u32 %v1726_v51, %v1722_v21  ;;  %v1658_v42 = vshll.u32 %v5326_v48, 16  ;;  %v2246_v58 = vsel %vm4755_vm12, %v2241_v18, %v2245_v41 }
  0xe9   : > { %v3440_v59 = vunpack.c.l.b16 %v2677_v63  ;;  %v1645_v62 = vor.u32 %v1644_v53, %v1641_v52  ;;  %v1650_v4 = vrot.slane %v1648_v15, 5  ;;  %v1654_v43 = vrot.slane %v1652_v45, 4  ;;  %v5371_v52 = vld [vmem:[#allocation2 + $0x2c] sm:$0x1] }
  0xea   : > { %3001 = vrot.lane.b32.xlu2 %v2972_v33, %s4649_s28  ;;  %v1723_v5 = vsel %vm4755_vm12, %v1718_v30, %v1722_v21  ;;  %v1728_v10 = vrot.slane %v1727_v54, 4  ;;  %v3135_v3 = vpack.c.b16 %v3104_v57, %v5309_v35  ;;  %v5341_v7 = vunpack.c.l.b16 %v2236_v28  ;;  %v2183_v33 = vld [vmem:[#allocation2 + $0x48] sm:$0xf] }
  0xeb   : > { %v1646_v27 = vrot.slane %v1645_v62, 4  ;;  %v3360_v14 = vunpack.c.l.b16 %v2246_v58  ;;  %v1655_v22 = vor.u32 %v1654_v43, %v1650_v4  ;;  %v1660_v0 = vrot.slane %v1658_v42, 5  ;;  %v5375_v42 = vpop.permute.xlu1 %2975 }
  0xec   : > { %3231 = vrot.lane.b32.xlu0 %v3215_v34, %s4653_s11  ;;  %v1733_v9 = vsel %vm4755_vm12, %v1728_v10, %v1732_v61  ;;  %v3471_v55 = vpack.c.b16 %v3440_v59, %v3439_v29  ;;  %v3111_v32 = vunpack.c.l.b16 %v1723_v5  ;;  %v2092_v38 = vrot.slane %v5313_v50, 5  ;;  %v5350_v34 = vld [vmem:[#allocation2 + $0x4c] sm:$0xf]  ;;  %v5358_v29 = vld [vmem:[#allocation2 + $0x50] sm:$0x1] }
  0xed   : > { %v3112_v24 = vunpack.c.l.b16 %v1733_v9  ;;  %v1651_v36 = vsel %vm4755_vm12, %v1646_v27, %v1650_v4  ;;  %v1656_v35 = vrot.slane %v1655_v22, 4  ;;  %v4283_v6 = vrot.slane %v2002_v11, 9  ;;  %v5383_v11 = vpop.permute.xlu2 %2903 }
  0xee   : > { %v2095_v25 = vrot.slane %v5316_v8, 5  ;;  %v3391_v17 = vpack.c.b16 %v3360_v14, %v5341_v7  ;;  %v2094_v57 = vrot.slane %v2092_v38, 4  ;;  %v2320_v18 = vshrl.u32 %v2183_v33, 16 }
  0xef   : > { %v1661_v13 = vsel %vm4755_vm12, %v1656_v35, %v1660_v0  ;;  %v3105_v41 = vunpack.c.l.b16 %v1651_v36  ;;  %v4280_v50 = vrot.slane %v1999_v23, 9  ;;  %v2323_v8 = vshll.u32 %v2183_v33, 16  ;;  %v5386_v33 = vpop.permute.xlu0 %2895 }
  0xf0   : > { %3073 = vrot.lane.b32.xlu1 %v4556_v37, %s4651_s9  ;;  %v3106_v56 = vunpack.c.l.b16 %v1661_v13  ;;  %v3139_v46 = vpack.c.b16 %v3112_v24, %v3111_v32  ;;  %v2071_v47 = vrot.slane %v5320_v16, 5  ;;  %v2322_v28 = vrot.slane %v2320_v18, 4 }
  0xf1   : > { %v2329_v20 = vshll.u32 %v5350_v34, 16  ;;  %v2093_v49 = vsel %vm4739_vm10, %v4283_v6, %v2092_v38  ;;  %v2096_v63 = vsel %vm4739_vm10, %v2094_v57, %v2095_v25  ;;  %v2325_v31 = vrot.slane %v2323_v8, 5  ;;  %v2608_v38 = vld [vmem:[#allocation2 + $0x24] sm:$0xe]  ;;  %v4559_v6 = vld [vmem:[#allocation2 + $0x3c] sm:$0xff] }
  0xf2   : > { %3151 = vrot.lane.b32.xlu2 %v3135_v3, %s4654_s12  ;;  %v2333_v21 = vshrl.u32 %v5350_v34, 16  ;;  %v2339_v61 = vshll.u32 %v5358_v29, 16  ;;  %v2248_v16 = vshrl.u32 %v2177_v44, 16  ;;  %v2251_v53 = vshll.u32 %v2177_v44, 16  ;;  %v2611_v57 = vld [vmem:[#allocation2 + $0x48] sm:$0xe] }
  0xf3   : > { %v2331_v51 = vrot.slane %v2329_v20, 5  ;;  %v3136_v15 = vpack.c.b16 %v3106_v56, %v3105_v41  ;;  %v2326_v30 = vor.u32 %v2325_v31, %v2322_v28  ;;  %v2257_v45 = vshll.u32 %v5363_v40, 16  ;;  %v5401_v28 = vld [vmem:[#allocation2 + $0x70] sm:$0xf]  ;;  %v5405_v31 = vpop.permute.xlu1 %2899 }
  0xf4   : > { %3487 = vrot.lane.b32.xlu0 %v3471_v55, %s4655_s13  ;;  %v2335_v54 = vrot.slane %v2333_v21, 4  ;;  %v2341_v58 = vrot.slane %v2339_v61, 5  ;;  %v2250_v59 = vrot.slane %v2248_v16, 4  ;;  %v2253_v62 = vrot.slane %v2251_v53, 5  ;;  %v4572_v55 = vld [vmem:[#allocation2 + $0x24] sm:$0xff] }
  0xf5   : > { %v2261_v4 = vshrl.u32 %v5363_v40, 16  ;;  %v2327_v37 = vrot.slane %v2326_v30, 4  ;;  %v2259_v10 = vrot.slane %v2257_v45, 5  ;;  %v2267_v43 = vshll.u32 %v5371_v52, 16  ;;  %v1606_v61 = vld [vmem:[#allocation2 + $0x74] sm:$0x1] }
  0xf6   : > { %v2336_v5 = vor.u32 %v2335_v54, %v2331_v51  ;;  %v2073_v3 = vrot.slane %v2071_v47, 4  ;;  %v2074_v7 = vrot.slane %v5326_v48, 5  ;;  %v2254_v27 = vor.u32 %v2253_v62, %v2250_v59  ;;  %v2191_v59 = vld [vmem:[#allocation2 + $0x78] sm:$0xf] }
  0xf7   : > { %v2263_v14 = vrot.slane %v2261_v4, 4  ;;  %v2072_v9 = vsel %vm4739_vm10, %v4280_v50, %v2071_v47  ;;  %v3191_v22 = vunpack.c.l.b16 %v2093_v49  ;;  %v3192_v32 = vunpack.c.l.b16 %v2096_v63  ;;  %v1582_v50 = vld [vmem:[#allocation2 + $0x6c] sm:$0xf] }
  0xf8   : > { %3159 = vrot.lane.b32.xlu1 %v3139_v46, %s4654_s12  ;;  %v2337_v0 = vrot.slane %v2336_v5, 4  ;;  %v2255_v24 = vrot.slane %v2254_v27, 4  ;;  %v2269_v35 = vrot.slane %v2267_v43, 5  ;;  %v2332_v48 = vsel %vm4755_vm12, %v2327_v37, %v2331_v51  ;;  %v5411_v43 = vpop.permute.xlu2 %2905 }
  0xf9   : > { %v2264_v36 = vor.u32 %v2263_v14, %v2259_v10  ;;  %v2075_v25 = vsel %vm4739_vm10, %v2073_v3, %v2074_v7  ;;  %v2680_v13 = vrot.slane %v5363_v40, 5  ;;  %v2701_v18 = vrot.slane %v5350_v34, 5  ;;  %v5413_v3 = vpop.permute.xlu0 %2897 }
  0xfa   : > { %3407 = vrot.lane.b32.xlu2 %v3391_v17, %s4656_s14  ;;  %v2342_v23 = vsel %vm4755_vm12, %v2337_v0, %v2341_v58  ;;  %v3185_v41 = vunpack.c.l.b16 %v2072_v9  ;;  %v2260_v56 = vsel %vm4755_vm12, %v2255_v24, %v2259_v10  ;;  %v3219_v8 = vpack.c.b16 %v3192_v32, %v3191_v22  ;;  %v2006_v10 = vld [vmem:[#allocation2 + $0x6c] sm:$0xe]  ;;  %v5420_v9 = vld [vmem:[#allocation2 + $0x7c] sm:$0xf] }
  0xfb   : > { %v2265_v17 = vrot.slane %v2264_v36, 4  ;;  %v3367_v44 = vunpack.c.l.b16 %v2332_v48  ;;  %v3368_v46 = vunpack.c.l.b16 %v2342_v23  ;;  %v3186_v20 = vunpack.c.l.b16 %v2075_v25 }
  0xfc   : > { %3153 = vrot.lane.b32.xlu0 %v3136_v15, %s4654_s12  ;;  %v4296_v40 = vrot.slane %v2608_v38, 9  ;;  %v2683_v49 = vrot.slane %v5371_v52, 5  ;;  %v4299_v34 = vrot.slane %v2611_v57, 9  ;;  %v3361_v63 = vunpack.c.l.b16 %v2260_v56 }
  0xfd   : > { %v2270_v47 = vsel %vm4755_vm12, %v2265_v17, %v2269_v35  ;;  %v2682_v21 = vrot.slane %v2680_v13, 4  ;;  %v2703_v51 = vrot.slane %v2701_v18, 4  ;;  %v1807_v16 = vshrl.u32 %v1582_v50, 16 }
  0xfe   : > { %v3362_v53 = vunpack.c.l.b16 %v2270_v47  ;;  %v2704_v15 = vrot.slane %v5358_v29, 5  ;;  %v1810_v30 = vshll.u32 %v1582_v50, 16  ;;  %v1816_v54 = vshll.u32 %v5401_v28, 16  ;;  %v5430_v50 = vld [vmem:[#allocation2 + $0x80] sm:$0x1] }
  0xff   : > { %v3395_v45 = vpack.c.b16 %v3368_v46, %v3367_v44  ;;  %v1809_v52 = vrot.slane %v1807_v16, 4  ;;  %v1820_v58 = vshrl.u32 %v5401_v28, 16  ;;  %v3216_v62 = vpack.c.b16 %v3186_v20, %v3185_v41  ;;  %v4563_v46 = vld [vmem:[#allocation2 + $0x6c] sm:$0xff]  ;;  %v5435_v20 = vpop.permute.xlu1 %2901 }
 0x100   : > { %3329 = vrot.lane.b32.xlu1 %v4572_v55, %s4652_s10  ;;  %v1812_v4 = vrot.slane %v1810_v30, 5  ;;  %v1818_v37 = vrot.slane %v1816_v54, 5  ;;  %v1826_v5 = vshll.u32 %v1606_v61, 16  ;;  %v2681_v29 = vsel %vm4739_vm10, %v4296_v40, %v2680_v13 }
 0x101   : > { %v2702_v7 = vsel %vm4739_vm10, %v4299_v34, %v2701_v18  ;;  %v1822_v27 = vrot.slane %v1820_v58, 4  ;;  %v2120_v14 = vrot.slane %v5401_v28, 5  ;;  %v3392_v22 = vpack.c.b16 %v3362_v53, %v3361_v63  ;;  %v5448_v58 = vpop.permute.xlu2 %2911 }
 0x102   : > { %3079 = vrot.lane.b32.xlu2 %v4559_v6, %s4651_s9  ;;  %v2684_v0 = vsel %vm4739_vm10, %v2682_v21, %v2683_v49  ;;  %v2705_v55 = vsel %vm4739_vm10, %v2703_v51, %v2704_v15  ;;  %v1813_v32 = vor.u32 %v1812_v4, %v1809_v52  ;;  %v4287_v36 = vrot.slane %v2006_v10, 9  ;;  %v2615_v49 = vld [vmem:[#allocation2 + $0x78] sm:$0xe]  ;;  %v1576_v51 = vld [vmem:[#allocation2 + $0x48] sm:$0xf] }
 0x103   : > { %v1823_v24 = vor.u32 %v1822_v27, %v1818_v37  ;;  %v2123_v35 = vrot.slane %v1606_v61, 5  ;;  %v2416_v48 = vshrl.u32 %v2191_v59, 16  ;;  %v1828_v23 = vrot.slane %v1826_v5, 5  ;;  %v4575_v61 = vld [vmem:[#allocation2 + $0x48] sm:$0xff] }
 0x104   : > { %3239 = vrot.lane.b32.xlu0 %v3219_v8, %s4653_s11  ;;  %v2122_v38 = vrot.slane %v2120_v14, 4  ;;  %v2419_v6 = vshll.u32 %v2191_v59, 16  ;;  %v2425_v25 = vshll.u32 %v5420_v9, 16  ;;  %v1814_v17 = vrot.slane %v1813_v32, 4  ;;  %v5453_v5 = vld [vmem:[#allocation2 + $0x4c] sm:$0xf] }
 0x105   : > { %v1824_v13 = vrot.slane %v1823_v24, 4  ;;  %v2418_v57 = vrot.slane %v2416_v48, 4  ;;  %v2429_v18 = vshrl.u32 %v5420_v9, 16  ;;  %v3441_v41 = vunpack.c.l.b16 %v2681_v29 }
 0x106   : > { %v3442_v56 = vunpack.c.l.b16 %v2684_v0  ;;  %v2421_v8 = vrot.slane %v2419_v6, 5  ;;  %v5432_v44 = vrot.slane %v2425_v25, 5  ;;  %v3447_v47 = vunpack.c.l.b16 %v2702_v7 }
 0x107   : > { %v3448_v28 = vunpack.c.l.b16 %v2705_v55  ;;  %v2431_v40 = vrot.slane %v2429_v18, 4  ;;  %v2121_v34 = vsel %vm4739_vm10, %v4287_v36, %v2120_v14  ;;  %v2124_v63 = vsel %vm4739_vm10, %v2122_v38, %v2123_v35  ;;  %v5459_v14 = vld [vmem:[#allocation2 + $0x50] sm:$0x1]  ;;  %v4579_v36 = vld [vmem:[#allocation2 + $0x78] sm:$0xff] }
 0x108   : > { %3415 = vrot.lane.b32.xlu1 %v3395_v45, %s4656_s14  ;;  %v2422_v21 = vor.u32 %v2421_v8, %v2418_v57  ;;  %v1819_v16 = vsel %vm4755_vm12, %v1814_v17, %v1818_v37  ;;  %v1829_v53 = vsel %vm4755_vm12, %v1824_v13, %v1828_v23  ;;  %v2435_v30 = vshll.u32 %v5430_v50, 16  ;;  %v5469_v17 = vld [vmem:[#allocation2 + $0x28] sm:$0xf]  ;;  %v5474_v8 = vpop.permute.xlu1 %2909 }
 0x109   : > { %v2432_v15 = vor.u32 %v2431_v40, %v5432_v44  ;;  %v3472_v54 = vpack.c.b16 %v3442_v56, %v3441_v41  ;;  %v4303_v45 = vrot.slane %v2615_v49, 9  ;;  %v2729_v52 = vrot.slane %v5420_v9, 5 }
 0x10a   : > { %3233 = vrot.lane.b32.xlu2 %v3216_v62, %s4653_s11  ;;  %v3475_v59 = vpack.c.b16 %v3448_v28, %v3447_v47  ;;  %v5451_v62 = vpop.permute.xlu0 %2907  ;;  %v3199_v4 = vunpack.c.l.b16 %v2121_v34  ;;  %v3200_v37 = vunpack.c.l.b16 %v2124_v63  ;;  %v1735_v10 = vshrl.u32 %v1576_v51, 16  ;;  %v5476_v28 = vld [vmem:[#allocation2 + $0x2c] sm:$0x1] }
 0x10b   : > { %v5455_v29 = vunpack.c.l.b16 %v1819_v16  ;;  %v5457_v7 = vunpack.c.l.b16 %v1829_v53  ;;  %v2423_v27 = vrot.slane %v2422_v21, 4  ;;  %v1738_v9 = vshll.u32 %v1576_v51, 16 }
 0x10c   : > { %3409 = vrot.lane.b32.xlu0 %v3392_v22, %s4656_s14  ;;  %v1570_v22 = vld [vmem:[#allocation2 + $0x24] sm:$0xf]  ;;  %v2433_v0 = vrot.slane %v2432_v15, 4  ;;  %v2437_v55 = vrot.slane %v2435_v30, 5  ;;  %v2732_v32 = vrot.slane %v5430_v50, 5  ;;  %v1737_v24 = vrot.slane %v1735_v10, 4 }
 0x10d   : > { %v2730_v35 = vsel %vm4739_vm10, %v4303_v45, %v2729_v52  ;;  %v2731_v48 = vrot.slane %v2729_v52, 4  ;;  %v1740_v23 = vrot.slane %v1738_v9, 5  ;;  %v1744_v38 = vshll.u32 %v5453_v5, 16 }
 0x10e   : > { %v1748_v6 = vshrl.u32 %v5453_v5, 16  ;;  %v1754_v25 = vshll.u32 %v5459_v14, 16  ;;  %v1663_v13 = vshrl.u32 %v1570_v22, 16  ;;  %v1666_v57 = vshll.u32 %v1570_v22, 16 }
 0x10f   : > { %v3223_v18 = vpack.c.b16 %v3200_v37, %v3199_v4  ;;  %v2428_v41 = vsel %vm4755_vm12, %v2423_v27, %v5432_v44  ;;  %v1741_v56 = vor.u32 %v1740_v23, %v1737_v24  ;;  %v1746_v50 = vrot.slane %v1744_v38, 5  ;;  %v5489_v4 = vpop.permute.xlu2 %2917  ;;  %v4557_v24 = vld [vmem:[#allocation2 + $0x24] sm:$0xff]  ;;  %v2185_v23 = vld [vmem:[#allocation2 + $0x54] sm:$0xf] }
 0x110   : > { %3087 = vrot.lane.b32.xlu1 %v4563_v46, %s4651_s9  ;;  %v3455_v46 = vunpack.c.l.b16 %v2730_v35  ;;  %v1750_v47 = vrot.slane %v1748_v6, 4  ;;  %v1665_v40 = vrot.slane %v1663_v13, 4  ;;  %v1668_v49 = vrot.slane %v1666_v57, 5 }
 0x111   : > { %v2438_v34 = vsel %vm4755_vm12, %v2433_v0, %v2437_v55  ;;  %v2733_v63 = vsel %vm4739_vm10, %v2731_v48, %v2732_v32  ;;  %v1672_v21 = vshll.u32 %v5469_v17, 16  ;;  %v1676_v44 = vshrl.u32 %v5469_v17, 16  ;;  %v5495_v55 = vld [vmem:[#allocation2 + $0x24] sm:$0xe] }
 0x112   : > { %3335 = vrot.lane.b32.xlu2 %v4575_v61, %s4652_s10  ;;  %v1742_v51 = vrot.slane %v1741_v56, 4  ;;  %v1751_v61 = vor.u32 %v1750_v47, %v1746_v50  ;;  %v1756_v16 = vrot.slane %v1754_v25, 5  ;;  %v1669_v53 = vor.u32 %v1668_v49, %v1665_v40  ;;  %v5491_v37 = vpop.permute.xlu0 %2913  ;;  %v5511_v56 = vld [vmem:[#allocation2 + $0x58] sm:$0xf]  ;;  %v5515_v40 = vld [vmem:[#allocation2 + $0x5c] sm:$0x1] }
 0x113   : > { %v5485_v15 = vunpack.c.l.b16 %v2428_v41  ;;  %v1674_v30 = vrot.slane %v1672_v21, 5  ;;  %v1678_v45 = vrot.slane %v1676_v44, 4  ;;  %v1682_v52 = vshll.u32 %v5476_v28, 16 }
 0x114   : > { %3495 = vrot.lane.b32.xlu0 %v3475_v59, %s4655_s13  ;;  %v2003_v59 = vld [vmem:[#allocation2 + $0x48] sm:$0xe]  ;;  %v5493_v10 = vunpack.c.l.b16 %v2438_v34  ;;  %v3456_v27 = vunpack.c.l.b16 %v2733_v63  ;;  %v1752_v9 = vrot.slane %v1751_v61, 4  ;;  %v1670_v22 = vrot.slane %v1669_v53, 4  ;;  %v2179_v34 = vld [vmem:[#allocation2 + $0x30] sm:$0xf] }
 0x115   : > { %v1679_v0 = vor.u32 %v1678_v45, %v1674_v30  ;;  %v2078_v32 = vrot.slane %v5469_v17, 5  ;;  %v4284_v35 = vrot.slane %v2003_v59, 9  ;;  %v2099_v48 = vrot.slane %v5453_v5, 5  ;;  %v5530_v53 = vld [vmem:[#allocation2 + $0x34] sm:$0xf] }
 0x116   : > { %v1675_v38 = vsel %vm4755_vm12, %v1670_v22, %v1674_v30  ;;  %v1684_v25 = vrot.slane %v1682_v52, 5  ;;  %v3143_v13 = vpack.c.b16 %v5457_v7, %v5455_v29  ;;  %v3399_v57 = vpack.c.b16 %v5493_v10, %v5485_v15  ;;  %v5518_v29 = vpop.permute.xlu1 %2915  ;;  %v1590_v15 = vld [vmem:[#allocation2 + $0x9c] sm:$0xf] }
 0x117   : > { %v1680_v6 = vrot.slane %v1679_v0, 4  ;;  %v4281_v41 = vrot.slane %v5495_v55, 9  ;;  %v2080_v5 = vrot.slane %v2078_v32, 4  ;;  %v2344_v49 = vshrl.u32 %v2185_v23, 16 }
 0x118   : > { %3343 = vrot.lane.b32.xlu1 %v4579_v36, %s4652_s10  ;;  %v1757_v36 = vsel %vm4755_vm12, %v1752_v9, %v1756_v16  ;;  %v5520_v7 = vunpack.c.l.b16 %v1675_v38  ;;  %v2101_v63 = vrot.slane %v2099_v48, 4  ;;  %v2347_v21 = vshll.u32 %v2185_v23, 16  ;;  %v5541_v38 = vld [vmem:[#allocation2 + $0x38] sm:$0x1] }
 0x119   : > { %v3114_v47 = vunpack.c.l.b16 %v1757_v36  ;;  %v1685_v44 = vsel %vm4755_vm12, %v1680_v6, %v1684_v25  ;;  %v2353_v61 = vshll.u32 %v5511_v56, 16  ;;  %v2357_v16 = vshrl.u32 %v5511_v56, 16 }
 0x11a   : > { %3489 = vrot.lane.b32.xlu2 %v3472_v54, %s4655_s13  ;;  %v1747_v54 = vsel %vm4755_vm12, %v1742_v51, %v1746_v50  ;;  %v2346_v51 = vrot.slane %v2344_v49, 4  ;;  %v2102_v30 = vrot.slane %v5459_v14, 5  ;;  %v2349_v45 = vrot.slane %v2347_v21, 5  ;;  %v4546_v21 = vld [vmem:[#allocation2 + $0x54] sm:$0xff] }
 0x11b   : > { %v3113_v50 = vunpack.c.l.b16 %v1747_v54  ;;  %v2363_v52 = vshll.u32 %v5515_v40, 16  ;;  %v2272_v59 = vshrl.u32 %v2179_v34, 16  ;;  %v2355_v9 = vrot.slane %v2353_v61, 5 }
 0x11c   : > { %3247 = vrot.lane.b32.xlu0 %v3223_v18, %s4653_s11  ;;  %v3479_v18 = vpack.c.b16 %v3456_v27, %v3455_v46  ;;  %v5524_v46 = vsel %vm4739_vm10, %v4284_v35, %v2099_v48  ;;  %v2359_v22 = vrot.slane %v2357_v16, 4  ;;  %v2275_v0 = vshll.u32 %v2179_v34, 16 }
 0x11d   : > { %v3140_v27 = vpack.c.b16 %v3114_v47, %v3113_v50  ;;  %v3108_v54 = vunpack.c.l.b16 %v1685_v44  ;;  %v2350_v36 = vor.u32 %v2349_v45, %v2346_v51  ;;  %v2274_v35 = vrot.slane %v2272_v59, 4  ;;  %v4542_v50 = vld [vmem:[#allocation2 + $0x24] sm:$0xff] }
 0x11e   : > { %v2281_v48 = vshll.u32 %v5530_v53, 16  ;;  %v2360_v14 = vor.u32 %v2359_v22, %v2355_v9  ;;  %v2365_v23 = vrot.slane %v2363_v52, 5  ;;  %v2277_v6 = vrot.slane %v2275_v0, 5  ;;  %v2612_v0 = vld [vmem:[#allocation2 + $0x54] sm:$0xe] }
 0x11f   : > { %v2285_v25 = vshrl.u32 %v5530_v53, 16  ;;  %v2081_v47 = vrot.slane %v5476_v28, 5  ;;  %v2351_v49 = vrot.slane %v2350_v36, 4  ;;  %v3137_v16 = vpack.c.b16 %v3108_v54, %v5520_v7 }
 0x120   : > { %3075 = vrot.lane.b32.xlu1 %v4557_v24, %s4651_s9  ;;  %v5538_v24 = vpop.permute.xlu0 %2919  ;;  %v5547_v34 = vrot.slane %v2281_v48, 5  ;;  %v2361_v44 = vrot.slane %v2360_v14, 4  ;;  %v2278_v51 = vor.u32 %v2277_v6, %v2274_v35  ;;  %v5555_v28 = vsel %vm4739_vm10, %v4281_v41, %v2078_v32  ;;  %v5589_v48 = vld [vmem:[#allocation2 + $0xa0] sm:$0xf]  ;;  %v4560_v14 = vld [vmem:[#allocation2 + $0x48] sm:$0xff] }
 0x121   : > { %v2287_v61 = vrot.slane %v2285_v25, 4  ;;  %v2356_v52 = vsel %vm4755_vm12, %v2351_v49, %v2355_v9  ;;  %v3531_v32 = vsel %vm3519_vm15, %v4542_v50, %v5435_v20  ;;  %v5576_v7 = vsel %vm4739_vm10, %v2080_v5, %v2081_v47 }
 0x122   : > { %3167 = vrot.lane.b32.xlu2 %v3143_v13, %s4654_s12  ;;  %v4543_v13 = vld [vmem:[#allocation2 + $0x30] sm:$0xff]  ;;  %v2366_v59 = vsel %vm4755_vm12, %v2361_v44, %v2365_v23  ;;  %v3187_v9 = vunpack.c.l.b16 %v5555_v28  ;;  %v2279_v20 = vrot.slane %v2278_v51, 4  ;;  %v2687_v22 = vrot.slane %v5530_v53, 5 }
 0x123   : > { %v3534_v17 = vsel %vm3519_vm15, %v4543_v13, %v5383_v11  ;;  %v3543_v11 = vsel %vm3519_vm15, %v4546_v21, %v5474_v8  ;;  %v5585_v54 = vunpack.c.l.b16 %v2356_v52  ;;  %v5587_v5 = vunpack.c.l.b16 %v2366_v59  ;;  %v1584_v21 = vld [vmem:[#allocation2 + $0x78] sm:$0xf]  ;;  %v5615_v59 = vld [vmem:[#allocation2 + $0xa4] sm:$0x1] }
 0x124   : > { %v5535_v55 = vpop.permute.xlu2 %2923  ;;  %3503 = vrot.lane.b32.xlu0 %v3479_v18, %s4655_s13  ;;  %v2103_v18 = vsel %vm4739_vm10, %v2101_v63, %v2102_v30  ;;  %v3193_v63 = vunpack.c.l.b16 %v5524_v46  ;;  %v2291_v30 = vshll.u32 %v5541_v38, 16  ;;  %v5578_v46 = vld [vmem:[#allocation2 + $0x30] sm:$0xe]  ;;  %v3188_v23 = vunpack.c.l.b16 %v5576_v7  ;;  %v4541_v7 = vld [vmem:[#allocation2 + $0x18] sm:$0xff] }
 0x125   : > { %v3194_v45 = vunpack.c.l.b16 %v2103_v18  ;;  %v2708_v25 = vrot.slane %v5511_v56, 5  ;;  %v4297_v50 = vrot.slane %v5578_v46, 9  ;;  %v2690_v47 = vrot.slane %v5541_v38, 5  ;;  %v5606_v56 = vld [vmem:[#allocation2 + $0x7c] sm:$0xf] }
 0x126   : > { %v2293_v35 = vrot.slane %v2291_v30, 5  ;;  %v4300_v18 = vrot.slane %v2612_v0, 9  ;;  %v1903_v49 = vshrl.u32 %v1590_v15, 16  ;;  %v2284_v44 = vsel %vm4755_vm12, %v2279_v20, %v5547_v34 }
 0x127   : > { %v3220_v6 = vpack.c.b16 %v3194_v45, %v3193_v63  ;;  %v2689_v51 = vrot.slane %v2687_v22, 4  ;;  %v3396_v38 = vpack.c.b16 %v5587_v5, %v5585_v54  ;;  %v1916_v45 = vshrl.u32 %v5589_v48, 16 }
 0x128   : > { %3161 = vrot.lane.b32.xlu1 %v3140_v27, %s4654_s12  ;;  %v2288_v27 = vor.u32 %v2287_v61, %v5547_v34  ;;  %v1906_v61 = vshll.u32 %v1590_v15, 16  ;;  %v1905_v30 = vrot.slane %v1903_v49, 4  ;;  %v2710_v34 = vrot.slane %v2708_v25, 4  ;;  %v5628_v49 = vld [vmem:[#allocation2 + $0x80] sm:$0x1] }
 0x129   : > { %v2711_v52 = vrot.slane %v5515_v40, 5  ;;  %v1918_v20 = vrot.slane %v1916_v45, 4  ;;  %v1831_v0 = vshrl.u32 %v1584_v21, 16  ;;  %v1834_v15 = vshll.u32 %v1584_v21, 16 }
 0x12a   : > { %3423 = vrot.lane.b32.xlu2 %v3399_v57, %s4656_s14  ;;  %v5572_v41 = vpop.permute.xlu1 %2921  ;;  %v4573_v57 = vld [vmem:[#allocation2 + $0x30] sm:$0xff]  ;;  %v2289_v36 = vrot.slane %v2288_v27, 4  ;;  %v1908_v27 = vrot.slane %v1906_v61, 5  ;;  %v3363_v54 = vunpack.c.l.b16 %v2284_v44  ;;  %v2709_v40 = vsel %vm4739_vm10, %v4300_v18, %v2708_v25  ;;  %v4544_v18 = vld [vmem:[#allocation2 + $0x3c] sm:$0xff] }
 0x12b   : > { %v1833_v61 = vrot.slane %v1831_v0, 4  ;;  %v1836_v21 = vrot.slane %v1834_v15, 5  ;;  %v1844_v25 = vshrl.u32 %v5606_v56, 16  ;;  %v3217_v45 = vpack.c.b16 %v3188_v23, %v3187_v9 }
 0x12c   : > { %v2984_v10 = vpop.permute.xlu2 %2983  ;;  %3155 = vrot.lane.b32.xlu0 %v3137_v16, %s4654_s12  ;;  %v1912_v16 = vshll.u32 %v5589_v48, 16  ;;  %v2294_v63 = vsel %vm4755_vm12, %v2289_v36, %v2293_v35  ;;  %v1909_v5 = vor.u32 %v1908_v27, %v1905_v30  ;;  %v4549_v30 = vld [vmem:[#allocation2 + $0x78] sm:$0xff]  ;;  %v5652_v28 = vsel %vm4739_vm10, %v4297_v50, %v2687_v22 }
 0x12d   : > { %v5592_v8 = vsel %vm3568_vm1, %v3534_v17, %v2984_v10  ;;  %v1840_v10 = vshll.u32 %v5606_v56, 16  ;;  %v3364_v35 = vunpack.c.l.b16 %v2294_v63  ;;  %v4545_v63 = vld [vmem:[#allocation2 + $0x48] sm:$0xff]  ;;  %v1837_v0 = vor.u32 %v1836_v21, %v1833_v61  ;;  %v4564_v61 = vld [vmem:[#allocation2 + $0x78] sm:$0xff] }
 0x12e   : > { %v5596_v13 = vpop.permute.xlu0 %2925  ;;  %v5617_v17 = vrot.slane %v1912_v16, 5  ;;  %v1846_v15 = vrot.slane %v1844_v25, 4  ;;  %v5656_v9 = vsel %vm4739_vm10, %v2689_v51, %v2690_v47  ;;  %v3449_v23 = vunpack.c.l.b16 %v2709_v40  ;;  %v2010_v21 = vld [vmem:[#allocation2 + $0x9c] sm:$0xe] }
 0x12f   : > { %v5634_v44 = vrot.slane %v1840_v10, 5  ;;  %v1850_v10 = vshll.u32 %v5628_v49, 16  ;;  %v3537_v53 = vsel %vm3519_vm15, %v4544_v18, %v5411_v43  ;;  %v3540_v22 = vsel %vm3519_vm15, %v4545_v63, %v5451_v62  ;;  %v2007_v43 = vld [vmem:[#allocation2 + $0x78] sm:$0xe]  ;;  %v4548_v18 = vld [vmem:[#allocation2 + $0x6c] sm:$0xff] }
 0x130   : > { %3331 = vrot.lane.b32.xlu1 %v4573_v57, %s4652_s10  ;;  %v3552_v50 = vsel %vm3519_vm15, %v4549_v30, %v5518_v29  ;;  %v1838_v40 = vrot.slane %v1837_v0, 4  ;;  %v3443_v62 = vunpack.c.l.b16 %v5652_v28  ;;  %v3444_v29 = vunpack.c.l.b16 %v5656_v9 }
 0x131   : > { %vm3601_vm3 = vcmask 195584   ;;  %vm3634_vm5 = vcmask 261120   ;;  %vm3667_vm7 = vcmask 326656   ;;  %vm3700_vm8 = vcmask 392192  }
 0x132   : > { %3081 = vrot.lane.b32.xlu2 %v4560_v14, %s4651_s9  ;;  %v2982_v46 = vpop.permute.xlu1 %2981  ;;  %v1922_v14 = vshll.u32 %v5615_v59, 16  ;;  %v1843_v28 = vsel %vm4755_vm12, %v1838_v40, %v5634_v44  ;;  %v3473_v40 = vpack.c.b16 %v3444_v29, %v3443_v62  ;;  %vm3733_vm9 = vcmask 457728  }
 0x133   : > { %v5622_v57 = vsel %vm3568_vm1, %v3531_v32, %v2982_v46  ;;  %v1919_v32 = vor.u32 %v1918_v20, %v5617_v17  ;;  %v1910_v46 = vrot.slane %v1909_v5, 4  ;;  %v1847_v5 = vor.u32 %v1846_v15, %v5634_v44 }
 0x134   : > { %v2990_v36 = vpop.permute.xlu2 %2989  ;;  %3241 = vrot.lane.b32.xlu0 %v3220_v6, %s4653_s11  ;;  %v3528_v6 = vsel %vm3519_vm15, %v4541_v7, %v5405_v31  ;;  %v3393_v31 = vpack.c.b16 %v3364_v35, %v3363_v54  ;;  %v1924_v7 = vrot.slane %v1922_v14, 5  ;;  %v1852_v35 = vrot.slane %v1850_v10, 5 }
 0x135   : > { %v5631_v16 = vsel %vm3568_vm1, %v3543_v11, %v2990_v36  ;;  %v2712_v11 = vsel %vm4739_vm10, %v2710_v34, %v2711_v52  ;;  %v1920_v52 = vrot.slane %v1919_v32, 4  ;;  %v1915_v51 = vsel %vm4755_vm12, %v1910_v46, %v5617_v17  ;;  %v4547_v17 = vld [vmem:[#allocation2 + $0x60] sm:$0xff] }
 0x136   : > { %v2980_v27 = vpop.permute.xlu0 %2979  ;;  %v3450_v34 = vunpack.c.l.b16 %v2712_v11  ;;  %v1848_v36 = vrot.slane %v1847_v5, 4  ;;  %v2148_v32 = vrot.slane %v5589_v48, 5  ;;  %v4576_v11 = vld [vmem:[#allocation2 + $0x54] sm:$0xff]  ;;  %v3127_v0 = vunpack.c.l.b16 %v1915_v51 }
 0x137   : > { %v5644_v20 = vsel %vm3568_vm1, %v3528_v6, %v2980_v27  ;;  %v1925_v30 = vsel %vm4755_vm12, %v1920_v52, %v1924_v7  ;;  %v4552_v27 = vld [vmem:[#allocation2 + $0x9c] sm:$0xff]  ;;  %v4288_v15 = vrot.slane %v2007_v43, 9  ;;  %v2127_v10 = vrot.slane %v5606_v56, 5 }
 0x138   : > { %3417 = vrot.lane.b32.xlu1 %v3396_v38, %s4656_s14  ;;  %v3807_v38 = vld [vmem:[%s6620_s3 + $0x20] sm:$0xf]  ;;  %v3476_v63 = vpack.c.b16 %v3450_v34, %v3449_v23  ;;  %v1853_v9 = vsel %vm4755_vm12, %v1848_v36, %v1852_v35  ;;  %v4291_v23 = vrot.slane %v2010_v21, 9  ;;  %v3128_v34 = vunpack.c.l.b16 %v1925_v30  ;;  %v5735_v21 = vld [vmem:[#allocation2 + $0xb0] sm:$0x1] }
 0x139   : > { %v3825_v25 = vunpack.c.l.b16 %v3807_v38  ;;  %v2150_v52 = vrot.slane %v2148_v32, 4  ;;  %v2151_v7 = vrot.slane %v5615_v59, 5  ;;  %v3546_v5 = vsel %vm3519_vm15, %v4547_v17, %v5448_v58  ;;  %v4590_v58 = vld [vmem:[%s6620_s3 + $0x18] sm:$0xff]  ;;  %v2193_v17 = vld [vmem:[#allocation2 + $0x84] sm:$0xf] }
 0x13a   : > { %3235 = vrot.lane.b32.xlu2 %v3217_v45, %s4653_s11  ;;  %v2988_v47 = vpop.permute.xlu1 %2987  ;;  %v4551_v45 = vld [vmem:[#allocation2 + $0x90] sm:$0xff]  ;;  %v3549_v38 = vsel %vm3519_vm15, %v4548_v18, %v5491_v37  ;;  %v3147_v36 = vpack.c.b16 %v3128_v34, %v3127_v0  ;;  %v5727_v35 = vsel %vm4739_vm10, %v4288_v15, %v2127_v10  ;;  %v5751_v0 = vld [vmem:[#allocation2 + $0x8c] sm:$0x1]  ;;  %vm3766_vm11 = vcmask 523264  }
 0x13b   : > { %v5673_v54 = vsel %vm3568_vm1, %v3540_v22, %v2988_v47  ;;  %v3830_v48 = vpack.c.b16 %v3825_v25, %v3825_v25  ;;  %v5702_v44 = vsel %vm3519_vm15, %v4551_v45, %v5538_v24  ;;  %v5707_v22 = vunpack.c.l.b16 %v1843_v28  ;;  %v4589_v18 = vld [vmem:[%s6620_s3 + $0x10] sm:$0xff] }
 0x13c   : > { %v2996_v14 = vpop.permute.xlu2 %2995  ;;  %3411 = vrot.lane.b32.xlu0 %v3393_v31, %s4656_s14  ;;  %v5717_v24 = vrot.slane %v2127_v10, 4  ;;  %v2130_v47 = vrot.slane %v5628_v49, 5  ;;  %v5731_v43 = vsel %vm4739_vm10, %v2150_v52, %v2151_v7  ;;  %v2440_v52 = vshrl.u32 %v2193_v17, 16  ;;  %v4587_v49 = vld [vmem:[%s6620_s3] sm:$0xff] }
 0x13d   : > { %v5680_v6 = vsel %vm3568_vm1, %v3552_v50, %v2996_v14  ;;  %v3870_v56 = vsel %vm3868_vm2, %v3830_v48, 0  ;;  %v5709_v50 = vunpack.c.l.b16 %v1853_v9  ;;  %v2199_v14 = vld [vmem:[#allocation2 + $0xa8] sm:$0xf]  ;;  %v4539_v9 = vld [vmem:[#allocation2] sm:$0xff]  ;;  %v2443_v7 = vshll.u32 %v2193_v17, 16 }
 0x13e   : > { %v2986_v46 = vpop.permute.xlu0 %2985  ;;  %3875 = vmatpush.bf16.msra.mxu0 %v3870_v56  ;;  %4591 = vmatpush.bf16.msra.mxu1 %v3870_v56  ;;  %v2512_v62 = vshrl.u32 %v2199_v14, 16  ;;  %v2515_v29 = vshll.u32 %v2199_v14, 16  ;;  %v4588_v14 = vld [vmem:[%s6620_s3 + $0x8] sm:$0xff]  ;;  %vm3835_vm2 = vcmask 588800  }
 0x13f   : > { %v5686_v31 = vsel %vm3568_vm1, %v3537_v53, %v2986_v46  ;;  %v3561_v53 = vsel %vm3519_vm15, %v4552_v27, %v5572_v41  ;;  %4592 = vmatpush.bf16.msra.mxu2 %v3870_v56  ;;  %v5722_v41 = vsel %vm4739_vm10, %v4291_v23, %v2148_v32  ;;  %4593 = vmatpush.bf16.msra.mxu3 %v3870_v56  ;;  %v5749_v46 = vld [vmem:[#allocation2 + $0x88] sm:$0xf]  ;;  %v3208_v23 = vunpack.c.l.b16 %v5731_v43  ;;  %v4540_v56 = vld [vmem:[#allocation2 + $0xc] sm:$0xff] }
 0x140   : > { %3089 = vrot.lane.b32.xlu1 %v4564_v61, %s4651_s9  ;;  %v5733_v61 = vld [vmem:[#allocation2 + $0xac] sm:$0xf]  ;;  %v3144_v30 = vpack.c.b16 %v5709_v50, %v5707_v22  ;;  %v3207_v45 = vunpack.c.l.b16 %v5722_v41  ;;  %v2514_v10 = vrot.slane %v2512_v62, 4  ;;  %v2517_v48 = vrot.slane %v2515_v29, 5  ;;  %v4550_v22 = vld [vmem:[#allocation2 + $0x84] sm:$0xff] }
 0x141   : > { %v2521_v25 = vshll.u32 %v5733_v61, 16  ;;  %v2525_v27 = vshrl.u32 %v5733_v61, 16  ;;  %v2445_v43 = vrot.slane %v2443_v7, 5  ;;  %v2736_v41 = vrot.slane %v5749_v46, 5 }
 0x142   : > { %3337 = vrot.lane.b32.xlu2 %v4576_v11, %s4652_s10  ;;  %v2994_v59 = vpop.permute.xlu1 %2993  ;;  %3876 = vmatpush.bf16.msra.mxu0 %v4590_v58  ;;  %v2531_v11 = vshll.u32 %v5735_v21, 16 }
 0x143   : > { %v5715_v37 = vsel %vm3568_vm1, %v3549_v38, %v2994_v59  ;;  %4594 = vmatpush.bf16.msra.mxu1 %v4590_v58  ;;  %4595 = vmatpush.bf16.msra.mxu2 %v4590_v58  ;;  %v2523_v28 = vrot.slane %v2521_v25, 5  ;;  %v2527_v34 = vrot.slane %v2525_v27, 4  ;;  %v2518_v38 = vor.u32 %v2517_v48, %v2514_v10 }
 0x144   : > { %v3002_v51 = vpop.permute.xlu2 %3001  ;;  %3497 = vrot.lane.b32.xlu0 %v3476_v63, %s4655_s13  ;;  %4596 = vmatpush.bf16.msra.mxu3 %v4590_v58  ;;  %v2453_v59 = vshrl.u32 %v5749_v46, 16  ;;  %v2131_v27 = vsel %vm4739_vm10, %v5717_v24, %v2130_v47  ;;  %v5781_v48 = vsel %vm3519_vm15, %v4540_v56, %v5413_v3  ;;  %v3555_v24 = vsel %vm3519_vm15, %v4550_v22, %v5489_v4  ;;  %v4567_v47 = vld [vmem:[#allocation2 + $0x9c] sm:$0xff] }
 0x145   : > { %v5738_v32 = vsel %vm3568_vm1, %v3561_v53, %v3002_v51  ;;  %v2449_v53 = vshll.u32 %v5749_v46, 16  ;;  %v2528_v58 = vor.u32 %v2527_v34, %v2523_v28  ;;  %v2533_v51 = vrot.slane %v2531_v11, 5  ;;  %v4580_v11 = vld [vmem:[#allocation2 + $0x84] sm:$0xff] }
 0x146   : > { %v2992_v63 = vpop.permute.xlu0 %2991  ;;  %3877 = vmatpush.bf16.msra.mxu0 %v4589_v18  ;;  %v2519_v29 = vrot.slane %v2518_v38, 4  ;;  %v2455_v17 = vrot.slane %v2453_v59, 4  ;;  %v3201_v3 = vunpack.c.l.b16 %v5727_v35  ;;  %v3202_v38 = vunpack.c.l.b16 %v2131_v27 }
 0x147   : > { %v5754_v15 = vsel %vm3568_vm1, %v3546_v5, %v2992_v63  ;;  %v2459_v5 = vshll.u32 %v5751_v0, 16  ;;  %4597 = vmatpush.bf16.msra.mxu1 %v4589_v18  ;;  %4598 = vmatpush.bf16.msra.mxu2 %v4589_v18  ;;  %v2451_v25 = vrot.slane %v2449_v53, 5  ;;  %v3227_v53 = vpack.c.b16 %v3208_v23, %v3207_v45 }
 0x148   : > { %3175 = vrot.lane.b32.xlu1 %v3147_v36, %s4654_s12  ;;  %v2442_v36 = vrot.slane %v2440_v52, 4  ;;  %4599 = vmatpush.bf16.msra.mxu3 %v4589_v18  ;;  %v4553_v18 = vld [vmem:[#allocation2 + $0xa8] sm:$0xff] }
 0x149   : > { %v2461_v34 = vrot.slane %v2459_v5, 5  ;;  %v2619_v5 = vld [vmem:[#allocation2 + $0xa8] sm:$0xe] }
 0x14a   : > { %3491 = vrot.lane.b32.xlu2 %v3473_v40, %s4655_s13  ;;  %v3000_v50 = vpop.permute.xlu1 %2999  ;;  %v3522_v40 = vsel %vm3519_vm15, %v4539_v9, %v5386_v33  ;;  %v2446_v10 = vor.u32 %v2445_v43, %v2442_v36  ;;  %v2524_v33 = vsel %vm4755_vm12, %v2519_v29, %v2523_v28  ;;  %v2456_v9 = vor.u32 %v2455_v17, %v2451_v25 }
 0x14b   : > { %v5767_v62 = vsel %vm3568_vm1, %v5702_v44, %v3000_v50  ;;  %v2529_v44 = vrot.slane %v2528_v58, 4  ;;  %3878 = vmatpush.bf16.msra.mxu0 %v4588_v14  ;;  %4600 = vmatpush.bf16.msra.mxu1 %v4588_v14  ;;  %v3383_v4 = vunpack.c.l.b16 %v2524_v33  ;;  %v3564_v58 = vsel %vm3519_vm15, %v4553_v18, %v5535_v55  ;;  %v5825_v18 = vld [vmem:[#allocation2 + $0x5c] sm:$0x1] }
 0x14c   : > { %v5771_v63 = vpop.permute.xlu2 %3151  ;;  %3169 = vrot.lane.b32.xlu0 %v3144_v30, %s4654_s12  ;;  %v2616_v30 = vld [vmem:[#allocation2 + $0x84] sm:$0xe]  ;;  %v2447_v28 = vrot.slane %v2446_v10, 4  ;;  %4601 = vmatpush.bf16.msra.mxu2 %v4588_v14  ;;  %v2457_v59 = vrot.slane %v2456_v9, 4  ;;  %v4307_v43 = vrot.slane %v2619_v5, 9  ;;  %v3224_v29 = vpack.c.b16 %v3202_v38, %v3201_v3 }
 0x14d   : > { %v2534_v7 = vsel %vm4755_vm12, %v2529_v44, %v2533_v51  ;;  %4602 = vmatpush.bf16.msra.mxu3 %v4588_v14  ;;  %v4304_v50 = vrot.slane %v2616_v30, 9  ;;  %v2757_v14 = vrot.slane %v5733_v61, 5  ;;  %v3570_v55 = vsel %vm3568_vm1, %v3522_v40, %v5375_v42  ;;  %v1578_v44 = vld [vmem:[#allocation2 + $0x54] sm:$0xf]  ;;  %v5821_v10 = vld [vmem:[#allocation2 + $0x58] sm:$0xf] }
 0x14e   : > { %v2998_v52 = vpop.permute.xlu0 %2997  ;;  %v3384_v22 = vunpack.c.l.b16 %v2534_v7  ;;  %v2452_v35 = vsel %vm4755_vm12, %v2447_v28, %v2451_v25  ;;  %v2462_v51 = vsel %vm4755_vm12, %v2457_v59, %v2461_v34  ;;  %v2760_v25 = vrot.slane %v5735_v21, 5  ;;  %v1572_v9 = vld [vmem:[#allocation2 + $0x30] sm:$0xf]  ;;  %v5840_v5 = vld [vmem:[#allocation2 + $0x38] sm:$0x1] }
 0x14f   : > { %v5794_v56 = vsel %vm3568_vm1, %v3555_v24, %v2998_v52  ;;  %v5805_v36 = vunpack.c.l.b16 %v2452_v35  ;;  %3879 = vmatpush.bf16.msra.mxu0 %v4587_v49  ;;  %4603 = vmatpush.bf16.msra.mxu1 %v4587_v49  ;;  %v3378_v23 = vunpack.c.l.b16 %v2462_v51  ;;  %v5818_v27 = vsel %vm4739_vm10, %v4304_v50, %v2736_v41 }
 0x150   : > { %3345 = vrot.lane.b32.xlu1 %v4580_v11, %s4652_s10  ;;  %4604 = vmatpush.bf16.msra.mxu2 %v4587_v49  ;;  %v3403_v17 = vpack.c.b16 %v3384_v22, %v3383_v4  ;;  %v2739_v61 = vrot.slane %v5751_v0, 5  ;;  %v2759_v11 = vrot.slane %v2757_v14, 4  ;;  %v2738_v40 = vrot.slane %v2736_v41, 4 }
 0x151   : > { %4605 = vmatpush.bf16.msra.mxu3 %v4587_v49  ;;  %v3400_v21 = vpack.c.b16 %v3378_v23, %v5805_v36  ;;  %v1759_v33 = vshrl.u32 %v1578_v44, 16  ;;  %v2758_v30 = vsel %vm4739_vm10, %v4307_v43, %v2757_v14  ;;  %v1762_v49 = vshll.u32 %v1578_v44, 16  ;;  %v4558_v44 = vld [vmem:[#allocation2 + $0x30] sm:$0xff] }
 0x152   : > { %3095 = vrot.lane.b32.xlu2 %v4567_v47, %s4651_s9  ;;  %v3072_v45 = vpop.permute.xlu1 %3071  ;;  %v1768_v0 = vshll.u32 %v5821_v10, 16  ;;  %v1772_v24 = vshrl.u32 %v5821_v10, 16  ;;  %v5831_v47 = vld [vmem:[#allocation2 + $0x34] sm:$0xf]  ;;  %v2761_v3 = vsel %vm4739_vm10, %v2759_v11, %v2760_v25  ;;  %v1778_v28 = vshll.u32 %v5825_v18, 16 }
 0x153   : > { %v3603_v42 = vsel %vm3601_vm3, %v3570_v55, %v3072_v45  ;;  %v1761_v7 = vrot.slane %v1759_v33, 4  ;;  %v1764_v38 = vrot.slane %v1762_v49, 5  ;;  %v1687_v4 = vshrl.u32 %v1572_v9, 16 }
 0x154   : > { %v5813_v46 = vpop.permute.xlu2 %3407  ;;  %3255 = vrot.lane.b32.xlu0 %v3227_v53, %s4653_s11  ;;  %v1770_v53 = vrot.slane %v1768_v0, 5  ;;  %v1774_v59 = vrot.slane %v1772_v24, 4  ;;  %v3463_v22 = vunpack.c.l.b16 %v2758_v30  ;;  %v1780_v35 = vrot.slane %v1778_v28, 5  ;;  %v2001_v0 = vld [vmem:[#allocation2 + $0x30] sm:$0xe] }
 0x155   : > { %v1690_v50 = vshll.u32 %v1572_v9, 16  ;;  %v1765_v36 = vor.u32 %v1764_v38, %v1761_v7  ;;  %v1689_v45 = vrot.slane %v1687_v4, 4  ;;  %v1700_v23 = vshrl.u32 %v5831_v47, 16 }
 0x156   : > { %v3004_v34 = vpop.permute.xlu0 %3003  ;;  %v1775_v41 = vor.u32 %v1774_v59, %v1770_v53  ;;  %v3464_v43 = vunpack.c.l.b16 %v2761_v3  ;;  %v1706_v25 = vshll.u32 %v5840_v5, 16  ;;  %v2740_v11 = vsel %vm4739_vm10, %v2738_v40, %v2739_v61  ;;  %v4583_v3 = vld [vmem:[#allocation2 + $0xa8] sm:$0xff] }
 0x157   : > { %v5834_v52 = vsel %vm3568_vm1, %v3564_v58, %v3004_v34  ;;  %v1696_v58 = vshll.u32 %v5831_v47, 16  ;;  %v1692_v14 = vrot.slane %v1690_v50, 5  ;;  %v1702_v9 = vrot.slane %v1700_v23, 4 }
 0x158   : > { %3431 = vrot.lane.b32.xlu1 %v3403_v17, %s4656_s14  ;;  %v1776_v33 = vrot.slane %v1775_v41, 4  ;;  %v3636_v34 = vsel %vm3634_vm5, %v3603_v42, %v5771_v63  ;;  %v3457_v30 = vunpack.c.l.b16 %v5818_v27  ;;  %v2085_v24 = vrot.slane %v5831_v47, 5  ;;  %v2004_v27 = vld [vmem:[#allocation2 + $0x54] sm:$0xe] }
 0x159   : > { %v1698_v55 = vrot.slane %v1696_v58, 5  ;;  %v1693_v49 = vor.u32 %v1692_v14, %v1689_v45  ;;  %v1708_v28 = vrot.slane %v1706_v25, 5  ;;  %v3458_v59 = vunpack.c.l.b16 %v2740_v11 }
 0x15a   : > { %3249 = vrot.lane.b32.xlu2 %v3224_v29, %s4653_s11  ;;  %v3328_v51 = vpop.permute.xlu1 %3327  ;;  %v1766_v29 = vrot.slane %v1765_v36, 4  ;;  %v1781_v61 = vsel %vm4755_vm12, %v1776_v33, %v1780_v35  ;;  %v3483_v63 = vpack.c.b16 %v3464_v43, %v3463_v22  ;;  %v4282_v58 = vrot.slane %v2001_v0, 9  ;;  %v5879_v33 = vld [vmem:[#allocation2 + $0x64] sm:$0xf]  ;;  %v2181_v0 = vld [vmem:[#allocation2 + $0x3c] sm:$0xf] }
 0x15b   : > { %v1703_v40 = vor.u32 %v1702_v9, %v1698_v55  ;;  %v1694_v42 = vrot.slane %v1693_v49, 4  ;;  %v3116_v47 = vunpack.c.l.b16 %v1781_v61  ;;  %v2087_v36 = vrot.slane %v2085_v24, 4  ;;  %v5893_v61 = vld [vmem:[#allocation2 + $0x40] sm:$0xf] }
 0x15c   : > { %v5846_v17 = vpop.permute.xlu2 %3079  ;;  %3425 = vrot.lane.b32.xlu0 %v3400_v21, %s4656_s14  ;;  %v1771_v21 = vsel %vm4755_vm12, %v1766_v29, %v1770_v53  ;;  %v2088_v35 = vrot.slane %v5840_v5, 5  ;;  %v4285_v23 = vrot.slane %v2004_v27, 9  ;;  %v2106_v43 = vrot.slane %v5821_v10, 5  ;;  %v2187_v29 = vld [vmem:[#allocation2 + $0x60] sm:$0xf] }
 0x15d   : > { %v3115_v4 = vunpack.c.l.b16 %v1771_v21  ;;  %v1704_v50 = vrot.slane %v1703_v40, 4  ;;  %v1699_v53 = vsel %vm4755_vm12, %v1694_v42, %v1698_v55  ;;  %v3480_v14 = vpack.c.b16 %v3458_v59, %v3457_v30  ;;  %v5887_v30 = vld [vmem:[#allocation2 + $0x68] sm:$0x1]  ;;  %v5899_v27 = vld [vmem:[#allocation2 + $0x44] sm:$0x1] }
 0x15e   : > { %v3232_v7 = vpop.permute.xlu0 %3231  ;;  %v3109_v25 = vunpack.c.l.b16 %v1699_v53  ;;  %v5885_v9 = vsel %vm4739_vm10, %v2087_v36, %v2088_v35  ;;  %v2368_v49 = vshrl.u32 %v2187_v29, 16  ;;  %v2381_v21 = vshrl.u32 %v5879_v33, 16 }
 0x15f   : > { %v3669_v38 = vsel %vm3667_vm7, %v3636_v34, %v3232_v7  ;;  %v1709_v45 = vsel %vm4755_vm12, %v1704_v50, %v1708_v28  ;;  %v3141_v5 = vpack.c.b16 %v3116_v47, %v3115_v4  ;;  %v2108_v34 = vrot.slane %v2106_v43, 4 }
 0x160   : > { %3077 = vrot.lane.b32.xlu1 %v4558_v44, %s4651_s9  ;;  %v3702_v41 = vsel %vm3700_vm8, %v3669_v38, %v3328_v51  ;;  %v3110_v11 = vunpack.c.l.b16 %v1709_v45  ;;  %v5876_v51 = vsel %vm4739_vm10, %v4282_v58, %v2085_v24  ;;  %v2109_v44 = vrot.slane %v5825_v18, 5 }
 0x161   : > { %v3735_v10 = vsel %vm3733_vm9, %v3702_v41, %v5813_v46  ;;  %v2107_v24 = vsel %vm4739_vm10, %v4285_v23, %v2106_v43  ;;  %v2371_v18 = vshll.u32 %v2187_v29, 16  ;;  %v2377_v7 = vshll.u32 %v5879_v33, 16  ;;  %v2610_v43 = vld [vmem:[#allocation2 + $0x3c] sm:$0xe] }
 0x162   : > { %3351 = vrot.lane.b32.xlu2 %v4583_v3, %s4652_s10  ;;  %v5866_v22 = vpop.permute.xlu1 %3073  ;;  %v3138_v40 = vpack.c.b16 %v3110_v11, %v3109_v25  ;;  %v2370_v28 = vrot.slane %v2368_v49, 4  ;;  %v2387_v38 = vshll.u32 %v5887_v30, 16  ;;  %v2383_v42 = vrot.slane %v2381_v21, 4 }
 0x163   : > { %v2373_v59 = vrot.slane %v2371_v18, 5  ;;  %v2296_v4 = vshrl.u32 %v2181_v0, 16  ;;  %v2110_v47 = vsel %vm4739_vm10, %v2108_v34, %v2109_v44  ;;  %v2299_v58 = vshll.u32 %v2181_v0, 16  ;;  %v4574_v44 = vld [vmem:[#allocation2 + $0x3c] sm:$0xff] }
 0x164   : > { %v5871_v55 = vpop.permute.xlu2 %3233  ;;  %3511 = vrot.lane.b32.xlu0 %v3483_v63, %s4655_s13  ;;  %v2379_v63 = vrot.slane %v2377_v7, 5  ;;  %v2389_v50 = vrot.slane %v2387_v38, 5  ;;  %v2305_v53 = vshll.u32 %v5893_v61, 16  ;;  %v2309_v23 = vshrl.u32 %v5893_v61, 16 }
 0x165   : > { %v2374_v35 = vor.u32 %v2373_v59, %v2370_v28  ;;  %v2298_v45 = vrot.slane %v2296_v4, 4  ;;  %v3195_v25 = vunpack.c.l.b16 %v2107_v24  ;;  %v2301_v11 = vrot.slane %v2299_v58, 5  ;;  %v2613_v24 = vld [vmem:[#allocation2 + $0x60] sm:$0xe] }
 0x166   : > { %v3488_v3 = vpop.permute.xlu0 %3487  ;;  %v2384_v41 = vor.u32 %v2383_v42, %v2379_v63  ;;  %v2315_v29 = vshll.u32 %v5899_v27, 16  ;;  %v3196_v34 = vunpack.c.l.b16 %v2110_v47  ;;  %v2311_v0 = vrot.slane %v2309_v23, 4 }
 0x167   : > { %v3768_v46 = vsel %vm3766_vm11, %v3735_v10, %v3488_v3  ;;  %v2375_v49 = vrot.slane %v2374_v35, 4  ;;  %v3189_v3 = vunpack.c.l.b16 %v5876_v51  ;;  %v3190_v18 = vunpack.c.l.b16 %v5885_v9 }
 0x168   : > { %4519 = vmatmul.msk.bf16.vlgmr.msra.gmra.mxu0 %vm3835_vm2, %v3768_v46  ;;  %3163 = vrot.lane.b32.xlu1 %v3141_v5, %s4654_s12  ;;  %v2307_v5 = vrot.slane %v2305_v53, 5  ;;  %v2302_v7 = vor.u32 %v2301_v11, %v2298_v45  ;;  %v4298_v21 = vrot.slane %v2610_v43, 9  ;;  %v4561_v46 = vld [vmem:[#allocation2 + $0x54] sm:$0xff]  ;;  %v2317_v42 = vrot.slane %v2315_v29, 5 }
 0x169   : > { %v2380_v38 = vsel %vm4755_vm12, %v2375_v49, %v2379_v63  ;;  %v2694_v51 = vrot.slane %v5893_v61, 5  ;;  %v3572_v9 = vsel %vm3568_vm1, %v5781_v48, %v5354_v60  ;;  %v3221_v53 = vpack.c.b16 %v3196_v34, %v3195_v25  ;;  %v1592_v49 = vld [vmem:[#allocation2 + $0xa8] sm:$0xf] }
 0x16a   : > { %3505 = vrot.lane.b32.xlu2 %v3480_v14, %s4655_s13  ;;  %v3160_v36 = vpop.permute.xlu1 %3159  ;;  %v2385_v14 = vrot.slane %v2384_v41, 4  ;;  %v2312_v59 = vor.u32 %v2311_v0, %v2307_v5  ;;  %v3371_v4 = vunpack.c.l.b16 %v2380_v38  ;;  %v2303_v58 = vrot.slane %v2302_v7, 4  ;;  %v1586_v38 = vld [vmem:[#allocation2 + $0x84] sm:$0xf] }
 0x16b   : > { %v4301_v41 = vrot.slane %v2613_v24, 9  ;;  %v3611_v63 = vsel %vm3601_vm3, %v5592_v8, %v5846_v17  ;;  %v2715_v61 = vrot.slane %v5879_v33, 5  ;;  %v3218_v48 = vpack.c.b16 %v3190_v18, %v3189_v3  ;;  %v5949_v3 = vld [vmem:[#allocation2 + $0xb0] sm:$0x1] }
 0x16c   : > { %v5907_v10 = vpop.permute.xlu2 %3335  ;;  %3157 = vrot.lane.b32.xlu0 %v3138_v40, %s4654_s12  ;;  %v2390_v40 = vsel %vm4755_vm12, %v2385_v14, %v2389_v50  ;;  %v2313_v35 = vrot.slane %v2312_v59, 4  ;;  %v3605_v50 = vsel %vm3601_vm3, %v3572_v9, %v5866_v22  ;;  %v2308_v45 = vsel %vm4755_vm12, %v2303_v58, %v2307_v5 }
 0x16d   : > { %v3372_v47 = vunpack.c.l.b16 %v2390_v40  ;;  %v2697_v25 = vrot.slane %v5899_v27, 5  ;;  %v3365_v17 = vunpack.c.l.b16 %v2308_v45  ;;  %v5936_v22 = vsel %vm4739_vm10, %v4298_v21, %v2694_v51  ;;  %v5944_v27 = vld [vmem:[#allocation2 + $0xac] sm:$0xf] }
 0x16e   : > { %v3154_v28 = vpop.permute.xlu0 %3153  ;;  %v2318_v43 = vsel %vm4755_vm12, %v2313_v35, %v2317_v42  ;;  %v2696_v11 = vrot.slane %v2694_v51, 4  ;;  %v2716_v29 = vsel %vm4739_vm10, %v4301_v41, %v2715_v61  ;;  %v2718_v34 = vrot.slane %v5887_v30, 5  ;;  %v5959_v42 = vld [vmem:[#allocation2 + $0x88] sm:$0xf] }
 0x16f   : > { %v3638_v60 = vsel %vm3634_vm5, %v3605_v50, %v3154_v28  ;;  %v3397_v8 = vpack.c.b16 %v3372_v47, %v3371_v4  ;;  %v3366_v33 = vunpack.c.l.b16 %v2318_v43  ;;  %v3644_v14 = vsel %vm3634_vm5, %v3611_v63, %v3160_v36  ;;  %v5961_v4 = vld [vmem:[#allocation2 + $0x8c] sm:$0x1] }
 0x170   : > { %3333 = vrot.lane.b32.xlu1 %v4574_v44, %s4652_s10  ;;  %v2717_v44 = vrot.slane %v2715_v61, 4  ;;  %v3671_v0 = vsel %vm3667_vm7, %v3638_v60, %v5871_v55  ;;  %v1927_v18 = vshrl.u32 %v1592_v49, 16  ;;  %v1930_v7 = vshll.u32 %v1592_v49, 16 }
 0x171   : > { %v3445_v24 = vunpack.c.l.b16 %v5936_v22  ;;  %v1940_v28 = vshrl.u32 %v5944_v27, 16  ;;  %v1946_v30 = vshll.u32 %v5949_v3, 16  ;;  %v5957_v36 = vsel %vm4739_vm10, %v2696_v11, %v2697_v25 }
 0x172   : > { %3083 = vrot.lane.b32.xlu2 %v4561_v46, %s4651_s9  ;;  %v3330_v23 = vpop.permute.xlu1 %3329  ;;  %v1936_v46 = vshll.u32 %v5944_v27, 16  ;;  %v3451_v40 = vunpack.c.l.b16 %v2716_v29  ;;  %v1929_v55 = vrot.slane %v1927_v18, 4  ;;  %v1932_v59 = vrot.slane %v1930_v7, 5  ;;  %v2008_v18 = vld [vmem:[#allocation2 + $0x84] sm:$0xe] }
 0x173   : > { %v3394_v47 = vpack.c.b16 %v3366_v33, %v3365_v17  ;;  %v2719_v58 = vsel %vm4739_vm10, %v2717_v44, %v2718_v34  ;;  %v1942_v9 = vrot.slane %v1940_v28, 4  ;;  %v1948_v35 = vrot.slane %v1946_v30, 5  ;;  %v4565_v44 = vld [vmem:[#allocation2 + $0x84] sm:$0xff] }
 0x174   : > { %v5938_v5 = vpop.permute.xlu2 %3489  ;;  %3243 = vrot.lane.b32.xlu0 %v3221_v53, %s4653_s11  ;;  %v1938_v51 = vrot.slane %v1936_v46, 5  ;;  %v1933_v53 = vor.u32 %v1932_v59, %v1929_v55  ;;  %v1855_v41 = vshrl.u32 %v1586_v38, 16  ;;  %v1858_v63 = vshll.u32 %v1586_v38, 16  ;;  %v4577_v55 = vld [vmem:[#allocation2 + $0x60] sm:$0xff] }
 0x175   : > { %v1864_v61 = vshll.u32 %v5959_v42, 16  ;;  %v1868_v60 = vshrl.u32 %v5959_v42, 16  ;;  %v1874_v43 = vshll.u32 %v5961_v4, 16  ;;  %v3452_v25 = vunpack.c.l.b16 %v2719_v58 }
 0x176   : > { %v3240_v21 = vpop.permute.xlu0 %3239  ;;  %v1943_v45 = vor.u32 %v1942_v9, %v1938_v51  ;;  %v1857_v17 = vrot.slane %v1855_v41, 4  ;;  %v1860_v11 = vrot.slane %v1858_v63, 5  ;;  %v3704_v29 = vsel %vm3700_vm8, %v3671_v0, %v3330_v23  ;;  %v2011_v41 = vld [vmem:[#allocation2 + $0xa8] sm:$0xe] }
 0x177   : > { %v1866_v34 = vrot.slane %v1864_v61, 5  ;;  %v1870_v49 = vrot.slane %v1868_v60, 4  ;;  %v3446_v7 = vunpack.c.l.b16 %v5957_v36  ;;  %v2134_v30 = vrot.slane %v5959_v42, 5 }
 0x178   : > { %3419 = vrot.lane.b32.xlu1 %v3397_v8, %s4656_s14  ;;  %v1934_v8 = vrot.slane %v1933_v53, 4  ;;  %v1861_v28 = vor.u32 %v1860_v11, %v1857_v17  ;;  %v3677_v38 = vsel %vm3667_vm7, %v3644_v14, %v3240_v21  ;;  %v3477_v9 = vpack.c.b16 %v3452_v25, %v3451_v40 }
 0x179   : > { %v1871_v0 = vor.u32 %v1870_v49, %v1866_v34  ;;  %v4289_v36 = vrot.slane %v2008_v18, 9  ;;  %v2136_v63 = vrot.slane %v2134_v30, 4  ;;  %v2155_v40 = vrot.slane %v5944_v27, 5  ;;  %v2195_v18 = vld [vmem:[#allocation2 + $0x90] sm:$0xf] }
 0x17a   : > { %3237 = vrot.lane.b32.xlu2 %v3218_v48, %s4653_s11  ;;  %v3416_v50 = vpop.permute.xlu1 %3415  ;;  %v1944_v48 = vrot.slane %v1943_v45, 4  ;;  %v1939_v46 = vsel %vm4755_vm12, %v1934_v8, %v1938_v51  ;;  %v1862_v53 = vrot.slane %v1861_v28, 4  ;;  %v2137_v45 = vrot.slane %v5961_v4, 5 }
 0x17b   : > { %v3129_v42 = vunpack.c.l.b16 %v1939_v46  ;;  %v1872_v21 = vrot.slane %v1871_v0, 4  ;;  %v4292_v60 = vrot.slane %v2011_v41, 9  ;;  %v3474_v25 = vpack.c.b16 %v3446_v7, %v3445_v24  ;;  %v6012_v24 = vld [vmem:[#allocation2 + $0xbc] sm:$0x1] }
 0x17c   : > { %v5970_v33 = vpop.permute.xlu2 %3167  ;;  %3413 = vrot.lane.b32.xlu0 %v3394_v47, %s4656_s14  ;;  %v1949_v23 = vsel %vm4755_vm12, %v1944_v48, %v1948_v35  ;;  %v1876_v47 = vrot.slane %v1874_v43, 5  ;;  %v1867_v35 = vsel %vm4755_vm12, %v1862_v53, %v1866_v34  ;;  %v3710_v43 = vsel %vm3700_vm8, %v3677_v38, %v5907_v10  ;;  %v2201_v48 = vld [vmem:[#allocation2 + $0xb4] sm:$0xf]  ;;  %v6002_v34 = vld [vmem:[#allocation2 + $0xb8] sm:$0xf] }
 0x17d   : > { %v3130_v14 = vunpack.c.l.b16 %v1949_v23  ;;  %v3123_v8 = vunpack.c.l.b16 %v1867_v35  ;;  %v3743_v4 = vsel %vm3733_vm9, %v3710_v43, %v3416_v50  ;;  %v6006_v10 = vsel %vm4739_vm10, %v4289_v36, %v2134_v30  ;;  %v6019_v38 = vld [vmem:[#allocation2 + $0x94] sm:$0xf] }
 0x17e   : > { %v3410_v59 = vpop.permute.xlu0 %3409  ;;  %v6010_v22 = vsel %vm4739_vm10, %v2136_v63, %v2137_v45  ;;  %v2536_v50 = vshrl.u32 %v2201_v48, 16  ;;  %v2539_v49 = vshll.u32 %v2201_v48, 16  ;;  %v2545_v46 = vshll.u32 %v6002_v34, 16 }
 0x17f   : > { %v3737_v58 = vsel %vm3733_vm9, %v3704_v29, %v3410_v59  ;;  %v3148_v27 = vpack.c.b16 %v3130_v14, %v3129_v42  ;;  %v2157_v29 = vrot.slane %v2155_v40, 4  ;;  %v2549_v28 = vshrl.u32 %v6002_v34, 16 }
 0x180   : > { %v3770_v51 = vsel %vm3766_vm11, %v3737_v58, %v5938_v5  ;;  %3091 = vrot.lane.b32.xlu1 %v4565_v44, %s4651_s9  ;;  %v1877_v5 = vsel %vm4755_vm12, %v1872_v21, %v1876_v47  ;;  %v2158_v44 = vrot.slane %v5949_v3, 5  ;;  %v2156_v3 = vsel %vm4739_vm10, %v4292_v60, %v2155_v40  ;;  %v6022_v47 = vld [vmem:[#allocation2 + $0x98] sm:$0x1] }
 0x181   : > { %4520 = vmatmul.msk.bf16.gmra.mxu0 %vm3835_vm2, %v3770_v51  ;;  %v3124_v17 = vunpack.c.l.b16 %v1877_v5  ;;  %v2555_v30 = vshll.u32 %v6012_v24, 16  ;;  %v2538_v23 = vrot.slane %v2536_v50, 4  ;;  %v2541_v0 = vrot.slane %v2539_v49, 5 }
 0x182   : > { %3339 = vrot.lane.b32.xlu2 %v4577_v55, %s4652_s10  ;;  %v3088_v61 = vpop.permute.xlu1 %3087  ;;  %v2159_v58 = vsel %vm4739_vm10, %v2157_v29, %v2158_v44  ;;  %v2551_v53 = vrot.slane %v2549_v28, 4  ;;  %v2464_v36 = vshrl.u32 %v2195_v18, 16  ;;  %v2467_v42 = vshll.u32 %v2195_v18, 16 }
 0x183   : > { %v3145_v59 = vpack.c.b16 %v3124_v17, %v3123_v8  ;;  %v2542_v41 = vor.u32 %v2541_v0, %v2538_v23  ;;  %v2557_v51 = vrot.slane %v2555_v30, 5  ;;  %v2473_v14 = vshll.u32 %v6019_v38, 16 }
 0x184   : > { %v5997_v11 = vpop.permute.xlu2 %3423  ;;  %3499 = vrot.lane.b32.xlu0 %v3477_v9, %s4655_s13  ;;  %v2547_v9 = vrot.slane %v2545_v46, 5  ;;  %v2466_v63 = vrot.slane %v2464_v36, 4  ;;  %v2477_v45 = vshrl.u32 %v6019_v38, 16  ;;  %v2483_v40 = vshll.u32 %v6022_v47, 16 }
 0x185   : > { %v3619_v5 = vsel %vm3601_vm3, %v5754_v15, %v3088_v61  ;;  %v2543_v60 = vrot.slane %v2542_v41, 4  ;;  %v2469_v43 = vrot.slane %v2467_v42, 5  ;;  %v2475_v8 = vrot.slane %v2473_v14, 5  ;;  %v4568_v61 = vld [vmem:[#allocation2 + $0xa8] sm:$0xff] }
 0x186   : > { %v3496_v7 = vpop.permute.xlu0 %3495  ;;  %v2552_v35 = vor.u32 %v2551_v53, %v2547_v9  ;;  %v2479_v44 = vrot.slane %v2477_v45, 4  ;;  %v3203_v48 = vunpack.c.l.b16 %v6006_v10  ;;  %v3204_v50 = vunpack.c.l.b16 %v6010_v22  ;;  %v2620_v10 = vld [vmem:[#allocation2 + $0xb4] sm:$0xe]  ;;  %v1581_v45 = vld [vmem:[#allocation2 + $0x64] sm:$0xf] }
 0x187   : > { %v3776_v55 = vsel %vm3766_vm11, %v3743_v4, %v3496_v7  ;;  %v4581_v4 = vld [vmem:[#allocation2 + $0x90] sm:$0xff]  ;;  %v2548_v49 = vsel %vm4755_vm12, %v2543_v60, %v2547_v9  ;;  %v2470_v15 = vor.u32 %v2469_v43, %v2466_v63  ;;  %v3652_v18 = vsel %vm3634_vm5, %v3619_v5, %v5970_v33  ;;  %v1580_v9 = vld [vmem:[#allocation2 + $0x60] sm:$0xf] }
 0x188   : > { %4523 = vmatmul.msk.bf16.vlgmr.msra.gmra.mxu1 %vm3835_vm2, %v3776_v55  ;;  %3177 = vrot.lane.b32.xlu1 %v3148_v27, %s4654_s12  ;;  %v3209_v27 = vunpack.c.l.b16 %v2156_v3  ;;  %v2553_v29 = vrot.slane %v2552_v35, 4  ;;  %v2480_v3 = vor.u32 %v2479_v44, %v2475_v8  ;;  %v2485_v28 = vrot.slane %v2483_v40, 5 }
 0x189   : > { %v2471_v55 = vrot.slane %v2470_v15, 4  ;;  %v3225_v53 = vpack.c.b16 %v3204_v50, %v3203_v48  ;;  %v2743_v41 = vrot.slane %v6019_v38, 5  ;;  %v4308_v35 = vrot.slane %v2620_v10, 9  ;;  %v2005_v50 = vld [vmem:[#allocation2 + $0x60] sm:$0xe] }
 0x18a   : > { %3493 = vrot.lane.b32.xlu2 %v3474_v25, %s4655_s13  ;;  %v3344_v21 = vpop.permute.xlu1 %3343  ;;  %v3210_v25 = vunpack.c.l.b16 %v2159_v58  ;;  %v2558_v46 = vsel %vm4755_vm12, %v2553_v29, %v2557_v51  ;;  %v2481_v0 = vrot.slane %v2480_v3, 4  ;;  %v2617_v58 = vld [vmem:[#allocation2 + $0x90] sm:$0xe]  ;;  %v2764_v63 = vrot.slane %v6002_v34, 5 }
 0x18b   : > { %v3386_v23 = vunpack.c.l.b16 %v2558_v46  ;;  %v2476_v36 = vsel %vm4755_vm12, %v2471_v55, %v2475_v8  ;;  %v2767_v5 = vrot.slane %v6012_v24, 5  ;;  %v1783_v60 = vshrl.u32 %v1580_v9, 16 }
 0x18c   : > { %v6034_v17 = vpop.permute.xlu2 %3081  ;;  %3171 = vrot.lane.b32.xlu0 %v3145_v59, %s4654_s12  ;;  %v3228_v22 = vpack.c.b16 %v3210_v25, %v3209_v27  ;;  %v3385_v59 = vunpack.c.l.b16 %v2548_v49  ;;  %v2486_v42 = vsel %vm4755_vm12, %v2481_v0, %v2485_v28  ;;  %v3379_v14 = vunpack.c.l.b16 %v2476_v36  ;;  %v1605_v27 = vld [vmem:[#allocation2 + $0x68] sm:$0x1]  ;;  %v2189_v28 = vld [vmem:[#allocation2 + $0x6c] sm:$0xf] }
 0x18d   : > { %v3380_v40 = vunpack.c.l.b16 %v2486_v42  ;;  %v2746_v8 = vrot.slane %v6022_v47, 5  ;;  %v1786_v25 = vshll.u32 %v1580_v9, 16  ;;  %v2745_v34 = vrot.slane %v2743_v41, 4  ;;  %v2190_v9 = vld [vmem:[#allocation2 + $0x70] sm:$0xf] }
 0x18e   : > { %v3248_v7 = vpop.permute.xlu0 %3247  ;;  %v3404_v38 = vpack.c.b16 %v3386_v23, %v3385_v59  ;;  %v1785_v44 = vrot.slane %v1783_v60, 4  ;;  %v1792_v48 = vshll.u32 %v1581_v45, 16  ;;  %v2765_v15 = vsel %vm4739_vm10, %v4308_v35, %v2764_v63 }
 0x18f   : > { %v3685_v30 = vsel %vm3667_vm7, %v3652_v18, %v3248_v7  ;;  %v3401_v24 = vpack.c.b16 %v3380_v40, %v3379_v14  ;;  %v1796_v18 = vshrl.u32 %v1581_v45, 16  ;;  %v1802_v3 = vshll.u32 %v1605_v27, 16 }
 0x190   : > { %3347 = vrot.lane.b32.xlu1 %v4581_v4, %s4652_s10  ;;  %v3718_v33 = vsel %vm3700_vm8, %v3685_v30, %v3344_v21  ;;  %v4305_v21 = vrot.slane %v2617_v58, 9  ;;  %v2766_v4 = vrot.slane %v2764_v63, 4  ;;  %v1794_v46 = vrot.slane %v1792_v48, 5 }
 0x191   : > { %v3751_v29 = vsel %vm3733_vm9, %v3718_v33, %v5997_v11  ;;  %v1798_v30 = vrot.slane %v1796_v18, 4  ;;  %v4286_v55 = vrot.slane %v2005_v50, 9  ;;  %v2113_v10 = vrot.slane %v1581_v45, 5 }
 0x192   : > { %3097 = vrot.lane.b32.xlu2 %v4568_v61, %s4651_s9  ;;  %v6052_v51 = vpop.permute.xlu1 %3075  ;;  %v1788_v61 = vrot.slane %v1786_v25, 5  ;;  %v2768_v47 = vsel %vm4739_vm10, %v2766_v4, %v2767_v5  ;;  %v2116_v59 = vrot.slane %v1605_v27, 5  ;;  %v2392_v33 = vshrl.u32 %v2189_v28, 16  ;;  %v2614_v4 = vld [vmem:[#allocation2 + $0x6c] sm:$0xe] }
 0x193   : > { %v1799_v0 = vor.u32 %v1798_v30, %v1794_v46  ;;  %v2115_v58 = vrot.slane %v2113_v10, 4  ;;  %v2395_v36 = vshll.u32 %v2189_v28, 16  ;;  %v2747_v42 = vsel %vm4739_vm10, %v2745_v34, %v2746_v8  ;;  %v4584_v8 = vld [vmem:[#allocation2 + $0xb4] sm:$0xff] }
 0x194   : > { %v6058_v43 = vpop.permute.xlu2 %3235  ;;  %3257 = vrot.lane.b32.xlu0 %v3228_v22, %s4653_s11  ;;  %v1789_v11 = vor.u32 %v1788_v61, %v1785_v44  ;;  %v2744_v22 = vsel %vm4739_vm10, %v4305_v21, %v2743_v41  ;;  %v3465_v14 = vunpack.c.l.b16 %v2765_v15  ;;  %v3466_v35 = vunpack.c.l.b16 %v2768_v47  ;;  %v4562_v41 = vld [vmem:[#allocation2 + $0x60] sm:$0xff]  ;;  %v2214_v61 = vld [vmem:[#allocation2 + $0x74] sm:$0x1] }
 0x195   : > { %v1800_v40 = vrot.slane %v1799_v0, 4  ;;  %v2114_v21 = vsel %vm4739_vm10, %v4286_v55, %v2113_v10  ;;  %v2117_v5 = vsel %vm4739_vm10, %v2115_v58, %v2116_v59  ;;  %v2401_v60 = vshll.u32 %v2190_v9, 16  ;;  %v4578_v0 = vld [vmem:[#allocation2 + $0x6c] sm:$0xff] }
 0x196   : > { %v3504_v49 = vpop.permute.xlu0 %3503  ;;  %v1790_v63 = vrot.slane %v1789_v11, 4  ;;  %v3459_v25 = vunpack.c.l.b16 %v2744_v22  ;;  %v2394_v34 = vrot.slane %v2392_v33, 4  ;;  %v2397_v44 = vrot.slane %v2395_v36, 5  ;;  %v1594_v33 = vld [vmem:[#allocation2 + $0xb4] sm:$0xf] }
 0x197   : > { %v3784_v7 = vsel %vm3766_vm11, %v3751_v29, %v3504_v49  ;;  %v3460_v29 = vunpack.c.l.b16 %v2747_v42  ;;  %v3484_v48 = vpack.c.b16 %v3466_v35, %v3465_v14  ;;  %v3197_v49 = vunpack.c.l.b16 %v2114_v21  ;;  %v6111_v36 = vld [vmem:[#allocation2 + $0xb8] sm:$0xf]  ;;  %v6114_v14 = vld [vmem:[#allocation2 + $0xbc] sm:$0x1] }
 0x198   : > { %4527 = vmatmul.msk.bf16.vlgmr.msra.gmra.mxu2 %vm3835_vm2, %v3784_v7  ;;  %3433 = vrot.lane.b32.xlu1 %v3404_v38, %s4656_s14  ;;  %v2405_v38 = vshrl.u32 %v2190_v9, 16  ;;  %v1795_v50 = vsel %vm4755_vm12, %v1790_v63, %v1794_v46  ;;  %v3198_v15 = vunpack.c.l.b16 %v2117_v5  ;;  %v4302_v18 = vrot.slane %v2614_v4, 9 }
 0x199   : > { %v2722_v7 = vrot.slane %v2190_v9, 5  ;;  %v6090_v47 = vrot.slane %v2401_v60, 5  ;;  %v6095_v28 = vsel %vm3601_vm3, %v5686_v31, %v6034_v17  ;;  %v3607_v46 = vsel %vm3601_vm3, %v5644_v20, %v6052_v51 }
 0x19a   : > { %3251 = vrot.lane.b32.xlu2 %v3225_v53, %s4653_s11  ;;  %v6074_v23 = vpop.permute.xlu1 %3161  ;;  %v1804_v53 = vrot.slane %v1802_v3, 5  ;;  %v2407_v3 = vrot.slane %v2405_v38, 4  ;;  %v3481_v11 = vpack.c.b16 %v3460_v29, %v3459_v25  ;;  %v2398_v55 = vor.u32 %v2397_v44, %v2394_v34  ;;  %v1588_v38 = vld [vmem:[#allocation2 + $0x90] sm:$0xf]  ;;  %v6123_v29 = vld [vmem:[#allocation2 + $0x94] sm:$0xf] }
 0x19b   : > { %v6102_v22 = vunpack.c.l.b16 %v1795_v50  ;;  %v2411_v58 = vshll.u32 %v2214_v61, 16  ;;  %v3222_v31 = vpack.c.b16 %v3198_v15, %v3197_v49  ;;  %v2723_v20 = vsel %vm4739_vm10, %v4302_v18, %v2722_v7  ;;  %v6128_v50 = vld [vmem:[#allocation2 + $0x98] sm:$0x1] }
 0x19c   : > { %v6078_v45 = vpop.permute.xlu2 %3337  ;;  %3427 = vrot.lane.b32.xlu0 %v3401_v24, %s4656_s14  ;;  %v1805_v24 = vsel %vm4755_vm12, %v1800_v40, %v1804_v53  ;;  %v2724_v17 = vrot.slane %v2722_v7, 4  ;;  %v2725_v51 = vrot.slane %v2214_v61, 5  ;;  %v2408_v42 = vor.u32 %v2407_v3, %v6090_v47 }
 0x19d   : > { %v6104_v59 = vunpack.c.l.b16 %v1805_v24  ;;  %v1951_v35 = vshrl.u32 %v1594_v33, 16  ;;  %v1954_v63 = vshll.u32 %v1594_v33, 16  ;;  %v2399_v21 = vrot.slane %v2398_v55, 4 }
 0x19e   : > { %v3156_v27 = vpop.permute.xlu0 %3155  ;;  %v1964_v5 = vshrl.u32 %v6111_v36, 16  ;;  %v1970_v60 = vshll.u32 %v6114_v14, 16  ;;  %v2409_v49 = vrot.slane %v2408_v42, 4  ;;  %v1879_v15 = vshrl.u32 %v1588_v38, 16 }
 0x19f   : > { %v3640_v10 = vsel %vm3634_vm5, %v3607_v46, %v3156_v27  ;;  %v3142_v4 = vpack.c.b16 %v6104_v59, %v6102_v22  ;;  %v3453_v27 = vunpack.c.l.b16 %v2723_v20  ;;  %v1953_v25 = vrot.slane %v1951_v35, 4  ;;  %v4566_v20 = vld [vmem:[#allocation2 + $0x90] sm:$0xff] }
 0x1a0   : > { %3085 = vrot.lane.b32.xlu1 %v4562_v41, %s4651_s9  ;;  %v1960_v41 = vshll.u32 %v6111_v36, 16  ;;  %v3673_v40 = vsel %vm3667_vm7, %v3640_v10, %v6058_v43  ;;  %v2726_v43 = vsel %vm4739_vm10, %v2724_v17, %v2725_v51  ;;  %v1956_v34 = vrot.slane %v1954_v63, 5 }
 0x1a1   : > { %v1972_v24 = vrot.slane %v1970_v60, 5  ;;  %v1882_v61 = vshll.u32 %v1588_v38, 16  ;;  %v1888_v46 = vshll.u32 %v6123_v29, 16  ;;  %v1892_v55 = vshrl.u32 %v6123_v29, 16 }
 0x1a2   : > { %3353 = vrot.lane.b32.xlu2 %v4584_v8, %s4652_s10  ;;  %v3332_v30 = vpop.permute.xlu1 %3331  ;;  %v2413_v8 = vrot.slane %v2411_v58, 5  ;;  %v1962_v44 = vrot.slane %v1960_v41, 5  ;;  %v1957_v7 = vor.u32 %v1956_v34, %v1953_v25  ;;  %v3454_v10 = vunpack.c.l.b16 %v2726_v43 }
 0x1a3   : > { %v1881_v22 = vrot.slane %v1879_v15, 4  ;;  %v1884_v59 = vrot.slane %v1882_v61, 5  ;;  %v1894_v33 = vrot.slane %v1892_v55, 4  ;;  %v3706_v42 = vsel %vm3700_vm8, %v3673_v40, %v3332_v30 }
 0x1a4   : > { %v6106_v9 = vpop.permute.xlu2 %3491  ;;  %3513 = vrot.lane.b32.xlu0 %v3484_v48, %s4655_s13  ;;  %v1966_v48 = vrot.slane %v1964_v5, 4  ;;  %v1958_v17 = vrot.slane %v1957_v7, 4  ;;  %v2404_v35 = vsel %vm4755_vm12, %v2399_v21, %v6090_v47  ;;  %v2414_v63 = vsel %vm4755_vm12, %v2409_v49, %v2413_v8 }
 0x1a5   : > { %v1885_v41 = vor.u32 %v1884_v59, %v1881_v22  ;;  %v3478_v30 = vpack.c.b16 %v3454_v10, %v3453_v27  ;;  %v2162_v34 = vrot.slane %v6111_v36, 5  ;;  %v3646_v49 = vsel %vm3634_vm5, %v6095_v28, %v6074_v23  ;;  %v267_v10 = vld [vmem:[%s4730_s25 + $0xf0] sm:$0xff]  ;;  %v463_v22 = vld [vmem:[#allocation2 + $0xc0] sm:$0x1] }
 0x1a6   : > { %v3242_v53 = vpop.permute.xlu0 %3241  ;;  %v1967_v3 = vor.u32 %v1966_v48, %v1962_v44  ;;  %v1963_v60 = vsel %vm4755_vm12, %v1958_v17, %v1962_v44  ;;  %v2012_v44 = vld [vmem:[#allocation2 + $0xb4] sm:$0xe] }
 0x1a7   : > { %v1886_v40 = vrot.slane %v1885_v41, 4  ;;  %v3131_v21 = vunpack.c.l.b16 %v1963_v60  ;;  %v3679_v36 = vsel %vm3667_vm7, %v3646_v49, %v3242_v53  ;;  %v4293_v7 = vrot.slane %v2012_v44, 9  ;;  %v4637_v41 = vld [vmem:[%s6619_s2] ss:$0 sm:$0xff] }
 0x1a8   : > { %3341 = vrot.lane.b32.xlu1 %v4578_v0, %s4652_s10  ;;  %v1898_v0 = vshll.u32 %v6128_v50, 16  ;;  %v1968_v51 = vrot.slane %v1967_v3, 4  ;;  %v2164_v23 = vrot.slane %v2162_v34, 4  ;;  %v2165_v53 = vrot.slane %v6114_v14, 5  ;;  %v4582_v49 = vld [vmem:[#allocation2 + $0x9c] sm:$0xff] }
 0x1a9   : > { %v3712_v59 = vsel %vm3700_vm8, %v3679_v36, %v6078_v45 }
 0x1aa   : > { %3507 = vrot.lane.b32.xlu2 %v3481_v11, %s4655_s13  ;;  %v3418_v18 = vpop.permute.xlu1 %3417  ;;  %v1890_v11 = vrot.slane %v1888_v46, 5  ;;  %v1900_v25 = vrot.slane %v1898_v0, 5  ;;  %v4636_v0 = vld [vmem:[%s6618_s1] ss:$0 sm:$0xff]  ;;  %v2166_v2 = vsel %vm4739_vm10, %v2164_v23, %v2165_v53 }
 0x1ac   : > { %v6134_v58 = vpop.permute.xlu2 %3095  ;;  %3245 = vrot.lane.b32.xlu0 %v3222_v31, %s4653_s11  ;;  %v1973_v31 = vsel %vm4755_vm12, %v1968_v51, %v1972_v24  ;;  %v1895_v38 = vor.u32 %v1894_v33, %v1890_v11  ;;  %v1891_v27 = vsel %vm4755_vm12, %v1886_v40, %v1890_v11  ;;  %v3374_v24 = vunpack.c.l.b16 %v2414_v63  ;;  %v513_v11 = vld [vmem:[#allocation2 + $0xc8] sm:$0x1]  ;;  %v6193_v40 = vld [vmem:[#allocation2 + $0xa0] sm:$0xf] }
 0x1ad   : > { %v3132_v8 = vunpack.c.l.b16 %v1973_v31  ;;  %v3125_v46 = vunpack.c.l.b16 %v1891_v27  ;;  %v464_v51 = vsel %vm4700_vm4, 0, %v463_v22  ;;  %v3745_v33 = vsel %vm3733_vm9, %v3712_v59, %v3418_v18 }
 0x1ae   : > { %v3412_v5 = vpop.permute.xlu0 %3411  ;;  %v1896_v48 = vrot.slane %v1895_v38, 4  ;;  %465 = vst [vmem:[#allocation2 + $0xc0] sm:$0x1] %v464_v51  ;;  %v2163_v63 = vsel %vm4739_vm10, %v4293_v7, %v2162_v34  ;;  %v6195_v34 = vld [vmem:[#allocation2 + $0xa4] sm:$0x1]  ;;  %v2497_v36 = vshll.u32 %v6193_v40, 16 }
 0x1af   : > { %v3739_v43 = vsel %vm3733_vm9, %v3706_v42, %v3412_v5  ;;  %v3149_v3 = vpack.c.b16 %v3132_v8, %v3131_v21 }
 0x1b0   : > { %v3772_v47 = vsel %vm3766_vm11, %v3739_v43, %v6106_v9  ;;  %3093 = vrot.lane.b32.xlu1 %v4566_v20, %s4651_s9  ;;  %v3373_v9 = vunpack.c.l.b16 %v2404_v35  ;;  %v1901_v61 = vsel %vm4755_vm12, %v1896_v48, %v1900_v25  ;;  %v303_v20 = vmul.f32 %v4636_v0, %v267_v10 }
 0x1b1   : > { %4521 = vmatmul.msk.bf16.gmra.mxu0 %vm3835_vm2, %v3772_v47  ;;  %v3126_v55 = vunpack.c.l.b16 %v1901_v61  ;;  %v514_v35 = vsel %vm4706_vm6, 0, %v513_v11  ;;  %v3211_v43 = vunpack.c.l.b16 %v2163_v63  ;;  %v3212_v47 = vunpack.c.l.b16 %v2166_v2 }
 0x1b2   : > { %3165 = vrot.lane.b32.xlu2 %v3142_v4, %s4654_s12  ;;  %v6160_v15 = vpop.permute.xlu1 %3089  ;;  %v268_v4 = vld [vmem:[%s4730_s25 + $0xf8] sm:$0xff]  ;;  %v3398_v42 = vpack.c.b16 %v3374_v24, %v3373_v9  ;;  %v339_v5 = vadd.f32 %v4637_v41, %v303_v20  ;;  %515 = vst [vmem:[#allocation2 + $0xc8] sm:$0x1] %v514_v35  ;;  %v2501_v9 = vshrl.u32 %v6193_v40, 16  ;;  %v2507_v24 = vshll.u32 %v6195_v34, 16 }
 0x1b3   : > { %v304_v17 = vmul.f32 %v4636_v0, %v268_v4  ;;  %v3146_v18 = vpack.c.b16 %v3126_v55, %v3125_v46  ;;  %v4569_v46 = vld [vmem:[#allocation2 + $0xb4] sm:$0xff]  ;;  %v2499_v4 = vrot.slane %v2497_v36, 5  ;;  %v3229_v20 = vpack.c.b16 %v3212_v47, %v3211_v43 }
 0x1b4   : > { %v6164_v28 = vpop.permute.xlu2 %3249  ;;  %3501 = vrot.lane.b32.xlu0 %v3478_v30, %s4655_s13  ;;  %v371_v31 = vmax.f32 %v339_v5, 0.0  ;;  %v2197_v30 = vld [vmem:[#allocation2 + $0x9c] sm:$0xf]  ;;  %v2503_v22 = vrot.slane %v2501_v9, 4  ;;  %v3621_v1 = vsel %vm3601_vm3, %v5715_v37, %v6160_v15  ;;  %v2141_v36 = vrot.slane %v6123_v29, 5 }
 0x1b5   : > { %v340_v60 = vadd.f32 %v4637_v41, %v304_v17  ;;  %v2488_v48 = vshrl.u32 %v2197_v30, 16  ;;  %v2491_v27 = vshll.u32 %v2197_v30, 16  ;;  %v945_v17 = vld [vmem:[#allocation2 + $0xc0] sm:$0xf]  ;;  %v2144_v9 = vrot.slane %v6128_v50, 5 }
 0x1b6   : > { %v3498_v14 = vpop.permute.xlu0 %3497  ;;  %v403_v21 = vpack.c.bf16 %v371_v31, %v371_v31  ;;  %v2143_v37 = vrot.slane %v2141_v36, 4 }
 0x1b7   : > { %v3778_v45 = vsel %vm3766_vm11, %v3745_v33, %v3498_v14  ;;  %v372_v38 = vmax.f32 %v340_v60, 0.0  ;;  %v2490_v53 = vrot.slane %v2488_v48, 4  ;;  %v2493_v10 = vrot.slane %v2491_v27, 5 }
 0x1b8   : > { %4524 = vmatmul.msk.bf16.gmra.mxu1 %vm3835_vm2, %v3778_v45  ;;  %3179 = vrot.lane.b32.xlu1 %v3149_v3, %s4654_s12  ;;  %v774_v61 = vshrl.u32 %v403_v21, 16  ;;  %v777_v7 = vshll.u32 %v403_v21, 16  ;;  %v2504_v33 = vor.u32 %v2503_v22, %v2499_v4  ;;  %v1402_v21 = vld [vmem:[#allocation2 + $0xb4] sm:$0xe] }
 0x1b9   : > { %v404_v8 = vpack.c.bf16 %v372_v38, %v372_v38  ;;  %v949_v51 = vld [vmem:[#allocation2 + $0xc8] sm:$0x1]  ;;  %v2494_v11 = vor.u32 %v2493_v10, %v2490_v53 }
 0x1ba   : > { %3421 = vrot.lane.b32.xlu2 %v3398_v42, %s4656_s14  ;;  %v6191_v25 = vpop.permute.xlu1 %3175  ;;  %v776_v59 = vrot.slane %v774_v61, 7  ;;  %v2509_v42 = vrot.slane %v2507_v24, 5  ;;  %v2505_v60 = vrot.slane %v2504_v33, 4  ;;  %v4278_v61 = vrot.slane %v1402_v21, 9 }
 0x1bb   : > { %v782_v23 = vshrl.u32 %v404_v8, 16  ;;  %v785_v3 = vshll.u32 %v404_v8, 16  ;;  %v2495_v5 = vrot.slane %v2494_v11, 4 }
 0x1bc   : > { %v6197_v44 = vpop.permute.xlu2 %3351  ;;  %3173 = vrot.lane.b32.xlu0 %v3146_v18, %s4654_s12  ;;  %v779_v14 = vor.u32 %v777_v7, %v776_v59  ;;  %v780_v35 = vrot.slane %v776_v59, 4  ;;  %v2009_v18 = vld [vmem:[#allocation2 + $0x90] sm:$0xe]  ;;  %v2510_v47 = vsel %vm4755_vm12, %v2505_v60, %v2509_v42  ;;  %v3627_v7 = vsel %vm3601_vm3, %v5767_v62, %v6134_v58 }
 0x1bd   : > { %v784_v0 = vrot.slane %v782_v23, 7  ;;  %v2500_v30 = vsel %vm4755_vm12, %v2495_v5, %v2499_v4  ;;  %v3382_v8 = vunpack.c.l.b16 %v2510_v47  ;;  %v4290_v19 = vrot.slane %v2009_v18, 9 }
 0x1be   : > { %v3170_v55 = vpop.permute.xlu0 %3169  ;;  %v946_v31 = vsel %vm4780_vm13, %v779_v14, %v945_v17  ;;  %v3381_v26 = vunpack.c.l.b16 %v2500_v30  ;;  %v3660_v15 = vsel %vm3634_vm5, %v3627_v7, %v6191_v25  ;;  %v2145_v62 = vsel %vm4739_vm10, %v2143_v37, %v2144_v9 }
 0x1bf   : > { %v787_v45 = vor.u32 %v785_v3, %v784_v0  ;;  %v789_v63 = vrot.slane %v784_v0, 4  ;;  %947 = vst [vmem:[#allocation2 + $0xc0] sm:$0xf] %v946_v31  ;;  %v3654_v24 = vsel %vm3634_vm5, %v3621_v1, %v3170_v55  ;;  %v2142_v3 = vsel %vm4739_vm10, %v4290_v19, %v2141_v36  ;;  %v6236_v55 = vld [vmem:[#allocation2 + $0xbc] sm:$0x1] }
 0x1c0   : > { %3349 = vrot.lane.b32.xlu1 %v4582_v49, %s4652_s10  ;;  %v4638_v49 = vld [vmem:[#allocation2 + $0xb8] sm:$0xf]  ;;  %v3402_v23 = vpack.c.b16 %v3382_v8, %v3381_v26  ;;  %v3687_v29 = vsel %vm3667_vm7, %v3654_v24, %v6164_v28  ;;  %v1564_v53 = vrot.slane %v6236_v55, 5  ;;  %v3205_v22 = vunpack.c.l.b16 %v2142_v3 }
 0x1c1   : > { %v788_v2 = vsel %vm4788_vm14, %v780_v35, %v787_v45  ;;  %v950_v38 = vsel %vm4700_vm4, %v789_v63, %v949_v51  ;;  %v1561_v27 = vrot.slane %v4638_v49, 5  ;;  %v3206_v33 = vunpack.c.l.b16 %v2145_v62 }
 0x1c2   : > { %3099 = vrot.lane.b32.xlu2 %v4569_v46, %s4651_s9  ;;  %v3346_v41 = vpop.permute.xlu1 %3345  ;;  %948 = vst.msk [vmem:[#allocation2 + $0xc4] sm:$0xf] %vm405_vm0, %v788_v2  ;;  %vm4131_vm0 = vcmask 1040384   ;;  %vm4133_vm4 = vcmask 58368  }
 0x1c3   : > { %951 = vst [vmem:[#allocation2 + $0xc8] sm:$0x1] %v950_v38  ;;  %v6234_v50 = vrot.slane %v1561_v27, 4  ;;  %v3720_v58 = vsel %vm3700_vm8, %v3687_v29, %v3346_v41  ;;  %v6245_v25 = vsel %vm4739_vm10, %v4278_v61, %v1561_v27  ;;  %v3226_v27 = vpack.c.b16 %v3206_v33, %v3205_v22 }
 0x1c4   : > { %v3506_v43 = vpop.permute.xlu2 %3505  ;;  %3259 = vrot.lane.b32.xlu0 %v3229_v20, %s4653_s11 }
 0x1c5   : > { %v1565_v33 = vsel %vm4739_vm10, %v6234_v50, %v1564_v53  ;;  %v2957_v53 = vunpack.c.l.b16 %v6245_v25 }
 0x1c6   : > { %v3256_v48 = vpop.permute.xlu0 %3255  ;;  %v2203_v4 = vld [vmem:[#allocation2 + $0xc0] sm:$0xf] }
 0x1c7   : > { %v3693_v10 = vsel %vm3667_vm7, %v3660_v15, %v3256_v48  ;;  %v2621_v28 = vld [vmem:[#allocation2 + $0xc0] sm:$0xe]  ;;  %v2560_v17 = vshrl.u32 %v2203_v4, 16  ;;  %v2563_v51 = vshll.u32 %v2203_v4, 16 }
 0x1c8   : > { %v1596_v59 = vld [vmem:[#allocation2 + $0xc0] sm:$0xf]  ;;  %v4309_v11 = vrot.slane %v2621_v28, 9 }
 0x1c9   : > { %v2204_v20 = vld [vmem:[#allocation2 + $0xc4] sm:$0xf]  ;;  %v1975_v63 = vshrl.u32 %v1596_v59, 16  ;;  %v2562_v41 = vrot.slane %v2560_v17, 4  ;;  %v2565_v5 = vrot.slane %v2563_v51, 5 }
 0x1ca   : > { %v6232_v46 = vpop.permute.xlu1 %3431  ;;  %v2221_v42 = vld [vmem:[#allocation2 + $0xc8] sm:$0x1]  ;;  %v2569_v14 = vshll.u32 %v2204_v20, 16  ;;  %v2573_v35 = vshrl.u32 %v2204_v20, 16  ;;  %v2771_v45 = vrot.slane %v2204_v20, 5  ;;  %3253 = vrot.lane.b32.xlu2 %v3226_v27, %s4653_s11 }
 0x1cb   : > { %v2579_v60 = vshll.u32 %v2221_v42, 16  ;;  %v2774_v2 = vrot.slane %v2221_v42, 5  ;;  %v6253_v21 = vld [vmem:[#allocation2 + $0xc4] sm:$0xf]  ;;  %v2566_v26 = vor.u32 %v2565_v5, %v2562_v41  ;;  %v6257_v36 = vld [vmem:[#allocation2 + $0xc8] sm:$0x1] }
 0x1cc   : > { %v6247_v0 = vpop.permute.xlu2 %3083  ;;  %3429 = vrot.lane.b32.xlu0 %v3402_v23, %s4656_s14  ;;  %v2571_v31 = vrot.slane %v2569_v14, 5  ;;  %v2575_v38 = vrot.slane %v2573_v35, 4  ;;  %v2772_v47 = vsel %vm4739_vm10, %v4309_v11, %v2771_v45  ;;  %v2773_v1 = vrot.slane %v2771_v45, 4  ;;  %v6282_v35 = vld [vmem:[#allocation2 + $0xd0] sm:$0xf] }
 0x1cd   : > { %v2581_v8 = vrot.slane %v2579_v60, 5  ;;  %v3467_v49 = vunpack.c.l.b16 %v2772_v47  ;;  %v1977_v9 = vrot.slane %v1975_v63, 4  ;;  %v2567_v24 = vrot.slane %v2566_v26, 4  ;;  %v2013_v5 = vld [vmem:[#allocation2 + $0xc0] sm:$0xe] }
 0x1ce   : > { %v3426_v18 = vpop.permute.xlu0 %3425  ;;  %v2576_v48 = vor.u32 %v2575_v38, %v2571_v31  ;;  %v2775_v61 = vsel %vm4739_vm10, %v2773_v1, %v2774_v2  ;;  %v1978_v23 = vshll.u32 %v1596_v59, 16  ;;  %v1984_v3 = vshll.u32 %v6253_v21, 16 }
 0x1cf   : > { %v3753_v30 = vsel %vm3733_vm9, %v3720_v58, %v3426_v18  ;;  %v3468_v15 = vunpack.c.l.b16 %v2775_v61  ;;  %v1988_v29 = vshrl.u32 %v6253_v21, 16  ;;  %v2572_v58 = vsel %vm4755_vm12, %v2567_v24, %v2571_v31 }
 0x1d0   : > { %v3786_v19 = vsel %vm3766_vm11, %v3753_v30, %v3506_v43  ;;  %v2577_v37 = vrot.slane %v2576_v48, 4  ;;  %v3726_v43 = vsel %vm3700_vm8, %v3693_v10, %v6197_v44  ;;  %v1980_v4 = vrot.slane %v1978_v23, 5  ;;  %v2205_v10 = vld [vmem:[#allocation2 + $0xcc] sm:$0xf] }
 0x1d1   : > { %4528 = vmatmul.msk.bf16.gmra.mxu2 %vm3835_vm2, %v3786_v19  ;;  %v1986_v28 = vrot.slane %v1984_v3, 5  ;;  %v1994_v22 = vshll.u32 %v6257_v36, 16  ;;  %v3387_v20 = vunpack.c.l.b16 %v2572_v58  ;;  %v3485_v17 = vpack.c.b16 %v3468_v15, %v3467_v49 }
 0x1d2   : > { %v6261_v7 = vpop.permute.xlu1 %3077  ;;  %v2582_v59 = vsel %vm4755_vm12, %v2577_v37, %v2581_v8  ;;  %v1990_v44 = vrot.slane %v1988_v29, 4  ;;  %v3759_v11 = vsel %vm3733_vm9, %v3726_v43, %v6232_v46  ;;  %v1981_v14 = vor.u32 %v1980_v4, %v1977_v9  ;;  %v4585_v46 = vld [vmem:[#allocation2 + $0xc0] sm:$0xff]  ;;  %v2222_v8 = vld [vmem:[#allocation2 + $0xd4] sm:$0x1]  ;;  %v2618_v43 = vld [vmem:[#allocation2 + $0x9c] sm:$0xe] }
 0x1d3   : > { %v3388_v51 = vunpack.c.l.b16 %v2582_v59  ;;  %v1996_v41 = vrot.slane %v1994_v22, 5  ;;  %v2169_v60 = vrot.slane %v6253_v21, 5  ;;  %v2584_v2 = vshrl.u32 %v2205_v10, 16  ;;  %3355 = vrot.lane.b32.xlu2 %v4585_v46, %s4652_s10  ;;  %v2622_v59 = vld [vmem:[#allocation2 + $0xcc] sm:$0xe] }
 0x1d4   : > { %v6268_v62 = vpop.permute.xlu2 %3237  ;;  %3515 = vrot.lane.b32.xlu0 %v3485_v17, %s4655_s13  ;;  %v1991_v63 = vor.u32 %v1990_v44, %v1986_v28  ;;  %v1982_v55 = vrot.slane %v1981_v14, 4  ;;  %v2587_v50 = vshll.u32 %v2205_v10, 16  ;;  %v2958_v31 = vunpack.c.l.b16 %v1565_v33 }
 0x1d5   : > { %v3405_v18 = vpack.c.b16 %v3388_v51, %v3387_v20  ;;  %v2593_v30 = vshll.u32 %v6282_v35, 16  ;;  %v4294_v26 = vrot.slane %v2013_v5, 9  ;;  %v2586_v19 = vrot.slane %v2584_v2, 4 }
 0x1d6   : > { %v3512_v42 = vpop.permute.xlu0 %3511  ;;  %v1992_v38 = vrot.slane %v1991_v63, 4  ;;  %v1987_v47 = vsel %vm4755_vm12, %v1982_v55, %v1986_v28  ;;  %v2589_v1 = vrot.slane %v2587_v50, 5  ;;  %v2171_v25 = vrot.slane %v2169_v60, 4 }
 0x1d7   : > { %v3792_v45 = vsel %vm3766_vm11, %v3759_v11, %v3512_v42  ;;  %3435 = vrot.lane.b32.xlu1 %v3405_v18, %s4656_s14  ;;  %v3133_v49 = vunpack.c.l.b16 %v1987_v47  ;;  %v2172_v27 = vrot.slane %v6257_v36, 5  ;;  %v2595_v23 = vrot.slane %v2593_v30, 5 }
 0x1d8   : > { %4531 = vmatmul.msk.bf16.vlgmr.msra.gmra.mxu3 %vm3835_vm2, %v3792_v45  ;;  %v1997_v48 = vsel %vm4755_vm12, %v1992_v38, %v1996_v41  ;;  %v2590_v61 = vor.u32 %v2589_v1, %v2586_v19  ;;  %v2597_v3 = vshrl.u32 %v6282_v35, 16  ;;  %v2603_v37 = vshll.u32 %v2222_v8, 16 }
 0x1d9   : > { %v3134_v24 = vunpack.c.l.b16 %v1997_v48  ;;  %v2974_v15 = vpack.c.b16 %v2958_v31, %v2957_v53  ;;  %v2170_v28 = vsel %vm4739_vm10, %v4294_v26, %v2169_v60  ;;  %v2173_v36 = vsel %vm4739_vm10, %v2171_v25, %v2172_v27 }
 0x1da   : > { %v6293_v21 = vpop.permute.xlu1 %3163  ;;  %v2591_v4 = vrot.slane %v2590_v61, 4  ;;  %v2599_v22 = vrot.slane %v2597_v3, 4  ;;  %v2778_v20 = vrot.slane %v6282_v35, 5  ;;  %v2605_v17 = vrot.slane %v2603_v37, 5 }
 0x1db   : > { %v3150_v29 = vpack.c.b16 %v3134_v24, %v3133_v49  ;;  %v4306_v44 = vrot.slane %v2618_v43, 9  ;;  %v2750_v11 = vrot.slane %v6193_v40, 5  ;;  %v2753_v33 = vrot.slane %v6195_v34, 5 }
 0x1dc   : > { %v6299_v9 = vpop.permute.xlu2 %3339  ;;  %v2596_v10 = vsel %vm4755_vm12, %v2591_v4, %v2595_v23  ;;  %v2600_v51 = vor.u32 %v2599_v22, %v2595_v23  ;;  %v3213_v42 = vunpack.c.l.b16 %v2170_v28  ;;  %v3214_v14 = vunpack.c.l.b16 %v2173_v36 }
 0x1dd   : > { %3181 = vrot.lane.b32.xlu0 %v3150_v29, %s4654_s12  ;;  %v4310_v45 = vrot.slane %v2622_v59, 9  ;;  %v2781_v63 = vrot.slane %v2222_v8, 5  ;;  %v2780_v5 = vrot.slane %v2778_v20, 4  ;;  %v2751_v60 = vsel %vm4739_vm10, %v4306_v44, %v2750_v11 }
 0x1de   : > { %v3158_v58 = vpop.permute.xlu0 %3157  ;;  %v2601_v41 = vrot.slane %v2600_v51, 4  ;;  %v2752_v46 = vrot.slane %v2750_v11, 4  ;;  %v3389_v34 = vunpack.c.l.b16 %v2596_v10  ;;  %v3461_v18 = vunpack.c.l.b16 %v2751_v60  ;;  %v4586_v51 = vld [vmem:[#allocation2 + $0xcc] sm:$0xff] }
 0x1df   : > { %3005 = vrot.lane.b32.xlu1 %v2974_v15, %s4649_s28  ;;  %v3230_v53 = vpack.c.b16 %v3214_v14, %v3213_v42  ;;  %v2779_v47 = vsel %vm4739_vm10, %v4310_v45, %v2778_v20  ;;  %v2782_v26 = vsel %vm4739_vm10, %v2780_v5, %v2781_v63  ;;  %v3609_v39 = vsel %vm3601_vm3, %v5622_v57, %v6261_v7  ;;  %v4570_v15 = vld [vmem:[#allocation2 + $0xc0] sm:$0xff] }
 0x1e0   : > { %v2606_v55 = vsel %vm4755_vm12, %v2601_v41, %v2605_v17  ;;  %v2754_v2 = vsel %vm4739_vm10, %v2752_v46, %v2753_v33  ;;  %v3642_v1 = vsel %vm3634_vm5, %v3609_v39, %v3158_v58  ;;  %v3469_v48 = vunpack.c.l.b16 %v2779_v47 }
 0x1e1   : > { %v3390_v31 = vunpack.c.l.b16 %v2606_v55  ;;  %v3462_v38 = vunpack.c.l.b16 %v2754_v2  ;;  %v3470_v49 = vunpack.c.l.b16 %v2782_v26  ;;  %v3675_v27 = vsel %vm3667_vm7, %v3642_v1, %v6268_v62 }
 0x1e2   : > { %v3334_v35 = vpop.permute.xlu1 %3333  ;;  %v3615_v62 = vsel %vm3601_vm3, %v5673_v54, %v6247_v0 }
 0x1e3   : > { %v3406_v8 = vpack.c.b16 %v3390_v31, %v3389_v34  ;;  %v3482_v19 = vpack.c.b16 %v3462_v38, %v3461_v18  ;;  %v3708_v57 = vsel %vm3700_vm8, %v3675_v27, %v3334_v35  ;;  %v3486_v61 = vpack.c.b16 %v3470_v49, %v3469_v48 }
 0x1e4   : > { %v3494_v40 = vpop.permute.xlu2 %3493  ;;  %v3648_v22 = vsel %vm3634_vm5, %v3615_v62, %v6293_v21 }
 0x1e5   : > { %v3881_v50 = vpop.f32.mrf.mxu0  ;;  %3437 = vrot.lane.b32.xlu0 %v3406_v8, %s4656_s14  ;;  %3509 = vrot.lane.b32.xlu2 %v3482_v19, %s4655_s13 }
 0x1e6   : > { %4135 = vst.msk [vmem:[%s6320_s15] sm:$0xff] %vm3519_vm15, %v3881_v50  ;;  %v3244_v30 = vpop.permute.xlu0 %3243  ;;  %v4030_v12 = vmul.f32 %v3881_v50, %v3881_v50  ;;  %v3961_v23 = vsel %vm3519_vm15, %v3881_v50, 0.0 }
 0x1e7   : > { %3261 = vrot.lane.b32.xlu1 %v3230_v53, %s4653_s11  ;;  %v3681_v20 = vsel %vm3667_vm7, %v3648_v22, %v3244_v30 }
 0x1e8   : > { %v4062_v4 = vsel %vm3519_vm15, %v4030_v12, 0.0  ;;  %v3714_v54 = vsel %vm3700_vm8, %v3681_v20, %v6299_v9 }
 0x1ea   : > { %v3420_v25 = vpop.permute.xlu1 %3419 }
 0x1eb   : > { %v3747_v0 = vsel %vm3733_vm9, %v3714_v54, %v3420_v25 }
 0x1ec   : > { %v6341_v24 = vpop.permute.xlu2 %3097 }
 0x1ed   : > { %v3883_v7 = vpop.f32.mrf.mxu0  ;;  %3101 = vrot.lane.b32.xlu2 %v4570_v15, %s4651_s9  ;;  %v3629_v19 = vsel %vm3601_vm3, %v5738_v32, %v6341_v24 }
 0x1ee   : > { %v3962_v3 = vsel %vm3519_vm15, %v3883_v7, 0.0  ;;  %v4031_v37 = vmul.f32 %v3883_v7, %v3883_v7  ;;  %4136 = vst.msk [vmem:[%s6320_s15 + $0x8] sm:$0xff] %vm3519_vm15, %v3883_v7  ;;  %v3414_v43 = vpop.permute.xlu0 %3413 }
 0x1ef   : > { %v3963_v29 = vadd.f32 %v3962_v3, %v3961_v23  ;;  %v3741_v58 = vsel %vm3733_vm9, %v3708_v57, %v3414_v43  ;;  %3517 = vrot.lane.b32.xlu1 %v3486_v61, %s4655_s13 }
 0x1f0   : > { %v4063_v28 = vsel %vm3519_vm15, %v4031_v37, 0.0  ;;  %v3774_v36 = vsel %vm3766_vm11, %v3741_v58, %v3494_v40 }
 0x1f1   : > { %v4064_v59 = vadd.f32 %v4063_v28, %v4062_v4  ;;  %4522 = vmatmul.msk.bf16.gmra.mxu0 %vm3835_vm2, %v3774_v36 }
 0x1f2   : > { %v3092_v17 = vpop.permute.xlu1 %3091 }
 0x1f3   : > { %v3623_v2 = vsel %vm3601_vm3, %v5680_v6, %v3092_v17 }
 0x1f4   : > { %v3252_v10 = vpop.permute.xlu2 %3251 }
 0x1f5   : > { %3357 = vrot.lane.b32.xlu2 %v4586_v51, %s4652_s10  ;;  %s235_s10 = scalar_lea.vmem %s6622_s5, %s4262_s22 }
 0x1f6   : > { %v3500_v44 = vpop.permute.xlu0 %3499 }
 0x1f7   : > { %v3780_v21 = vsel %vm3766_vm11, %v3747_v0, %v3500_v44 }
 0x1f8   : > { %4525 = vmatmul.msk.bf16.gmra.mxu1 %vm3835_vm2, %v3780_v21 }
 0x1fa   : > { %v3178_v11 = vpop.permute.xlu1 %3177 }
 0x1fb   : > { %v3662_v48 = vsel %vm3634_vm5, %v3629_v19, %v3178_v11  ;;  %v4554_v19 = vld [vmem:[#allocation2 + $0xb4] sm:$0xff] }
 0x1fc   : > { %v3354_v63 = vpop.permute.xlu2 %3353 }
 0x1fe   : > { %v3886_v33 = vpop.f32.mrf.mxu0  ;;  %v3172_v42 = vpop.permute.xlu0 %3171 }
 0x1ff   : > { %v3964_v14 = vsel %vm3519_vm15, %v3886_v33, 0.0  ;;  %v4032_v45 = vmul.f32 %v3886_v33, %v3886_v33  ;;  %4137 = vst.msk [vmem:[%s6320_s15 + $0x10] sm:$0xff] %vm3519_vm15, %v3886_v33  ;;  %v3656_v53 = vsel %vm3634_vm5, %v3623_v2, %v3172_v42 }
 0x200   : > { %v3965_v9 = vadd.f32 %v3964_v14, %v3963_v29  ;;  %v3689_v47 = vsel %vm3667_vm7, %v3656_v53, %v3252_v10 }
 0x201   : > { %v4065_v35 = vsel %vm3519_vm15, %v4032_v45, 0.0 }
 0x202   : > { %v4066_v41 = vadd.f32 %v4065_v35, %v4064_v59  ;;  %v3348_v5 = vpop.permute.xlu1 %3347 }
 0x203   : > { %v3722_v39 = vsel %vm3700_vm8, %v3689_v47, %v3348_v5 }
 0x204   : > { %v3508_v38 = vpop.permute.xlu2 %3507 }
 0x205   : > { %v6371_v60 = vpop.f32.mrf.mxu1 }
 0x206   : > { %4143 = vst.msk [vmem:[%s6320_s15 + $0x40] sm:$0xff] %vm3519_vm15, %v6371_v60  ;;  %v3888_v46 = vpop.f32.mrf.mxu0  ;;  %v3258_v40 = vpop.permute.xlu0 %3257 }
 0x207   : > { %v3966_v34 = vsel %vm3519_vm15, %v3888_v46, 0.0  ;;  %v4033_v18 = vmul.f32 %v3888_v46, %v3888_v46  ;;  %4138 = vst.msk [vmem:[%s6320_s15 + $0x18] sm:$0xff] %vm3519_vm15, %v3888_v46  ;;  %v3695_v49 = vsel %vm3667_vm7, %v3662_v48, %v3258_v40 }
 0x208   : > { %v3967_v55 = vadd.f32 %v3966_v34, %v3965_v9  ;;  %v3728_v12 = vsel %vm3700_vm8, %v3695_v49, %v3354_v63 }
 0x209   : > { %v4067_v50 = vsel %vm3519_vm15, %v4033_v18, 0.0 }
 0x20a   : > { %v4068_v31 = vadd.f32 %v4067_v50, %v4066_v41  ;;  %v3434_v30 = vpop.permute.xlu1 %3433 }
 0x20b   : > { %v3761_v27 = vsel %vm3733_vm9, %v3728_v12, %v3434_v30 }
 0x20c   : > { %v3166_v25 = vpop.permute.xlu2 %3165 }
 0x20d   : > { %v6384_v26 = vpop.f32.mrf.mxu1 }
 0x20e   : > { %4144 = vst.msk [vmem:[%s6320_s15 + $0x48] sm:$0xff] %vm3519_vm15, %v6384_v26  ;;  %v3428_v8 = vpop.permute.xlu0 %3427 }
 0x20f   : > { %v3755_v6 = vsel %vm3733_vm9, %v3722_v39, %v3428_v8 }
 0x210   : > { %v3788_v1 = vsel %vm3766_vm11, %v3755_v6, %v3508_v38 }
 0x211   : > { %4529 = vmatmul.msk.bf16.gmra.mxu2 %vm3835_vm2, %v3788_v1 }
 0x212   : > { %v3086_v57 = vpop.permute.xlu1 %3085 }
 0x213   : > { %v3617_v24 = vsel %vm3601_vm3, %v5631_v16, %v3086_v57 }
 0x214   : > { %v3422_v3 = vpop.permute.xlu2 %3421  ;;  %v3650_v37 = vsel %vm3634_vm5, %v3617_v24, %v3166_v25  ;;  %v3567_v25 = vsel %vm3519_vm15, %v4554_v19, %v5596_v13 }
 0x216   : > { %v3514_v7 = vpop.permute.xlu0 %3513 }
 0x217   : > { %v3794_v61 = vsel %vm3766_vm11, %v3761_v27, %v3514_v7 }
 0x218   : > { %4532 = vmatmul.msk.bf16.gmra.mxu3 %vm3835_vm2, %v3794_v61 }
 0x21a   : > { %v3342_v43 = vpop.permute.xlu1 %3341 }
 0x21b   : > { %v6402_v32 = vpop.f32.mrf.mxu2 }
 0x21c   : > { %4151 = vst.msk [vmem:[%s6320_s15 + $0x80] sm:$0xff] %vm3519_vm15, %v6402_v32  ;;  %v3100_v28 = vpop.permute.xlu2 %3099 }
 0x21e   : > { %v3246_v23 = vpop.permute.xlu0 %3245 }
 0x21f   : > { %v3683_v15 = vsel %vm3667_vm7, %v3650_v37, %v3246_v23 }
 0x220   : > { %v3716_v29 = vsel %vm3700_vm8, %v3683_v15, %v3342_v43 }
 0x221   : > { %v3749_v16 = vsel %vm3733_vm9, %v3716_v29, %v3422_v3 }
 0x222   : > { %v3094_v36 = vpop.permute.xlu1 %3093 }
 0x223   : > { %v6412_v58 = vpop.f32.mrf.mxu2  ;;  %v3625_v41 = vsel %vm3601_vm3, %v5794_v56, %v3094_v36  ;;  %v3631_v56 = vsel %vm3601_vm3, %v5834_v52, %v3100_v28 }
 0x224   : > { %4152 = vst.msk [vmem:[%s6320_s15 + $0x88] sm:$0xff] %vm3519_vm15, %v6412_v58  ;;  %v3254_v44 = vpop.permute.xlu2 %3253 }
 0x226   : > { %v3502_v62 = vpop.permute.xlu0 %3501 }
 0x227   : > { %v3782_v4 = vsel %vm3766_vm11, %v3749_v16, %v3502_v62 }
 0x228   : > { %4526 = vmatmul.msk.bf16.gmra.mxu1 %vm3835_vm2, %v3782_v4 }
 0x22a   : > { %v3180_v51 = vpop.permute.xlu1 %3179 }
 0x22d   : > { %v3356_v35 = vpop.permute.xlu2 %3355 }
 0x22e   : > { %v3891_v22 = vpop.f32.mrf.mxu0  ;;  %v3174_v59 = vpop.permute.xlu0 %3173 }
 0x22f   : > { %v3968_v20 = vsel %vm3519_vm15, %v3891_v22, 0.0  ;;  %v4034_v17 = vmul.f32 %v3891_v22, %v3891_v22  ;;  %4139 = vst.msk [vmem:[%s6320_s15 + $0x20] sm:$0xff] %vm3519_vm15, %v3891_v22  ;;  %v3658_v46 = vsel %vm3634_vm5, %v3625_v41, %v3174_v59 }
 0x230   : > { %v3969_v54 = vadd.f32 %v3968_v20, %v3967_v55  ;;  %v3691_v18 = vsel %vm3667_vm7, %v3658_v46, %v3254_v44 }
 0x231   : > { %v4069_v0 = vsel %vm3519_vm15, %v4034_v17, 0.0 }
 0x232   : > { %v4070_v10 = vadd.f32 %v4069_v0, %v4068_v31  ;;  %v3350_v40 = vpop.permute.xlu1 %3349  ;;  %v3664_v31 = vsel %vm3634_vm5, %v3631_v56, %v3180_v51  ;;  %v3976_v51 = vsel %vm3519_vm15, %v6371_v60, 0.0 }
 0x233   : > { %v3724_v55 = vsel %vm3700_vm8, %v3691_v18, %v3350_v40 }
 0x235   : > { %v6424_v21 = vpop.f32.mrf.mxu1 }
 0x236   : > { %4145 = vst.msk [vmem:[%s6320_s15 + $0x50] sm:$0xff] %vm3519_vm15, %v6424_v21  ;;  %v3893_v11 = vpop.f32.mrf.mxu0  ;;  %v3260_v33 = vpop.permute.xlu0 %3259  ;;  %v3980_v46 = vsel %vm3519_vm15, %v6424_v21, 0.0 }
 0x237   : > { %v3970_v42 = vsel %vm3519_vm15, %v3893_v11, 0.0  ;;  %v4035_v14 = vmul.f32 %v3893_v11, %v3893_v11  ;;  %4140 = vst.msk [vmem:[%s6320_s15 + $0x28] sm:$0xff] %vm3519_vm15, %v3893_v11  ;;  %v3697_v38 = vsel %vm3667_vm7, %v3664_v31, %v3260_v33  ;;  %v4039_v11 = vmul.f32 %v6384_v26, %v6384_v26 }
 0x238   : > { %v3971_v45 = vadd.f32 %v3970_v42, %v3969_v54  ;;  %v3730_v47 = vsel %vm3700_vm8, %v3697_v38, %v3356_v35  ;;  %v4038_v54 = vmul.f32 %v6371_v60, %v6371_v60 }
 0x239   : > { %v4071_v9 = vsel %vm3519_vm15, %v4035_v14, 0.0  ;;  %v4079_v60 = vsel %vm3519_vm15, %v4039_v11, 0.0 }
 0x23a   : > { %v4072_v63 = vadd.f32 %v4071_v9, %v4070_v10  ;;  %v3978_v9 = vsel %vm3519_vm15, %v6384_v26, 0.0 }
 0x23d   : > { %v6435_v5 = vpop.f32.mrf.mxu1 }
 0x23e   : > { %4146 = vst.msk [vmem:[%s6320_s15 + $0x58] sm:$0xff] %vm3519_vm15, %v6435_v5  ;;  %v3430_v34 = vpop.permute.xlu0 %3429  ;;  %v4041_v40 = vmul.f32 %v6435_v5, %v6435_v5 }
 0x23f   : > { %v3757_v2 = vsel %vm3733_vm9, %v3724_v55, %v3430_v34  ;;  %v3510_v50 = vpop.permute.xlu2 %3509 }
 0x240   : > { %v3790_v53 = vsel %vm3766_vm11, %v3757_v2, %v3510_v50  ;;  %v3982_v2 = vsel %vm3519_vm15, %v6435_v5, 0.0 }
 0x241   : > { %4530 = vmatmul.msk.bf16.gmra.mxu2 %vm3835_vm2, %v3790_v53 }
 0x246   : > { %v3516_v30 = vpop.permute.xlu0 %3515 }
 0x247   : > { %v3102_v52 = vpop.permute.xlu2 %3101 }
 0x249   : > { %v3436_v39 = vpop.permute.xlu1 %3435 }
 0x24a   : > { %v3763_v8 = vsel %vm3733_vm9, %v3730_v47, %v3436_v39 }
 0x24b   : > { %v3796_v6 = vsel %vm3766_vm11, %v3763_v8, %v3516_v30 }
 0x24c   : > { %4533 = vmatmul.msk.bf16.gmra.mxu3 %vm3835_vm2, %v3796_v6 }
 0x24f   : > { %v3182_v49 = vpop.permute.xlu0 %3181  ;;  %v3358_v3 = vpop.permute.xlu2 %3357 }
 0x251   : > { %v3006_v1 = vpop.permute.xlu1 %3005 }
 0x252   : > { %v3600_v12 = vsel %vm3568_vm1, %v3567_v25, %v3006_v1 }
 0x253   : > { %v3633_v27 = vsel %vm3601_vm3, %v3600_v12, %v3102_v52 }
 0x254   : > { %v6454_v48 = vpop.f32.mrf.mxu2  ;;  %v3666_v57 = vsel %vm3634_vm5, %v3633_v27, %v3182_v49 }
 0x255   : > { %4153 = vst.msk [vmem:[%s6320_s15 + $0x90] sm:$0xff] %vm3519_vm15, %v6454_v48 }
 0x257   : > { %v3438_v13 = vpop.permute.xlu0 %3437 }
 0x259   : > { %v3262_v61 = vpop.permute.xlu1 %3261 }
 0x25a   : > { %v3699_v23 = vsel %vm3667_vm7, %v3666_v57, %v3262_v61 }
 0x25b   : > { %v6464_v7 = vpop.f32.mrf.mxu3  ;;  %v3732_v37 = vsel %vm3700_vm8, %v3699_v23, %v3358_v3 }
 0x25c   : > { %4159 = vst.msk [vmem:[%s6320_s15 + $0xc0] sm:$0xff] %vm3519_vm15, %v6464_v7  ;;  %v6469_v24 = vpop.f32.mrf.mxu2  ;;  %v3765_v43 = vsel %vm3733_vm9, %v3732_v37, %v3438_v13  ;;  %v4046_v37 = vmul.f32 %v6402_v32, %v6402_v32 }
 0x25d   : > { %4154 = vst.msk [vmem:[%s6320_s15 + $0x98] sm:$0xff] %vm3519_vm15, %v6469_v24 }
 0x261   : > { %v3518_v29 = vpop.permute.xlu1 %3517 }
 0x262   : > { %v3798_v62 = vsel %vm3766_vm11, %v3765_v43, %v3518_v29 }
 0x263   : > { %v6477_v15 = vpop.f32.mrf.mxu3  ;;  %4534 = vmatmul.msk.bf16.gmra.mxu3 %vm3835_vm2, %v3798_v62 }
 0x264   : > { %4160 = vst.msk [vmem:[%s6320_s15 + $0xc8] sm:$0xff] %vm3519_vm15, %v6477_v15 }
 0x26e   : > { %v3896_v16 = vpop.f32.mrf.mxu0 }
 0x26f   : > { %v3972_v4 = vsel %vm3519_vm15, %v3896_v16, 0.0  ;;  %v4036_v28 = vmul.f32 %v3896_v16, %v3896_v16  ;;  %4141 = vst.msk [vmem:[%s6320_s15 + $0x30] sm:$0xff] %vm3519_vm15, %v3896_v16 }
 0x270   : > { %v3973_v36 = vadd.f32 %v3972_v4, %v3971_v45  ;;  %v4077_v45 = vsel %vm3519_vm15, %v4038_v54, 0.0  ;;  %v3992_v4 = vsel %vm3519_vm15, %v6402_v32, 0.0  ;;  %v4048_v54 = vmul.f32 %v6454_v48, %v6454_v48 }
 0x271   : > { %v4073_v22 = vsel %vm3519_vm15, %v4036_v28, 0.0  ;;  %v4047_v28 = vmul.f32 %v6412_v58, %v6412_v58  ;;  %v3996_v32 = vsel %vm3519_vm15, %v6454_v48, 0.0 }
 0x272   : > { %v4074_v59 = vadd.f32 %v4073_v22, %v4072_v63  ;;  %v4040_v63 = vmul.f32 %v6424_v21, %v6424_v21  ;;  %v4083_v21 = vsel %vm3519_vm15, %v4041_v40, 0.0 }
 0x274   : > { %v4081_v26 = vsel %vm3519_vm15, %v4040_v63, 0.0 }
 0x275   : > { %v3911_v20 = vpop.f32.mrf.mxu1 }
 0x276   : > { %4147 = vst.msk [vmem:[%s6320_s15 + $0x60] sm:$0xff] %vm3519_vm15, %v3911_v20  ;;  %v3898_v17 = vpop.f32.mrf.mxu0  ;;  %v4042_v50 = vmul.f32 %v3911_v20, %v3911_v20  ;;  %v3984_v31 = vsel %vm3519_vm15, %v3911_v20, 0.0  ;;  %v4093_v20 = vsel %vm3519_vm15, %v4046_v37, 0.0 }
 0x277   : > { %v3974_v0 = vsel %vm3519_vm15, %v3898_v17, 0.0  ;;  %v4037_v44 = vmul.f32 %v3898_v17, %v3898_v17  ;;  %4142 = vst.msk [vmem:[%s6320_s15 + $0x38] sm:$0xff] %vm3519_vm15, %v3898_v17  ;;  %v3994_v17 = vsel %vm3519_vm15, %v6412_v58, 0.0  ;;  %v3998_v58 = vsel %vm3519_vm15, %v6469_v24, 0.0 }
 0x278   : > { %v3975_v10 = vadd.f32 %v3974_v0, %v3973_v36  ;;  %v4085_v39 = vsel %vm3519_vm15, %v4042_v50, 0.0 }
 0x279   : > { %v4075_v33 = vsel %vm3519_vm15, %v4037_v44, 0.0 }
 0x27a   : > { %v3977_v42 = vadd.f32 %v3976_v51, %v3975_v10  ;;  %v4076_v14 = vadd.f32 %v4075_v33, %v4074_v59  ;;  %v4095_v10 = vsel %vm3519_vm15, %v4047_v28, 0.0  ;;  %v4049_v51 = vmul.f32 %v6469_v24, %v6469_v24 }
 0x27c   : > { %v3979_v35 = vadd.f32 %v3978_v9, %v3977_v42  ;;  %v4078_v41 = vadd.f32 %v4077_v45, %v4076_v14  ;;  %v4097_v42 = vsel %vm3519_vm15, %v4048_v54, 0.0  ;;  %v4099_v63 = vsel %vm3519_vm15, %v4049_v51, 0.0 }
 0x27d   : > { %v3913_v34 = vpop.f32.mrf.mxu1 }
 0x27e   : > { %v3981_v18 = vadd.f32 %v3980_v46, %v3979_v35  ;;  %v4080_v55 = vadd.f32 %v4079_v60, %v4078_v41  ;;  %4148 = vst.msk [vmem:[%s6320_s15 + $0x68] sm:$0xff] %vm3519_vm15, %v3913_v34  ;;  %v4043_v38 = vmul.f32 %v3913_v34, %v3913_v34  ;;  %v3986_v8 = vsel %vm3519_vm15, %v3913_v34, 0.0 }
 0x280   : > { %v4082_v53 = vadd.f32 %v4081_v26, %v4080_v55  ;;  %v3983_v56 = vadd.f32 %v3982_v2, %v3981_v18  ;;  %v4087_v19 = vsel %vm3519_vm15, %v4043_v38, 0.0  ;;  %v4054_v38 = vmul.f32 %v6464_v7, %v6464_v7 }
 0x282   : > { %v3985_v30 = vadd.f32 %v3984_v31, %v3983_v56  ;;  %v4084_v47 = vadd.f32 %v4083_v21, %v4082_v53 }
 0x284   : > { %v3987_v5 = vadd.f32 %v3986_v8, %v3985_v30  ;;  %v4086_v6 = vadd.f32 %v4085_v39, %v4084_v47 }
 0x286   : > { %v4088_v52 = vadd.f32 %v4087_v19, %v4086_v6  ;;  %v4055_v6 = vmul.f32 %v6477_v15, %v6477_v15 }
 0x294   : > { %v3931_v1 = vpop.f32.mrf.mxu2 }
 0x295   : > { %4155 = vst.msk [vmem:[%s6320_s15 + $0xa0] sm:$0xff] %vm3519_vm15, %v3931_v1  ;;  %v4050_v14 = vmul.f32 %v3931_v1, %v3931_v1  ;;  %v4000_v35 = vsel %vm3519_vm15, %v3931_v1, 0.0 }
 0x297   : > { %v4101_v46 = vsel %vm3519_vm15, %v4050_v14, 0.0 }
 0x29b   : > { %v6522_v49 = vpop.f32.mrf.mxu3 }
 0x29c   : > { %4161 = vst.msk [vmem:[%s6320_s15 + $0xd0] sm:$0xff] %vm3519_vm15, %v6522_v49  ;;  %v3933_v25 = vpop.f32.mrf.mxu2 }
 0x29d   : > { %4156 = vst.msk [vmem:[%s6320_s15 + $0xa8] sm:$0xff] %vm3519_vm15, %v3933_v25  ;;  %v4051_v41 = vmul.f32 %v3933_v25, %v3933_v25  ;;  %v4002_v40 = vsel %vm3519_vm15, %v3933_v25, 0.0  ;;  %v4109_v25 = vsel %vm3519_vm15, %v4054_v38, 0.0 }
 0x29f   : > { %v4103_v24 = vsel %vm3519_vm15, %v4051_v41, 0.0 }
 0x2a3   : > { %v6529_v12 = vpop.f32.mrf.mxu3 }
 0x2a4   : > { %4162 = vst.msk [vmem:[%s6320_s15 + $0xd8] sm:$0xff] %vm3519_vm15, %v6529_v12 }
 0x2a5   : > { %v3916_v27 = vpop.f32.mrf.mxu1 }
 0x2a6   : > { %4149 = vst.msk [vmem:[%s6320_s15 + $0x70] sm:$0xff] %vm3519_vm15, %v3916_v27  ;;  %v4044_v57 = vmul.f32 %v3916_v27, %v3916_v27  ;;  %v3988_v61 = vsel %vm3519_vm15, %v3916_v27, 0.0  ;;  %v4010_v27 = vsel %vm3519_vm15, %v6477_v15, 0.0  ;;  %v4014_v15 = vsel %vm3519_vm15, %v6529_v12, 0.0 }
 0x2a7   : > { %v3989_v3 = vadd.f32 %v3988_v61, %v3987_v5  ;;  %v4008_v5 = vsel %vm3519_vm15, %v6464_v7, 0.0  ;;  %v4111_v7 = vsel %vm3519_vm15, %v4055_v6, 0.0 }
 0x2a8   : > { %v4089_v23 = vsel %vm3519_vm15, %v4044_v57, 0.0  ;;  %v4056_v57 = vmul.f32 %v6522_v49, %v6522_v49 }
 0x2a9   : > { %v4090_v62 = vadd.f32 %v4089_v23, %v4088_v52 }
 0x2ad   : > { %v3918_v13 = vpop.f32.mrf.mxu1 }
 0x2ae   : > { %v3990_v43 = vsel %vm3519_vm15, %v3918_v13, 0.0  ;;  %v4045_v29 = vmul.f32 %v3918_v13, %v3918_v13  ;;  %4150 = vst.msk [vmem:[%s6320_s15 + $0x78] sm:$0xff] %vm3519_vm15, %v3918_v13  ;;  %v4057_v13 = vmul.f32 %v6529_v12, %v6529_v12 }
 0x2af   : > { %v3991_v16 = vadd.f32 %v3990_v43, %v3989_v3  ;;  %v4012_v3 = vsel %vm3519_vm15, %v6522_v49, 0.0 }
 0x2b0   : > { %v4091_v36 = vsel %vm3519_vm15, %v4045_v29, 0.0  ;;  %v4115_v28 = vsel %vm3519_vm15, %v4057_v13, 0.0 }
 0x2b1   : > { %v3993_v22 = vadd.f32 %v3992_v4, %v3991_v16  ;;  %v4092_v59 = vadd.f32 %v4091_v36, %v4090_v62  ;;  %v4113_v62 = vsel %vm3519_vm15, %v4056_v57, 0.0 }
 0x2b3   : > { %v3995_v0 = vadd.f32 %v3994_v17, %v3993_v22  ;;  %v4094_v44 = vadd.f32 %v4093_v20, %v4092_v59 }
 0x2b5   : > { %v3997_v11 = vadd.f32 %v3996_v32, %v3995_v0  ;;  %v4096_v33 = vadd.f32 %v4095_v10, %v4094_v44 }
 0x2b7   : > { %v4098_v45 = vadd.f32 %v4097_v42, %v4096_v33  ;;  %v3999_v9 = vadd.f32 %v3998_v58, %v3997_v11 }
 0x2b9   : > { %v4001_v48 = vadd.f32 %v4000_v35, %v3999_v9  ;;  %v4100_v60 = vadd.f32 %v4099_v63, %v4098_v45 }
 0x2bb   : > { %v4003_v34 = vadd.f32 %v4002_v40, %v4001_v48  ;;  %v4102_v18 = vadd.f32 %v4101_v46, %v4100_v60 }
 0x2bd   : > { %v4104_v55 = vadd.f32 %v4103_v24, %v4102_v18 }
 0x2c4   : > { %v3936_v26 = vpop.f32.mrf.mxu2 }
 0x2c5   : > { %4157 = vst.msk [vmem:[%s6320_s15 + $0xb0] sm:$0xff] %vm3519_vm15, %v3936_v26  ;;  %v4052_v2 = vmul.f32 %v3936_v26, %v3936_v26  ;;  %v4004_v50 = vsel %vm3519_vm15, %v3936_v26, 0.0 }
 0x2c6   : > { %v4005_v56 = vadd.f32 %v4004_v50, %v4003_v34 }
 0x2c7   : > { %v4105_v53 = vsel %vm3519_vm15, %v4052_v2, 0.0 }
 0x2c8   : > { %v4106_v39 = vadd.f32 %v4105_v53, %v4104_v55 }
 0x2cc   : > { %v3938_v31 = vpop.f32.mrf.mxu2 }
 0x2cd   : > { %v4006_v30 = vsel %vm3519_vm15, %v3938_v31, 0.0  ;;  %v4053_v47 = vmul.f32 %v3938_v31, %v3938_v31  ;;  %4158 = vst.msk [vmem:[%s6320_s15 + $0xb8] sm:$0xff] %vm3519_vm15, %v3938_v31 }
 0x2ce   : > { %v4007_v8 = vadd.f32 %v4006_v30, %v4005_v56 }
 0x2cf   : > { %v3951_v21 = vpop.f32.mrf.mxu3  ;;  %v4107_v19 = vsel %vm3519_vm15, %v4053_v47, 0.0 }
 0x2d0   : > { %4163 = vst.msk [vmem:[%s6320_s15 + $0xe0] sm:$0xff] %vm3519_vm15, %v3951_v21  ;;  %v4009_v52 = vadd.f32 %v4008_v5, %v4007_v8  ;;  %v4108_v1 = vadd.f32 %v4107_v19, %v4106_v39  ;;  %v4058_v22 = vmul.f32 %v3951_v21, %v3951_v21  ;;  %v4016_v59 = vsel %vm3519_vm15, %v3951_v21, 0.0 }
 0x2d2   : > { %v4011_v61 = vadd.f32 %v4010_v27, %v4009_v52  ;;  %v4110_v23 = vadd.f32 %v4109_v25, %v4108_v1  ;;  %v4117_v17 = vsel %vm3519_vm15, %v4058_v22, 0.0 }
 0x2d4   : > { %v4013_v37 = vadd.f32 %v4012_v3, %v4011_v61  ;;  %v4112_v43 = vadd.f32 %v4111_v7, %v4110_v23 }
 0x2d6   : > { %v4114_v16 = vadd.f32 %v4113_v62, %v4112_v43  ;;  %v4015_v4 = vadd.f32 %v4014_v15, %v4013_v37 }
 0x2d7   : > { %v3953_v29 = vpop.f32.mrf.mxu3 }
 0x2d8   : > { %4164 = vst.msk [vmem:[%s6320_s15 + $0xe8] sm:$0xff] %vm3519_vm15, %v3953_v29  ;;  %v4116_v36 = vadd.f32 %v4115_v28, %v4114_v16  ;;  %v4017_v20 = vadd.f32 %v4016_v59, %v4015_v4  ;;  %v4059_v54 = vmul.f32 %v3953_v29, %v3953_v29  ;;  %v4018_v44 = vsel %vm3519_vm15, %v3953_v29, 0.0 }
 0x2da   : > { %v4118_v12 = vadd.f32 %v4117_v17, %v4116_v36  ;;  %v4019_v32 = vadd.f32 %v4018_v44, %v4017_v20  ;;  %v4119_v51 = vsel %vm3519_vm15, %v4059_v54, 0.0 }
 0x2dc   : > { %v4120_v33 = vadd.f32 %v4119_v51, %v4118_v12 }
 0x2e6   : > { %v3956_v49 = vpop.f32.mrf.mxu3 }
 0x2e7   : > { %4165 = vst.msk [vmem:[%s6320_s15 + $0xf0] sm:$0xff] %vm3519_vm15, %v3956_v49  ;;  %v4060_v0 = vmul.f32 %v3956_v49, %v3956_v49  ;;  %v4020_v10 = vsel %vm3519_vm15, %v3956_v49, 0.0 }
 0x2e8   : > { %v4021_v42 = vadd.f32 %v4020_v10, %v4019_v32 }
 0x2e9   : > { %v4121_v11 = vsel %vm3519_vm15, %v4060_v0, 0.0 }
 0x2ea   : > { %v4122_v9 = vadd.f32 %v4121_v11, %v4120_v33 }
 0x2ee   : > { %v3958_v58 = vpop.f32.mrf.mxu3 }
 0x2ef   : > { %v4022_v14 = vsel %vm3519_vm15, %v3958_v58, 0.0  ;;  %v4061_v45 = vmul.f32 %v3958_v58, %v3958_v58  ;;  %4166 = vst.msk [vmem:[%s6320_s15 + $0xf8] sm:$0xff] %vm3519_vm15, %v3958_v58 }
 0x2f0   : > { %v4023_v63 = vadd.f32 %v4022_v14, %v4021_v42 }
 0x2f1   : > { %v4123_v35 = vsel %vm3519_vm15, %v4061_v45, 0.0 }
 0x2f2   : > { %v4024_v41 = vrot.slane %v4023_v63, 4  ;;  %v4124_v48 = vadd.f32 %v4123_v35, %v4122_v9 }
 0x2f4   : > { %v4025_v60 = vadd.f32 %v4024_v41, %v4023_v63  ;;  %v4125_v46 = vrot.slane %v4124_v48, 4 }
 0x2f6   : > { %v4026_v40 = vrot.slane %v4025_v60, 2  ;;  %v4126_v34 = vadd.f32 %v4125_v46, %v4124_v48 }
 0x2f8   : > { %v4027_v18 = vadd.f32 %v4026_v40, %v4025_v60  ;;  %v4127_v24 = vrot.slane %v4126_v34, 2 }
 0x2fa   : > { %v4028_v55 = vrot.slane %v4027_v18, 1  ;;  %v4128_v26 = vadd.f32 %v4127_v24, %v4126_v34 }
 0x2fc   : > { %v4129_v2 = vrot.slane %v4128_v26, 1  ;;  %v4029_v50 = vadd.f32 %v4028_v55, %v4027_v18 }
 0x2fe   : > { %v4130_v53 = vadd.f32 %v4129_v2, %v4128_v26 }
 0x300   : > { %v4132_v56 = vsel %vm4131_vm0, %v4029_v50, %v4130_v53 }
 0x301   : > { %4134 = vst.msk [vmem:[%s235_s10] sm:$0x3] %vm4133_vm4, %v4132_v56 }
 0x302 PF: > { %s16_s18 = sadd.s32 1, %s4646_s18  }
 0x303   : > { %p13_p4 = scmp.ge.s32.totalorder %s16_s18, 4  }
 0x305   :  { %15 = sbr.rel (!%p13_p4) target bundleno = 1 (0x1), region = 81 }

</bundles_post_ra>
